<compile_context>
chip_gen: v6e
topology: v6e:2x2x1
jax: 0.10.0
libtpu: 0.0.40
codegen_flags: <defaults>
</compile_context>

<pallas_src>
import math

import jax
import jax.numpy as jnp
from jax.experimental import pallas as pl
from jax.experimental.pallas import tpu as pltpu


# ----------------------------- kernel ---------------------------------------

def _layernorm_kernel(eps, inv_d):
    def kernel(x_ref, g_ref, b_ref, o_ref):
        x = x_ref[...].astype(jnp.float32)                      # (TR, D)
        # Fused single sweep: sum and sum-of-squares.
        s1 = jnp.sum(x, axis=-1, keepdims=True)                 # (TR, 1)
        s2 = jnp.sum(x * x, axis=-1, keepdims=True)             # (TR, 1)
        mean = s1 * inv_d
        var = jnp.maximum(s2 * inv_d - mean * mean, 0.0)        # unbiased=False
        std = jnp.sqrt(var)
        inv = pl.reciprocal(std + eps, approx=False)            # eps on std (module semantics)
        g = g_ref[...].astype(jnp.float32)                      # (1, D)
        b = b_ref[...].astype(jnp.float32)                      # (1, D)
        o_ref[...] = (g * ((x - mean) * inv) + b).astype(o_ref.dtype)
    return kernel


# ----------------------------- helpers ---------------------------------------

def _layernorm_ref(x, gamma, beta, epsilon=1e-10):
    """Pure-jnp reference / fallback path (matches the torch module exactly)."""
    xf = x.astype(jnp.float32)
    mean = jnp.mean(xf, axis=-1, keepdims=True)
    var = jnp.mean((xf - mean) ** 2, axis=-1, keepdims=True)    # unbiased=False
    std = jnp.sqrt(var)
    y = gamma.astype(jnp.float32) * (xf - mean) / (std + epsilon) + beta.astype(jnp.float32)
    return y.astype(x.dtype)


def _vmem_capacity_bytes():
    try:
        return int(getattr(pltpu.get_tpu_info(), "vmem_capacity_bytes"))
    except Exception:
        return 64 * 1024 * 1024     # conservative default (v7x per-TC)


def _round_up8(n):
    return max(8, ((int(n) + 7) // 8) * 8)


# ----------------------------- Pallas path -----------------------------------

def _layer_norm_pallas(x, gamma, beta, epsilon=1e-10):
    """Row-tiled Pallas layernorm. Assumes D is lane-friendly (>= 128 recommended)."""
    orig_shape = x.shape
    D = orig_shape[-1]
    R = math.prod(orig_shape[:-1]) if len(orig_shape) > 1 else 1

    x2 = x.reshape(R, D)
    g2 = gamma.reshape(1, D)
    b2 = beta.reshape(1, D)

    in_itemsize = x.dtype.itemsize
    vmem_cap = _vmem_capacity_bytes()
    # Buffer budget: ~60% of physical VMEM (=> ~38 MiB on v7x), capped at 48 MiB.
    budget = min(int(vmem_cap * 0.6), 48 * 1024 * 1024)
    # Per-row VMEM cost: double-buffered in+out tiles at real dtype + f32 intermediates.
    per_row = 4 * D * in_itemsize + 3 * D * 4

    if per_row * 8 > budget:
        # TODO(synk): tile the reduction dim (two-pass / Welford) for enormous D.
        return _layernorm_ref(x, gamma, beta, epsilon)

    tr = _round_up8((budget // per_row) // 8 * 8)
    if tr >= R:
        # Whole input fits in one tile: split into >= 2 grid steps so both v7x
        # TensorCores get work (dimension_semantics=("parallel",)).
        tr = _round_up8(-(-R // 2)) if R > 16 else _round_up8(R)

    grid = (pl.cdiv(R, tr),)

    # VMEM limit: actual need + slack, never the full physical capacity.
    tile_bytes = tr * D * in_itemsize
    need = 4 * tile_bytes + 3 * tr * D * 4 + 4 * D * 4 + (4 << 20)
    vmem_limit = int(min(max(need, 16 << 20), int(vmem_cap * 0.75)))

    out = pl.pallas_call(
        _layernorm_kernel(float(epsilon), 1.0 / float(D)),
        out_shape=jax.ShapeDtypeStruct((R, D), x.dtype),
        grid=grid,
        in_specs=[
            pl.BlockSpec((tr, D), lambda i: (i, 0)),   # row tile, full reduction dim
            pl.BlockSpec((1, D), lambda i: (0, 0)),    # gamma (resident)
            pl.BlockSpec((1, D), lambda i: (0, 0)),    # beta (resident)
        ],
        out_specs=pl.BlockSpec((tr, D), lambda i: (i, 0)),
        compiler_params=pltpu.CompilerParams(
            dimension_semantics=("parallel",),         # megacore sharding on v7x
            vmem_limit_bytes=vmem_limit,
        ),
    )(x2, g2, b2)

    return out.reshape(orig_shape)


# ----------------------------- public wrapper --------------------------------

def layer_normalization(x, gamma, beta, epsilon=1e-10):
    """x: (..., D); gamma, beta: (D,). Returns same shape/dtype as x."""
    D = x.shape[-1]
    total_bytes = x.size * x.dtype.itemsize
    # Tiny-D or tiny-input: the XLA fusion beats pallas_call dispatch, and D < 128
    # would leave most of the 128-lane vregs empty (masked partial stores).
    if D < 128 or total_bytes < (2 << 20) or x.ndim < 2:
        return _layernorm_ref(x, gamma, beta, epsilon)
    return _layer_norm_pallas(x, gamma, beta, epsilon)


# ----------------------------- test harness ----------------------------------

if __name__ == "__main__":
    key = jax.random.PRNGKey(0)
    k1, k2, k3, k4 = jax.random.split(key, 4)

    # 1) Module-spec shape: (batch=2, seq=8, emb_dim=4) with default-init params.
    emb_dim = 4
    x_small = jax.random.normal(k1, (2, 8, emb_dim), dtype=jnp.float32)
    gamma = jnp.ones((emb_dim,), dtype=jnp.float32)
    beta = jnp.zeros((emb_dim,), dtype=jnp.float32)
    y_small = jax.block_until_ready(layer_normalization(x_small, gamma, beta, epsilon=1e-10))
    assert y_small.shape == x_small.shape and y_small.dtype == x_small.dtype
    assert jnp.allclose(y_small, _layernorm_ref(x_small, gamma, beta, 1e-10),
                        atol=1e-5, rtol=1e-5), "small-shape mismatch vs reference"

    # 2) Exercise the Pallas kernel path (lane-friendly D, ragged last row block).
    D = 256
    x_big = jax.random.normal(k2, (7, 300, D), dtype=jnp.float32)     # R=2100 rows, >2 MiB
    gamma_b = jax.random.normal(k3, (D,), dtype=jnp.float32)
    beta_b = jax.random.normal(k4, (D,), dtype=jnp.float32)
    y_big = jax.block_until_ready(layer_normalization(x_big, gamma_b, beta_b, epsilon=1e-10))
    assert y_big.shape == x_big.shape and y_big.dtype == x_big.dtype
    assert jnp.allclose(y_big, _layernorm_ref(x_big, gamma_b, beta_b, 1e-10),
                        atol=1e-4, rtol=1e-4), "pallas-path mismatch vs reference"

    print("KERNEL_OK")
</pallas_src>

<mosaic_0001>
module attributes {stable_mosaic.version = 11 : i64} {
  func.func @kernel(%arg0: i32, %arg1: memref<1056x256xf32, #tpu.memory_space<vmem>>, %arg2: memref<1x256xf32, #tpu.memory_space<vmem>>, %arg3: memref<1x256xf32, #tpu.memory_space<vmem>>, %arg4: memref<1056x256xf32, #tpu.memory_space<vmem>>) attributes {dimension_semantics = [#tpu.dimension_semantics<parallel>], iteration_bounds = array<i64: 2>, scalar_prefetch = 0 : i64, scratch_operands = 0 : i64, tpu.core_type = #tpu.core_type<tc>, window_params = [{transform_indices = @transform_0, window_bounds = array<i64: 1056, 256>}, {pipeline_mode = #tpu.pipeline_mode<synchronous>, transform_indices = @transform_1, window_bounds = array<i64: 1, 256>}, {pipeline_mode = #tpu.pipeline_mode<synchronous>, transform_indices = @transform_2, window_bounds = array<i64: 1, 256>}, {transform_indices = @transform_3, window_bounds = array<i64: 1056, 256>}]} {
    %c0 = arith.constant 0 : index
    %c0_0 = arith.constant 0 : index
    %0 = vector.load %arg1[%c0, %c0_0] : memref<1056x256xf32, #tpu.memory_space<vmem>>, vector<1056x256xf32>
    %cst = arith.constant dense<0.000000e+00> : vector<1056xf32>
    %1 = vector.multi_reduction <add>, %0, %cst [1] : vector<1056x256xf32> to vector<1056xf32>
    %2 = vector.shape_cast %1 : vector<1056xf32> to vector<1056x1xf32>
    %3 = arith.mulf %0, %0 : vector<1056x256xf32>
    %cst_1 = arith.constant dense<0.000000e+00> : vector<1056xf32>
    %4 = vector.multi_reduction <add>, %3, %cst_1 [1] : vector<1056x256xf32> to vector<1056xf32>
    %5 = vector.shape_cast %4 : vector<1056xf32> to vector<1056x1xf32>
    %cst_2 = arith.constant 3.906250e-03 : f32
    %6 = vector.broadcast %cst_2 : f32 to vector<1056x1xf32>
    %7 = arith.mulf %2, %6 : vector<1056x1xf32>
    %cst_3 = arith.constant 3.906250e-03 : f32
    %8 = vector.broadcast %cst_3 : f32 to vector<1056x1xf32>
    %9 = arith.mulf %5, %8 : vector<1056x1xf32>
    %10 = arith.mulf %7, %7 : vector<1056x1xf32>
    %11 = arith.subf %9, %10 : vector<1056x1xf32>
    %cst_4 = arith.constant 0.000000e+00 : f32
    %12 = vector.broadcast %cst_4 : f32 to vector<1056x1xf32>
    %13 = arith.maximumf %11, %12 : vector<1056x1xf32>
    %14 = math.sqrt %13 : vector<1056x1xf32>
    %cst_5 = arith.constant 1.000000e-10 : f32
    %15 = vector.broadcast %cst_5 : f32 to vector<1056x1xf32>
    %16 = arith.addf %14, %15 : vector<1056x1xf32>
    %17 = tpu.reciprocal %16 : vector<1056x1xf32> -> vector<1056x1xf32>
    %c0_6 = arith.constant 0 : index
    %c0_7 = arith.constant 0 : index
    %18 = vector.load %arg2[%c0_6, %c0_7] : memref<1x256xf32, #tpu.memory_space<vmem>>, vector<1x256xf32>
    %c0_8 = arith.constant 0 : index
    %c0_9 = arith.constant 0 : index
    %19 = vector.load %arg3[%c0_8, %c0_9] : memref<1x256xf32, #tpu.memory_space<vmem>>, vector<1x256xf32>
    %20 = vector.broadcast %7 : vector<1056x1xf32> to vector<1056x256xf32>
    %21 = arith.subf %0, %20 : vector<1056x256xf32>
    %22 = vector.broadcast %17 : vector<1056x1xf32> to vector<1056x256xf32>
    %23 = arith.mulf %21, %22 : vector<1056x256xf32>
    %24 = vector.broadcast %18 : vector<1x256xf32> to vector<1056x256xf32>
    %25 = arith.mulf %24, %23 : vector<1056x256xf32>
    %26 = vector.broadcast %19 : vector<1x256xf32> to vector<1056x256xf32>
    %27 = arith.addf %25, %26 : vector<1056x256xf32>
    %c0_10 = arith.constant 0 : index
    %c0_11 = arith.constant 0 : index
    %28 = vector.load %arg4[%c0_10, %c0_11] : memref<1056x256xf32, #tpu.memory_space<vmem>>, vector<1056x256xf32>
    tpu.vector_store %arg4[%c0_10, %c0_11], %27 {strides = array<i32>} : memref<1056x256xf32, #tpu.memory_space<vmem>>, vector<1056x256xf32>,
    return
  }
  func.func @transform_0(%arg0: i32) -> (i32, i32) {
    %c0_i32 = arith.constant 0 : i32
    %c0_i32_0 = arith.constant 0 : i32
    return %arg0, %c0_i32 : i32, i32
  }
  func.func @transform_1(%arg0: i32) -> (i32, i32) {
    %c0_i32 = arith.constant 0 : i32
    %c0_i32_0 = arith.constant 0 : i32
    %c0_i32_1 = arith.constant 0 : i32
    return %c0_i32, %c0_i32_0 : i32, i32
  }
  func.func @transform_2(%arg0: i32) -> (i32, i32) {
    %c0_i32 = arith.constant 0 : i32
    %c0_i32_0 = arith.constant 0 : i32
    %c0_i32_1 = arith.constant 0 : i32
    return %c0_i32, %c0_i32_0 : i32, i32
  }
  func.func @transform_3(%arg0: i32) -> (i32, i32) {
    %c0_i32 = arith.constant 0 : i32
    %c0_i32_0 = arith.constant 0 : i32
    return %arg0, %c0_i32 : i32, i32
  }
}

</mosaic_0001>

<bundles_post_ra>
// kernel: tpu_custom_call.1
= control target key start
LH: loop header
LB: loop body
LE: loop exit
PB: predicated region body
PF: predicated region fallthrough
CT: control target
= control target key end

     0   :  { %8 = vsyncpa [#allocation3], 0  ;;  %s12887_s0 = inlined_call_operand.hbm [shape: f32[2100,256], index: 0, kind: input, shape index: {}]   ;;  %s12888_s1 = inlined_call_operand.hbm [shape: f32[1,256], index: 1, kind: input, shape index: {}]   ;;  %s12889_s2 = inlined_call_operand.hbm [shape: f32[1,256], index: 2, kind: input, shape index: {}]   ;;  %s12890_s3 = inlined_call_operand.hbm [shape: f32[2100,256], index: 3, kind: output, shape index: {}]  }
   0x1   :  { %10 = vsyncpa [#allocation3 + $0x1], 0 }
   0x2   :  { %11 = vsyncpa [#allocation6], 0 }
   0x3   :  { %12 = vsyncpa [#allocation4], 0 }
   0x4   :  { %14 = vsyncpa [#allocation4 + $0x1], 0  ;;  %s5973_s12 = smov 0   ;;  %s5975_s13 = smov 0  }
   0x5   :  { %s5977_s14 = smov 0   ;;  %s5979_s15 = smov 0  }
   0x6 LB: > { %s5994_s16 = sadd.s32 4294967295, %s5943_s15   ;;  %s4860_s17 = sadd.s32 4294967294, %s5943_s15   ;;  %s5943_s15 = sphi %s5979_s15, %s14723_s15   ;;  %s5939_s14 = sphi %s5977_s14, %s14722_s14   ;;  %s5935_s13 = sphi %s5975_s13, %s14721_s13   ;;  %s5931_s12 = sphi %s5973_s12, %s14720_s12  }
   0x7   : > { %s5998_s18 = sadd.s32 1, %s5943_s15   ;;  %s27_s19 = sadd.s32 1, %s5939_s14 }
   0x8   : > { %s24_s20 = ssub.s32 %s5943_s15, %s5998_s18  ;;  %p34_p0 = scmp.ne.s32.totalorder %s5939_s14, %s5935_s13 }
   0x9   : > { %p25_p1 = scmp.eq.s32.totalorder %s24_s20, 0  ;;  %p35_p2 = scmp.eq.s32.totalorder %s5943_s15, 0 }
   0xa   : > { %p40_p3 = scmp.ne.s32.totalorder %s5935_s13, %s5931_s12  ;;  %p12891_p4 = scmp.eq.s32.totalorder %s5994_s16, 0 }
   0xb   : > { %s6010_s21 = scalar_select %p25_p1, %s5939_s14, %s27_s19  }
   0xc   : > { %p6012_p5 = por %p35_p2, %p34_p0  ;;  %p6018_p6 = por %p12891_p4, %p40_p3 }
   0xd   : > { %p106_p7 = scmp.eq.s32.totalorder %s5994_s16, 1  ;;  %p112_p8 = scmp.eq.s32.totalorder %s4860_s17, 1 }
   0xe   : > { %s13368_s22 = scalar_select %p6012_p5, 1, 0 }
   0xf   : > { %s13369_s23 = scalar_select %p6018_p6, 1, 0 }
  0x10   : > { %p4861_p9 = scmp.ge.s32.totalorder %s5943_s15, 1  ;;  %p119_p10 = scmp.lt.s32.totalorder %s5943_s15, 3 }
  0x11   : > { %p6025_p11 = por %p106_p7, %p34_p0  ;;  %p6029_p12 = por %p112_p8, %p40_p3 }
  0x12   : > { %p6033_p13 = pnand %p4861_p9, %p119_p10  ;;  %s5945_s27 = smov [#allocation5]  }
  0x13   : > { %s13370_s24 = scalar_select %p6025_p11, 1, 0 }
  0x14   : > { %s13371_s25 = scalar_select %p6029_p12, 1, 0 }
  0x15   : > { %s13372_s26 = scalar_select %p6033_p13, 1, 0 }
  0x16   : > { %p4904_p1 = pneg %p6033_p13  ;;  %s132_s28 = sshll.u32 %s5945_s27, 4  ;;  %s133_s28 = int_to_ptr.vmem [resolvable:$true] %s132_s28 }
  0x17   : > { %s5946_s29 = smov [#allocation7]   ;;  %s5808_s5 = scalar_lea.vmem %s133_s28, 32 }
  0x18   : > { %s143_s30 = sshll.u32 %s5946_s29, 4  ;;  %p6041_p0 = pnand %p4904_p1, %p12891_p4  ;;  %s144_s30 = int_to_ptr.vmem [resolvable:$true] %s143_s30 }
  0x19   : > { %p5809_p3 = scmp.ne.s32.totalorder %s133_s28, %s5808_s5  ;;  %p5816_p9 = scmp.lt.s32.totalorder %s133_s28, %s133_s28 }
  0x1a   : > { %p5799_p2 = pneg %p6041_p0  ;;  %p5817_p10 = scmp.lt.s32.totalorder %s5808_s5, %s5808_s5 }
  0x1c   : > { %p5811_p7 = pnand %p5809_p3, %p5799_p2  ;;  %p5818_p12 = por %p5817_p10, %p5816_p9 }
  0x1e   : > { %p5812_p8 = pneg %p5811_p7 }
  0x20   : > { %p5819_p11 = pnand %p5818_p12, %p5812_p8 }
  0x22   : > { %5822 = shalt.err (!%p5819_p11)
}
  0x23   : > { %4907 = dma.hbm_to_vmem [thread:$0]  (!%p6041_p0), %s12888_s1, 32, %s133_s28, [#allocation6]  }
  0x24   : > { %s5834_s8 = scalar_lea.vmem %s144_s30, 32  ;;  %p5842_p3 = scmp.lt.s32.totalorder %s144_s30, %s144_s30 }
  0x25   : > { %p5835_p1 = scmp.ne.s32.totalorder %s144_s30, %s5834_s8  ;;  %p5843_p7 = scmp.lt.s32.totalorder %s5834_s8, %s5834_s8 }
  0x27   : > { %p5837_p4 = pnand %p5835_p1, %p5799_p2  ;;  %p5844_p13 = por %p5843_p7, %p5842_p3 }
  0x29   : > { %p5838_p6 = pneg %p5837_p4 }
  0x2b   : > { %p5845_p5 = pnand %p5844_p13, %p5838_p6 }
  0x2d   : > { %5848 = shalt.err (!%p5845_p5)
}
  0x2e   : > { %4910 = dma.hbm_to_vmem [thread:$0]  (!%p6041_p0), %s12889_s2, 32, %s144_s30, [#allocation6]  }
  0x2f   : > { %p4864_p11 = scmp.ge.s32.totalorder %s5943_s15, 2 }
  0x30   : > { %p13374_p12 = scmp.ne.s32.totalorder (!%p4864_p11), %s13368_s22, 0 }
  0x31   : > { %150 = sbr.rel (%p4864_p11) target bundleno = 88 (0x58), region = 24 }
  0x36   : > { %153 = sbr.rel (!%p13374_p12) target bundleno = 88 (0x58), region = 28  ;;  %s154_s11 = sand.u32 (%p13374_p12), 1, %s5939_s14  }
  0x37   : > { %s159_s17 = smul.u32 (%p13374_p12), 132, %s5943_s15  ;;  %s6073_s29 = scalar_lea.sflag (%p13374_p12), [#allocation3], %s154_s11 }
  0x38   : > { %s4892_s19 = smul.u32 (%p13374_p12), 2112, %s154_s11 }
  0x39   : > { %s160_s20 = ssub.s32 (%p13374_p12), 263, %s159_s17 }
  0x3a   : > { %p161_p4 = scmp.lt.s32.totalorder (%p13374_p12), %s160_s20, 132  ;;  %s158_s30 = scalar_lea.vmem (%p13374_p12), [#allocation2], %s4892_s19 }
  0x3c   : > { %s14725_s20 = smov (!%p161_p4, %s160_s20), 132 }
  0x3d   : > { %s6070_s27 = sshll.u32 %s14725_s20, 8 }
  0x3e   : > { %s166_s28 = ssub.s32 33792, %s6070_s27 }
  0x3f   : > { %167 = vsyncadd %s6073_s29, %s166_s28  ;;  %p4867_p5 = scmp.ne.s32.totalorder %s6070_s27, 0  ;;  %s4890_s22 = smul.u32 33792, %s5943_s15 }
  0x40   : > { %s173_s4 = sshll.u32 %s158_s30, 4  ;;  %s5853_s11 = scalar_lea.hbm %s12887_s0, 67328  ;;  %s6083_s4 = int_to_ptr.vmem [resolvable:$true] %s173_s4 }
  0x41   : > { %s6081_s7 = scalar_lea.hbm %s12887_s0, %s4890_s22 }
  0x42   : > { %s5849_s8 = scalar_lea.hbm %s6081_s7, %s6070_s27  ;;  %p5854_p2 = scmp.lt.s32.totalorder %s6081_s7, %s12887_s0 }
  0x43   : > { %p5850_p6 = scmp.ne.s32.totalorder %s6081_s7, %s5849_s8  ;;  %p5855_p8 = scmp.lt.s32.totalorder %s5853_s11, %s5849_s8 }
  0x45   : > { %p5851_p13 = pnand %p5850_p6, %p4867_p5  ;;  %p5856_p9 = por %p5855_p8, %p5854_p2 }
  0x47   : > { %p5852_p0 = pneg %p5851_p13 }
  0x49   : > { %p5857_p10 = pnand %p5856_p9, %p5852_p0 }
  0x4b   : > { %5860 = shalt.err (!%p5857_p10)
}
  0x4c   : > { %s5861_s20 = scalar_lea.vmem %s6083_s4, %s6070_s27  ;;  %s5947_s28 = smov [#allocation2]  }
  0x4d   : > { %p5862_p1 = scmp.ne.s32.totalorder %s6083_s4, %s5861_s20  ;;  %s5865_s30 = sshll.u32 %s5947_s28, 4  ;;  %s5866_s30 = int_to_ptr.vmem [resolvable:$false] %s5865_s30 }
  0x4e   : > { %s5867_s22 = scalar_lea.vmem %s5866_s30, 67584  ;;  %p5868_p12 = scmp.lt.s32.totalorder %s6083_s4, %s5866_s30 }
  0x4f   : > { %p5863_p3 = pnand %p5862_p1, %p4867_p5  ;;  %p5869_p4 = scmp.lt.s32.totalorder %s5867_s22, %s5861_s20 }
  0x51   : > { %p5864_p7 = pneg %p5863_p3  ;;  %p5870_p6 = por %p5869_p4, %p5868_p12 }
  0x53   : > { %p5871_p13 = pnand %p5870_p6, %p5864_p7 }
  0x55   : > { %5874 = shalt.err (!%p5871_p13)
}
  0x56   : > { %s5948_s5 = smov 256   ;;  %s5949_s6 = smov 16  }
  0x57   : > { %179 = dma.hbm_to_vmem [thread:$0]  (%p4867_p5), %s6081_s7, %s6070_s27, %s6083_s4, %s6073_s29, %s5948_s5, %s5948_s5, %s5949_s6  }
  0x58 PF: > { %p13375_p0 = scmp.ne.s32.totalorder %s13372_s26, 0 }
  0x5a   : > { %185 = sbr.rel (%p13375_p0) target bundleno = 1320 (0x528), region = 32 }
  0x5f   : > { %s6112_s8 = sand.u32 1, %s5935_s13   ;;  %p13376_p2 = scmp.ne.s32.totalorder %s13369_s23, 0 }
  0x60   : > { %s4893_s9 = smul.u32 2112, %s6112_s8  ;;  %s188_s10 = scalar_lea.sflag [#allocation3], %s6112_s8 }
  0x62   : > { %s6118_s11 = scalar_lea.vmem [#allocation2], %s4893_s9 }
  0x63   : > { %5918 = dma.done.wait (%p13376_p2), %s188_s10, 33792  }
  0x64   : > { %5920 = vsyncadd (%p13376_p2), %s188_s10, 4294933504  ;;  %p13377_p5 = scmp.eq.s32.totalorder %s5994_s16, 0 }
  0x66   : > { %5922 = dma.done.wait (%p13377_p5), [#allocation6], 64   ;;  %p13378_p8 = pmov %p13377_p5 }
  0x67   : > { %v238_v0 = vld [vmem:[%s6118_s11 + $0x20] sm:$0xff]  ;;  %v239_v1 = vld [vmem:[%s6118_s11 + $0x28] sm:$0xff]  ;;  %v240_v5 = vld [vmem:[%s6118_s11 + $0x30] sm:$0xff]  ;;  %s9394_s23 = scalar_lea.vmem [#allocation8], %s4893_s9  ;;  %s4747_s26 = scalar_lea.sflag [#allocation4], %s6112_s8 }
  0x68   : > { %5924 = vsyncadd (%p13378_p8), [#allocation6], 4294967232  ;;  %v234_v2 = vld [vmem:[%s6118_s11] sm:$0xff]  ;;  %v504_v3 = vadd.f32 %v239_v1, %v238_v0  ;;  %v235_v4 = vld [vmem:[%s6118_s11 + $0x8] sm:$0xff]  ;;  %p14718_p9 = scmp.ne.s32.totalorder %s13370_s24, 0 }
  0x69   : > { %v241_v6 = vld [vmem:[%s6118_s11 + $0x38] sm:$0xff]  ;;  %v498_v7 = vadd.f32 %v235_v4, %v234_v2  ;;  %v236_v8 = vld [vmem:[%s6118_s11 + $0x10] sm:$0xff]  ;;  %v242_v14 = vld [vmem:[%s6118_s11 + $0x40] sm:$0xff]  ;;  %s4754_s27 = smul.u32 (%p14718_p9), 132, %s5994_s16 }
  0x6a   : > { %v237_v9 = vld [vmem:[%s6118_s11 + $0x18] sm:$0xff]  ;;  %505 = vadd.xlane.f32.xlu1 %v504_v3  ;;  %v507_v10 = vadd.f32 %v241_v6, %v240_v5  ;;  %v244_v12 = vld [vmem:[%s6118_s11 + $0x50] sm:$0xff]  ;;  %v243_v15 = vld [vmem:[%s6118_s11 + $0x48] sm:$0xff] }
  0x6b   : > { %499 = vadd.xlane.f32.xlu0 %v498_v7  ;;  %v501_v11 = vadd.f32 %v237_v9, %v236_v8  ;;  %v245_v13 = vld [vmem:[%s6118_s11 + $0x58] sm:$0xff]  ;;  %v510_v17 = vadd.f32 %v243_v15, %v242_v14  ;;  %v248_v18 = vld [vmem:[%s6118_s11 + $0x70] sm:$0xff]  ;;  %v246_v20 = vld [vmem:[%s6118_s11 + $0x60] sm:$0xff]  ;;  %s4755_s29 = ssub.s32 (%p14718_p9), 263, %s4754_s27 }
  0x6c   : > { %v513_v16 = vadd.f32 %v245_v13, %v244_v12  ;;  %v249_v19 = vld [vmem:[%s6118_s11 + $0x78] sm:$0xff]  ;;  %v247_v21 = vld [vmem:[%s6118_s11 + $0x68] sm:$0xff]  ;;  %v252_v24 = vld [vmem:[%s6118_s11 + $0x90] sm:$0xff]  ;;  %p4756_p10 = scmp.lt.s32.totalorder (%p14718_p9), %s4755_s29, 132 }
  0x6d   : > { %v519_v22 = vadd.f32 %v249_v19, %v248_v18  ;;  %v516_v23 = vadd.f32 %v247_v21, %v246_v20  ;;  %v253_v25 = vld [vmem:[%s6118_s11 + $0x98] sm:$0xff]  ;;  %v250_v26 = vld [vmem:[%s6118_s11 + $0x80] sm:$0xff]  ;;  %v251_v27 = vld [vmem:[%s6118_s11 + $0x88] sm:$0xff] }
  0x6e   : > { %508 = vadd.xlane.f32.xlu1 %v507_v10  ;;  %v525_v28 = vadd.f32 %v253_v25, %v252_v24  ;;  %v522_v29 = vadd.f32 %v251_v27, %v250_v26  ;;  %v256_v30 = vld [vmem:[%s6118_s11 + $0xb0] sm:$0xff]  ;;  %v257_v31 = vld [vmem:[%s6118_s11 + $0xb8] sm:$0xff]  ;;  %v254_v32 = vld [vmem:[%s6118_s11 + $0xa0] sm:$0xff] }
  0x6f   : > { %502 = vadd.xlane.f32.xlu0 %v501_v11  ;;  %v255_v33 = vld [vmem:[%s6118_s11 + $0xa8] sm:$0xff]  ;;  %v531_v34 = vadd.f32 %v257_v31, %v256_v30  ;;  %v260_v36 = vld [vmem:[%s6118_s11 + $0xd0] sm:$0xff]  ;;  %v261_v37 = vld [vmem:[%s6118_s11 + $0xd8] sm:$0xff] }
  0x70   : > { %v528_v35 = vadd.f32 %v255_v33, %v254_v32  ;;  %v258_v38 = vld [vmem:[%s6118_s11 + $0xc0] sm:$0xff]  ;;  %v259_v39 = vld [vmem:[%s6118_s11 + $0xc8] sm:$0xff]  ;;  %v537_v40 = vadd.f32 %v261_v37, %v260_v36  ;;  %v264_v42 = vld [vmem:[%s6118_s11 + $0xf0] sm:$0xff] }
  0x71   : > { %v534_v41 = vadd.f32 %v259_v39, %v258_v38  ;;  %v265_v43 = vld [vmem:[%s6118_s11 + $0xf8] sm:$0xff]  ;;  %v262_v44 = vld [vmem:[%s6118_s11 + $0xe0] sm:$0xff]  ;;  %v263_v45 = vld [vmem:[%s6118_s11 + $0xe8] sm:$0xff] }
  0x72   : > { %514 = vadd.xlane.f32.xlu1 %v513_v16  ;;  %v543_v46 = vadd.f32 %v265_v43, %v264_v42  ;;  %v540_v47 = vadd.f32 %v263_v45, %v262_v44  ;;  %v268_v48 = vld [vmem:[%s6118_s11 + $0x110] sm:$0xff]  ;;  %v269_v49 = vld [vmem:[%s6118_s11 + $0x118] sm:$0xff]  ;;  %v266_v50 = vld [vmem:[%s6118_s11 + $0x100] sm:$0xff] }
  0x73   : > { %511 = vadd.xlane.f32.xlu0 %v510_v17  ;;  %v267_v51 = vld [vmem:[%s6118_s11 + $0x108] sm:$0xff]  ;;  %v549_v52 = vadd.f32 %v269_v49, %v268_v48  ;;  %v272_v54 = vld [vmem:[%s6118_s11 + $0x130] sm:$0xff]  ;;  %v273_v55 = vld [vmem:[%s6118_s11 + $0x138] sm:$0xff] }
  0x74   : > { %v546_v53 = vadd.f32 %v267_v51, %v266_v50  ;;  %v270_v56 = vld [vmem:[%s6118_s11 + $0x120] sm:$0xff]  ;;  %v271_v57 = vld [vmem:[%s6118_s11 + $0x128] sm:$0xff]  ;;  %v555_v58 = vadd.f32 %v273_v55, %v272_v54  ;;  %v276_v60 = vld [vmem:[%s6118_s11 + $0x150] sm:$0xff] }
  0x75   : > { %v552_v59 = vadd.f32 %v271_v57, %v270_v56  ;;  %v277_v61 = vld [vmem:[%s6118_s11 + $0x158] sm:$0xff]  ;;  %v274_v62 = vld [vmem:[%s6118_s11 + $0x140] sm:$0xff]  ;;  %v275_v63 = vld [vmem:[%s6118_s11 + $0x148] sm:$0xff] }
  0x76   : > { %520 = vadd.xlane.f32.xlu1 %v519_v22  ;;  %v561_v0 = vadd.f32 %v277_v61, %v276_v60  ;;  %v558_v1 = vadd.f32 %v275_v63, %v274_v62  ;;  %v280_v2 = vld [vmem:[%s6118_s11 + $0x170] sm:$0xff]  ;;  %v281_v3 = vld [vmem:[%s6118_s11 + $0x178] sm:$0xff]  ;;  %v278_v4 = vld [vmem:[%s6118_s11 + $0x160] sm:$0xff] }
  0x77   : > { %517 = vadd.xlane.f32.xlu0 %v516_v23  ;;  %v279_v5 = vld [vmem:[%s6118_s11 + $0x168] sm:$0xff]  ;;  %v567_v6 = vadd.f32 %v281_v3, %v280_v2  ;;  %v284_v8 = vld [vmem:[%s6118_s11 + $0x190] sm:$0xff]  ;;  %v285_v9 = vld [vmem:[%s6118_s11 + $0x198] sm:$0xff] }
  0x78   : > { %v564_v7 = vadd.f32 %v279_v5, %v278_v4  ;;  %v282_v10 = vld [vmem:[%s6118_s11 + $0x180] sm:$0xff]  ;;  %v283_v11 = vld [vmem:[%s6118_s11 + $0x188] sm:$0xff]  ;;  %v573_v12 = vadd.f32 %v285_v9, %v284_v8  ;;  %v288_v14 = vld [vmem:[%s6118_s11 + $0x1b0] sm:$0xff] }
  0x79   : > { %v570_v13 = vadd.f32 %v283_v11, %v282_v10  ;;  %v289_v15 = vld [vmem:[%s6118_s11 + $0x1b8] sm:$0xff]  ;;  %v286_v16 = vld [vmem:[%s6118_s11 + $0x1a0] sm:$0xff]  ;;  %v287_v17 = vld [vmem:[%s6118_s11 + $0x1a8] sm:$0xff] }
  0x7a   : > { %526 = vadd.xlane.f32.xlu1 %v525_v28  ;;  %v579_v18 = vadd.f32 %v289_v15, %v288_v14  ;;  %v576_v19 = vadd.f32 %v287_v17, %v286_v16  ;;  %v292_v20 = vld [vmem:[%s6118_s11 + $0x1d0] sm:$0xff]  ;;  %v293_v21 = vld [vmem:[%s6118_s11 + $0x1d8] sm:$0xff]  ;;  %v290_v22 = vld [vmem:[%s6118_s11 + $0x1c0] sm:$0xff] }
  0x7b   : > { %523 = vadd.xlane.f32.xlu0 %v522_v29  ;;  %v291_v23 = vld [vmem:[%s6118_s11 + $0x1c8] sm:$0xff]  ;;  %v585_v24 = vadd.f32 %v293_v21, %v292_v20  ;;  %v296_v26 = vld [vmem:[%s6118_s11 + $0x1f0] sm:$0xff]  ;;  %v297_v27 = vld [vmem:[%s6118_s11 + $0x1f8] sm:$0xff] }
  0x7c   : > { %v582_v25 = vadd.f32 %v291_v23, %v290_v22  ;;  %v294_v28 = vld [vmem:[%s6118_s11 + $0x1e0] sm:$0xff]  ;;  %v295_v29 = vld [vmem:[%s6118_s11 + $0x1e8] sm:$0xff]  ;;  %v591_v30 = vadd.f32 %v297_v27, %v296_v26  ;;  %v300_v32 = vld [vmem:[%s6118_s11 + $0x210] sm:$0xff] }
  0x7d   : > { %v588_v31 = vadd.f32 %v295_v29, %v294_v28  ;;  %v301_v33 = vld [vmem:[%s6118_s11 + $0x218] sm:$0xff]  ;;  %v304_v38 = vld [vmem:[%s6118_s11 + $0x230] sm:$0xff] }
  0x7e   : > { %532 = vadd.xlane.f32.xlu1 %v531_v34  ;;  %v298_v34 = vld [vmem:[%s6118_s11 + $0x200] sm:$0xff]  ;;  %v597_v36 = vadd.f32 %v301_v33, %v300_v32  ;;  %v305_v39 = vld [vmem:[%s6118_s11 + $0x238] sm:$0xff]  ;;  %v308_v44 = vld [vmem:[%s6118_s11 + $0x250] sm:$0xff] }
  0x7f   : > { %529 = vadd.xlane.f32.xlu0 %v528_v35  ;;  %v299_v35 = vld [vmem:[%s6118_s11 + $0x208] sm:$0xff]  ;;  %v603_v42 = vadd.f32 %v305_v39, %v304_v38  ;;  %v309_v45 = vld [vmem:[%s6118_s11 + $0x258] sm:$0xff]  ;;  %v312_v50 = vld [vmem:[%s6118_s11 + $0x270] sm:$0xff] }
  0x80   : > { %v594_v37 = vadd.f32 %v299_v35, %v298_v34  ;;  %v609_v48 = vadd.f32 %v309_v45, %v308_v44  ;;  %v313_v51 = vld [vmem:[%s6118_s11 + $0x278] sm:$0xff]  ;;  %v316_v56 = vld [vmem:[%s6118_s11 + $0x290] sm:$0xff] }
  0x81   : > { %v615_v54 = vadd.f32 %v313_v51, %v312_v50  ;;  %v317_v57 = vld [vmem:[%s6118_s11 + $0x298] sm:$0xff]  ;;  %v320_v62 = vld [vmem:[%s6118_s11 + $0x2b0] sm:$0xff] }
  0x82   : > { %538 = vadd.xlane.f32.xlu1 %v537_v40  ;;  %v302_v40 = vld [vmem:[%s6118_s11 + $0x220] sm:$0xff]  ;;  %v621_v60 = vadd.f32 %v317_v57, %v316_v56  ;;  %v321_v63 = vld [vmem:[%s6118_s11 + $0x2b8] sm:$0xff]  ;;  %v324_v4 = vld [vmem:[%s6118_s11 + $0x2d0] sm:$0xff] }
  0x83   : > { %535 = vadd.xlane.f32.xlu0 %v534_v41  ;;  %v303_v41 = vld [vmem:[%s6118_s11 + $0x228] sm:$0xff]  ;;  %v627_v2 = vadd.f32 %v321_v63, %v320_v62  ;;  %v325_v5 = vld [vmem:[%s6118_s11 + $0x2d8] sm:$0xff]  ;;  %v328_v10 = vld [vmem:[%s6118_s11 + $0x2f0] sm:$0xff] }
  0x84   : > { %v600_v43 = vadd.f32 %v303_v41, %v302_v40  ;;  %v633_v8 = vadd.f32 %v325_v5, %v324_v4  ;;  %v329_v11 = vld [vmem:[%s6118_s11 + $0x2f8] sm:$0xff]  ;;  %v332_v16 = vld [vmem:[%s6118_s11 + $0x310] sm:$0xff] }
  0x85   : > { %v639_v14 = vadd.f32 %v329_v11, %v328_v10  ;;  %v333_v17 = vld [vmem:[%s6118_s11 + $0x318] sm:$0xff]  ;;  %v336_v22 = vld [vmem:[%s6118_s11 + $0x330] sm:$0xff] }
  0x86   : > { %544 = vadd.xlane.f32.xlu1 %v543_v46  ;;  %v306_v46 = vld [vmem:[%s6118_s11 + $0x240] sm:$0xff]  ;;  %v645_v20 = vadd.f32 %v333_v17, %v332_v16  ;;  %v337_v23 = vld [vmem:[%s6118_s11 + $0x338] sm:$0xff]  ;;  %v340_v28 = vld [vmem:[%s6118_s11 + $0x350] sm:$0xff] }
  0x87   : > { %541 = vadd.xlane.f32.xlu0 %v540_v47  ;;  %v307_v47 = vld [vmem:[%s6118_s11 + $0x248] sm:$0xff]  ;;  %v651_v26 = vadd.f32 %v337_v23, %v336_v22  ;;  %v341_v29 = vld [vmem:[%s6118_s11 + $0x358] sm:$0xff]  ;;  %v344_v34 = vld [vmem:[%s6118_s11 + $0x370] sm:$0xff] }
  0x88   : > { %v606_v49 = vadd.f32 %v307_v47, %v306_v46  ;;  %v657_v32 = vadd.f32 %v341_v29, %v340_v28  ;;  %v345_v35 = vld [vmem:[%s6118_s11 + $0x378] sm:$0xff]  ;;  %v348_v40 = vld [vmem:[%s6118_s11 + $0x390] sm:$0xff]  ;;  %v378_v28 = vld [vmem:[%s6118_s11 + $0x480] sm:$0xff] }
  0x89   : > { %v663_v38 = vadd.f32 %v345_v35, %v344_v34  ;;  %v349_v41 = vld [vmem:[%s6118_s11 + $0x398] sm:$0xff]  ;;  %v352_v46 = vld [vmem:[%s6118_s11 + $0x3b0] sm:$0xff]  ;;  %v379_v29 = vld [vmem:[%s6118_s11 + $0x488] sm:$0xff] }
  0x8a   : > { %550 = vadd.xlane.f32.xlu1 %v549_v52  ;;  %v310_v52 = vld [vmem:[%s6118_s11 + $0x260] sm:$0xff]  ;;  %v669_v44 = vadd.f32 %v349_v41, %v348_v40  ;;  %v353_v47 = vld [vmem:[%s6118_s11 + $0x3b8] sm:$0xff]  ;;  %v388_v41 = vld [vmem:[%s6118_s11 + $0x4d0] sm:$0xff] }
  0x8b   : > { %547 = vadd.xlane.f32.xlu0 %v546_v53  ;;  %v311_v53 = vld [vmem:[%s6118_s11 + $0x268] sm:$0xff]  ;;  %v675_v50 = vadd.f32 %v353_v47, %v352_v46  ;;  %v385_v34 = vld [vmem:[%s6118_s11 + $0x4b8] sm:$0xff] }
  0x8c   : > { %v612_v55 = vadd.f32 %v311_v53, %v310_v52  ;;  %v356_v52 = vld [vmem:[%s6118_s11 + $0x3d0] sm:$0xff]  ;;  %v357_v53 = vld [vmem:[%s6118_s11 + $0x3d8] sm:$0xff] }
  0x8d   : > { %v681_v56 = vadd.f32 %v357_v53, %v356_v52  ;;  %v390_v52 = vld [vmem:[%s6118_s11 + $0x4e0] sm:$0xff]  ;;  %v391_v53 = vld [vmem:[%s6118_s11 + $0x4e8] sm:$0xff] }
  0x8e   : > { %556 = vadd.xlane.f32.xlu1 %v555_v58  ;;  %v314_v58 = vld [vmem:[%s6118_s11 + $0x280] sm:$0xff] }
  0x8f   : > { %553 = vadd.xlane.f32.xlu0 %v552_v59  ;;  %v315_v59 = vld [vmem:[%s6118_s11 + $0x288] sm:$0xff] }
  0x90   : > { %v618_v61 = vadd.f32 %v315_v59, %v314_v58  ;;  %v360_v58 = vld [vmem:[%s6118_s11 + $0x3f0] sm:$0xff]  ;;  %v361_v59 = vld [vmem:[%s6118_s11 + $0x3f8] sm:$0xff] }
  0x91   : > { %v687_v62 = vadd.f32 %v361_v59, %v360_v58  ;;  %v397_v58 = vld [vmem:[%s6118_s11 + $0x518] sm:$0xff] }
  0x92   : > { %562 = vadd.xlane.f32.xlu1 %v561_v0  ;;  %v318_v0 = vld [vmem:[%s6118_s11 + $0x2a0] sm:$0xff] }
  0x93   : > { %559 = vadd.xlane.f32.xlu0 %v558_v1  ;;  %v319_v1 = vld [vmem:[%s6118_s11 + $0x2a8] sm:$0xff] }
  0x94   : > { %v624_v3 = vadd.f32 %v319_v1, %v318_v0  ;;  %v364_v0 = vld [vmem:[%s6118_s11 + $0x410] sm:$0xff]  ;;  %v365_v1 = vld [vmem:[%s6118_s11 + $0x418] sm:$0xff] }
  0x95   : > { %v693_v4 = vadd.f32 %v365_v1, %v364_v0  ;;  %v400_v1 = vld [vmem:[%s6118_s11 + $0x530] sm:$0xff] }
  0x96   : > { %568 = vadd.xlane.f32.xlu1 %v567_v6  ;;  %v322_v6 = vld [vmem:[%s6118_s11 + $0x2c0] sm:$0xff] }
  0x97   : > { %565 = vadd.xlane.f32.xlu0 %v564_v7  ;;  %v323_v7 = vld [vmem:[%s6118_s11 + $0x2c8] sm:$0xff] }
  0x98   : > { %v630_v9 = vadd.f32 %v323_v7, %v322_v6  ;;  %v368_v6 = vld [vmem:[%s6118_s11 + $0x430] sm:$0xff]  ;;  %v369_v7 = vld [vmem:[%s6118_s11 + $0x438] sm:$0xff] }
  0x99   : > { %v699_v10 = vadd.f32 %v369_v7, %v368_v6 }
  0x9a   : > { %574 = vadd.xlane.f32.xlu1 %v573_v12  ;;  %v326_v12 = vld [vmem:[%s6118_s11 + $0x2e0] sm:$0xff] }
  0x9b   : > { %571 = vadd.xlane.f32.xlu0 %v570_v13  ;;  %v327_v13 = vld [vmem:[%s6118_s11 + $0x2e8] sm:$0xff] }
  0x9c   : > { %v636_v15 = vadd.f32 %v327_v13, %v326_v12  ;;  %v372_v12 = vld [vmem:[%s6118_s11 + $0x450] sm:$0xff]  ;;  %v373_v13 = vld [vmem:[%s6118_s11 + $0x458] sm:$0xff] }
  0x9d   : > { %v705_v16 = vadd.f32 %v373_v13, %v372_v12  ;;  %v402_v12 = vld [vmem:[%s6118_s11 + $0x540] sm:$0xff]  ;;  %v403_v13 = vld [vmem:[%s6118_s11 + $0x548] sm:$0xff] }
  0x9e   : > { %580 = vadd.xlane.f32.xlu1 %v579_v18  ;;  %v330_v18 = vld [vmem:[%s6118_s11 + $0x300] sm:$0xff] }
  0x9f   : > { %577 = vadd.xlane.f32.xlu0 %v576_v19  ;;  %v331_v19 = vld [vmem:[%s6118_s11 + $0x308] sm:$0xff] }
  0xa0   : > { %v642_v21 = vadd.f32 %v331_v19, %v330_v18  ;;  %v376_v18 = vld [vmem:[%s6118_s11 + $0x470] sm:$0xff]  ;;  %v377_v19 = vld [vmem:[%s6118_s11 + $0x478] sm:$0xff] }
  0xa1   : > { %v711_v22 = vadd.f32 %v377_v19, %v376_v18  ;;  %v409_v18 = vld [vmem:[%s6118_s11 + $0x578] sm:$0xff] }
  0xa2   : > { %586 = vadd.xlane.f32.xlu1 %v585_v24  ;;  %v334_v24 = vld [vmem:[%s6118_s11 + $0x320] sm:$0xff] }
  0xa3   : > { %583 = vadd.xlane.f32.xlu0 %v582_v25  ;;  %v335_v25 = vld [vmem:[%s6118_s11 + $0x328] sm:$0xff] }
  0xa4   : > { %v648_v27 = vadd.f32 %v335_v25, %v334_v24  ;;  %v380_v25 = vld [vmem:[%s6118_s11 + $0x490] sm:$0xff] }
  0xa6   : > { %592 = vadd.xlane.f32.xlu1 %v591_v30  ;;  %v338_v30 = vld [vmem:[%s6118_s11 + $0x340] sm:$0xff] }
  0xa7   : > { %589 = vadd.xlane.f32.xlu0 %v588_v31  ;;  %v339_v31 = vld [vmem:[%s6118_s11 + $0x348] sm:$0xff] }
  0xa8   : > { %v654_v33 = vadd.f32 %v339_v31, %v338_v30 }
  0xaa   : > { %598 = vadd.xlane.f32.xlu1 %v597_v36  ;;  %v342_v36 = vld [vmem:[%s6118_s11 + $0x360] sm:$0xff] }
  0xab   : > { %595 = vadd.xlane.f32.xlu0 %v594_v37  ;;  %v343_v37 = vld [vmem:[%s6118_s11 + $0x368] sm:$0xff] }
  0xac   : > { %v660_v39 = vadd.f32 %v343_v37, %v342_v36  ;;  %v382_v36 = vld [vmem:[%s6118_s11 + $0x4a0] sm:$0xff]  ;;  %v383_v37 = vld [vmem:[%s6118_s11 + $0x4a8] sm:$0xff] }
  0xad   : > { %v720_v40 = vadd.f32 %v383_v37, %v382_v36  ;;  %v416_v37 = vld [vmem:[%s6118_s11 + $0x5b0] sm:$0xff] }
  0xae   : > { %604 = vadd.xlane.f32.xlu1 %v603_v42  ;;  %v346_v42 = vld [vmem:[%s6118_s11 + $0x380] sm:$0xff] }
  0xaf   : > { %601 = vadd.xlane.f32.xlu0 %v600_v43  ;;  %v347_v43 = vld [vmem:[%s6118_s11 + $0x388] sm:$0xff] }
  0xb0   : > { %v666_v45 = vadd.f32 %v347_v43, %v346_v42  ;;  %v389_v42 = vld [vmem:[%s6118_s11 + $0x4d8] sm:$0xff] }
  0xb1   : > { %v729_v46 = vadd.f32 %v389_v42, %v388_v41  ;;  %v414_v41 = vld [vmem:[%s6118_s11 + $0x5a0] sm:$0xff]  ;;  %v415_v42 = vld [vmem:[%s6118_s11 + $0x5a8] sm:$0xff] }
  0xb2   : > { %610 = vadd.xlane.f32.xlu1 %v609_v48  ;;  %v350_v48 = vld [vmem:[%s6118_s11 + $0x3a0] sm:$0xff] }
  0xb3   : > { %607 = vadd.xlane.f32.xlu0 %v606_v49  ;;  %v351_v49 = vld [vmem:[%s6118_s11 + $0x3a8] sm:$0xff] }
  0xb4   : > { %v672_v51 = vadd.f32 %v351_v49, %v350_v48  ;;  %v392_v49 = vld [vmem:[%s6118_s11 + $0x4f0] sm:$0xff] }
  0xb6   : > { %616 = vadd.xlane.f32.xlu1 %v615_v54  ;;  %v354_v54 = vld [vmem:[%s6118_s11 + $0x3c0] sm:$0xff] }
  0xb7   : > { %613 = vadd.xlane.f32.xlu0 %v612_v55  ;;  %v355_v55 = vld [vmem:[%s6118_s11 + $0x3c8] sm:$0xff] }
  0xb8   : > { %v678_v57 = vadd.f32 %v355_v55, %v354_v54 }
  0xba   : > { %622 = vadd.xlane.f32.xlu1 %v621_v60  ;;  %v358_v60 = vld [vmem:[%s6118_s11 + $0x3e0] sm:$0xff] }
  0xbb   : > { %619 = vadd.xlane.f32.xlu0 %v618_v61  ;;  %v359_v61 = vld [vmem:[%s6118_s11 + $0x3e8] sm:$0xff] }
  0xbc   : > { %v684_v63 = vadd.f32 %v359_v61, %v358_v60  ;;  %v394_v60 = vld [vmem:[%s6118_s11 + $0x500] sm:$0xff]  ;;  %v395_v61 = vld [vmem:[%s6118_s11 + $0x508] sm:$0xff] }
  0xbd   : > { %v738_v0 = vadd.f32 %v395_v61, %v394_v60  ;;  %v425_v60 = vld [vmem:[%s6118_s11 + $0x5f8] sm:$0xff] }
  0xbe   : > { %628 = vadd.xlane.f32.xlu1 %v627_v2  ;;  %v362_v2 = vld [vmem:[%s6118_s11 + $0x400] sm:$0xff] }
  0xbf   : > { %625 = vadd.xlane.f32.xlu0 %v624_v3  ;;  %v363_v3 = vld [vmem:[%s6118_s11 + $0x408] sm:$0xff] }
  0xc0   : > { %v690_v5 = vadd.f32 %v363_v3, %v362_v2  ;;  %v401_v2 = vld [vmem:[%s6118_s11 + $0x538] sm:$0xff] }
  0xc1   : > { %v747_v6 = vadd.f32 %v401_v2, %v400_v1 }
  0xc2   : > { %634 = vadd.xlane.f32.xlu1 %v633_v8  ;;  %v366_v8 = vld [vmem:[%s6118_s11 + $0x420] sm:$0xff] }
  0xc3   : > { %631 = vadd.xlane.f32.xlu0 %v630_v9  ;;  %v367_v9 = vld [vmem:[%s6118_s11 + $0x428] sm:$0xff] }
  0xc4   : > { %v696_v11 = vadd.f32 %v367_v9, %v366_v8  ;;  %v404_v9 = vld [vmem:[%s6118_s11 + $0x550] sm:$0xff] }
  0xc6   : > { %640 = vadd.xlane.f32.xlu1 %v639_v14  ;;  %v370_v14 = vld [vmem:[%s6118_s11 + $0x440] sm:$0xff] }
  0xc7   : > { %637 = vadd.xlane.f32.xlu0 %v636_v15  ;;  %v371_v15 = vld [vmem:[%s6118_s11 + $0x448] sm:$0xff] }
  0xc8   : > { %v702_v17 = vadd.f32 %v371_v15, %v370_v14 }
  0xca   : > { %646 = vadd.xlane.f32.xlu1 %v645_v20  ;;  %v374_v20 = vld [vmem:[%s6118_s11 + $0x460] sm:$0xff] }
  0xcb   : > { %643 = vadd.xlane.f32.xlu0 %v642_v21  ;;  %v375_v21 = vld [vmem:[%s6118_s11 + $0x468] sm:$0xff] }
  0xcc   : > { %v708_v24 = vadd.f32 %v375_v21, %v374_v20  ;;  %v406_v20 = vld [vmem:[%s6118_s11 + $0x560] sm:$0xff]  ;;  %v407_v21 = vld [vmem:[%s6118_s11 + $0x568] sm:$0xff] }
  0xce   : > { %652 = vadd.xlane.f32.xlu1 %v651_v26  ;;  %v381_v26 = vld [vmem:[%s6118_s11 + $0x498] sm:$0xff] }
  0xcf   : > { %649 = vadd.xlane.f32.xlu0 %v648_v27  ;;  %v717_v30 = vadd.f32 %v381_v26, %v380_v25  ;;  %v756_v25 = vadd.f32 %v407_v21, %v406_v20  ;;  %v412_v26 = vld [vmem:[%s6118_s11 + $0x590] sm:$0xff]  ;;  %v430_v20 = vld [vmem:[%s6118_s11 + $0x620] sm:$0xff]  ;;  %v431_v21 = vld [vmem:[%s6118_s11 + $0x628] sm:$0xff] }
  0xd2   : > { %658 = vadd.xlane.f32.xlu1 %v657_v32  ;;  %v714_v32 = vadd.f32 %v379_v29, %v378_v28  ;;  %v413_v28 = vld [vmem:[%s6118_s11 + $0x598] sm:$0xff] }
  0xd3   : > { %655 = vadd.xlane.f32.xlu0 %v654_v33  ;;  %v384_v33 = vld [vmem:[%s6118_s11 + $0x4b0] sm:$0xff] }
  0xd6   : > { %664 = vadd.xlane.f32.xlu1 %v663_v38  ;;  %v723_v38 = vadd.f32 %v385_v34, %v384_v33  ;;  %v765_v33 = vadd.f32 %v413_v28, %v412_v26  ;;  %v792_v26 = vadd.f32 %v431_v21, %v430_v20  ;;  %v436_v28 = vld [vmem:[%s6118_s11 + $0x650] sm:$0xff] }
  0xd7   : > { %661 = vadd.xlane.f32.xlu0 %v660_v39  ;;  %v452_v21 = vld [vmem:[%s6118_s11 + $0x6d0] sm:$0xff] }
  0xda   : > { %670 = vadd.xlane.f32.xlu1 %v669_v44  ;;  %v386_v44 = vld [vmem:[%s6118_s11 + $0x4c0] sm:$0xff] }
  0xdb   : > { %667 = vadd.xlane.f32.xlu0 %v666_v45  ;;  %v387_v45 = vld [vmem:[%s6118_s11 + $0x4c8] sm:$0xff] }
  0xdc   : > { %v726_v48 = vadd.f32 %v387_v45, %v386_v44 }
  0xde   : > { %676 = vadd.xlane.f32.xlu1 %v675_v50  ;;  %v393_v50 = vld [vmem:[%s6118_s11 + $0x4f8] sm:$0xff] }
  0xdf   : > { %673 = vadd.xlane.f32.xlu0 %v672_v51  ;;  %v735_v54 = vadd.f32 %v393_v50, %v392_v49  ;;  %v421_v49 = vld [vmem:[%s6118_s11 + $0x5d8] sm:$0xff] }
  0xe2   : > { %682 = vadd.xlane.f32.xlu1 %v681_v56  ;;  %v732_v56 = vadd.f32 %v391_v53, %v390_v52  ;;  %v418_v52 = vld [vmem:[%s6118_s11 + $0x5c0] sm:$0xff]  ;;  %v419_v53 = vld [vmem:[%s6118_s11 + $0x5c8] sm:$0xff] }
  0xe3   : > { %679 = vadd.xlane.f32.xlu0 %v678_v57  ;;  %v396_v57 = vld [vmem:[%s6118_s11 + $0x510] sm:$0xff] }
  0xe6   : > { %688 = vadd.xlane.f32.xlu1 %v687_v62  ;;  %v741_v62 = vadd.f32 %v397_v58, %v396_v57  ;;  %v774_v57 = vadd.f32 %v419_v53, %v418_v52  ;;  %v424_v58 = vld [vmem:[%s6118_s11 + $0x5f0] sm:$0xff] }
  0xe7   : > { %685 = vadd.xlane.f32.xlu0 %v684_v63  ;;  %v783_v1 = vadd.f32 %v425_v60, %v424_v58  ;;  %v445_v58 = vld [vmem:[%s6118_s11 + $0x698] sm:$0xff] }
  0xea   : > { %694 = vadd.xlane.f32.xlu1 %v693_v4  ;;  %v398_v4 = vld [vmem:[%s6118_s11 + $0x520] sm:$0xff] }
  0xeb   : > { %691 = vadd.xlane.f32.xlu0 %v690_v5  ;;  %v399_v5 = vld [vmem:[%s6118_s11 + $0x528] sm:$0xff] }
  0xec   : > { %v744_v8 = vadd.f32 %v399_v5, %v398_v4  ;;  %v428_v5 = vld [vmem:[%s6118_s11 + $0x610] sm:$0xff] }
  0xee   : > { %700 = vadd.xlane.f32.xlu1 %v699_v10  ;;  %v405_v10 = vld [vmem:[%s6118_s11 + $0x558] sm:$0xff] }
  0xef   : > { %697 = vadd.xlane.f32.xlu0 %v696_v11  ;;  %v753_v14 = vadd.f32 %v405_v10, %v404_v9  ;;  %v426_v9 = vld [vmem:[%s6118_s11 + $0x600] sm:$0xff]  ;;  %v427_v10 = vld [vmem:[%s6118_s11 + $0x608] sm:$0xff] }
  0xf2   : > { %706 = vadd.xlane.f32.xlu1 %v705_v16  ;;  %v750_v16 = vadd.f32 %v403_v13, %v402_v12 }
  0xf3   : > { %703 = vadd.xlane.f32.xlu0 %v702_v17  ;;  %v6272_v23 = vpop.xlane.xlu1 %505  ;;  %v408_v17 = vld [vmem:[%s6118_s11 + $0x570] sm:$0xff] }
  0xf4   : > { %v6276_v27 = vpop.xlane.xlu0 %499 }
  0xf6   : > { %712 = vadd.xlane.f32.xlu1 %v711_v22  ;;  %v759_v22 = vadd.f32 %v409_v18, %v408_v17  ;;  %v433_v17 = vld [vmem:[%s6118_s11 + $0x638] sm:$0xff] }
  0xf7   : > { %709 = vadd.xlane.f32.xlu0 %v708_v24  ;;  %v6280_v31 = vpop.xlane.xlu1 %508 }
  0xf8   : > { %v6284_v35 = vpop.xlane.xlu0 %502 }
  0xfa   : > { %718 = vadd.xlane.f32.xlu1 %v717_v30  ;;  %v410_v30 = vld [vmem:[%s6118_s11 + $0x580] sm:$0xff] }
  0xfb   : > { %715 = vadd.xlane.f32.xlu0 %v714_v32  ;;  %v6288_v39 = vpop.xlane.xlu1 %514  ;;  %v411_v32 = vld [vmem:[%s6118_s11 + $0x588] sm:$0xff] }
  0xfc   : > { %v6292_v43 = vpop.xlane.xlu0 %511  ;;  %v762_v36 = vadd.f32 %v411_v32, %v410_v30  ;;  %v437_v30 = vld [vmem:[%s6118_s11 + $0x658] sm:$0xff] }
  0xfe   : > { %724 = vadd.xlane.f32.xlu1 %v723_v38  ;;  %v417_v38 = vld [vmem:[%s6118_s11 + $0x5b8] sm:$0xff] }
  0xff   : > { %721 = vadd.xlane.f32.xlu0 %v720_v40  ;;  %v6296_v47 = vpop.xlane.xlu1 %520  ;;  %v771_v44 = vadd.f32 %v417_v38, %v416_v37  ;;  %v801_v37 = vadd.f32 %v437_v30, %v436_v28  ;;  %v450_v28 = vld [vmem:[%s6118_s11 + $0x6c0] sm:$0xff]  ;;  %v451_v30 = vld [vmem:[%s6118_s11 + $0x6c8] sm:$0xff] }
 0x100   : > { %v6300_v51 = vpop.xlane.xlu0 %517 }
 0x102   : > { %730 = vadd.xlane.f32.xlu1 %v729_v46  ;;  %v768_v46 = vadd.f32 %v415_v42, %v414_v41  ;;  %v440_v42 = vld [vmem:[%s6118_s11 + $0x670] sm:$0xff] }
 0x103   : > { %727 = vadd.xlane.f32.xlu0 %v726_v48  ;;  %v6304_v55 = vpop.xlane.xlu1 %526  ;;  %v420_v48 = vld [vmem:[%s6118_s11 + $0x5d0] sm:$0xff] }
 0x104   : > { %v6308_v59 = vpop.xlane.xlu0 %523 }
 0x106   : > { %736 = vadd.xlane.f32.xlu1 %v735_v54  ;;  %v777_v54 = vadd.f32 %v421_v49, %v420_v48  ;;  %v438_v48 = vld [vmem:[%s6118_s11 + $0x660] sm:$0xff]  ;;  %v439_v49 = vld [vmem:[%s6118_s11 + $0x668] sm:$0xff] }
 0x107   : > { %733 = vadd.xlane.f32.xlu0 %v732_v56  ;;  %v6312_v63 = vpop.xlane.xlu1 %532 }
 0x108   : > { %v6316_v3 = vpop.xlane.xlu0 %529 }
 0x10a   : > { %742 = vadd.xlane.f32.xlu1 %v741_v62  ;;  %v422_v62 = vld [vmem:[%s6118_s11 + $0x5e0] sm:$0xff] }
 0x10b   : > { %739 = vadd.xlane.f32.xlu0 %v738_v0  ;;  %v6320_v7 = vpop.xlane.xlu1 %538  ;;  %v423_v0 = vld [vmem:[%s6118_s11 + $0x5e8] sm:$0xff] }
 0x10c   : > { %v6324_v11 = vpop.xlane.xlu0 %535  ;;  %v780_v4 = vadd.f32 %v423_v0, %v422_v62  ;;  %v442_v62 = vld [vmem:[%s6118_s11 + $0x680] sm:$0xff]  ;;  %v443_v0 = vld [vmem:[%s6118_s11 + $0x688] sm:$0xff] }
 0x10e   : > { %748 = vadd.xlane.f32.xlu1 %v747_v6  ;;  %v429_v6 = vld [vmem:[%s6118_s11 + $0x618] sm:$0xff] }
 0x10f   : > { %745 = vadd.xlane.f32.xlu0 %v744_v8  ;;  %v6328_v15 = vpop.xlane.xlu1 %544  ;;  %v789_v12 = vadd.f32 %v429_v6, %v428_v5  ;;  %v810_v5 = vadd.f32 %v443_v0, %v442_v62  ;;  %v448_v6 = vld [vmem:[%s6118_s11 + $0x6b0] sm:$0xff]  ;;  %v461_v62 = vld [vmem:[%s6118_s11 + $0x718] sm:$0xff] }
 0x110   : > { %13379 = vst [vmem:[#allocation12_spill] sm:$0xff] %v6328_v15  ;;  %v6332_v19 = vpop.xlane.xlu0 %541 }
 0x111   : > { %13380 = vst [vmem:[#allocation13_spill] sm:$0xff] %v6332_v19 }
 0x112   : > { %754 = vadd.xlane.f32.xlu1 %v753_v14  ;;  %v786_v14 = vadd.f32 %v427_v10, %v426_v9  ;;  %v449_v9 = vld [vmem:[%s6118_s11 + $0x6b8] sm:$0xff] }
 0x113   : > { %751 = vadd.xlane.f32.xlu0 %v750_v16  ;;  %v6336_v24 = vpop.xlane.xlu1 %550  ;;  %v432_v16 = vld [vmem:[%s6118_s11 + $0x630] sm:$0xff] }
 0x114   : > { %13381 = vst [vmem:[#allocation14_spill] sm:$0xff] %v6336_v24  ;;  %v6340_v29 = vpop.xlane.xlu0 %547 }
 0x115   : > { %13382 = vst [vmem:[#allocation15_spill] sm:$0xff] %v6340_v29  ;;  %v6541_v29 = vmul.f32 0.00390625, %v6272_v23 }
 0x116   : > { %760 = vadd.xlane.f32.xlu1 %v759_v22  ;;  %v795_v22 = vadd.f32 %v433_v17, %v432_v16  ;;  %v819_v16 = vadd.f32 %v449_v9, %v448_v6  ;;  %v464_v6 = vld [vmem:[%s6118_s11 + $0x730] sm:$0xff]  ;;  %v465_v9 = vld [vmem:[%s6118_s11 + $0x738] sm:$0xff] }
 0x117   : > { %757 = vadd.xlane.f32.xlu0 %v756_v25  ;;  %v6344_v34 = vpop.xlane.xlu1 %556  ;;  %13419 = vst [vmem:[#allocation52_spill] sm:$0xff] %v6541_v29 }
 0x118   : > { %13383 = vst [vmem:[#allocation16_spill] sm:$0xff] %v6344_v34  ;;  %v6348_v40 = vpop.xlane.xlu0 %553 }
 0x119   : > { %13384 = vst [vmem:[#allocation17_spill] sm:$0xff] %v6348_v40  ;;  %v6536_v40 = vld [vmem:[%s6118_s11 + $0x38] sm:$0xff] }
 0x11a   : > { %766 = vadd.xlane.f32.xlu1 %v765_v33  ;;  %v434_v33 = vld [vmem:[%s6118_s11 + $0x640] sm:$0xff]  ;;  %13418 = vst [vmem:[#allocation51_spill] sm:$0xff] %v6536_v40  ;;  %v901_v34 = vmul.f32 %v6536_v40, %v6536_v40 }
 0x11b   : > { %763 = vadd.xlane.f32.xlu0 %v762_v36  ;;  %v6352_v45 = vpop.xlane.xlu1 %562  ;;  %v435_v36 = vld [vmem:[%s6118_s11 + $0x648] sm:$0xff] }
 0x11c   : > { %13385 = vst [vmem:[#allocation18_spill] sm:$0xff] %v6352_v45  ;;  %v6356_v50 = vpop.xlane.xlu0 %559  ;;  %v798_v41 = vadd.f32 %v435_v36, %v434_v33 }
 0x11d   : > { %13386 = vst [vmem:[#allocation19_spill] sm:$0xff] %v6356_v50 }
 0x11e   : > { %772 = vadd.xlane.f32.xlu1 %v771_v44  ;;  %v441_v44 = vld [vmem:[%s6118_s11 + $0x678] sm:$0xff] }
 0x11f   : > { %769 = vadd.xlane.f32.xlu0 %v768_v46  ;;  %v6360_v56 = vpop.xlane.xlu1 %568  ;;  %v807_v52 = vadd.f32 %v441_v44, %v440_v42  ;;  %v457_v42 = vld [vmem:[%s6118_s11 + $0x6f8] sm:$0xff] }
 0x120   : > { %13387 = vst [vmem:[#allocation20_spill] sm:$0xff] %v6360_v56  ;;  %v6364_v61 = vpop.xlane.xlu0 %565 }
 0x121   : > { %13388 = vst [vmem:[#allocation21_spill] sm:$0xff] %v6364_v61 }
 0x122   : > { %778 = vadd.xlane.f32.xlu1 %v777_v54  ;;  %v804_v54 = vadd.f32 %v439_v49, %v438_v48  ;;  %v454_v48 = vld [vmem:[%s6118_s11 + $0x6e0] sm:$0xff]  ;;  %v455_v49 = vld [vmem:[%s6118_s11 + $0x6e8] sm:$0xff] }
 0x123   : > { %775 = vadd.xlane.f32.xlu0 %v774_v57  ;;  %v6368_v2 = vpop.xlane.xlu1 %574  ;;  %v444_v57 = vld [vmem:[%s6118_s11 + $0x690] sm:$0xff] }
 0x124   : > { %13389 = vst [vmem:[#allocation22_spill] sm:$0xff] %v6368_v2  ;;  %v6372_v8 = vpop.xlane.xlu0 %571 }
 0x125   : > { %13390 = vst [vmem:[#allocation23_spill] sm:$0xff] %v6372_v8  ;;  %v486_v8 = vld [vmem:[%s6118_s11 + $0x7e0] sm:$0xff] }
 0x126   : > { %784 = vadd.xlane.f32.xlu1 %v783_v1  ;;  %v813_v1 = vadd.f32 %v445_v58, %v444_v57  ;;  %v828_v57 = vadd.f32 %v455_v49, %v454_v48  ;;  %v460_v58 = vld [vmem:[%s6118_s11 + $0x710] sm:$0xff] }
 0x127   : > { %781 = vadd.xlane.f32.xlu0 %v780_v4  ;;  %v6376_v13 = vpop.xlane.xlu1 %580  ;;  %v476_v49 = vld [vmem:[%s6118_s11 + $0x790] sm:$0xff] }
 0x128   : > { %13391 = vst [vmem:[#allocation24_spill] sm:$0xff] %v6376_v13  ;;  %v6380_v18 = vpop.xlane.xlu0 %577  ;;  %v489_v13 = vld [vmem:[%s6118_s11 + $0x7f8] sm:$0xff] }
 0x129   : > { %13392 = vst [vmem:[#allocation25_spill] sm:$0xff] %v6380_v18  ;;  %v488_v18 = vld [vmem:[%s6118_s11 + $0x7f0] sm:$0xff] }
 0x12a   : > { %790 = vadd.xlane.f32.xlu1 %v789_v12  ;;  %v446_v12 = vld [vmem:[%s6118_s11 + $0x6a0] sm:$0xff] }
 0x12b   : > { %787 = vadd.xlane.f32.xlu0 %v786_v14  ;;  %v6384_v25 = vpop.xlane.xlu1 %586  ;;  %v447_v14 = vld [vmem:[%s6118_s11 + $0x6a8] sm:$0xff] }
 0x12c   : > { %13393 = vst [vmem:[#allocation26_spill] sm:$0xff] %v6384_v25  ;;  %v6388_v32 = vpop.xlane.xlu0 %583  ;;  %v816_v20 = vadd.f32 %v447_v14, %v446_v12  ;;  %v462_v12 = vld [vmem:[%s6118_s11 + $0x720] sm:$0xff]  ;;  %v463_v14 = vld [vmem:[%s6118_s11 + $0x728] sm:$0xff] }
 0x12d   : > { %13394 = vst [vmem:[#allocation27_spill] sm:$0xff] %v6388_v32  ;;  %v843_v32 = vadd.f32 %v465_v9, %v464_v6  ;;  %v840_v25 = vadd.f32 %v463_v14, %v462_v12  ;;  %v487_v6 = vld [vmem:[%s6118_s11 + $0x7e8] sm:$0xff]  ;;  %v492_v9 = vld [vmem:[%s6118_s11 + $0x810] sm:$0xff]  ;;  %v493_v12 = vld [vmem:[%s6118_s11 + $0x818] sm:$0xff] }
 0x12e   : > { %796 = vadd.xlane.f32.xlu1 %v795_v22  ;;  %v453_v22 = vld [vmem:[%s6118_s11 + $0x6d8] sm:$0xff]  ;;  %v6554_v19 = vadd.f32 %v487_v6, %v486_v8  ;;  %v6556_v15 = vadd.f32 %v493_v12, %v492_v9  ;;  %v6637_v12 = vmul.f32 0.00390625, %v6288_v39 }
 0x12f   : > { %793 = vadd.xlane.f32.xlu0 %v792_v26  ;;  %v6392_v38 = vpop.xlane.xlu1 %592  ;;  %v825_v33 = vadd.f32 %v453_v22, %v452_v21  ;;  %v469_v21 = vld [vmem:[%s6118_s11 + $0x758] sm:$0xff]  ;;  %v466_v22 = vld [vmem:[%s6118_s11 + $0x740] sm:$0xff] }
 0x130   : > { %13395 = vst [vmem:[#allocation28_spill] sm:$0xff] %v6392_v38  ;;  %v6396_v46 = vpop.xlane.xlu0 %589  ;;  %13431 = vst [vmem:[#allocation64_spill] sm:$0xff] %v6637_v12 }
 0x131   : > { %13396 = vst [vmem:[#allocation29_spill] sm:$0xff] %v6396_v46  ;;  %v6488_v46 = vld [vmem:[%s6118_s11 + $0x8] sm:$0xff] }
 0x132   : > { %802 = vadd.xlane.f32.xlu1 %v801_v37  ;;  %v822_v37 = vadd.f32 %v451_v30, %v450_v28  ;;  %v467_v28 = vld [vmem:[%s6118_s11 + $0x748] sm:$0xff]  ;;  %v472_v30 = vld [vmem:[%s6118_s11 + $0x770] sm:$0xff]  ;;  %13412 = vst [vmem:[#allocation45_spill] sm:$0xff] %v6488_v46  ;;  %v895_v38 = vmul.f32 %v6488_v46, %v6488_v46 }
 0x133   : > { %799 = vadd.xlane.f32.xlu0 %v798_v41  ;;  %v6400_v53 = vpop.xlane.xlu1 %598  ;;  %v456_v41 = vld [vmem:[%s6118_s11 + $0x6f0] sm:$0xff]  ;;  %v846_v56 = vadd.f32 %v467_v28, %v466_v22 }
 0x134   : > { %13397 = vst [vmem:[#allocation30_spill] sm:$0xff] %v6400_v53  ;;  %v6404_v60 = vpop.xlane.xlu0 %595  ;;  %v496_v22 = vld [vmem:[%s6118_s11 + $0x830] sm:$0xff] }
 0x135   : > { %13398 = vst [vmem:[#allocation31_spill] sm:$0xff] %v6404_v60  ;;  %v6483_v60 = vld [vmem:[%s6118_s11] sm:$0xff]  ;;  %v6514_v28 = vld [vmem:[%s6118_s11 + $0x10] sm:$0xff] }
 0x136   : > { %808 = vadd.xlane.f32.xlu1 %v807_v52  ;;  %v831_v52 = vadd.f32 %v457_v42, %v456_v41  ;;  %v471_v41 = vld [vmem:[%s6118_s11 + $0x768] sm:$0xff]  ;;  %13411 = vst [vmem:[#allocation44_spill] sm:$0xff] %v6483_v60  ;;  %v894_v53 = vmul.f32 %v6483_v60, %v6483_v60  ;;  %13415 = vst [vmem:[#allocation48_spill] sm:$0xff] %v6514_v28  ;;  %v6706_v60 = vmul.f32 0.00390625, %v6300_v51 }
 0x137   : > { %805 = vadd.xlane.f32.xlu0 %v804_v54  ;;  %v6408_v4 = vpop.xlane.xlu1 %604 }
 0x138   : > { %13399 = vst [vmem:[#allocation32_spill] sm:$0xff] %v6408_v4  ;;  %v6412_v10 = vpop.xlane.xlu0 %601  ;;  %v483_v4 = vld [vmem:[%s6118_s11 + $0x7c8] sm:$0xff]  ;;  %13442 = vst [vmem:[#allocation75_spill] sm:$0xff] %v6706_v60 }
 0x139   : > { %13400 = vst [vmem:[#allocation33_spill] sm:$0xff] %v6412_v10  ;;  %v482_v10 = vld [vmem:[%s6118_s11 + $0x7c0] sm:$0xff] }
 0x13a   : > { %814 = vadd.xlane.f32.xlu1 %v813_v1  ;;  %v458_v1 = vld [vmem:[%s6118_s11 + $0x700] sm:$0xff] }
 0x13b   : > { %811 = vadd.xlane.f32.xlu0 %v810_v5  ;;  %v6416_v17 = vpop.xlane.xlu1 %610  ;;  %v459_v5 = vld [vmem:[%s6118_s11 + $0x708] sm:$0xff] }
 0x13c   : > { %13401 = vst [vmem:[#allocation34_spill] sm:$0xff] %v6416_v17  ;;  %v6420_v26 = vpop.xlane.xlu0 %607  ;;  %v834_v48 = vadd.f32 %v459_v5, %v458_v1  ;;  %v6472_v5 = vld [vmem:[%s6118_s11 + $0x28] sm:$0xff]  ;;  %v485_v17 = vld [vmem:[%s6118_s11 + $0x7d8] sm:$0xff] }
 0x13d   : > { %13402 = vst [vmem:[#allocation35_spill] sm:$0xff] %v6420_v26  ;;  %v479_v26 = vld [vmem:[%s6118_s11 + $0x7a8] sm:$0xff]  ;;  %13410 = vst [vmem:[#allocation43_spill] sm:$0xff] %v6472_v5 }
 0x13e   : > { %820 = vadd.xlane.f32.xlu1 %v819_v16  ;;  %v837_v16 = vadd.f32 %v461_v62, %v460_v58  ;;  %v474_v58 = vld [vmem:[%s6118_s11 + $0x780] sm:$0xff]  ;;  %v475_v62 = vld [vmem:[%s6118_s11 + $0x788] sm:$0xff] }
 0x13f   : > { %817 = vadd.xlane.f32.xlu0 %v816_v20  ;;  %v6424_v36 = vpop.xlane.xlu1 %616  ;;  %v468_v20 = vld [vmem:[%s6118_s11 + $0x750] sm:$0xff] }
 0x140   : > { %13403 = vst [vmem:[#allocation36_spill] sm:$0xff] %v6424_v36  ;;  %v6428_v44 = vpop.xlane.xlu0 %613  ;;  %v478_v36 = vld [vmem:[%s6118_s11 + $0x7a0] sm:$0xff]  ;;  %v849_v61 = vadd.f32 %v469_v21, %v468_v20  ;;  %v491_v21 = vld [vmem:[%s6118_s11 + $0x808] sm:$0xff] }
 0x141   : > { %13404 = vst [vmem:[#allocation37_spill] sm:$0xff] %v6428_v44  ;;  %v481_v44 = vld [vmem:[%s6118_s11 + $0x7b8] sm:$0xff]  ;;  %v490_v20 = vld [vmem:[%s6118_s11 + $0x800] sm:$0xff] }
 0x142   : > { %826 = vadd.xlane.f32.xlu1 %v825_v33  ;;  %v473_v33 = vld [vmem:[%s6118_s11 + $0x778] sm:$0xff]  ;;  %v6558_v23 = vadd.f32 %v491_v21, %v490_v20  ;;  %v6606_v20 = vmul.f32 0.00390625, %v6284_v35  ;;  %v6642_v21 = vmul.f32 0.00390625, %v6292_v43 }
 0x143   : > { %823 = vadd.xlane.f32.xlu0 %v822_v37  ;;  %v6432_v54 = vpop.xlane.xlu1 %622  ;;  %v470_v37 = vld [vmem:[%s6118_s11 + $0x760] sm:$0xff]  ;;  %v6497_v50 = vadd.f32 %v473_v33, %v472_v30  ;;  %v896_v30 = vmul.f32 %v6514_v28, %v6514_v28  ;;  %v6519_v33 = vld [vmem:[%s6118_s11 + $0x18] sm:$0xff] }
 0x144   : > { %13405 = vst [vmem:[#allocation38_spill] sm:$0xff] %v6432_v54  ;;  %v6436_v0 = vpop.xlane.xlu0 %619  ;;  %v480_v54 = vld [vmem:[%s6118_s11 + $0x7b0] sm:$0xff]  ;;  %v6499_v45 = vadd.f32 %v471_v41, %v470_v37  ;;  %13416 = vst [vmem:[#allocation49_spill] sm:$0xff] %v6519_v33  ;;  %v897_v37 = vmul.f32 %v6519_v33, %v6519_v33  ;;  %v6746_v33 = vmul.f32 0.00390625, %v6308_v59 }
 0x145   : > { %13406 = vst [vmem:[#allocation39_spill] sm:$0xff] %v6436_v0  ;;  %v6523_v41 = vadd.f32 %v481_v44, %v480_v54  ;;  %v6550_v54 = vmul.f32 0.00390625, %v6276_v27  ;;  %v6568_v27 = vadd.f32 %v895_v38, %v894_v53  ;;  %v6597_v53 = vld [vmem:[%s6118_s11 + $0x48] sm:$0xff]  ;;  %13426 = vst [vmem:[#allocation59_spill] sm:$0xff] %v6606_v20  ;;  %v6782_v59 = vld [vmem:[%s6118_s11 + $0xd0] sm:$0xff] }
 0x146   : > { %832 = vadd.xlane.f32.xlu1 %v831_v52  ;;  %v477_v52 = vld [vmem:[%s6118_s11 + $0x798] sm:$0xff]  ;;  %13425 = vst [vmem:[#allocation58_spill] sm:$0xff] %v6597_v53  ;;  %v903_v9 = vmul.f32 %v6597_v53, %v6597_v53  ;;  %13432 = vst [vmem:[#allocation65_spill] sm:$0xff] %v6642_v21  ;;  %v6739_v53 = vmul.f32 0.00390625, %v6304_v55 }
 0x147   : > { %829 = vadd.xlane.f32.xlu0 %v828_v57  ;;  %v6452_v42 = vpop.xlane.xlu1 %628  ;;  %v6465_v57 = vld [vmem:[%s6118_s11 + $0x20] sm:$0xff]  ;;  %13420 = vst [vmem:[#allocation53_spill] sm:$0xff] %v6550_v54  ;;  %13448 = vst [vmem:[#allocation81_spill] sm:$0xff] %v6746_v33 }
 0x148   : > { %13407 = vst [vmem:[#allocation40_spill] sm:$0xff] %v6452_v42  ;;  %v6458_v0 = vpop.xlane.xlu0 %625  ;;  %13409 = vst [vmem:[#allocation42_spill] sm:$0xff] %v6465_v57  ;;  %v6469_v1 = vmul.f32 %v6465_v57, %v6465_v57  ;;  %v6476_v42 = vmul.f32 %v6472_v5, %v6472_v5  ;;  %v6648_v5 = vld [vmem:[%s6118_s11 + $0x60] sm:$0xff]  ;;  %v6685_v57 = vld [vmem:[%s6118_s11 + $0x98] sm:$0xff] }
 0x149   : > { %13408 = vst [vmem:[#allocation41_spill] sm:$0xff] %v6458_v0  ;;  %v484_v0 = vld [vmem:[%s6118_s11 + $0x7d0] sm:$0xff]  ;;  %13433 = vst [vmem:[#allocation66_spill] sm:$0xff] %v6648_v5  ;;  %v913_v40 = vmul.f32 %v6685_v57, %v6685_v57 }
 0x14a   : > { %838 = vadd.xlane.f32.xlu1 %v837_v16  ;;  %v6506_v16 = vadd.f32 %v477_v52, %v476_v49  ;;  %v6525_v49 = vadd.f32 %v479_v26, %v478_v36  ;;  %v497_v52 = vld [vmem:[%s6118_s11 + $0x838] sm:$0xff]  ;;  %v6543_v44 = vadd.f32 %v485_v17, %v484_v0  ;;  %v6545_v26 = vadd.f32 %v483_v4, %v482_v10  ;;  %v6576_v10 = vld [vmem:[%s6118_s11 + $0x50] sm:$0xff] }
 0x14b   : > { %835 = vadd.xlane.f32.xlu0 %v834_v48  ;;  %v6495_v2 = vpop.xlane.xlu1 %634  ;;  %v6508_v48 = vadd.f32 %v475_v62, %v474_v58  ;;  %v494_v58 = vld [vmem:[%s6118_s11 + $0x820] sm:$0xff]  ;;  %v495_v62 = vld [vmem:[%s6118_s11 + $0x828] sm:$0xff]  ;;  %v6547_v36 = vadd.f32 %v489_v13, %v488_v18  ;;  %v6562_v4 = vadd.f32 %v497_v52, %v496_v22  ;;  %v6566_v18 = vadd.f32 %v897_v37, %v896_v30  ;;  %v6581_v0 = vld [vmem:[%s6118_s11 + $0x58] sm:$0xff] }
 0x14c   : > { %13413 = vst [vmem:[#allocation46_spill] sm:$0xff] %v6495_v2  ;;  %v6504_v14 = vpop.xlane.xlu0 %631  ;;  %v6564_v13 = vadd.f32 %v495_v62, %v494_v58  ;;  %13422 = vst [vmem:[#allocation55_spill] sm:$0xff] %v6576_v10  ;;  %v904_v17 = vmul.f32 %v6576_v10, %v6576_v10  ;;  %v905_v6 = vmul.f32 %v6581_v0, %v6581_v0  ;;  %v6619_v30 = vld [vmem:[%s6118_s11 + $0x70] sm:$0xff]  ;;  %v6624_v37 = vld [vmem:[%s6118_s11 + $0x78] sm:$0xff] }
 0x14d   : > { %13414 = vst [vmem:[#allocation47_spill] sm:$0xff] %v6504_v14  ;;  %v6531_v14 = vld [vmem:[%s6118_s11 + $0x30] sm:$0xff]  ;;  %13423 = vst [vmem:[#allocation56_spill] sm:$0xff] %v6581_v0  ;;  %v908_v35 = vmul.f32 %v6619_v30, %v6619_v30  ;;  %v6630_v52 = vmul.f32 %v6550_v54, %v6550_v54  ;;  %v906_v58 = vmul.f32 %v6648_v5, %v6648_v5  ;;  %v6653_v62 = vld [vmem:[%s6118_s11 + $0x68] sm:$0xff] }
 0x14e   : > { %13417 = vst [vmem:[#allocation50_spill] sm:$0xff] %v6531_v14  ;;  %v900_v2 = vmul.f32 %v6531_v14, %v6531_v14  ;;  %844 = vadd.xlane.f32.xlu1 %v843_v32  ;;  %13428 = vst [vmem:[#allocation61_spill] sm:$0xff] %v6619_v30  ;;  %v6639_v38 = vadd.f32 %v905_v6, %v904_v17  ;;  %v907_v39 = vmul.f32 %v6653_v62, %v6653_v62  ;;  %v6699_v14 = vld [vmem:[%s6118_s11 + $0x88] sm:$0xff]  ;;  %v6721_v54 = vld [vmem:[%s6118_s11 + $0xb0] sm:$0xff] }
 0x14f   : > { %841 = vadd.xlane.f32.xlu0 %v840_v25  ;;  %v6552_v24 = vpop.xlane.xlu1 %640  ;;  %v6571_v25 = vmul.f32 0.00390625, %v6280_v31  ;;  %v6589_v31 = vadd.f32 %v6476_v42, %v6469_v1  ;;  %v6612_v1 = vmul.f32 %v6541_v29, %v6541_v29  ;;  %13429 = vst [vmem:[#allocation62_spill] sm:$0xff] %v6624_v37  ;;  %13430 = vst [vmem:[#allocation63_spill] sm:$0xff] %v6630_v52  ;;  %v6756_v0 = vld [vmem:[%s6118_s11 + $0xa8] sm:$0xff] }
 0x150   : > { %v6560_v32 = vpop.xlane.xlu0 %637  ;;  %v6573_v8 = vadd.f32 %v901_v34, %v900_v2  ;;  %v6592_v34 = vld [vmem:[%s6118_s11 + $0x40] sm:$0xff]  ;;  %13434 = vst [vmem:[#allocation67_spill] sm:$0xff] %v6653_v62  ;;  %v6666_v6 = vmul.f32 %v6606_v20, %v6606_v20  ;;  %13439 = vst [vmem:[#allocation72_spill] sm:$0xff] %v6685_v57  ;;  %v911_v46 = vmul.f32 %v6699_v14, %v6699_v14  ;;  %v6787_v62 = vld [vmem:[%s6118_s11 + $0xd8] sm:$0xff] }
 0x151   : > { %13421 = vst [vmem:[#allocation54_spill] sm:$0xff] %v6571_v25  ;;  %13424 = vst [vmem:[#allocation57_spill] sm:$0xff] %v6592_v34  ;;  %v902_v2 = vmul.f32 %v6592_v34, %v6592_v34  ;;  %v916_v51 = vmul.f32 %v6721_v54, %v6721_v54  ;;  %v915_v55 = vmul.f32 %v6756_v0, %v6756_v0 }
 0x152   : > { %850 = vadd.xlane.f32.xlu1 %v849_v61  ;;  %13427 = vst [vmem:[#allocation60_spill] sm:$0xff] %v6612_v1  ;;  %13435 = vst [vmem:[#allocation68_spill] sm:$0xff] %v6666_v6  ;;  %v13506_v6 = vld [vmem:[#allocation19_spill] sm:$0xff] }
 0x153   : > { %847 = vadd.xlane.f32.xlu0 %v846_v56  ;;  %v6608_v42 = vpop.xlane.xlu1 %646  ;;  %v909_v56 = vmul.f32 %v6624_v37, %v6624_v37  ;;  %v6645_v61 = vadd.f32 %v903_v9, %v902_v2  ;;  %v6670_v2 = vmul.f32 %v6571_v25, %v6571_v25  ;;  %v6673_v9 = vmul.f32 0.00390625, %v6296_v47  ;;  %13441 = vst [vmem:[#allocation74_spill] sm:$0xff] %v6699_v14 }
 0x154   : > { %v6616_v22 = vpop.xlane.xlu0 %643  ;;  %v6709_v25 = vadd.f32 %v907_v39, %v906_v58  ;;  %v6713_v47 = vmul.f32 %v6637_v12, %v6637_v12  ;;  %13444 = vst [vmem:[#allocation77_spill] sm:$0xff] %v6721_v54  ;;  %v6732_v39 = vmul.f32 %v6642_v21, %v6642_v21  ;;  %13447 = vst [vmem:[#allocation80_spill] sm:$0xff] %v6739_v53  ;;  %v6751_v21 = vld [vmem:[%s6118_s11 + $0xa0] sm:$0xff]  ;;  %v6840_v14 = vmul.f32 0.00390625, %v6320_v7 }
 0x155   : > { %13436 = vst [vmem:[#allocation69_spill] sm:$0xff] %v6670_v2  ;;  %13437 = vst [vmem:[#allocation70_spill] sm:$0xff] %v6673_v9  ;;  %v6677_v29 = vadd.f32 %v909_v56, %v908_v35  ;;  %v6694_v35 = vld [vmem:[%s6118_s11 + $0x80] sm:$0xff] }
 0x156   : > { %856 = vadd.xlane.f32.xlu1 %v6497_v50  ;;  %v6680_v50 = vld [vmem:[%s6118_s11 + $0x90] sm:$0xff]  ;;  %13440 = vst [vmem:[#allocation73_spill] sm:$0xff] %v6694_v35  ;;  %v910_v56 = vmul.f32 %v6694_v35, %v6694_v35  ;;  %13443 = vst [vmem:[#allocation76_spill] sm:$0xff] %v6713_v47  ;;  %v6855_v54 = vld [vmem:[%s6118_s11 + $0xe0] sm:$0xff] }
 0x157   : > { %853 = vadd.xlane.f32.xlu0 %v6499_v45  ;;  %v6662_v17 = vpop.xlane.xlu1 %652  ;;  %13438 = vst [vmem:[#allocation71_spill] sm:$0xff] %v6680_v50  ;;  %v912_v45 = vmul.f32 %v6680_v50, %v6680_v50  ;;  %13446 = vst [vmem:[#allocation79_spill] sm:$0xff] %v6732_v39  ;;  %v922_v7 = vmul.f32 %v6855_v54, %v6855_v54  ;;  %v6925_v39 = vld [vmem:[%s6118_s11 + $0x130] sm:$0xff]  ;;  %v13483_v47 = vld [vmem:[#allocation15_spill] sm:$0xff] }
 0x158   : > { %v6675_v43 = vpop.xlane.xlu0 %649  ;;  %v6748_v20 = vadd.f32 %v911_v46, %v910_v56  ;;  %13449 = vst [vmem:[#allocation82_spill] sm:$0xff] %v6751_v21  ;;  %13450 = vst [vmem:[#allocation83_spill] sm:$0xff] %v6756_v0  ;;  %v6767_v46 = vmul.f32 %v6673_v9, %v6673_v9  ;;  %v6774_v56 = vmul.f32 0.00390625, %v6312_v63  ;;  %v6803_v9 = vld [vmem:[%s6118_s11 + $0xc8] sm:$0xff]  ;;  %v6810_v63 = vmul.f32 0.00390625, %v6316_v3  ;;  %v6827_v3 = vld [vmem:[%s6118_s11 + $0xf8] sm:$0xff] }
 0x159   : > { %v6743_v12 = vadd.f32 %v913_v40, %v912_v45  ;;  %v6771_v45 = vmul.f32 %v6706_v60, %v6706_v60  ;;  %13454 = vst [vmem:[#allocation87_spill] sm:$0xff] %v6782_v59  ;;  %13455 = vst [vmem:[#allocation88_spill] sm:$0xff] %v6787_v62  ;;  %v921_v60 = vmul.f32 %v6787_v62, %v6787_v62  ;;  %v6888_v0 = vld [vmem:[%s6118_s11 + $0x118] sm:$0xff]  ;;  %v6949_v1 = vmul.f32 0.00390625, %v13483_v47 }
 0x15a   : > { %862 = vadd.xlane.f32.xlu1 %v6506_v16  ;;  %v6726_v16 = vld [vmem:[%s6118_s11 + $0xb8] sm:$0xff]  ;;  %13451 = vst [vmem:[#allocation84_spill] sm:$0xff] %v6767_v46  ;;  %13453 = vst [vmem:[#allocation86_spill] sm:$0xff] %v6774_v56  ;;  %v919_v30 = vmul.f32 %v6803_v9, %v6803_v9  ;;  %v6920_v62 = vmul.f32 %v6840_v14, %v6840_v14  ;;  %v6962_v46 = vld [vmem:[%s6118_s11 + $0x128] sm:$0xff] }
 0x15b   : > { %859 = vadd.xlane.f32.xlu0 %v6508_v48  ;;  %v6718_v10 = vpop.xlane.xlu1 %658  ;;  %13445 = vst [vmem:[#allocation78_spill] sm:$0xff] %v6726_v16  ;;  %v917_v58 = vmul.f32 %v6726_v16, %v6726_v16  ;;  %v914_v48 = vmul.f32 %v6751_v21, %v6751_v21  ;;  %13452 = vst [vmem:[#allocation85_spill] sm:$0xff] %v6771_v45  ;;  %v6822_v45 = vld [vmem:[%s6118_s11 + $0xf0] sm:$0xff]  ;;  %v929_v21 = vmul.f32 %v6888_v0, %v6888_v0 }
 0x15c   : > { %v6741_v34 = vpop.xlane.xlu0 %655  ;;  %13457 = vst [vmem:[#allocation90_spill] sm:$0xff] %v6803_v9  ;;  %13458 = vst [vmem:[#allocation91_spill] sm:$0xff] %v6810_v63  ;;  %v924_v28 = vmul.f32 %v6822_v45, %v6822_v45  ;;  %v13481_v9 = vld [vmem:[#allocation14_spill] sm:$0xff] }
 0x15d   : > { %v6779_v5 = vadd.f32 %v917_v58, %v916_v51  ;;  %v6798_v58 = vld [vmem:[%s6118_s11 + $0xc0] sm:$0xff]  ;;  %v6812_v50 = vadd.f32 %v915_v55, %v914_v48  ;;  %13460 = vst [vmem:[#allocation93_spill] sm:$0xff] %v6822_v45  ;;  %13461 = vst [vmem:[#allocation94_spill] sm:$0xff] %v6827_v3  ;;  %v925_v48 = vmul.f32 %v6827_v3, %v6827_v3 }
 0x15e   : > { %868 = vadd.xlane.f32.xlu1 %v6523_v41  ;;  %v920_v41 = vmul.f32 %v6782_v59, %v6782_v59  ;;  %13456 = vst [vmem:[#allocation89_spill] sm:$0xff] %v6798_v58  ;;  %v918_v37 = vmul.f32 %v6798_v58, %v6798_v58  ;;  %v6833_v55 = vmul.f32 %v6746_v33, %v6746_v33  ;;  %13463 = vst [vmem:[#allocation96_spill] sm:$0xff] %v6840_v14  ;;  %v13475_v59 = vld [vmem:[#allocation13_spill] sm:$0xff]  ;;  %v6957_v45 = vld [vmem:[%s6118_s11 + $0x120] sm:$0xff] }
 0x15f   : > { %865 = vadd.xlane.f32.xlu0 %v6525_v49  ;;  %v6777_v40 = vpop.xlane.xlu1 %664  ;;  %v6816_v49 = vmul.f32 %v6739_v53, %v6739_v53  ;;  %13465 = vst [vmem:[#allocation98_spill] sm:$0xff] %v6855_v54  ;;  %13472 = vst [vmem:[#allocation103_spill] sm:$0xff] %v6888_v0  ;;  %v6943_v14 = vmul.f32 0.00390625, %v13481_v9  ;;  %v930_v9 = vmul.f32 %v6957_v45, %v6957_v45 }
 0x160   : > { %v6795_v51 = vpop.xlane.xlu0 %661  ;;  %13462 = vst [vmem:[#allocation95_spill] sm:$0xff] %v6833_v55  ;;  %v6845_v53 = vadd.f32 %v921_v60, %v920_v41  ;;  %v6852_v57 = vadd.f32 %v919_v30, %v918_v37  ;;  %v6870_v30 = vmul.f32 %v6774_v56, %v6774_v56  ;;  %v6874_v37 = vmul.f32 %v6810_v63, %v6810_v63  ;;  %v13469_v41 = vld [vmem:[#allocation12_spill] sm:$0xff] }
 0x161   : > { %13459 = vst [vmem:[#allocation92_spill] sm:$0xff] %v6816_v49  ;;  %v6848_v49 = vmul.f32 0.00390625, %v6324_v11  ;;  %v6877_v16 = vmul.f32 0.00390625, %v13469_v41  ;;  %v6880_v55 = vadd.f32 %v925_v48, %v924_v28  ;;  %v6883_v11 = vld [vmem:[%s6118_s11 + $0x110] sm:$0xff]  ;;  %v6900_v48 = vld [vmem:[%s6118_s11 + $0x100] sm:$0xff]  ;;  %v6905_v56 = vld [vmem:[%s6118_s11 + $0x108] sm:$0xff]  ;;  %v932_v63 = vmul.f32 %v6925_v39, %v6925_v39 }
 0x162   : > { %874 = vadd.xlane.f32.xlu1 %v6543_v44  ;;  %v6860_v44 = vld [vmem:[%s6118_s11 + $0xe8] sm:$0xff]  ;;  %13467 = vst [vmem:[#allocation100_spill] sm:$0xff] %v6870_v30  ;;  %13468 = vst [vmem:[#allocation101_spill] sm:$0xff] %v6874_v37  ;;  %v928_v60 = vmul.f32 %v6883_v11, %v6883_v11  ;;  %v926_v41 = vmul.f32 %v6900_v48, %v6900_v48  ;;  %v927_v37 = vmul.f32 %v6905_v56, %v6905_v56 }
 0x163   : > { %871 = vadd.xlane.f32.xlu0 %v6545_v26  ;;  %v6843_v35 = vpop.xlane.xlu1 %670  ;;  %13464 = vst [vmem:[#allocation97_spill] sm:$0xff] %v6848_v49  ;;  %13466 = vst [vmem:[#allocation99_spill] sm:$0xff] %v6860_v44  ;;  %v923_v26 = vmul.f32 %v6860_v44, %v6860_v44  ;;  %v6912_v30 = vmul.f32 0.00390625, %v13475_v59  ;;  %v6930_v59 = vld [vmem:[%s6118_s11 + $0x138] sm:$0xff]  ;;  %v7022_v0 = vmul.f32 %v6943_v14, %v6943_v14 }
 0x164   : > { %v6850_v33 = vpop.xlane.xlu0 %667  ;;  %13470 = vst [vmem:[#allocation12_spill] sm:$0xff] %v6877_v16  ;;  %13471 = vst [vmem:[#allocation102_spill] sm:$0xff] %v6883_v11  ;;  %v6954_v58 = vadd.f32 %v927_v37, %v926_v41  ;;  %v13490_v41 = vld [vmem:[#allocation16_spill] sm:$0xff]  ;;  %v6991_v44 = vld [vmem:[%s6118_s11 + $0x158] sm:$0xff] }
 0x165   : > { %13473 = vst [vmem:[#allocation104_spill] sm:$0xff] %v6900_v48  ;;  %13474 = vst [vmem:[#allocation105_spill] sm:$0xff] %v6905_v56  ;;  %v6978_v37 = vmul.f32 %v6912_v30, %v6912_v30  ;;  %v6981_v3 = vmul.f32 0.00390625, %v13490_v41  ;;  %v937_v54 = vmul.f32 %v6991_v44, %v6991_v44  ;;  %v13504_v48 = vld [vmem:[#allocation18_spill] sm:$0xff]  ;;  %v7063_v56 = vld [vmem:[%s6118_s11 + $0x168] sm:$0xff] }
 0x166   : > { %880 = vadd.xlane.f32.xlu1 %v6547_v36  ;;  %13476 = vst [vmem:[#allocation13_spill] sm:$0xff] %v6912_v30  ;;  %13477 = vst [vmem:[#allocation106_spill] sm:$0xff] %v6920_v62  ;;  %v6946_v62 = vadd.f32 %v929_v21, %v928_v60  ;;  %v6974_v60 = vmul.f32 %v6877_v16, %v6877_v16  ;;  %v6986_v21 = vld [vmem:[%s6118_s11 + $0x150] sm:$0xff]  ;;  %v7006_v16 = vld [vmem:[%s6118_s11 + $0x148] sm:$0xff] }
 0x167   : > { %877 = vadd.xlane.f32.xlu0 %v6554_v19  ;;  %v6897_v28 = vpop.xlane.xlu1 %676  ;;  %v6916_v19 = vadd.f32 %v923_v26, %v922_v7  ;;  %13478 = vst [vmem:[#allocation107_spill] sm:$0xff] %v6925_v39  ;;  %13479 = vst [vmem:[#allocation108_spill] sm:$0xff] %v6930_v59  ;;  %v933_v7 = vmul.f32 %v6930_v59, %v6930_v59  ;;  %v6936_v26 = vmul.f32 %v6848_v49, %v6848_v49  ;;  %v13496_v30 = vld [vmem:[#allocation17_spill] sm:$0xff] }
 0x168   : > { %v6914_v36 = vpop.xlane.xlu0 %673  ;;  %13482 = vst [vmem:[#allocation14_spill] sm:$0xff] %v6943_v14  ;;  %13484 = vst [vmem:[#allocation15_spill] sm:$0xff] %v6949_v1  ;;  %v7013_v11 = vmul.f32 0.00390625, %v13496_v30  ;;  %v7034_v30 = vld [vmem:[%s6118_s11 + $0x178] sm:$0xff]  ;;  %v7047_v14 = vmul.f32 0.00390625, %v13504_v48  ;;  %v7109_v39 = vld [vmem:[%s6118_s11 + $0x188] sm:$0xff] }
 0x169   : > { %13480 = vst [vmem:[#allocation109_spill] sm:$0xff] %v6936_v26  ;;  %13485 = vst [vmem:[#allocation110_spill] sm:$0xff] %v6957_v45  ;;  %v6983_v26 = vadd.f32 %v933_v7, %v932_v63  ;;  %v7001_v63 = vld [vmem:[%s6118_s11 + $0x140] sm:$0xff] }
 0x16a   : > { %886 = vadd.xlane.f32.xlu1 %v6556_v15  ;;  %13486 = vst [vmem:[#allocation111_spill] sm:$0xff] %v6962_v46  ;;  %v931_v15 = vmul.f32 %v6962_v46, %v6962_v46  ;;  %13488 = vst [vmem:[#allocation113_spill] sm:$0xff] %v6974_v60  ;;  %v934_v7 = vmul.f32 %v7001_v63, %v7001_v63  ;;  %v7029_v60 = vld [vmem:[%s6118_s11 + $0x170] sm:$0xff]  ;;  %v7095_v46 = vld [vmem:[%s6118_s11 + $0x198] sm:$0xff] }
 0x16b   : > { %883 = vadd.xlane.f32.xlu0 %v6558_v23  ;;  %v6952_v49 = vpop.xlane.xlu1 %682  ;;  %13489 = vst [vmem:[#allocation114_spill] sm:$0xff] %v6978_v37  ;;  %13491 = vst [vmem:[#allocation16_spill] sm:$0xff] %v6981_v3  ;;  %v936_v23 = vmul.f32 %v6986_v21, %v6986_v21  ;;  %v935_v37 = vmul.f32 %v7006_v16, %v7006_v16 }
 0x16c   : > { %v6970_v47 = vpop.xlane.xlu0 %679  ;;  %13492 = vst [vmem:[#allocation115_spill] sm:$0xff] %v6986_v21  ;;  %13493 = vst [vmem:[#allocation116_spill] sm:$0xff] %v6991_v44  ;;  %v7166_v44 = vld [vmem:[%s6118_s11 + $0x1a8] sm:$0xff] }
 0x16d   : > { %13487 = vst [vmem:[#allocation112_spill] sm:$0xff] %v6970_v47  ;;  %13494 = vst [vmem:[#allocation117_spill] sm:$0xff] %v7001_v63 }
 0x16e   : > { %892 = vadd.xlane.f32.xlu1 %v6562_v4  ;;  %13495 = vst [vmem:[#allocation118_spill] sm:$0xff] %v7006_v16  ;;  %13497 = vst [vmem:[#allocation17_spill] sm:$0xff] %v7013_v11  ;;  %v7018_v4 = vadd.f32 %v931_v15, %v930_v9  ;;  %v941_v9 = vmul.f32 %v7034_v30, %v7034_v30  ;;  %v7040_v15 = vmul.f32 %v6949_v1, %v6949_v1  ;;  %v7058_v1 = vld [vmem:[%s6118_s11 + $0x160] sm:$0xff]  ;;  %v13527_v16 = vld [vmem:[#allocation22_spill] sm:$0xff] }
 0x16f   : > { %889 = vadd.xlane.f32.xlu0 %v6564_v13  ;;  %v7016_v41 = vpop.xlane.xlu1 %688  ;;  %13499 = vst [vmem:[#allocation120_spill] sm:$0xff] %v7022_v0  ;;  %13501 = vst [vmem:[#allocation122_spill] sm:$0xff] %v7029_v60  ;;  %v940_v13 = vmul.f32 %v7029_v60, %v7029_v60  ;;  %v7049_v0 = vadd.f32 %v937_v54, %v936_v23  ;;  %v938_v2 = vmul.f32 %v7058_v1, %v7058_v1  ;;  %v7213_v60 = vld [vmem:[%s6118_s11 + $0x1c8] sm:$0xff] }
 0x170   : > { %13498 = vst [vmem:[#allocation119_spill] sm:$0xff] %v7016_v41  ;;  %v7026_v52 = vpop.xlane.xlu0 %685  ;;  %13502 = vst [vmem:[#allocation123_spill] sm:$0xff] %v7034_v30  ;;  %v7055_v41 = vadd.f32 %v935_v37, %v934_v7  ;;  %v939_v54 = vmul.f32 %v7063_v56, %v7063_v56  ;;  %v7076_v23 = vmul.f32 %v6981_v3, %v6981_v3  ;;  %v13513_v7 = vld [vmem:[#allocation20_spill] sm:$0xff]  ;;  %v7149_v63 = vmul.f32 0.00390625, %v13527_v16 }
 0x171   : > { %13500 = vst [vmem:[#allocation121_spill] sm:$0xff] %v7026_v52  ;;  %13503 = vst [vmem:[#allocation124_spill] sm:$0xff] %v7040_v15  ;;  %v7052_v52 = vmul.f32 0.00390625, %v13506_v6  ;;  %v7080_v37 = vmul.f32 %v7013_v11, %v7013_v11  ;;  %v7083_v59 = vmul.f32 0.00390625, %v13513_v7  ;;  %v7087_v45 = vadd.f32 %v941_v9, %v940_v13  ;;  %v7104_v13 = vld [vmem:[%s6118_s11 + $0x180] sm:$0xff]  ;;  %v13520_v15 = vld [vmem:[#allocation21_spill] sm:$0xff] }
 0x172   : > { %13505 = vst [vmem:[#allocation18_spill] sm:$0xff] %v7047_v14  ;;  %1162 = vadd.xlane.f32.xlu1 %v6566_v18  ;;  %13508 = vst [vmem:[#allocation125_spill] sm:$0xff] %v7058_v1  ;;  %v7090_v18 = vld [vmem:[%s6118_s11 + $0x190] sm:$0xff]  ;;  %v945_v3 = vmul.f32 %v7095_v46, %v7095_v46  ;;  %v942_v9 = vmul.f32 %v7104_v13, %v7104_v13  ;;  %v7119_v11 = vadd.f32 %v939_v54, %v938_v2  ;;  %v7136_v2 = vld [vmem:[%s6118_s11 + $0x1b8] sm:$0xff] }
 0x173   : > { %13507 = vst [vmem:[#allocation19_spill] sm:$0xff] %v7052_v52  ;;  %13509 = vst [vmem:[#allocation126_spill] sm:$0xff] %v7063_v56  ;;  %1159 = vadd.xlane.f32.xlu0 %v6568_v27  ;;  %v7072_v48 = vpop.xlane.xlu1 %694  ;;  %v944_v27 = vmul.f32 %v7090_v18, %v7090_v18  ;;  %v7123_v7 = vmul.f32 %v7047_v14, %v7047_v14  ;;  %v7142_v54 = vmul.f32 %v7052_v52, %v7052_v52  ;;  %v7161_v52 = vld [vmem:[%s6118_s11 + $0x1a0] sm:$0xff]  ;;  %v7197_v56 = vld [vmem:[%s6118_s11 + $0x1d8] sm:$0xff] }
 0x174   : > { %13510 = vst [vmem:[#allocation127_spill] sm:$0xff] %v7072_v48  ;;  %13511 = vst [vmem:[#allocation128_spill] sm:$0xff] %v7076_v23  ;;  %v7085_v6 = vpop.xlane.xlu0 %691  ;;  %v7131_v23 = vld [vmem:[%s6118_s11 + $0x1b0] sm:$0xff]  ;;  %v947_v16 = vmul.f32 %v7166_v44, %v7166_v44 }
 0x175   : > { %13512 = vst [vmem:[#allocation129_spill] sm:$0xff] %v7080_v37  ;;  %13514 = vst [vmem:[#allocation20_spill] sm:$0xff] %v7083_v59  ;;  %v943_v37 = vmul.f32 %v7109_v39, %v7109_v39 }
 0x176   : > { %13515 = vst [vmem:[#allocation130_spill] sm:$0xff] %v7085_v6  ;;  %13516 = vst [vmem:[#allocation131_spill] sm:$0xff] %v7090_v18  ;;  %v7116_v6 = vmul.f32 0.00390625, %v13520_v15  ;;  %1168 = vadd.xlane.f32.xlu1 %v6573_v8  ;;  %v948_v8 = vmul.f32 %v7131_v23, %v7131_v23  ;;  %v949_v15 = vmul.f32 %v7136_v2, %v7136_v2 }
 0x177   : > { %13517 = vst [vmem:[#allocation132_spill] sm:$0xff] %v7095_v46  ;;  %13518 = vst [vmem:[#allocation133_spill] sm:$0xff] %v7104_v13  ;;  %1165 = vadd.xlane.f32.xlu0 %v6589_v31  ;;  %v7128_v21 = vpop.xlane.xlu1 %700  ;;  %v7158_v47 = vadd.f32 %v943_v37, %v942_v9  ;;  %v946_v31 = vmul.f32 %v7161_v52, %v7161_v52  ;;  %v7177_v37 = vmul.f32 %v7083_v59, %v7083_v59  ;;  %v13536_v9 = vld [vmem:[#allocation24_spill] sm:$0xff] }
 0x178   : > { %13519 = vst [vmem:[#allocation134_spill] sm:$0xff] %v7109_v39  ;;  %13521 = vst [vmem:[#allocation21_spill] sm:$0xff] %v7116_v6  ;;  %v7151_v14 = vpop.xlane.xlu0 %697  ;;  %v7184_v30 = vmul.f32 0.00390625, %v13536_v9  ;;  %v7189_v1 = vadd.f32 %v949_v15, %v948_v8  ;;  %v7208_v15 = vld [vmem:[%s6118_s11 + $0x1c0] sm:$0xff]  ;;  %v13550_v39 = vld [vmem:[#allocation26_spill] sm:$0xff] }
 0x179   : > { %13522 = vst [vmem:[#allocation135_spill] sm:$0xff] %v7123_v7  ;;  %13523 = vst [vmem:[#allocation136_spill] sm:$0xff] %v7128_v21  ;;  %v7153_v7 = vadd.f32 %v945_v3, %v944_v27  ;;  %v13530_v21 = vld [vmem:[#allocation23_spill] sm:$0xff]  ;;  %v7181_v27 = vmul.f32 %v7116_v6, %v7116_v6  ;;  %v953_v6 = vmul.f32 %v7197_v56, %v7197_v56  ;;  %v7250_v13 = vmul.f32 0.00390625, %v13550_v39 }
 0x17a   : > { %13524 = vst [vmem:[#allocation137_spill] sm:$0xff] %v7131_v23  ;;  %13525 = vst [vmem:[#allocation138_spill] sm:$0xff] %v7136_v2  ;;  %v7156_v48 = vmul.f32 0.00390625, %v13530_v21  ;;  %1174 = vadd.xlane.f32.xlu1 %v6639_v38  ;;  %v7192_v21 = vld [vmem:[%s6118_s11 + $0x1d0] sm:$0xff]  ;;  %v950_v59 = vmul.f32 %v7208_v15, %v7208_v15  ;;  %v7222_v18 = vadd.f32 %v947_v16, %v946_v31  ;;  %v7265_v23 = vld [vmem:[%s6118_s11 + $0x1e0] sm:$0xff] }
 0x17b   : > { %13526 = vst [vmem:[#allocation139_spill] sm:$0xff] %v7142_v54  ;;  %13528 = vst [vmem:[#allocation22_spill] sm:$0xff] %v7149_v63  ;;  %1171 = vadd.xlane.f32.xlu0 %v6645_v61  ;;  %v7187_v3 = vpop.xlane.xlu1 %706  ;;  %v952_v38 = vmul.f32 %v7192_v21, %v7192_v21  ;;  %v13544_v54 = vld [vmem:[#allocation25_spill] sm:$0xff]  ;;  %v7226_v61 = vmul.f32 %v7149_v63, %v7149_v63  ;;  %v954_v39 = vmul.f32 %v7265_v23, %v7265_v23 }
 0x17c   : > { %13529 = vst [vmem:[#allocation140_spill] sm:$0xff] %v7151_v14  ;;  %13531 = vst [vmem:[#allocation23_spill] sm:$0xff] %v7156_v48  ;;  %v7205_v8 = vpop.xlane.xlu0 %703  ;;  %v7220_v9 = vmul.f32 0.00390625, %v13544_v54  ;;  %v7237_v54 = vld [vmem:[%s6118_s11 + $0x1f8] sm:$0xff]  ;;  %v7243_v16 = vmul.f32 %v7156_v48, %v7156_v48 }
 0x17d   : > { %13532 = vst [vmem:[#allocation141_spill] sm:$0xff] %v7161_v52  ;;  %13533 = vst [vmem:[#allocation142_spill] sm:$0xff] %v7166_v44  ;;  %v957_v31 = vmul.f32 %v7237_v54, %v7237_v54  ;;  %v7298_v44 = vld [vmem:[%s6118_s11 + $0x218] sm:$0xff] }
 0x17e   : > { %13534 = vst [vmem:[#allocation143_spill] sm:$0xff] %v7177_v37  ;;  %13535 = vst [vmem:[#allocation144_spill] sm:$0xff] %v7181_v27  ;;  %v951_v27 = vmul.f32 %v7213_v60, %v7213_v60  ;;  %1180 = vadd.xlane.f32.xlu1 %v6677_v29  ;;  %v7270_v29 = vld [vmem:[%s6118_s11 + $0x1e8] sm:$0xff]  ;;  %v961_v52 = vmul.f32 %v7298_v44, %v7298_v44 }
 0x17f   : > { %13537 = vst [vmem:[#allocation24_spill] sm:$0xff] %v7184_v30  ;;  %13538 = vst [vmem:[#allocation145_spill] sm:$0xff] %v7187_v3  ;;  %1177 = vadd.xlane.f32.xlu0 %v6709_v25  ;;  %v7253_v63 = vpop.xlane.xlu1 %712  ;;  %v13553_v3 = vld [vmem:[#allocation27_spill] sm:$0xff]  ;;  %v955_v25 = vmul.f32 %v7270_v29, %v7270_v29 }
 0x180   : > { %13539 = vst [vmem:[#allocation146_spill] sm:$0xff] %v7192_v21  ;;  %13540 = vst [vmem:[#allocation147_spill] sm:$0xff] %v7197_v56  ;;  %v7258_v14 = vmul.f32 0.00390625, %v13553_v3  ;;  %v7260_v48 = vpop.xlane.xlu0 %709  ;;  %v7262_v46 = vadd.f32 %v951_v27, %v950_v59  ;;  %v7280_v59 = vmul.f32 %v7184_v30, %v7184_v30  ;;  %v7284_v27 = vmul.f32 %v7220_v9, %v7220_v9  ;;  %v7315_v30 = vld [vmem:[%s6118_s11 + $0x208] sm:$0xff] }
 0x181   : > { %13541 = vst [vmem:[#allocation148_spill] sm:$0xff] %v7205_v8  ;;  %13542 = vst [vmem:[#allocation149_spill] sm:$0xff] %v7208_v15  ;;  %v7232_v8 = vld [vmem:[%s6118_s11 + $0x1f0] sm:$0xff]  ;;  %v7330_v56 = vmul.f32 %v7250_v13, %v7250_v13 }
 0x182   : > { %13543 = vst [vmem:[#allocation150_spill] sm:$0xff] %v7213_v60  ;;  %13545 = vst [vmem:[#allocation25_spill] sm:$0xff] %v7220_v9  ;;  %v956_v37 = vmul.f32 %v7232_v8, %v7232_v8  ;;  %1186 = vadd.xlane.f32.xlu1 %v6743_v12  ;;  %v13567_v21 = vld [vmem:[#allocation29_spill] sm:$0xff]  ;;  %v13574_v60 = vld [vmem:[#allocation30_spill] sm:$0xff] }
 0x183   : > { %13546 = vst [vmem:[#allocation151_spill] sm:$0xff] %v7226_v61  ;;  %13547 = vst [vmem:[#allocation152_spill] sm:$0xff] %v7232_v8  ;;  %v7255_v61 = vadd.f32 %v953_v6, %v952_v38  ;;  %v13560_v38 = vld [vmem:[#allocation28_spill] sm:$0xff]  ;;  %v7293_v6 = vld [vmem:[%s6118_s11 + $0x210] sm:$0xff]  ;;  %1183 = vadd.xlane.f32.xlu0 %v6748_v20  ;;  %v7326_v20 = vadd.f32 %v955_v25, %v954_v39  ;;  %v7346_v25 = vmul.f32 %v7258_v14, %v7258_v14 }
 0x184   : > { %13548 = vst [vmem:[#allocation153_spill] sm:$0xff] %v7237_v54  ;;  %13549 = vst [vmem:[#allocation154_spill] sm:$0xff] %v7243_v16  ;;  %v7287_v2 = vmul.f32 0.00390625, %v13560_v38  ;;  %v7290_v16 = vadd.f32 %v957_v31, %v956_v37  ;;  %v960_v3 = vmul.f32 %v7293_v6, %v7293_v6  ;;  %v7307_v37 = vpop.xlane.xlu1 %718  ;;  %v7310_v31 = vld [vmem:[%s6118_s11 + $0x200] sm:$0xff]  ;;  %v7324_v12 = vpop.xlane.xlu0 %715 }
 0x185   : > { %13551 = vst [vmem:[#allocation26_spill] sm:$0xff] %v7250_v13  ;;  %13552 = vst [vmem:[#allocation155_spill] sm:$0xff] %v7253_v63  ;;  %v958_v38 = vmul.f32 %v7310_v31, %v7310_v31  ;;  %v7353_v13 = vmul.f32 0.00390625, %v13574_v60  ;;  %v7367_v8 = vld [vmem:[%s6118_s11 + $0x220] sm:$0xff] }
 0x186   : > { %13554 = vst [vmem:[#allocation27_spill] sm:$0xff] %v7258_v14  ;;  %13555 = vst [vmem:[#allocation156_spill] sm:$0xff] %v7260_v48  ;;  %v7335_v48 = vld [vmem:[%s6118_s11 + $0x230] sm:$0xff]  ;;  %1192 = vadd.xlane.f32.xlu1 %v6779_v5  ;;  %v962_v60 = vmul.f32 %v7367_v8, %v7367_v8 }
 0x187   : > { %13556 = vst [vmem:[#allocation157_spill] sm:$0xff] %v7265_v23  ;;  %13557 = vst [vmem:[#allocation158_spill] sm:$0xff] %v7270_v29  ;;  %v964_v9 = vmul.f32 %v7335_v48, %v7335_v48  ;;  %1189 = vadd.xlane.f32.xlu0 %v6812_v50  ;;  %v7401_v29 = vld [vmem:[%s6118_s11 + $0x258] sm:$0xff] }
 0x188   : > { %13558 = vst [vmem:[#allocation159_spill] sm:$0xff] %v7280_v59  ;;  %13559 = vst [vmem:[#allocation160_spill] sm:$0xff] %v7284_v27  ;;  %v959_v27 = vmul.f32 %v7315_v30, %v7315_v30  ;;  %v7322_v59 = vmul.f32 0.00390625, %v13567_v21  ;;  %v7340_v21 = vld [vmem:[%s6118_s11 + $0x238] sm:$0xff]  ;;  %v7362_v14 = vpop.xlane.xlu1 %724  ;;  %v969_v23 = vmul.f32 %v7401_v29, %v7401_v29 }
 0x189   : > { %13561 = vst [vmem:[#allocation28_spill] sm:$0xff] %v7287_v2  ;;  %13562 = vst [vmem:[#allocation161_spill] sm:$0xff] %v7293_v6  ;;  %v965_v39 = vmul.f32 %v7340_v21, %v7340_v21 }
 0x18a   : > { %13563 = vst [vmem:[#allocation162_spill] sm:$0xff] %v7298_v44  ;;  %13564 = vst [vmem:[#allocation163_spill] sm:$0xff] %v7307_v37  ;;  %v7364_v15 = vadd.f32 %v959_v27, %v958_v38  ;;  %v7372_v37 = vld [vmem:[%s6118_s11 + $0x228] sm:$0xff]  ;;  %v7384_v27 = vmul.f32 %v7287_v2, %v7287_v2  ;;  %1198 = vadd.xlane.f32.xlu1 %v6845_v53  ;;  %v7432_v44 = vmul.f32 %v7353_v13, %v7353_v13 }
 0x18b   : > { %13565 = vst [vmem:[#allocation164_spill] sm:$0xff] %v7310_v31  ;;  %13566 = vst [vmem:[#allocation165_spill] sm:$0xff] %v7315_v30  ;;  %v963_v5 = vmul.f32 %v7372_v37, %v7372_v37  ;;  %v13584_v38 = vld [vmem:[#allocation32_spill] sm:$0xff]  ;;  %1195 = vadd.xlane.f32.xlu0 %v6852_v57  ;;  %v13599_v31 = vld [vmem:[#allocation34_spill] sm:$0xff] }
 0x18c   : > { %13568 = vst [vmem:[#allocation29_spill] sm:$0xff] %v7322_v59  ;;  %13569 = vst [vmem:[#allocation166_spill] sm:$0xff] %v7324_v12  ;;  %v13576_v12 = vld [vmem:[#allocation31_spill] sm:$0xff]  ;;  %v7391_v54 = vmul.f32 0.00390625, %v13584_v38  ;;  %v7416_v2 = vld [vmem:[%s6118_s11 + $0x248] sm:$0xff]  ;;  %v7426_v38 = vpop.xlane.xlu1 %730 }
 0x18d   : > { %13570 = vst [vmem:[#allocation167_spill] sm:$0xff] %v7330_v56  ;;  %13571 = vst [vmem:[#allocation168_spill] sm:$0xff] %v7335_v48  ;;  %v7356_v56 = vadd.f32 %v961_v52, %v960_v3  ;;  %v7359_v63 = vmul.f32 0.00390625, %v13576_v12  ;;  %v7380_v3 = vpop.xlane.xlu0 %721  ;;  %v7388_v12 = vmul.f32 %v7322_v59, %v7322_v59  ;;  %v7396_v52 = vld [vmem:[%s6118_s11 + $0x250] sm:$0xff]  ;;  %v7428_v53 = vadd.f32 %v963_v5, %v962_v60  ;;  %v7473_v30 = vld [vmem:[%s6118_s11 + $0x268] sm:$0xff] }
 0x18e   : > { %13572 = vst [vmem:[#allocation169_spill] sm:$0xff] %v7340_v21  ;;  %13573 = vst [vmem:[#allocation170_spill] sm:$0xff] %v7346_v25  ;;  %v7393_v25 = vadd.f32 %v965_v39, %v964_v9  ;;  %v968_v50 = vmul.f32 %v7396_v52, %v7396_v52  ;;  %v7411_v9 = vld [vmem:[%s6118_s11 + $0x240] sm:$0xff]  ;;  %v13590_v59 = vld [vmem:[#allocation33_spill] sm:$0xff]  ;;  %1204 = vadd.xlane.f32.xlu1 %v6880_v55 }
 0x18f   : > { %13575 = vst [vmem:[#allocation30_spill] sm:$0xff] %v7353_v13  ;;  %13577 = vst [vmem:[#allocation31_spill] sm:$0xff] %v7359_v63  ;;  %v966_v39 = vmul.f32 %v7411_v9, %v7411_v9  ;;  %v7423_v6 = vmul.f32 0.00390625, %v13590_v59  ;;  %v7444_v59 = vld [vmem:[%s6118_s11 + $0x278] sm:$0xff]  ;;  %v7450_v5 = vmul.f32 %v7359_v63, %v7359_v63  ;;  %v7457_v13 = vmul.f32 0.00390625, %v13599_v31  ;;  %v7468_v63 = vld [vmem:[%s6118_s11 + $0x260] sm:$0xff]  ;;  %1201 = vadd.xlane.f32.xlu0 %v6916_v19 }
 0x190   : > { %13578 = vst [vmem:[#allocation171_spill] sm:$0xff] %v7362_v14  ;;  %13579 = vst [vmem:[#allocation172_spill] sm:$0xff] %v7367_v8  ;;  %v973_v60 = vmul.f32 %v7444_v59, %v7444_v59  ;;  %v7482_v31 = vpop.xlane.xlu1 %736  ;;  %v7500_v55 = vld [vmem:[%s6118_s11 + $0x290] sm:$0xff]  ;;  %v7519_v48 = vld [vmem:[%s6118_s11 + $0x288] sm:$0xff] }
 0x191   : > { %13580 = vst [vmem:[#allocation173_spill] sm:$0xff] %v7372_v37  ;;  %13581 = vst [vmem:[#allocation174_spill] sm:$0xff] %v7380_v3  ;;  %v7436_v14 = vpop.xlane.xlu0 %727  ;;  %v970_v3 = vmul.f32 %v7468_v63, %v7468_v63  ;;  %v976_v19 = vmul.f32 %v7500_v55, %v7500_v55  ;;  %v7505_v37 = vld [vmem:[%s6118_s11 + $0x298] sm:$0xff] }
 0x192   : > { %13582 = vst [vmem:[#allocation175_spill] sm:$0xff] %v7384_v27  ;;  %13583 = vst [vmem:[#allocation176_spill] sm:$0xff] %v7388_v12  ;;  %v967_v12 = vmul.f32 %v7416_v2, %v7416_v2  ;;  %v7439_v27 = vld [vmem:[%s6118_s11 + $0x270] sm:$0xff]  ;;  %1210 = vadd.xlane.f32.xlu1 %v6946_v62 }
 0x193   : > { %13585 = vst [vmem:[#allocation32_spill] sm:$0xff] %v7391_v54  ;;  %13586 = vst [vmem:[#allocation177_spill] sm:$0xff] %v7396_v52  ;;  %v972_v57 = vmul.f32 %v7439_v27, %v7439_v27  ;;  %1207 = vadd.xlane.f32.xlu0 %v6954_v58 }
 0x194   : > { %13587 = vst [vmem:[#allocation178_spill] sm:$0xff] %v7401_v29  ;;  %13588 = vst [vmem:[#allocation179_spill] sm:$0xff] %v7411_v9  ;;  %v7538_v52 = vpop.xlane.xlu1 %742  ;;  %v7576_v29 = vld [vmem:[%s6118_s11 + $0x2a8] sm:$0xff] }
 0x195   : > { %13589 = vst [vmem:[#allocation180_spill] sm:$0xff] %v7416_v2  ;;  %13591 = vst [vmem:[#allocation33_spill] sm:$0xff] %v7423_v6  ;;  %v7497_v8 = vadd.f32 %v973_v60, %v972_v57  ;;  %v7514_v57 = vld [vmem:[%s6118_s11 + $0x280] sm:$0xff]  ;;  %v13623_v2 = vld [vmem:[#allocation38_spill] sm:$0xff] }
 0x196   : > { %13592 = vst [vmem:[#allocation181_spill] sm:$0xff] %v7426_v38  ;;  %13593 = vst [vmem:[#allocation182_spill] sm:$0xff] %v7428_v53  ;;  %v7465_v53 = vadd.f32 %v967_v12, %v966_v39  ;;  %v7490_v12 = vmul.f32 %v7423_v6, %v7423_v6  ;;  %v13608_v39 = vld [vmem:[#allocation36_spill] sm:$0xff]  ;;  %v974_v60 = vmul.f32 %v7514_v57, %v7514_v57  ;;  %v7559_v9 = vmul.f32 0.00390625, %v13623_v2 }
 0x197   : > { %13594 = vst [vmem:[#allocation183_spill] sm:$0xff] %v7432_v44  ;;  %13595 = vst [vmem:[#allocation184_spill] sm:$0xff] %v7436_v14  ;;  %v7459_v44 = vadd.f32 %v969_v23, %v968_v50  ;;  %v13601_v14 = vld [vmem:[#allocation35_spill] sm:$0xff]  ;;  %v971_v23 = vmul.f32 %v7473_v30, %v7473_v30  ;;  %v7486_v50 = vmul.f32 %v7391_v54, %v7391_v54  ;;  %v7493_v21 = vmul.f32 0.00390625, %v13608_v39 }
 0x198   : > { %13596 = vst [vmem:[#allocation185_spill] sm:$0xff] %v7439_v27  ;;  %13597 = vst [vmem:[#allocation186_spill] sm:$0xff] %v7444_v59  ;;  %v7462_v38 = vmul.f32 0.00390625, %v13601_v14  ;;  %v7495_v14 = vpop.xlane.xlu0 %733  ;;  %v977_v54 = vmul.f32 %v7505_v37, %v7505_v37  ;;  %v7533_v39 = vmul.f32 %v7457_v13, %v7457_v13  ;;  %v979_v2 = vmul.f32 %v7576_v29, %v7576_v29  ;;  %v7623_v27 = vld [vmem:[%s6118_s11 + $0x2c8] sm:$0xff] }
 0x199   : > { %13598 = vst [vmem:[#allocation187_spill] sm:$0xff] %v7450_v5  ;;  %13600 = vst [vmem:[#allocation34_spill] sm:$0xff] %v7457_v13  ;;  %v13615_v5 = vld [vmem:[#allocation37_spill] sm:$0xff]  ;;  %v7529_v6 = vadd.f32 %v971_v23, %v970_v3  ;;  %v7546_v3 = vld [vmem:[%s6118_s11 + $0x2b8] sm:$0xff]  ;;  %1216 = vadd.xlane.f32.xlu1 %v6983_v26  ;;  %1213 = vadd.xlane.f32.xlu0 %v7018_v4  ;;  %v7636_v4 = vmul.f32 %v7559_v9, %v7559_v9 }
 0x19a   : > { %13602 = vst [vmem:[#allocation35_spill] sm:$0xff] %v7462_v38  ;;  %13603 = vst [vmem:[#allocation188_spill] sm:$0xff] %v7468_v63  ;;  %v7552_v23 = vmul.f32 %v7462_v38, %v7462_v38  ;;  %v7571_v38 = vld [vmem:[%s6118_s11 + $0x2a0] sm:$0xff] }
 0x19b   : > { %13604 = vst [vmem:[#allocation189_spill] sm:$0xff] %v7473_v30  ;;  %13605 = vst [vmem:[#allocation190_spill] sm:$0xff] %v7482_v31  ;;  %v978_v58 = vmul.f32 %v7571_v38, %v7571_v38  ;;  %v7607_v30 = vld [vmem:[%s6118_s11 + $0x2d8] sm:$0xff] }
 0x19c   : > { %13606 = vst [vmem:[#allocation191_spill] sm:$0xff] %v7486_v50  ;;  %13607 = vst [vmem:[#allocation192_spill] sm:$0xff] %v7490_v12  ;;  %v975_v12 = vmul.f32 %v7519_v48, %v7519_v48  ;;  %v7541_v50 = vld [vmem:[%s6118_s11 + $0x2b0] sm:$0xff]  ;;  %v7561_v13 = vpop.xlane.xlu0 %739 }
 0x19d   : > { %13609 = vst [vmem:[#allocation36_spill] sm:$0xff] %v7493_v21  ;;  %13610 = vst [vmem:[#allocation193_spill] sm:$0xff] %v7495_v14  ;;  %v7526_v14 = vmul.f32 0.00390625, %v13615_v5  ;;  %v980_v62 = vmul.f32 %v7541_v50, %v7541_v50  ;;  %v981_v5 = vmul.f32 %v7546_v3, %v7546_v3  ;;  %1222 = vadd.xlane.f32.xlu1 %v7049_v0  ;;  %1219 = vadd.xlane.f32.xlu0 %v7055_v41  ;;  %v7680_v0 = vld [vmem:[%s6118_s11 + $0x2e8] sm:$0xff] }
 0x19e   : > { %13611 = vst [vmem:[#allocation194_spill] sm:$0xff] %v7500_v55  ;;  %13612 = vst [vmem:[#allocation195_spill] sm:$0xff] %v7505_v37  ;;  %v7632_v55 = vadd.f32 %v979_v2, %v978_v58  ;;  %v987_v41 = vmul.f32 %v7680_v0, %v7680_v0 }
 0x19f   : > { %13613 = vst [vmem:[#allocation196_spill] sm:$0xff] %v7514_v57  ;;  %13614 = vst [vmem:[#allocation197_spill] sm:$0xff] %v7519_v48  ;;  %v7599_v63 = vadd.f32 %v981_v5, %v980_v62  ;;  %v7618_v5 = vld [vmem:[%s6118_s11 + $0x2c0] sm:$0xff]  ;;  %v13646_v48 = vld [vmem:[#allocation46_spill] sm:$0xff] }
 0x1a0   : > { %13616 = vst [vmem:[#allocation37_spill] sm:$0xff] %v7526_v14  ;;  %13617 = vst [vmem:[#allocation198_spill] sm:$0xff] %v7529_v6  ;;  %v7568_v6 = vadd.f32 %v975_v12, %v974_v60  ;;  %v7587_v12 = vmul.f32 %v7493_v21, %v7493_v21  ;;  %v13632_v60 = vld [vmem:[#allocation40_spill] sm:$0xff]  ;;  %v7615_v62 = vpop.xlane.xlu0 %745  ;;  %v982_v21 = vmul.f32 %v7618_v5, %v7618_v5  ;;  %v7660_v57 = vmul.f32 0.00390625, %v13646_v48 }
 0x1a1   : > { %13618 = vst [vmem:[#allocation199_spill] sm:$0xff] %v7533_v39  ;;  %13619 = vst [vmem:[#allocation200_spill] sm:$0xff] %v7538_v52  ;;  %v7563_v39 = vadd.f32 %v977_v54, %v976_v19  ;;  %v13626_v52 = vld [vmem:[#allocation39_spill] sm:$0xff]  ;;  %v7591_v19 = vmul.f32 %v7526_v14, %v7526_v14  ;;  %v7594_v59 = vmul.f32 0.00390625, %v13632_v60  ;;  %v7597_v54 = vpop.xlane.xlu1 %748  ;;  %v985_v14 = vmul.f32 %v7607_v30, %v7607_v30 }
 0x1a2   : > { %13620 = vst [vmem:[#allocation201_spill] sm:$0xff] %v7541_v50  ;;  %13621 = vst [vmem:[#allocation202_spill] sm:$0xff] %v7546_v3  ;;  %v7566_v31 = vmul.f32 0.00390625, %v13626_v52  ;;  %v7602_v52 = vld [vmem:[%s6118_s11 + $0x2d0] sm:$0xff]  ;;  %v7675_v50 = vld [vmem:[%s6118_s11 + $0x2e0] sm:$0xff]  ;;  %1228 = vadd.xlane.f32.xlu1 %v7087_v45  ;;  %1225 = vadd.xlane.f32.xlu0 %v7119_v11 }
 0x1a3   : > { %13622 = vst [vmem:[#allocation203_spill] sm:$0xff] %v7552_v23  ;;  %13624 = vst [vmem:[#allocation38_spill] sm:$0xff] %v7559_v9  ;;  %v984_v26 = vmul.f32 %v7602_v52, %v7602_v52  ;;  %v13640_v23 = vld [vmem:[#allocation41_spill] sm:$0xff]  ;;  %v986_v48 = vmul.f32 %v7675_v50, %v7675_v50 }
 0x1a4   : > { %13625 = vst [vmem:[#allocation204_spill] sm:$0xff] %v7561_v13  ;;  %13627 = vst [vmem:[#allocation39_spill] sm:$0xff] %v7566_v31  ;;  %v7630_v60 = vmul.f32 0.00390625, %v13640_v23  ;;  %v7647_v23 = vld [vmem:[%s6118_s11 + $0x2f8] sm:$0xff]  ;;  %v7653_v2 = vmul.f32 %v7566_v31, %v7566_v31  ;;  %v7670_v31 = vpop.xlane.xlu0 %751 }
 0x1a5   : > { %13628 = vst [vmem:[#allocation205_spill] sm:$0xff] %v7571_v38  ;;  %13629 = vst [vmem:[#allocation206_spill] sm:$0xff] %v7576_v29  ;;  %v989_v58 = vmul.f32 %v7647_v23, %v7647_v23  ;;  %v7663_v9 = vpop.xlane.xlu1 %754  ;;  %v7708_v29 = vld [vmem:[%s6118_s11 + $0x318] sm:$0xff]  ;;  %v7736_v11 = vadd.f32 %v987_v41, %v986_v48 }
 0x1a6   : > { %13630 = vst [vmem:[#allocation207_spill] sm:$0xff] %v7587_v12  ;;  %13631 = vst [vmem:[#allocation208_spill] sm:$0xff] %v7591_v19  ;;  %v983_v19 = vmul.f32 %v7623_v27, %v7623_v27  ;;  %v993_v38 = vmul.f32 %v7708_v29, %v7708_v29  ;;  %1234 = vadd.xlane.f32.xlu1 %v7153_v7  ;;  %1231 = vadd.xlane.f32.xlu0 %v7158_v47 }
 0x1a7   : > { %13633 = vst [vmem:[#allocation40_spill] sm:$0xff] %v7594_v59  ;;  %13634 = vst [vmem:[#allocation209_spill] sm:$0xff] %v7597_v54  ;;  %v13648_v54 = vld [vmem:[#allocation47_spill] sm:$0xff] }
 0x1a8   : > { %13635 = vst [vmem:[#allocation210_spill] sm:$0xff] %v7602_v52  ;;  %13636 = vst [vmem:[#allocation211_spill] sm:$0xff] %v7607_v30  ;;  %v7668_v13 = vmul.f32 0.00390625, %v13648_v54  ;;  %v7672_v37 = vadd.f32 %v983_v19, %v982_v21  ;;  %v7690_v21 = vmul.f32 %v7594_v59, %v7594_v59  ;;  %v7694_v19 = vmul.f32 %v7630_v60, %v7630_v60  ;;  %v7725_v59 = vld [vmem:[%s6118_s11 + $0x308] sm:$0xff]  ;;  %v7734_v30 = vpop.xlane.xlu0 %757 }
 0x1a9   : > { %13637 = vst [vmem:[#allocation212_spill] sm:$0xff] %v7615_v62  ;;  %13638 = vst [vmem:[#allocation213_spill] sm:$0xff] %v7618_v5  ;;  %v7642_v62 = vld [vmem:[%s6118_s11 + $0x2f0] sm:$0xff]  ;;  %v7717_v45 = vpop.xlane.xlu1 %760  ;;  %v7740_v52 = vmul.f32 %v7660_v57, %v7660_v57  ;;  %v7753_v5 = vld [vmem:[%s6118_s11 + $0x338] sm:$0xff] }
 0x1aa   : > { %13639 = vst [vmem:[#allocation214_spill] sm:$0xff] %v7623_v27  ;;  %13641 = vst [vmem:[#allocation41_spill] sm:$0xff] %v7630_v60  ;;  %v988_v12 = vmul.f32 %v7642_v62, %v7642_v62  ;;  %v7748_v60 = vld [vmem:[%s6118_s11 + $0x330] sm:$0xff]  ;;  %v997_v48 = vmul.f32 %v7753_v5, %v7753_v5  ;;  %v7766_v27 = vmul.f32 %v7668_v13, %v7668_v13  ;;  %1240 = vadd.xlane.f32.xlu1 %v7189_v1 }
 0x1ab   : > { %13642 = vst [vmem:[#allocation215_spill] sm:$0xff] %v7636_v4  ;;  %13643 = vst [vmem:[#allocation216_spill] sm:$0xff] %v7642_v62  ;;  %v7665_v4 = vadd.f32 %v985_v14, %v984_v26  ;;  %v7697_v26 = vmul.f32 0.00390625, %v6552_v24  ;;  %v7703_v14 = vld [vmem:[%s6118_s11 + $0x310] sm:$0xff]  ;;  %v7732_v24 = vmul.f32 0.00390625, %v6560_v32  ;;  %v996_v32 = vmul.f32 %v7748_v60, %v7748_v60  ;;  %v7827_v62 = vld [vmem:[%s6118_s11 + $0x348] sm:$0xff]  ;;  %1237 = vadd.xlane.f32.xlu0 %v7222_v18 }
 0x1ac   : > { %13644 = vst [vmem:[#allocation217_spill] sm:$0xff] %v7647_v23  ;;  %13645 = vst [vmem:[#allocation218_spill] sm:$0xff] %v7653_v2  ;;  %v7700_v3 = vadd.f32 %v989_v58, %v988_v12  ;;  %v992_v54 = vmul.f32 %v7703_v14, %v7703_v14  ;;  %v7720_v12 = vld [vmem:[%s6118_s11 + $0x300] sm:$0xff]  ;;  %v7745_v2 = vmul.f32 0.00390625, %v6608_v42 }
 0x1ad   : > { %13647 = vst [vmem:[#allocation46_spill] sm:$0xff] %v7660_v57  ;;  %13649 = vst [vmem:[#allocation47_spill] sm:$0xff] %v7668_v13  ;;  %v990_v58 = vmul.f32 %v7720_v12, %v7720_v12  ;;  %v7769_v57 = vmul.f32 0.00390625, %v6616_v22  ;;  %v7798_v23 = vmul.f32 %v7732_v24, %v7732_v24  ;;  %v7802_v13 = vadd.f32 %v997_v48, %v996_v32  ;;  %v7805_v22 = vld [vmem:[%s6118_s11 + $0x350] sm:$0xff]  ;;  %v7822_v32 = vld [vmem:[%s6118_s11 + $0x340] sm:$0xff] }
 0x1ae   : > { %13650 = vst [vmem:[#allocation219_spill] sm:$0xff] %v7675_v50  ;;  %13651 = vst [vmem:[#allocation220_spill] sm:$0xff] %v7680_v0  ;;  %v7762_v42 = vadd.f32 %v993_v38, %v992_v54  ;;  %v7782_v38 = vld [vmem:[%s6118_s11 + $0x328] sm:$0xff]  ;;  %v1000_v47 = vmul.f32 %v7805_v22, %v7805_v22  ;;  %v7810_v0 = vld [vmem:[%s6118_s11 + $0x358] sm:$0xff]  ;;  %v998_v48 = vmul.f32 %v7822_v32, %v7822_v32  ;;  %1246 = vadd.xlane.f32.xlu1 %v7255_v61 }
 0x1af   : > { %13652 = vst [vmem:[#allocation221_spill] sm:$0xff] %v7690_v21  ;;  %13653 = vst [vmem:[#allocation222_spill] sm:$0xff] %v7694_v19  ;;  %v991_v19 = vmul.f32 %v7725_v59, %v7725_v59  ;;  %v7777_v21 = vld [vmem:[%s6118_s11 + $0x320] sm:$0xff]  ;;  %v995_v54 = vmul.f32 %v7782_v38, %v7782_v38  ;;  %v1001_v50 = vmul.f32 %v7810_v0, %v7810_v0  ;;  %1243 = vadd.xlane.f32.xlu0 %v7262_v46 }
 0x1b0   : > { %13654 = vst [vmem:[#allocation223_spill] sm:$0xff] %v7697_v26  ;;  %13655 = vst [vmem:[#allocation224_spill] sm:$0xff] %v7703_v14  ;;  %v994_v7 = vmul.f32 %v7777_v21, %v7777_v21  ;;  %v999_v14 = vmul.f32 %v7827_v62, %v7827_v62 }
 0x1b1   : > { %13656 = vst [vmem:[#allocation225_spill] sm:$0xff] %v7708_v29  ;;  %13657 = vst [vmem:[#allocation226_spill] sm:$0xff] %v7720_v12  ;;  %v7774_v41 = vadd.f32 %v991_v19, %v990_v58  ;;  %v7790_v19 = vpop.xlane.xlu0 %763  ;;  %v7794_v58 = vmul.f32 %v7697_v26, %v7697_v26  ;;  %v7815_v26 = vmul.f32 0.00390625, %v6662_v17  ;;  %v7849_v17 = vld [vmem:[%s6118_s11 + $0x370] sm:$0xff]  ;;  %v7854_v12 = vld [vmem:[%s6118_s11 + $0x378] sm:$0xff] }
 0x1b2   : > { %13658 = vst [vmem:[#allocation227_spill] sm:$0xff] %v7725_v59  ;;  %13659 = vst [vmem:[#allocation228_spill] sm:$0xff] %v7732_v24  ;;  %v7818_v24 = vmul.f32 0.00390625, %v6675_v43  ;;  %v1004_v43 = vmul.f32 %v7849_v17, %v7849_v17  ;;  %v1005_v18 = vmul.f32 %v7854_v12, %v7854_v12  ;;  %v7868_v59 = vld [vmem:[%s6118_s11 + $0x360] sm:$0xff]  ;;  %1252 = vadd.xlane.f32.xlu1 %v7290_v16 }
 0x1b3   : > { %13660 = vst [vmem:[#allocation229_spill] sm:$0xff] %v7740_v52  ;;  %13661 = vst [vmem:[#allocation230_spill] sm:$0xff] %v7745_v2  ;;  %v7772_v52 = vpop.xlane.xlu1 %766  ;;  %v1002_v29 = vmul.f32 %v7868_v59, %v7868_v59  ;;  %1249 = vadd.xlane.f32.xlu0 %v7326_v20 }
 0x1b4   : > { %13662 = vst [vmem:[#allocation231_spill] sm:$0xff] %v7748_v60  ;;  %13663 = vst [vmem:[#allocation232_spill] sm:$0xff] %v7753_v5  ;;  %v7895_v60 = vld [vmem:[%s6118_s11 + $0x390] sm:$0xff]  ;;  %v7909_v46 = vadd.f32 %v1005_v18, %v1004_v43  ;;  %v7929_v43 = vmul.f32 %v7815_v26, %v7815_v26  ;;  %v7932_v18 = vmul.f32 0.00390625, %v6795_v51 }
 0x1b5   : > { %13664 = vst [vmem:[#allocation233_spill] sm:$0xff] %v7766_v27  ;;  %13665 = vst [vmem:[#allocation234_spill] sm:$0xff] %v7769_v57  ;;  %v7865_v27 = vadd.f32 %v1001_v50, %v1000_v47  ;;  %v7884_v47 = vadd.f32 %v999_v14, %v998_v48  ;;  %v1008_v50 = vmul.f32 %v7895_v60, %v7895_v60  ;;  %v7905_v14 = vmul.f32 0.00390625, %v6777_v40  ;;  %v7912_v48 = vld [vmem:[%s6118_s11 + $0x380] sm:$0xff]  ;;  %v7983_v51 = vld [vmem:[%s6118_s11 + $0x3d0] sm:$0xff] }
 0x1b6   : > { %13666 = vst [vmem:[#allocation235_spill] sm:$0xff] %v7777_v21  ;;  %13667 = vst [vmem:[#allocation236_spill] sm:$0xff] %v7782_v38  ;;  %v7917_v38 = vld [vmem:[%s6118_s11 + $0x388] sm:$0xff]  ;;  %1258 = vadd.xlane.f32.xlu1 %v7356_v56 }
 0x1b7   : > { %13668 = vst [vmem:[#allocation237_spill] sm:$0xff] %v7790_v19  ;;  %13669 = vst [vmem:[#allocation238_spill] sm:$0xff] %v7794_v58  ;;  %v7836_v1 = vpop.xlane.xlu1 %772  ;;  %v7842_v58 = vmul.f32 %v7745_v2, %v7745_v2  ;;  %v7846_v19 = vpop.xlane.xlu0 %769  ;;  %v7873_v2 = vld [vmem:[%s6118_s11 + $0x368] sm:$0xff]  ;;  %v1007_v21 = vmul.f32 %v7917_v38, %v7917_v38  ;;  %1255 = vadd.xlane.f32.xlu0 %v7364_v15 }
 0x1b8   : > { %13670 = vst [vmem:[#allocation239_spill] sm:$0xff] %v7798_v23  ;;  %13671 = vst [vmem:[#allocation240_spill] sm:$0xff] %v7805_v22  ;;  %v7838_v23 = vadd.f32 %v995_v54, %v994_v7  ;;  %v7860_v7 = vmul.f32 %v7769_v57, %v7769_v57  ;;  %v7863_v54 = vmul.f32 0.00390625, %v6718_v10  ;;  %v7900_v10 = vld [vmem:[%s6118_s11 + $0x398] sm:$0xff] }
 0x1b9   : > { %13672 = vst [vmem:[#allocation241_spill] sm:$0xff] %v7810_v0  ;;  %13673 = vst [vmem:[#allocation242_spill] sm:$0xff] %v7815_v26  ;;  %v1009_v61 = vmul.f32 %v7900_v10, %v7900_v10  ;;  %v7959_v0 = vmul.f32 %v7818_v24, %v7818_v24 }
 0x1ba   : > { %13674 = vst [vmem:[#allocation243_spill] sm:$0xff] %v7818_v24  ;;  %13675 = vst [vmem:[#allocation244_spill] sm:$0xff] %v7822_v32  ;;  %1264 = vadd.xlane.f32.xlu1 %v7393_v25  ;;  %v8097_v25 = vld [vmem:[%s6118_s11 + $0x418] sm:$0xff] }
 0x1bb   : > { %13676 = vst [vmem:[#allocation245_spill] sm:$0xff] %v7827_v62  ;;  %13677 = vst [vmem:[#allocation246_spill] sm:$0xff] %v7836_v1  ;;  %v7892_v57 = vpop.xlane.xlu1 %778  ;;  %v7939_v1 = vld [vmem:[%s6118_s11 + $0x3b0] sm:$0xff]  ;;  %v7955_v5 = vadd.f32 %v1009_v61, %v1008_v50  ;;  %v7970_v62 = vld [vmem:[%s6118_s11 + $0x3a0] sm:$0xff]  ;;  %v7975_v50 = vmul.f32 0.00390625, %v6850_v33 }
 0x1bc   : > { %13678 = vst [vmem:[#allocation247_spill] sm:$0xff] %v7842_v58  ;;  %13679 = vst [vmem:[#allocation248_spill] sm:$0xff] %v7846_v19  ;;  %v1003_v58 = vmul.f32 %v7873_v2, %v7873_v2  ;;  %v7889_v19 = vmul.f32 0.00390625, %v6741_v34  ;;  %v7907_v34 = vpop.xlane.xlu0 %775  ;;  %v1012_v40 = vmul.f32 %v7939_v1, %v7939_v1  ;;  %v1010_v20 = vmul.f32 %v7970_v62, %v7970_v62  ;;  %v7978_v61 = vld [vmem:[%s6118_s11 + $0x3a8] sm:$0xff] }
 0x1bd   : > { %13680 = vst [vmem:[#allocation249_spill] sm:$0xff] %v7849_v17  ;;  %13681 = vst [vmem:[#allocation250_spill] sm:$0xff] %v7854_v12  ;;  %v1011_v22 = vmul.f32 %v7978_v61, %v7978_v61  ;;  %v8015_v17 = vld [vmem:[%s6118_s11 + $0x3c8] sm:$0xff] }
 0x1be   : > { %13682 = vst [vmem:[#allocation251_spill] sm:$0xff] %v7860_v7  ;;  %13683 = vst [vmem:[#allocation252_spill] sm:$0xff] %v7863_v54  ;;  %v1006_v7 = vmul.f32 %v7912_v48, %v7912_v48  ;;  %v1015_v56 = vmul.f32 %v8015_v17, %v8015_v17  ;;  %1270 = vadd.xlane.f32.xlu1 %v7459_v44 }
 0x1bf   : > { %13684 = vst [vmem:[#allocation253_spill] sm:$0xff] %v7868_v59  ;;  %13685 = vst [vmem:[#allocation254_spill] sm:$0xff] %v7873_v2  ;;  %v7953_v16 = vpop.xlane.xlu1 %784  ;;  %v8010_v59 = vld [vmem:[%s6118_s11 + $0x3c0] sm:$0xff]  ;;  %v13725_v2 = vld [vmem:[#allocation182_spill] sm:$0xff] }
 0x1c0   : > { %13686 = vst [vmem:[#allocation255_spill] sm:$0xff] %v7889_v19  ;;  %13687 = vst [vmem:[#allocation256_spill] sm:$0xff] %v7892_v57  ;;  %v7925_v57 = vadd.f32 %v1003_v58, %v1002_v29  ;;  %v7944_v29 = vld [vmem:[%s6118_s11 + $0x3b8] sm:$0xff]  ;;  %v7965_v32 = vpop.xlane.xlu0 %781  ;;  %v1014_v24 = vmul.f32 %v8010_v59, %v8010_v59  ;;  %1261 = vadd.xlane.f32.xlu0 %v13725_v2  ;;  %v8108_v2 = vld [vmem:[%s6118_s11 + $0x400] sm:$0xff] }
 0x1c1   : > { %13688 = vst [vmem:[#allocation257_spill] sm:$0xff] %v7895_v60  ;;  %13689 = vst [vmem:[#allocation258_spill] sm:$0xff] %v7900_v10  ;;  %v1013_v58 = vmul.f32 %v7944_v29, %v7944_v29  ;;  %v8033_v10 = vld [vmem:[%s6118_s11 + $0x3f8] sm:$0xff] }
 0x1c2   : > { %13690 = vst [vmem:[#allocation259_spill] sm:$0xff] %v7905_v14  ;;  %13691 = vst [vmem:[#allocation260_spill] sm:$0xff] %v7907_v34  ;;  %v7935_v34 = vmul.f32 0.00390625, %v6843_v35  ;;  %v7967_v35 = vadd.f32 %v1007_v21, %v1006_v7  ;;  %v1016_v21 = vmul.f32 %v7983_v51, %v7983_v51  ;;  %v7988_v7 = vld [vmem:[%s6118_s11 + $0x3d8] sm:$0xff]  ;;  %v1021_v60 = vmul.f32 %v8033_v10, %v8033_v10 }
 0x1c3   : > { %13692 = vst [vmem:[#allocation261_spill] sm:$0xff] %v7912_v48  ;;  %13693 = vst [vmem:[#allocation262_spill] sm:$0xff] %v7917_v38  ;;  %v1017_v12 = vmul.f32 %v7988_v7, %v7988_v7  ;;  %v7999_v26 = vadd.f32 %v1013_v58, %v1012_v40  ;;  %v8007_v33 = vpop.xlane.xlu1 %790  ;;  %v8020_v40 = vmul.f32 0.00390625, %v6914_v36  ;;  %v8028_v58 = vld [vmem:[%s6118_s11 + $0x3f0] sm:$0xff]  ;;  %v8058_v36 = vmul.f32 %v7863_v54, %v7863_v54 }
 0x1c4   : > { %13694 = vst [vmem:[#allocation263_spill] sm:$0xff] %v7929_v43  ;;  %13695 = vst [vmem:[#allocation264_spill] sm:$0xff] %v7932_v18  ;;  %v8004_v43 = vmul.f32 0.00390625, %v6897_v28  ;;  %v8023_v28 = vmul.f32 0.00390625, %v6952_v49  ;;  %v8025_v15 = vpop.xlane.xlu0 %787  ;;  %v8041_v49 = vadd.f32 %v1011_v22, %v1010_v20  ;;  %v13723_v20 = vld [vmem:[#allocation112_spill] sm:$0xff]  ;;  %v8074_v48 = vadd.f32 %v1015_v56, %v1014_v24  ;;  %v8092_v56 = vld [vmem:[%s6118_s11 + $0x410] sm:$0xff]  ;;  %1267 = vadd.xlane.f32.xlu0 %v7465_v53 }
 0x1c5   : > { %13696 = vst [vmem:[#allocation265_spill] sm:$0xff] %v7935_v34  ;;  %13697 = vst [vmem:[#allocation266_spill] sm:$0xff] %v7939_v1  ;;  %v13730_v1 = vld [vmem:[#allocation119_spill] sm:$0xff]  ;;  %v1025_v22 = vmul.f32 %v8097_v25, %v8097_v25  ;;  %1276 = vadd.xlane.f32.xlu1 %v7497_v8  ;;  %v8195_v8 = vmul.f32 %v7905_v14, %v7905_v14 }
 0x1c6   : > { %13698 = vst [vmem:[#allocation267_spill] sm:$0xff] %v7944_v29  ;;  %13699 = vst [vmem:[#allocation268_spill] sm:$0xff] %v7959_v0  ;;  %v1020_v0 = vmul.f32 %v8028_v58, %v8028_v58  ;;  %v8089_v24 = vmul.f32 0.00390625, %v13730_v1  ;;  %v8140_v53 = vld [vmem:[%s6118_s11 + $0x420] sm:$0xff] }
 0x1c7   : > { %13700 = vst [vmem:[#allocation269_spill] sm:$0xff] %v7965_v32  ;;  %13701 = vst [vmem:[#allocation270_spill] sm:$0xff] %v7967_v35  ;;  %v8052_v32 = vld [vmem:[%s6118_s11 + $0x3e8] sm:$0xff]  ;;  %v8072_v38 = vpop.xlane.xlu1 %796 }
 0x1c8   : > { %13702 = vst [vmem:[#allocation271_spill] sm:$0xff] %v7970_v62  ;;  %13703 = vst [vmem:[#allocation272_spill] sm:$0xff] %v7975_v50  ;;  %v1019_v35 = vmul.f32 %v8052_v32, %v8052_v32  ;;  %v8082_v29 = vpop.xlane.xlu0 %793  ;;  %v13739_v62 = vld [vmem:[#allocation127_spill] sm:$0xff] }
 0x1c9   : > { %13704 = vst [vmem:[#allocation273_spill] sm:$0xff] %v7978_v61  ;;  %13705 = vst [vmem:[#allocation274_spill] sm:$0xff] %v7983_v51  ;;  %v8113_v51 = vld [vmem:[%s6118_s11 + $0x408] sm:$0xff]  ;;  %v8120_v54 = vmul.f32 0.00390625, %v13739_v62  ;;  %1282 = vadd.xlane.f32.xlu1 %v7563_v39 }
 0x1ca   : > { %13706 = vst [vmem:[#allocation275_spill] sm:$0xff] %v7988_v7  ;;  %13707 = vst [vmem:[#allocation276_spill] sm:$0xff] %v7999_v26  ;;  %v1022_v7 = vmul.f32 %v8108_v2, %v8108_v2  ;;  %v1023_v61 = vmul.f32 %v8113_v51, %v8113_v51 }
 0x1cb   : > { %13708 = vst [vmem:[#allocation277_spill] sm:$0xff] %v8004_v43  ;;  %13709 = vst [vmem:[#allocation278_spill] sm:$0xff] %v8007_v33  ;;  %v8043_v33 = vadd.f32 %v1017_v12, %v1016_v21  ;;  %v8062_v12 = vmul.f32 %v7889_v19, %v7889_v19  ;;  %v8069_v21 = vmul.f32 0.00390625, %v13723_v20  ;;  %v8084_v20 = vadd.f32 %v1021_v60, %v1020_v0  ;;  %v13734_v60 = vld [vmem:[#allocation121_spill] sm:$0xff]  ;;  %v8123_v44 = vpop.xlane.xlu1 %802 }
 0x1cc   : > { %13710 = vst [vmem:[#allocation279_spill] sm:$0xff] %v8010_v59  ;;  %13711 = vst [vmem:[#allocation280_spill] sm:$0xff] %v8015_v17  ;;  %v1024_v19 = vmul.f32 %v8092_v56, %v8092_v56  ;;  %v8102_v0 = vmul.f32 0.00390625, %v13734_v60  ;;  %v8137_v62 = vpop.xlane.xlu0 %799  ;;  %v1026_v59 = vmul.f32 %v8140_v53, %v8140_v53  ;;  %v13747_v17 = vld [vmem:[#allocation130_spill] sm:$0xff] }
 0x1cd   : > { %13712 = vst [vmem:[#allocation281_spill] sm:$0xff] %v8020_v40  ;;  %13713 = vst [vmem:[#allocation282_spill] sm:$0xff] %v8023_v28  ;;  %1288 = vadd.xlane.f32.xlu1 %v7599_v63  ;;  %v8287_v63 = vmul.f32 %v7975_v50, %v7975_v50 }
 0x1ce   : > { %13714 = vst [vmem:[#allocation283_spill] sm:$0xff] %v8025_v15  ;;  %13715 = vst [vmem:[#allocation284_spill] sm:$0xff] %v8028_v58  ;;  %v8047_v15 = vld [vmem:[%s6118_s11 + $0x3e0] sm:$0xff]  ;;  %v8169_v58 = vld [vmem:[%s6118_s11 + $0x458] sm:$0xff] }
 0x1cf   : > { %13716 = vst [vmem:[#allocation285_spill] sm:$0xff] %v8033_v10  ;;  %13717 = vst [vmem:[#allocation286_spill] sm:$0xff] %v8041_v49  ;;  %v1018_v26 = vmul.f32 %v8047_v15, %v8047_v15  ;;  %v8164_v49 = vld [vmem:[%s6118_s11 + $0x450] sm:$0xff] }
 0x1d0   : > { %13718 = vst [vmem:[#allocation287_spill] sm:$0xff] %v8043_v33  ;;  %13719 = vst [vmem:[#allocation288_spill] sm:$0xff] %v8047_v15  ;;  %v1032_v33 = vmul.f32 %v8164_v49, %v8164_v49  ;;  %v8187_v10 = vpop.xlane.xlu0 %805 }
 0x1d1   : > { %13720 = vst [vmem:[#allocation289_spill] sm:$0xff] %v8052_v32  ;;  %13721 = vst [vmem:[#allocation290_spill] sm:$0xff] %v8058_v36  ;;  %v8105_v1 = vadd.f32 %v1019_v35, %v1018_v26  ;;  %v8126_v26 = vld [vmem:[%s6118_s11 + $0x430] sm:$0xff]  ;;  %v13768_v32 = vld [vmem:[#allocation148_spill] sm:$0xff]  ;;  %1294 = vadd.xlane.f32.xlu1 %v7665_v4 }
 0x1d2   : > { %13722 = vst [vmem:[#allocation291_spill] sm:$0xff] %v8062_v12  ;;  %13724 = vst [vmem:[#allocation112_spill] sm:$0xff] %v8069_v21  ;;  %v1028_v35 = vmul.f32 %v8126_v26, %v8126_v26  ;;  %v8131_v12 = vld [vmem:[%s6118_s11 + $0x438] sm:$0xff]  ;;  %v8227_v14 = vmul.f32 0.00390625, %v13768_v32 }
 0x1d3   : > { %13726 = vst [vmem:[#allocation182_spill] sm:$0xff] %v8072_v38  ;;  %13727 = vst [vmem:[#allocation292_spill] sm:$0xff] %v8074_v48  ;;  %v1029_v36 = vmul.f32 %v8131_v12, %v8131_v12  ;;  %v3933_v48 = vlaneseq  ;;  %v8161_v38 = vadd.f32 %v1023_v61, %v1022_v7  ;;  %v13753_v61 = vld [vmem:[#allocation136_spill] sm:$0xff] }
 0x1d4   : > { %13728 = vst [vmem:[#allocation293_spill] sm:$0xff] %v8082_v29  ;;  %13729 = vst [vmem:[#allocation294_spill] sm:$0xff] %v8084_v20  ;;  %v8178_v7 = vmul.f32 0.00390625, %v13753_v61  ;;  %v8181_v29 = vpop.xlane.xlu1 %808 }
 0x1d5   : > { %13731 = vst [vmem:[#allocation119_spill] sm:$0xff] %v8089_v24  ;;  %13732 = vst [vmem:[#allocation295_spill] sm:$0xff] %v8092_v56  ;;  %v8183_v60 = vadd.f32 %v1029_v36, %v1028_v35  ;;  %v8203_v35 = vld [vmem:[%s6118_s11 + $0x440] sm:$0xff]  ;;  %1300 = vadd.xlane.f32.xlu1 %v7700_v3 }
 0x1d6   : > { %13733 = vst [vmem:[#allocation296_spill] sm:$0xff] %v8097_v25  ;;  %13735 = vst [vmem:[#allocation121_spill] sm:$0xff] %v8102_v0  ;;  %v13764_v25 = vld [vmem:[#allocation145_spill] sm:$0xff] }
 0x1d7   : > { %13736 = vst [vmem:[#allocation297_spill] sm:$0xff] %v8105_v1  ;;  %13737 = vst [vmem:[#allocation298_spill] sm:$0xff] %v8108_v2  ;;  %v8145_v1 = vld [vmem:[%s6118_s11 + $0x428] sm:$0xff]  ;;  %v8215_v61 = vmul.f32 0.00390625, %v13764_v25  ;;  %v8222_v2 = vmul.f32 %v7932_v18, %v7932_v18  ;;  %v8233_v25 = vld [vmem:[%s6118_s11 + $0x470] sm:$0xff] }
 0x1d8   : > { %13738 = vst [vmem:[#allocation299_spill] sm:$0xff] %v8113_v51  ;;  %13740 = vst [vmem:[#allocation127_spill] sm:$0xff] %v8120_v54  ;;  %v1027_v20 = vmul.f32 %v8145_v1, %v8145_v1  ;;  %v8230_v15 = vpop.xlane.xlu1 %814  ;;  %v1036_v39 = vmul.f32 %v8233_v25, %v8233_v25  ;;  %v8242_v51 = vpop.xlane.xlu0 %811  ;;  %v8252_v18 = vld [vmem:[%s6118_s11 + $0x468] sm:$0xff] }
 0x1d9   : > { %13741 = vst [vmem:[#allocation300_spill] sm:$0xff] %v8123_v44  ;;  %13742 = vst [vmem:[#allocation301_spill] sm:$0xff] %v8126_v26  ;;  %v8154_v44 = vmul.f32 0.00390625, %v13747_v17  ;;  %v1033_v17 = vmul.f32 %v8169_v58, %v8169_v58  ;;  %v8247_v26 = vld [vmem:[%s6118_s11 + $0x460] sm:$0xff]  ;;  %1306 = vadd.xlane.f32.xlu1 %v7762_v42 }
 0x1da   : > { %13743 = vst [vmem:[#allocation302_spill] sm:$0xff] %v8131_v12  ;;  %13744 = vst [vmem:[#allocation303_spill] sm:$0xff] %v8137_v62  ;;  %v8156_v62 = vadd.f32 %v1025_v22, %v1024_v19  ;;  %v13755_v22 = vld [vmem:[#allocation198_spill] sm:$0xff]  ;;  %v8191_v19 = vshrl.u32 %v3933_v48, 7 }
 0x1db   : > { %13745 = vst [vmem:[#allocation304_spill] sm:$0xff] %v8140_v53  ;;  %13746 = vst [vmem:[#allocation305_spill] sm:$0xff] %v8145_v1  ;;  %1273 = vadd.xlane.f32.xlu0 %v13755_v22  ;;  %v13760_v22 = vld [vmem:[#allocation140_spill] sm:$0xff] }
 0x1dc   : > { %13748 = vst [vmem:[#allocation130_spill] sm:$0xff] %v8154_v44  ;;  %13749 = vst [vmem:[#allocation306_spill] sm:$0xff] %v8156_v62  ;;  %v8200_v36 = vmul.f32 0.00390625, %v13760_v22  ;;  %v8218_v22 = vadd.f32 %v1033_v17, %v1032_v33  ;;  %v8238_v33 = vld [vmem:[%s6118_s11 + $0x478] sm:$0xff]  ;;  %v3935_v56 = vsub.s32 0, %v8191_v19  ;;  %v3939_v32 = vsub.s32 1, %v8191_v19 }
 0x1dd   : > { %13750 = vst [vmem:[#allocation307_spill] sm:$0xff] %v8161_v38  ;;  %13751 = vst [vmem:[#allocation308_spill] sm:$0xff] %v8164_v49  ;;  %v8189_v38 = vadd.f32 %v1027_v20, %v1026_v59  ;;  %v1030_v59 = vmul.f32 %v8203_v35, %v8203_v35  ;;  %v8208_v20 = vld [vmem:[%s6118_s11 + $0x448] sm:$0xff]  ;;  %v1037_v17 = vmul.f32 %v8238_v33, %v8238_v33  ;;  %v8311_v49 = vld [vmem:[%s6118_s11 + $0x498] sm:$0xff]  ;;  %1312 = vadd.xlane.f32.xlu1 %v7802_v13 }
 0x1de   : > { %13752 = vst [vmem:[#allocation309_spill] sm:$0xff] %v8169_v58  ;;  %13754 = vst [vmem:[#allocation136_spill] sm:$0xff] %v8178_v7  ;;  %v1031_v48 = vmul.f32 %v8208_v20, %v8208_v20  ;;  %v13782_v62 = vld [vmem:[#allocation156_spill] sm:$0xff]  ;;  %v8292_v58 = vpop.xlane.xlu0 %817 }
 0x1df   : > { %13756 = vst [vmem:[#allocation198_spill] sm:$0xff] %v8183_v60  ;;  %13757 = vst [vmem:[#allocation310_spill] sm:$0xff] %v8187_v10  ;;  %1279 = vadd.xlane.f32.xlu0 %v7568_v6  ;;  %v1034_v6 = vmul.f32 %v8247_v26, %v8247_v26  ;;  %v3402_v60 = vld [vmem:[#allocation5] sm:$0x3]  ;;  %v8327_v53 = vld [vmem:[%s6118_s11 + $0x488] sm:$0xff] }
 0x1e0   : > { %13758 = vst [vmem:[#allocation311_spill] sm:$0xff] %v8189_v38  ;;  %13759 = vst [vmem:[#allocation312_spill] sm:$0xff] %v8195_v8  ;;  %v8262_v19 = vadd.f32 %v1031_v48, %v1030_v59  ;;  %v3403_v8 = vld [vmem:[#allocation7] sm:$0x3]  ;;  %v8290_v38 = vmul.f32 0.00390625, %v13782_v62  ;;  %v8294_v59 = vrot.slane %v3402_v60, %v3935_v56  ;;  %v8296_v48 = vrot.slane %v3402_v60, %v3939_v32 }
 0x1e1   : > { %13761 = vst [vmem:[#allocation140_spill] sm:$0xff] %v8200_v36  ;;  %13762 = vst [vmem:[#allocation313_spill] sm:$0xff] %v8203_v35  ;;  %v8306_v35 = vld [vmem:[%s6118_s11 + $0x490] sm:$0xff]  ;;  %v1041_v60 = vmul.f32 %v8311_v49, %v8311_v49  ;;  %v1039_v12 = vmul.f32 %v8327_v53, %v8327_v53  ;;  %v8336_v4 = vrot.slane %v3403_v8, %v3939_v32  ;;  %1318 = vadd.xlane.f32.xlu1 %v7865_v27 }
 0x1e2   : > { %13763 = vst [vmem:[#allocation314_spill] sm:$0xff] %v8208_v20  ;;  %13765 = vst [vmem:[#allocation145_spill] sm:$0xff] %v8215_v61  ;;  %v13787_v20 = vld [vmem:[#allocation163_spill] sm:$0xff]  ;;  %v1040_v62 = vmul.f32 %v8306_v35, %v8306_v35 }
 0x1e3   : > { %13766 = vst [vmem:[#allocation315_spill] sm:$0xff] %v8218_v22  ;;  %13767 = vst [vmem:[#allocation316_spill] sm:$0xff] %v8222_v2  ;;  %v1035_v2 = vmul.f32 %v8252_v18, %v8252_v18  ;;  %v8274_v22 = vmul.f32 %v7935_v34, %v7935_v34  ;;  %1285 = vadd.xlane.f32.xlu0 %v7632_v55  ;;  %v8344_v34 = vld [vmem:[%s6118_s11 + $0x4b8] sm:$0xff] }
 0x1e4   : > { %13769 = vst [vmem:[#allocation148_spill] sm:$0xff] %v8227_v14  ;;  %13770 = vst [vmem:[#allocation317_spill] sm:$0xff] %v8230_v15  ;;  %v13777_v15 = vld [vmem:[#allocation155_spill] sm:$0xff] }
 0x1e5   : > { %13771 = vst [vmem:[#allocation318_spill] sm:$0xff] %v8233_v25  ;;  %13772 = vst [vmem:[#allocation319_spill] sm:$0xff] %v8238_v33  ;;  %v8269_v10 = vmul.f32 0.00390625, %v13777_v15  ;;  %v8283_v15 = vadd.f32 %v1037_v17, %v1036_v39  ;;  %v8298_v55 = vadd.f32 %v1035_v2, %v1034_v6  ;;  %v8301_v39 = vmul.f32 0.00390625, %v13787_v20  ;;  %v13792_v6 = vld [vmem:[#allocation166_spill] sm:$0xff]  ;;  %v13799_v2 = vld [vmem:[#allocation171_spill] sm:$0xff]  ;;  %1324 = vadd.xlane.f32.xlu1 %v7909_v46 }
 0x1e6   : > { %13773 = vst [vmem:[#allocation320_spill] sm:$0xff] %v8242_v51  ;;  %13774 = vst [vmem:[#allocation321_spill] sm:$0xff] %v8247_v26  ;;  %v8281_v51 = vpop.xlane.xlu1 %820  ;;  %v8303_v17 = vrot.slane %v3403_v8, %v3935_v56  ;;  %v8318_v20 = vmul.f32 0.00390625, %v13792_v6  ;;  %v8322_v56 = vld [vmem:[%s6118_s11 + $0x480] sm:$0xff]  ;;  %v8339_v25 = vld [vmem:[%s6118_s11 + $0x4b0] sm:$0xff]  ;;  %v8351_v33 = vmul.f32 0.00390625, %v13799_v2  ;;  %v8371_v26 = vadd.f32 %v1041_v60, %v1040_v62 }
 0x1e7   : > { %13775 = vst [vmem:[#allocation322_spill] sm:$0xff] %v8252_v18  ;;  %13776 = vst [vmem:[#allocation323_spill] sm:$0xff] %v8262_v19  ;;  %v1038_v1 = vmul.f32 %v8322_v56, %v8322_v56  ;;  %1291 = vadd.xlane.f32.xlu0 %v7672_v37  ;;  %v1044_v50 = vmul.f32 %v8339_v25, %v8339_v25  ;;  %v8353_v37 = vpop.xlane.xlu0 %823  ;;  %v8356_v8 = vld [vmem:[%s6118_s11 + $0x4a0] sm:$0xff]  ;;  %v13804_v19 = vld [vmem:[#allocation181_spill] sm:$0xff]  ;;  %v8637_v46 = vmul.f32 %v8120_v54, %v8120_v54 }
 0x1e8   : > { %13778 = vst [vmem:[#allocation155_spill] sm:$0xff] %v8269_v10  ;;  %13779 = vst [vmem:[#allocation324_spill] sm:$0xff] %v8274_v22  ;;  %v1042_v32 = vmul.f32 %v8356_v8, %v8356_v8  ;;  %v13805_v60 = vld [vmem:[#allocation184_spill] sm:$0xff]  ;;  %v8416_v62 = vld [vmem:[%s6118_s11 + $0x4d8] sm:$0xff] }
 0x1e9   : > { %13780 = vst [vmem:[#allocation325_spill] sm:$0xff] %v8283_v15  ;;  %13781 = vst [vmem:[#allocation326_spill] sm:$0xff] %v8287_v63  ;;  %v1045_v63 = vmul.f32 %v8344_v34, %v8344_v34  ;;  %v8387_v2 = vmul.f32 0.00390625, %v13805_v60  ;;  %v1049_v3 = vmul.f32 %v8416_v62, %v8416_v62  ;;  %v8421_v22 = vld [vmem:[%s6118_s11 + $0x4c0] sm:$0xff]  ;;  %1330 = vadd.xlane.f32.xlu1 %v7955_v5 }
 0x1ea   : > { %13783 = vst [vmem:[#allocation156_spill] sm:$0xff] %v8290_v38  ;;  %13784 = vst [vmem:[#allocation327_spill] sm:$0xff] %v8294_v59  ;;  %v8334_v6 = vpop.xlane.xlu1 %826 }
 0x1eb   : > { %13785 = vst [vmem:[#allocation328_spill] sm:$0xff] %v8296_v48  ;;  %13786 = vst [vmem:[#allocation329_spill] sm:$0xff] %v8298_v55  ;;  %v13803_v55 = vld [vmem:[#allocation174_spill] sm:$0xff]  ;;  %v8382_v48 = vadd.f32 %v1039_v12, %v1038_v1  ;;  %1297 = vadd.xlane.f32.xlu0 %v7736_v11  ;;  %v8392_v59 = vadd.f32 %v1045_v63, %v1044_v50  ;;  %v8402_v1 = vpop.xlane.xlu0 %829  ;;  %v8408_v11 = vmul.f32 %v8020_v40, %v8020_v40 }
 0x1ec   : > { %13788 = vst [vmem:[#allocation163_spill] sm:$0xff] %v8301_v39  ;;  %13789 = vst [vmem:[#allocation330_spill] sm:$0xff] %v8303_v17  ;;  %v8376_v15 = vmul.f32 0.00390625, %v13803_v55  ;;  %v8411_v50 = vld [vmem:[%s6118_s11 + $0x4d0] sm:$0xff] }
 0x1ed   : > { %13790 = vst [vmem:[#allocation331_spill] sm:$0xff] %v8306_v35  ;;  %13791 = vst [vmem:[#allocation332_spill] sm:$0xff] %v8311_v49  ;;  %v1048_v63 = vmul.f32 %v8411_v50, %v8411_v50  ;;  %v8460_v35 = vld [vmem:[%s6118_s11 + $0x4f8] sm:$0xff] }
 0x1ee   : > { %13793 = vst [vmem:[#allocation166_spill] sm:$0xff] %v8318_v20  ;;  %13794 = vst [vmem:[#allocation333_spill] sm:$0xff] %v8322_v56  ;;  %v8390_v55 = vpop.xlane.xlu1 %832  ;;  %v13814_v56 = vld [vmem:[#allocation190_spill] sm:$0xff]  ;;  %v1053_v18 = vmul.f32 %v8460_v35, %v8460_v35 }
 0x1ef   : > { %13795 = vst [vmem:[#allocation334_spill] sm:$0xff] %v8327_v53  ;;  %13796 = vst [vmem:[#allocation335_spill] sm:$0xff] %v8336_v4  ;;  %v8361_v4 = vld [vmem:[%s6118_s11 + $0x4a8] sm:$0xff]  ;;  %v8437_v49 = vmul.f32 0.00390625, %v13814_v56  ;;  %1303 = vadd.xlane.f32.xlu0 %v7774_v41  ;;  %v8452_v56 = vpop.xlane.xlu0 %835 }
 0x1f0   : > { %13797 = vst [vmem:[#allocation336_spill] sm:$0xff] %v8339_v25  ;;  %13798 = vst [vmem:[#allocation337_spill] sm:$0xff] %v8344_v34  ;;  %v1043_v17 = vmul.f32 %v8361_v4, %v8361_v4  ;;  %v8465_v34 = vld [vmem:[%s6118_s11 + $0x4e0] sm:$0xff]  ;;  %v8470_v41 = vld [vmem:[%s6118_s11 + $0x4e8] sm:$0xff] }
 0x1f1   : > { %13800 = vst [vmem:[#allocation171_spill] sm:$0xff] %v8353_v37  ;;  %13801 = vst [vmem:[#allocation338_spill] sm:$0xff] %v8356_v8  ;;  %v8379_v37 = vmul.f32 0.00390625, %v13804_v19  ;;  %v8396_v19 = vmul.f32 %v8004_v43, %v8004_v43  ;;  %v13816_v8 = vld [vmem:[#allocation193_spill] sm:$0xff]  ;;  %v8483_v43 = vmul.f32 %v8023_v28, %v8023_v28 }
 0x1f2   : > { %13802 = vst [vmem:[#allocation339_spill] sm:$0xff] %v8361_v4  ;;  %13806 = vst [vmem:[#allocation174_spill] sm:$0xff] %v8387_v2  ;;  %v8404_v60 = vadd.f32 %v1043_v17, %v1042_v32  ;;  %v1046_v17 = vmul.f32 %v8421_v22, %v8421_v22  ;;  %v8426_v32 = vld [vmem:[%s6118_s11 + $0x4c8] sm:$0xff]  ;;  %v8447_v25 = vmul.f32 0.00390625, %v13816_v8  ;;  %v8450_v53 = vpop.xlane.xlu1 %838  ;;  %v1050_v8 = vmul.f32 %v8465_v34, %v8465_v34 }
 0x1f3   : > { %13807 = vst [vmem:[#allocation181_spill] sm:$0xff] %v8396_v19  ;;  %13809 = vst [vmem:[#allocation340_spill] sm:$0xff] %v8408_v11  ;;  %v1047_v12 = vmul.f32 %v8426_v32, %v8426_v32  ;;  %v8477_v4 = vadd.f32 %v1049_v3, %v1048_v63  ;;  %v13825_v2 = vld [vmem:[#allocation204_spill] sm:$0xff]  ;;  %v13828_v63 = vld [vmem:[#allocation209_spill] sm:$0xff]  ;;  %1309 = vadd.xlane.f32.xlu0 %v7838_v23  ;;  %v8510_v11 = vpop.xlane.xlu0 %841 }
 0x1f4   : > { %13808 = vst [vmem:[#allocation184_spill] sm:$0xff] %v8404_v60  ;;  %13810 = vst [vmem:[#allocation341_spill] sm:$0xff] %v8411_v50  ;;  %v8455_v50 = vld [vmem:[%s6118_s11 + $0x4f0] sm:$0xff]  ;;  %v8490_v60 = vmul.f32 0.00390625, %v13825_v2  ;;  %v13830_v19 = vld [vmem:[#allocation212_spill] sm:$0xff] }
 0x1f5   : > { %13811 = vst [vmem:[#allocation342_spill] sm:$0xff] %v8416_v62  ;;  %13812 = vst [vmem:[#allocation343_spill] sm:$0xff] %v8421_v22  ;;  %v1052_v42 = vmul.f32 %v8455_v50, %v8455_v50  ;;  %v13822_v22 = vld [vmem:[#allocation200_spill] sm:$0xff]  ;;  %v8479_v40 = vadd.f32 %v1047_v12, %v1046_v17  ;;  %v8502_v17 = vmul.f32 0.00390625, %v13828_v63  ;;  %v8505_v2 = vmul.f32 0.00390625, %v13830_v19  ;;  %v8517_v3 = vld [vmem:[%s6118_s11 + $0x510] sm:$0xff] }
 0x1f6   : > { %13813 = vst [vmem:[#allocation344_spill] sm:$0xff] %v8426_v32  ;;  %13815 = vst [vmem:[#allocation190_spill] sm:$0xff] %v8437_v49  ;;  %v1051_v32 = vmul.f32 %v8470_v41, %v8470_v41  ;;  %v8475_v62 = vmul.f32 0.00390625, %v13822_v22  ;;  %v8495_v22 = vmul.f32 %v8069_v21, %v8069_v21  ;;  %v8508_v13 = vpop.xlane.xlu1 %844  ;;  %v1056_v63 = vmul.f32 %v8517_v3, %v8517_v3  ;;  %v8522_v12 = vld [vmem:[%s6118_s11 + $0x518] sm:$0xff]  ;;  %v8552_v21 = vld [vmem:[%s6118_s11 + $0x530] sm:$0xff] }
 0x1f7   : > { %13817 = vst [vmem:[#allocation193_spill] sm:$0xff] %v8447_v25  ;;  %13818 = vst [vmem:[#allocation345_spill] sm:$0xff] %v8455_v50  ;;  %v1057_v23 = vmul.f32 %v8522_v12, %v8522_v12  ;;  %v8562_v19 = vld [vmem:[%s6118_s11 + $0x520] sm:$0xff]  ;;  %1315 = vadd.xlane.f32.xlu0 %v7884_v47  ;;  %v8573_v28 = vld [vmem:[%s6118_s11 + $0x528] sm:$0xff]  ;;  %v1060_v49 = vmul.f32 %v8552_v21, %v8552_v21 }
 0x1f8   : > { %13819 = vst [vmem:[#allocation346_spill] sm:$0xff] %v8460_v35  ;;  %13820 = vst [vmem:[#allocation347_spill] sm:$0xff] %v8465_v34  ;;  %v8512_v35 = vadd.f32 %v1053_v18, %v1052_v42  ;;  %v8514_v50 = vadd.f32 %v1051_v32, %v1050_v8  ;;  %v8529_v18 = vmul.f32 0.00390625, %v7663_v9  ;;  %v8532_v32 = vld [vmem:[%s6118_s11 + $0x500] sm:$0xff]  ;;  %v8537_v8 = vld [vmem:[%s6118_s11 + $0x508] sm:$0xff]  ;;  %v8567_v9 = vmul.f32 0.00390625, %v7717_v45 }
 0x1f9   : > { %13821 = vst [vmem:[#allocation348_spill] sm:$0xff] %v8470_v41  ;;  %13823 = vst [vmem:[#allocation200_spill] sm:$0xff] %v8475_v62  ;;  %v1054_v42 = vmul.f32 %v8532_v32, %v8532_v32  ;;  %v1055_v41 = vmul.f32 %v8537_v8, %v8537_v8  ;;  %v8586_v45 = vmul.f32 %v8089_v24, %v8089_v24  ;;  %v8589_v47 = vld [vmem:[%s6118_s11 + $0x550] sm:$0xff]  ;;  %v8608_v24 = vld [vmem:[%s6118_s11 + $0x540] sm:$0xff] }
 0x1fa   : > { %13824 = vst [vmem:[#allocation349_spill] sm:$0xff] %v8483_v43  ;;  %13826 = vst [vmem:[#allocation204_spill] sm:$0xff] %v8490_v60  ;;  %v8570_v27 = vpop.xlane.xlu1 %850  ;;  %v8594_v43 = vmul.f32 0.00390625, %v7772_v52  ;;  %v8613_v52 = vld [vmem:[%s6118_s11 + $0x548] sm:$0xff]  ;;  %v8674_v62 = vmul.f32 %v8154_v44, %v8154_v44  ;;  %v8696_v44 = vld [vmem:[%s6118_s11 + $0x5b0] sm:$0xff] }
 0x1fb   : > { %13827 = vst [vmem:[#allocation350_spill] sm:$0xff] %v8495_v22  ;;  %13829 = vst [vmem:[#allocation209_spill] sm:$0xff] %v8502_v17  ;;  %v8557_v22 = vld [vmem:[%s6118_s11 + $0x538] sm:$0xff]  ;;  %v8596_v34 = vadd.f32 %v1055_v41, %v1054_v42  ;;  %v13857_v42 = vld [vmem:[#allocation237_spill] sm:$0xff]  ;;  %1321 = vadd.xlane.f32.xlu0 %v7925_v57 }
 0x1fc   : > { %13831 = vst [vmem:[#allocation212_spill] sm:$0xff] %v8505_v2  ;;  %13832 = vst [vmem:[#allocation351_spill] sm:$0xff] %v8512_v35  ;;  %v8640_v41 = vld [vmem:[%s6118_s11 + $0x578] sm:$0xff]  ;;  %v13870_v17 = vld [vmem:[#allocation260_spill] sm:$0xff] }
 0x1fd   : > { %13833 = vst [vmem:[#allocation352_spill] sm:$0xff] %v8514_v50  ;;  %13834 = vst [vmem:[#allocation353_spill] sm:$0xff] %v8517_v3  ;;  %v8548_v3 = vmul.f32 0.00390625, %v7670_v31  ;;  %v8582_v31 = vadd.f32 %v1057_v23, %v1056_v63  ;;  %v8603_v63 = vld [vmem:[%s6118_s11 + $0x558] sm:$0xff]  ;;  %v8645_v23 = vld [vmem:[%s6118_s11 + $0x560] sm:$0xff]  ;;  %v8653_v60 = vmul.f32 0.00390625, %v13870_v17  ;;  %v8689_v17 = vmul.f32 %v8178_v7, %v8178_v7 }
 0x1fe   : > { %13835 = vst [vmem:[#allocation354_spill] sm:$0xff] %v8522_v12  ;;  %13836 = vst [vmem:[#allocation355_spill] sm:$0xff] %v8529_v18  ;;  %v13862_v12 = vld [vmem:[#allocation248_spill] sm:$0xff]  ;;  %v13884_v7 = vld [vmem:[#allocation270_spill] sm:$0xff] }
 0x1ff   : > { %13837 = vst [vmem:[#allocation356_spill] sm:$0xff] %v8532_v32  ;;  %13838 = vst [vmem:[#allocation357_spill] sm:$0xff] %v8537_v8  ;;  %v8578_v8 = vmul.f32 0.00390625, %v7734_v30  ;;  %v8580_v32 = vpop.xlane.xlu0 %847  ;;  %v8600_v30 = vmul.f32 %v8102_v0, %v8102_v0  ;;  %v8618_v0 = vmul.f32 0.00390625, %v13857_v42  ;;  %v8630_v2 = vmul.f32 0.00390625, %v13862_v12  ;;  %v8633_v42 = vpop.xlane.xlu1 %856  ;;  %v8706_v12 = vld [vmem:[%s6118_s11 + $0x5a0] sm:$0xff]  ;;  %1327 = vadd.xlane.f32.xlu0 %v13884_v7 }
 0x200   : > { %13839 = vst [vmem:[#allocation358_spill] sm:$0xff] %v8548_v3  ;;  %13840 = vst [vmem:[#allocation359_spill] sm:$0xff] %v8552_v21  ;;  %v13868_v3 = vld [vmem:[#allocation256_spill] sm:$0xff]  ;;  %v8722_v25 = vld [vmem:[%s6118_s11 + $0x5d0] sm:$0xff]  ;;  %v1058_v7 = vmul.f32 %v8562_v19, %v8562_v19 }
 0x201   : > { %13841 = vst [vmem:[#allocation360_spill] sm:$0xff] %v8557_v22  ;;  %13842 = vst [vmem:[#allocation361_spill] sm:$0xff] %v8562_v19  ;;  %v8650_v57 = vmul.f32 0.00390625, %v13868_v3  ;;  %v8668_v3 = vld [vmem:[%s6118_s11 + $0x598] sm:$0xff] }
 0x202   : > { %13843 = vst [vmem:[#allocation362_spill] sm:$0xff] %v8567_v9  ;;  %13844 = vst [vmem:[#allocation363_spill] sm:$0xff] %v8570_v27  ;;  %v8663_v9 = vld [vmem:[%s6118_s11 + $0x590] sm:$0xff]  ;;  %v13900_v21 = vld [vmem:[#allocation283_spill] sm:$0xff] }
 0x203   : > { %13845 = vst [vmem:[#allocation364_spill] sm:$0xff] %v8573_v28  ;;  %13846 = vst [vmem:[#allocation365_spill] sm:$0xff] %v8578_v8  ;;  %v8655_v54 = vpop.xlane.xlu0 %853  ;;  %v8682_v8 = vld [vmem:[%s6118_s11 + $0x588] sm:$0xff]  ;;  %v13917_v35 = vld [vmem:[#allocation287_spill] sm:$0xff] }
 0x204   : > { %13847 = vst [vmem:[#allocation366_spill] sm:$0xff] %v8580_v32  ;;  %13848 = vst [vmem:[#allocation367_spill] sm:$0xff] %v8582_v31  ;;  %v13902_v32 = vld [vmem:[#allocation286_spill] sm:$0xff]  ;;  %v13913_v31 = vld [vmem:[#allocation300_spill] sm:$0xff] }
 0x205   : > { %13849 = vst [vmem:[#allocation368_spill] sm:$0xff] %v8586_v45  ;;  %13850 = vst [vmem:[#allocation369_spill] sm:$0xff] %v8589_v47  ;;  %v13860_v45 = vld [vmem:[#allocation246_spill] sm:$0xff]  ;;  %1333 = vadd.xlane.f32.xlu0 %v13902_v32  ;;  %v1063_v32 = vmul.f32 %v8613_v52, %v8613_v52  ;;  %v8811_v50 = vmul.f32 0.00390625, %v13913_v31 }
 0x206   : > { %13851 = vst [vmem:[#allocation370_spill] sm:$0xff] %v8594_v43  ;;  %13852 = vst [vmem:[#allocation371_spill] sm:$0xff] %v8596_v34  ;;  %v8627_v18 = vmul.f32 0.00390625, %v13860_v45  ;;  %v8693_v43 = vmul.f32 %v8200_v36, %v8200_v36  ;;  %v8711_v36 = vmul.f32 0.00390625, %v7953_v16  ;;  %v1061_v16 = vmul.f32 %v8557_v22, %v8557_v22  ;;  %v13898_v22 = vld [vmem:[#allocation278_spill] sm:$0xff]  ;;  %v8806_v34 = vld [vmem:[%s6118_s11 + $0x5e8] sm:$0xff] }
 0x207   : > { %13853 = vst [vmem:[#allocation372_spill] sm:$0xff] %v8600_v30  ;;  %13854 = vst [vmem:[#allocation373_spill] sm:$0xff] %v8603_v63  ;;  %v8622_v30 = vld [vmem:[%s6118_s11 + $0x570] sm:$0xff]  ;;  %v8757_v45 = vmul.f32 %v8215_v61, %v8215_v61  ;;  %v8769_v19 = vmul.f32 0.00390625, %v13898_v22  ;;  %v1065_v22 = vmul.f32 %v8603_v63, %v8603_v63 }
 0x208   : > { %13855 = vst [vmem:[#allocation374_spill] sm:$0xff] %v8608_v24  ;;  %13856 = vst [vmem:[#allocation375_spill] sm:$0xff] %v8613_v52  ;;  %v13909_v63 = vld [vmem:[#allocation293_spill] sm:$0xff]  ;;  %v8830_v52 = vld [vmem:[%s6118_s11 + $0x600] sm:$0xff]  ;;  %v1068_v31 = vmul.f32 %v8622_v30, %v8622_v30 }
 0x209   : > { %13858 = vst [vmem:[#allocation237_spill] sm:$0xff] %v8618_v0  ;;  %13859 = vst [vmem:[#allocation376_spill] sm:$0xff] %v8622_v30  ;;  %v8732_v0 = vld [vmem:[%s6118_s11 + $0x5c0] sm:$0xff] }
 0x20a   : > { %13861 = vst [vmem:[#allocation246_spill] sm:$0xff] %v8627_v18  ;;  %13863 = vst [vmem:[#allocation248_spill] sm:$0xff] %v8630_v2  ;;  %v8727_v18 = vld [vmem:[%s6118_s11 + $0x5d8] sm:$0xff]  ;;  %v13892_v2 = vld [vmem:[#allocation269_spill] sm:$0xff] }
 0x20b   : > { %13864 = vst [vmem:[#allocation377_spill] sm:$0xff] %v8633_v42  ;;  %13865 = vst [vmem:[#allocation378_spill] sm:$0xff] %v8637_v46  ;;  %v8658_v46 = vld [vmem:[%s6118_s11 + $0x568] sm:$0xff]  ;;  %v8744_v5 = vmul.f32 0.00390625, %v13892_v2  ;;  %v8761_v2 = vmul.f32 %v8227_v14, %v8227_v14  ;;  %v1064_v14 = vmul.f32 %v8589_v47, %v8589_v47  ;;  %v8801_v47 = vmul.f32 0.00390625, %v13909_v63  ;;  %v8820_v63 = vld [vmem:[%s6118_s11 + $0x610] sm:$0xff] }
 0x20c   : > { %13866 = vst [vmem:[#allocation379_spill] sm:$0xff] %v8640_v41  ;;  %13867 = vst [vmem:[#allocation380_spill] sm:$0xff] %v8645_v23  ;;  %v8739_v42 = vld [vmem:[%s6118_s11 + $0x5c8] sm:$0xff] }
 0x20d   : > { %13869 = vst [vmem:[#allocation256_spill] sm:$0xff] %v8650_v57  ;;  %13871 = vst [vmem:[#allocation260_spill] sm:$0xff] %v8653_v60  ;;  %v13894_v57 = vld [vmem:[#allocation276_spill] sm:$0xff]  ;;  %v8764_v60 = vld [vmem:[%s6118_s11 + $0x5f0] sm:$0xff] }
 0x20e   : > { %13872 = vst [vmem:[#allocation381_spill] sm:$0xff] %v8655_v54  ;;  %13873 = vst [vmem:[#allocation382_spill] sm:$0xff] %v8658_v46  ;;  %v8677_v54 = vld [vmem:[%s6118_s11 + $0x580] sm:$0xff]  ;;  %1336 = vadd.xlane.f32.xlu1 %v13894_v57  ;;  %v8791_v57 = vld [vmem:[%s6118_s11 + $0x5f8] sm:$0xff] }
 0x20f   : > { %13874 = vst [vmem:[#allocation383_spill] sm:$0xff] %v8663_v9  ;;  %13875 = vst [vmem:[#allocation384_spill] sm:$0xff] %v8668_v3 }
 0x210   : > { %13876 = vst [vmem:[#allocation385_spill] sm:$0xff] %v8674_v62  ;;  %13877 = vst [vmem:[#allocation386_spill] sm:$0xff] %v8677_v54  ;;  %v8701_v62 = vld [vmem:[%s6118_s11 + $0x5b8] sm:$0xff] }
 0x211   : > { %13878 = vst [vmem:[#allocation387_spill] sm:$0xff] %v8682_v8  ;;  %13879 = vst [vmem:[#allocation388_spill] sm:$0xff] %v8689_v17  ;;  %v8717_v17 = vld [vmem:[%s6118_s11 + $0x5a8] sm:$0xff] }
 0x212   : > { %13880 = vst [vmem:[#allocation389_spill] sm:$0xff] %v8693_v43  ;;  %13881 = vst [vmem:[#allocation390_spill] sm:$0xff] %v8701_v62  ;;  %v8714_v43 = vpop.xlane.xlu1 %862  ;;  %1342 = vadd.xlane.f32.xlu1 %v13917_v35  ;;  %v8835_v35 = vld [vmem:[%s6118_s11 + $0x608] sm:$0xff] }
 0x213   : > { %13882 = vst [vmem:[#allocation391_spill] sm:$0xff] %v8706_v12  ;;  %13883 = vst [vmem:[#allocation392_spill] sm:$0xff] %v8711_v36 }
 0x214   : > { %13885 = vst [vmem:[#allocation270_spill] sm:$0xff] %v8714_v43  ;;  %13886 = vst [vmem:[#allocation393_spill] sm:$0xff] %v8717_v17  ;;  %v8736_v43 = vpop.xlane.xlu0 %859 }
 0x215   : > { %13887 = vst [vmem:[#allocation394_spill] sm:$0xff] %v8722_v25  ;;  %13888 = vst [vmem:[#allocation395_spill] sm:$0xff] %v8727_v18 }
 0x216   : > { %13889 = vst [vmem:[#allocation396_spill] sm:$0xff] %v8732_v0  ;;  %13890 = vst [vmem:[#allocation397_spill] sm:$0xff] %v8736_v43  ;;  %v1059_v43 = vmul.f32 %v8573_v28, %v8573_v28  ;;  %v8772_v28 = vmul.f32 0.00390625, %v13900_v21  ;;  %v8775_v61 = vpop.xlane.xlu1 %868  ;;  %v1062_v21 = vmul.f32 %v8608_v24, %v8608_v24  ;;  %v8803_v24 = vadd.f32 %v1061_v16, %v1060_v49  ;;  %v8825_v16 = vld [vmem:[%s6118_s11 + $0x618] sm:$0xff] }
 0x217   : > { %13891 = vst [vmem:[#allocation398_spill] sm:$0xff] %v8739_v42  ;;  %13893 = vst [vmem:[#allocation269_spill] sm:$0xff] %v8744_v5  ;;  %v8843_v5 = vld [vmem:[%s6118_s11 + $0x630] sm:$0xff] }
 0x218   : > { %13895 = vst [vmem:[#allocation276_spill] sm:$0xff] %v8757_v45  ;;  %13896 = vst [vmem:[#allocation399_spill] sm:$0xff] %v8761_v2  ;;  %v13904_v2 = vld [vmem:[#allocation182_spill] sm:$0xff]  ;;  %v8782_v27 = vpop.xlane.xlu0 %865 }
 0x219   : > { %13897 = vst [vmem:[#allocation400_spill] sm:$0xff] %v8764_v60  ;;  %13899 = vst [vmem:[#allocation278_spill] sm:$0xff] %v8769_v19  ;;  %v8780_v45 = vmul.f32 0.00390625, %v13904_v2  ;;  %v13915_v2 = vld [vmem:[#allocation303_spill] sm:$0xff] }
 0x21a   : > { %13901 = vst [vmem:[#allocation283_spill] sm:$0xff] %v8772_v28  ;;  %13903 = vst [vmem:[#allocation286_spill] sm:$0xff] %v8775_v61  ;;  %v8796_v61 = vld [vmem:[%s6118_s11 + $0x5e0] sm:$0xff]  ;;  %v8814_v36 = vmul.f32 0.00390625, %v13915_v2  ;;  %v8840_v49 = vpop.xlane.xlu1 %874  ;;  %v8848_v19 = vld [vmem:[%s6118_s11 + $0x638] sm:$0xff]  ;;  %v8870_v2 = vmul.f32 %v8269_v10, %v8269_v10  ;;  %v8898_v10 = vmul.f32 0.00390625, %v8181_v29  ;;  %v1066_v29 = vmul.f32 %v8645_v23, %v8645_v23 }
 0x21b   : > { %13905 = vst [vmem:[#allocation182_spill] sm:$0xff] %v8780_v45  ;;  %13906 = vst [vmem:[#allocation401_spill] sm:$0xff] %v8782_v27  ;;  %v8817_v27 = vadd.f32 %v1059_v43, %v1058_v7  ;;  %v13923_v7 = vld [vmem:[#allocation292_spill] sm:$0xff]  ;;  %v8854_v43 = vadd.f32 %v1065_v22, %v1064_v14  ;;  %v8874_v14 = vmul.f32 %v8290_v38, %v8290_v38  ;;  %v8877_v22 = vld [vmem:[%s6118_s11 + $0x650] sm:$0xff] }
 0x21c   : > { %13907 = vst [vmem:[#allocation402_spill] sm:$0xff] %v8791_v57  ;;  %13908 = vst [vmem:[#allocation403_spill] sm:$0xff] %v8796_v61  ;;  %1339 = vadd.xlane.f32.xlu0 %v13923_v7  ;;  %v8856_v7 = vadd.f32 %v1063_v32, %v1062_v21  ;;  %v8882_v32 = vld [vmem:[%s6118_s11 + $0x658] sm:$0xff]  ;;  %v13943_v45 = vld [vmem:[#allocation317_spill] sm:$0xff]  ;;  %v8932_v23 = vmul.f32 %v8318_v20, %v8318_v20 }
 0x21d   : > { %13910 = vst [vmem:[#allocation293_spill] sm:$0xff] %v8801_v47  ;;  %13911 = vst [vmem:[#allocation404_spill] sm:$0xff] %v8803_v24  ;;  %v8864_v24 = vld [vmem:[%s6118_s11 + $0x628] sm:$0xff]  ;;  %v13937_v38 = vld [vmem:[#allocation294_spill] sm:$0xff] }
 0x21e   : > { %13912 = vst [vmem:[#allocation405_spill] sm:$0xff] %v8806_v34  ;;  %13914 = vst [vmem:[#allocation300_spill] sm:$0xff] %v8811_v50  ;;  %v8892_v47 = vld [vmem:[%s6118_s11 + $0x648] sm:$0xff]  ;;  %1348 = vadd.xlane.f32.xlu1 %v13937_v38  ;;  %v13939_v21 = vld [vmem:[#allocation310_spill] sm:$0xff]  ;;  %v8904_v28 = vpop.xlane.xlu1 %880  ;;  %v1069_v50 = vmul.f32 %v8640_v41, %v8640_v41  ;;  %v8938_v41 = vmul.f32 0.00390625, %v8292_v58 }
 0x21f   : > { %13916 = vst [vmem:[#allocation303_spill] sm:$0xff] %v8814_v36  ;;  %13918 = vst [vmem:[#allocation287_spill] sm:$0xff] %v8817_v27  ;;  %v8852_v27 = vpop.xlane.xlu0 %871  ;;  %v8911_v36 = vmul.f32 0.00390625, %v13943_v45  ;;  %v1072_v45 = vmul.f32 %v8663_v9, %v8663_v9  ;;  %v1070_v9 = vmul.f32 %v8677_v54, %v8677_v54  ;;  %v8966_v20 = vld [vmem:[%s6118_s11 + $0x668] sm:$0xff]  ;;  %v8971_v58 = vld [vmem:[%s6118_s11 + $0x690] sm:$0xff] }
 0x220   : > { %13919 = vst [vmem:[#allocation406_spill] sm:$0xff] %v8820_v63  ;;  %13920 = vst [vmem:[#allocation407_spill] sm:$0xff] %v8825_v16  ;;  %v8976_v54 = vld [vmem:[%s6118_s11 + $0x698] sm:$0xff] }
 0x221   : > { %13921 = vst [vmem:[#allocation408_spill] sm:$0xff] %v8830_v52  ;;  %13922 = vst [vmem:[#allocation409_spill] sm:$0xff] %v8835_v35 }
 0x222   : > { %13924 = vst [vmem:[#allocation292_spill] sm:$0xff] %v8840_v49  ;;  %13925 = vst [vmem:[#allocation410_spill] sm:$0xff] %v8843_v5  ;;  %v8859_v49 = vld [vmem:[%s6118_s11 + $0x620] sm:$0xff] }
 0x223   : > { %13926 = vst [vmem:[#allocation411_spill] sm:$0xff] %v8848_v19  ;;  %13927 = vst [vmem:[#allocation412_spill] sm:$0xff] %v8852_v27  ;;  %v8887_v27 = vld [vmem:[%s6118_s11 + $0x640] sm:$0xff]  ;;  %v8913_v38 = vpop.xlane.xlu0 %877 }
 0x224   : > { %13928 = vst [vmem:[#allocation413_spill] sm:$0xff] %v8856_v7  ;;  %13929 = vst [vmem:[#allocation414_spill] sm:$0xff] %v8859_v49  ;;  %v13973_v7 = vld [vmem:[#allocation311_spill] sm:$0xff] }
 0x225   : > { %13930 = vst [vmem:[#allocation415_spill] sm:$0xff] %v8864_v24  ;;  %13931 = vst [vmem:[#allocation416_spill] sm:$0xff] %v8870_v2  ;;  %v13941_v2 = vld [vmem:[#allocation297_spill] sm:$0xff] }
 0x226   : > { %13932 = vst [vmem:[#allocation417_spill] sm:$0xff] %v8874_v14  ;;  %13933 = vst [vmem:[#allocation418_spill] sm:$0xff] %v8877_v22  ;;  %v8901_v14 = vmul.f32 0.00390625, %v13939_v21  ;;  %1345 = vadd.xlane.f32.xlu0 %v13941_v2  ;;  %v1067_v2 = vmul.f32 %v8658_v46, %v8658_v46  ;;  %v8921_v21 = vmul.f32 %v8301_v39, %v8301_v39  ;;  %v8935_v46 = vmul.f32 0.00390625, %v8281_v51  ;;  %v8946_v39 = vld [vmem:[%s6118_s11 + $0x670] sm:$0xff]  ;;  %v8951_v51 = vld [vmem:[%s6118_s11 + $0x678] sm:$0xff] }
 0x227   : > { %13934 = vst [vmem:[#allocation419_spill] sm:$0xff] %v8882_v32  ;;  %13935 = vst [vmem:[#allocation420_spill] sm:$0xff] %v8887_v27 }
 0x228   : > { %13936 = vst [vmem:[#allocation421_spill] sm:$0xff] %v8892_v47  ;;  %13938 = vst [vmem:[#allocation294_spill] sm:$0xff] %v8898_v10  ;;  %v1076_v10 = vmul.f32 %v8696_v44, %v8696_v44 }
 0x229   : > { %13940 = vst [vmem:[#allocation310_spill] sm:$0xff] %v8901_v14  ;;  %13942 = vst [vmem:[#allocation297_spill] sm:$0xff] %v8904_v28  ;;  %v13947_v28 = vld [vmem:[#allocation320_spill] sm:$0xff] }
 0x22a   : > { %13944 = vst [vmem:[#allocation317_spill] sm:$0xff] %v8911_v36  ;;  %13945 = vst [vmem:[#allocation422_spill] sm:$0xff] %v8913_v38  ;;  %v8924_v30 = vmul.f32 0.00390625, %v13947_v28  ;;  %v1073_v38 = vmul.f32 %v8668_v3, %v8668_v3  ;;  %v13952_v28 = vld [vmem:[#allocation306_spill] sm:$0xff]  ;;  %v1071_v3 = vmul.f32 %v8682_v8, %v8682_v8  ;;  %v8961_v8 = vpop.xlane.xlu1 %886  ;;  %v8990_v14 = vld [vmem:[%s6118_s11 + $0x688] sm:$0xff] }
 0x22b   : > { %13946 = vst [vmem:[#allocation423_spill] sm:$0xff] %v8921_v21  ;;  %13949 = vst [vmem:[#allocation424_spill] sm:$0xff] %v8932_v23  ;;  %1354 = vadd.xlane.f32.xlu1 %v13952_v28  ;;  %v8956_v28 = vld [vmem:[%s6118_s11 + $0x660] sm:$0xff]  ;;  %v8963_v21 = vadd.f32 %v1069_v50, %v1068_v31  ;;  %v8982_v50 = vadd.f32 %v1067_v2, %v1066_v29  ;;  %v9005_v2 = vld [vmem:[%s6118_s11 + $0x6b8] sm:$0xff]  ;;  %v9043_v29 = vmul.f32 %v8351_v33, %v8351_v33 }
 0x22c   : > { %13948 = vst [vmem:[#allocation320_spill] sm:$0xff] %v8924_v30  ;;  %13950 = vst [vmem:[#allocation425_spill] sm:$0xff] %v8935_v46  ;;  %v13956_v23 = vld [vmem:[#allocation307_spill] sm:$0xff]  ;;  %v9063_v46 = vmul.f32 0.00390625, %v8450_v53 }
 0x22d   : > { %13951 = vst [vmem:[#allocation426_spill] sm:$0xff] %v8938_v41  ;;  %13953 = vst [vmem:[#allocation306_spill] sm:$0xff] %v8946_v39  ;;  %1351 = vadd.xlane.f32.xlu0 %v13956_v23  ;;  %v8985_v31 = vld [vmem:[%s6118_s11 + $0x680] sm:$0xff]  ;;  %v9000_v23 = vld [vmem:[%s6118_s11 + $0x6b0] sm:$0xff] }
 0x22e   : > { %13954 = vst [vmem:[#allocation427_spill] sm:$0xff] %v8951_v51  ;;  %13955 = vst [vmem:[#allocation428_spill] sm:$0xff] %v8956_v28  ;;  %v9071_v30 = vld [vmem:[%s6118_s11 + $0x6c0] sm:$0xff] }
 0x22f   : > { %13957 = vst [vmem:[#allocation307_spill] sm:$0xff] %v8961_v8  ;;  %13958 = vst [vmem:[#allocation429_spill] sm:$0xff] %v8963_v21  ;;  %v8980_v8 = vpop.xlane.xlu0 %883  ;;  %v8997_v21 = vadd.f32 %v1073_v38, %v1072_v45  ;;  %v9015_v38 = vadd.f32 %v1071_v3, %v1070_v9  ;;  %v9018_v45 = vld [vmem:[%s6118_s11 + $0x6a8] sm:$0xff]  ;;  %v1077_v9 = vmul.f32 %v8701_v62, %v8701_v62  ;;  %v9033_v3 = vmul.f32 0.00390625, %v8390_v55  ;;  %v13981_v55 = vld [vmem:[#allocation315_spill] sm:$0xff] }
 0x230   : > { %13959 = vst [vmem:[#allocation430_spill] sm:$0xff] %v8966_v20  ;;  %13960 = vst [vmem:[#allocation431_spill] sm:$0xff] %v8971_v58  ;;  %v8995_v58 = vmul.f32 0.00390625, %v8334_v6  ;;  %v13969_v6 = vld [vmem:[#allocation198_spill] sm:$0xff]  ;;  %v13984_v41 = vld [vmem:[#allocation323_spill] sm:$0xff] }
 0x231   : > { %13961 = vst [vmem:[#allocation432_spill] sm:$0xff] %v8976_v54  ;;  %13962 = vst [vmem:[#allocation433_spill] sm:$0xff] %v8980_v8  ;;  %v9010_v8 = vld [vmem:[%s6118_s11 + $0x6a0] sm:$0xff]  ;;  %1360 = vadd.xlane.f32.xlu1 %v13969_v6  ;;  %1357 = vadd.xlane.f32.xlu0 %v13973_v7  ;;  %v1075_v7 = vmul.f32 %v8717_v17, %v8717_v17  ;;  %v9112_v17 = vld [vmem:[%s6118_s11 + $0x710] sm:$0xff] }
 0x232   : > { %13963 = vst [vmem:[#allocation434_spill] sm:$0xff] %v8985_v31  ;;  %13964 = vst [vmem:[#allocation435_spill] sm:$0xff] %v8990_v14  ;;  %v9058_v31 = vld [vmem:[%s6118_s11 + $0x6d8] sm:$0xff] }
 0x233   : > { %13965 = vst [vmem:[#allocation436_spill] sm:$0xff] %v8995_v58  ;;  %13966 = vst [vmem:[#allocation437_spill] sm:$0xff] %v9000_v23  ;;  %v13971_v23 = vld [vmem:[#allocation171_spill] sm:$0xff]  ;;  %v9035_v6 = vpop.xlane.xlu0 %889  ;;  %v9085_v58 = vmul.f32 %v8376_v15, %v8376_v15 }
 0x234   : > { %13967 = vst [vmem:[#allocation438_spill] sm:$0xff] %v9005_v2  ;;  %13968 = vst [vmem:[#allocation439_spill] sm:$0xff] %v9010_v8  ;;  %v9023_v14 = vmul.f32 0.00390625, %v13971_v23  ;;  %v9026_v2 = vpop.xlane.xlu1 %892  ;;  %v1074_v23 = vmul.f32 %v8706_v12, %v8706_v12  ;;  %v1081_v8 = vmul.f32 %v8727_v18, %v8727_v18  ;;  %v9076_v18 = vld [vmem:[%s6118_s11 + $0x6c8] sm:$0xff] }
 0x235   : > { %13970 = vst [vmem:[#allocation198_spill] sm:$0xff] %v9018_v45  ;;  %13974 = vst [vmem:[#allocation311_spill] sm:$0xff] %v9026_v2  ;;  %v9046_v2 = vld [vmem:[%s6118_s11 + $0x6d0] sm:$0xff]  ;;  %v9051_v45 = vmul.f32 0.00390625, %v8402_v1  ;;  %1366 = vadd.xlane.f32.xlu1 %v13981_v55  ;;  %v1078_v1 = vmul.f32 %v8732_v0, %v8732_v0  ;;  %1363 = vadd.xlane.f32.xlu0 %v13984_v41  ;;  %v9105_v0 = vld [vmem:[%s6118_s11 + $0x6e8] sm:$0xff] }
 0x236   : > { %13972 = vst [vmem:[#allocation171_spill] sm:$0xff] %v9023_v14  ;;  %13975 = vst [vmem:[#allocation440_spill] sm:$0xff] %v9033_v3  ;;  %v9097_v14 = vadd.f32 %v1075_v7, %v1074_v23  ;;  %v9117_v23 = vmul.f32 0.00390625, %v8452_v56  ;;  %v13991_v7 = vld [vmem:[#allocation68_spill] sm:$0xff]  ;;  %v14414_v12 = vld [vmem:[#allocation273_spill] sm:$0xff] }
 0x237   : > { %13976 = vst [vmem:[#allocation441_spill] sm:$0xff] %v9035_v6  ;;  %13977 = vst [vmem:[#allocation442_spill] sm:$0xff] %v9046_v2  ;;  %v1080_v6 = vmul.f32 %v8722_v25, %v8722_v25  ;;  %v1079_v2 = vmul.f32 %v8739_v42, %v8739_v42  ;;  %v9088_v42 = vld [vmem:[%s6118_s11 + $0x6f0] sm:$0xff] }
 0x238   : > { %13978 = vst [vmem:[#allocation443_spill] sm:$0xff] %v9051_v45  ;;  %13979 = vst [vmem:[#allocation444_spill] sm:$0xff] %v9058_v31  ;;  %v1163_v55 = vpop.xlane.xlu1 %1162  ;;  %v9081_v31 = vadd.f32 %v1077_v9, %v1076_v10  ;;  %v9100_v10 = vld [vmem:[%s6118_s11 + $0x6e0] sm:$0xff] }
 0x239   : > { %13980 = vst [vmem:[#allocation445_spill] sm:$0xff] %v9063_v46  ;;  %13982 = vst [vmem:[#allocation315_spill] sm:$0xff] %v9071_v30  ;;  %v9093_v30 = vld [vmem:[%s6118_s11 + $0x6f8] sm:$0xff]  ;;  %v1687_v41 = vmul.f32 0.00390625, %v1163_v55  ;;  %v9109_v25 = vadd.f32 %v1081_v8, %v1080_v6  ;;  %v9121_v9 = vadd.f32 %v1079_v2, %v1078_v1  ;;  %v9129_v8 = vmul.f32 0.00390625, %v8508_v13  ;;  %v13996_v55 = vld [vmem:[#allocation329_spill] sm:$0xff] }
 0x23a   : > { %13983 = vst [vmem:[#allocation446_spill] sm:$0xff] %v9076_v18  ;;  %13985 = vst [vmem:[#allocation323_spill] sm:$0xff] %v9088_v42  ;;  %v1160_v18 = vpop.xlane.xlu0 %1159  ;;  %v13995_v6 = vld [vmem:[#allocation63_spill] sm:$0xff]  ;;  %1369 = vadd.xlane.f32.xlu0 %v13996_v55  ;;  %v1085_v13 = vmul.f32 %v8791_v57, %v8791_v57  ;;  %v1082_v55 = vmul.f32 %v8796_v61, %v8796_v61  ;;  %v13998_v45 = vld [vmem:[#allocation60_spill] sm:$0xff] }
 0x23b   : > { %13986 = vst [vmem:[#allocation447_spill] sm:$0xff] %v9093_v30  ;;  %13987 = vst [vmem:[#allocation448_spill] sm:$0xff] %v9100_v10  ;;  %v1686_v42 = vmul.f32 0.00390625, %v1160_v18  ;;  %v1951_v53 = vsub.f32 %v1687_v41, %v13991_v7  ;;  %v13992_v30 = vld [vmem:[#allocation325_spill] sm:$0xff]  ;;  %v9124_v10 = vld [vmem:[%s6118_s11 + $0x718] sm:$0xff]  ;;  %v9135_v41 = vmul.f32 %v8379_v37, %v8379_v37  ;;  %v1084_v7 = vmul.f32 %v8764_v60, %v8764_v60 }
 0x23c   : > { %13988 = vst [vmem:[#allocation449_spill] sm:$0xff] %v9105_v0  ;;  %13989 = vst [vmem:[#allocation450_spill] sm:$0xff] %v9112_v17  ;;  %1372 = vadd.xlane.f32.xlu1 %v13992_v30  ;;  %v1169_v56 = vpop.xlane.xlu1 %1168  ;;  %v1093_v17 = vmul.f32 %v8848_v19, %v8848_v19  ;;  %v13997_v0 = vld [vmem:[#allocation69_spill] sm:$0xff]  ;;  %v9176_v19 = vmul.f32 0.00390625, %v8510_v11  ;;  %v1095_v11 = vmul.f32 %v8892_v47, %v8892_v47 }
 0x23d   : > { %13990 = vst [vmem:[#allocation451_spill] sm:$0xff] %v9117_v23  ;;  %13993 = vst [vmem:[#allocation68_spill] sm:$0xff] %v9124_v10  ;;  %v1950_v36 = vsub.f32 %v1686_v42, %v13995_v6  ;;  %v9137_v30 = vmax.f32 %v1951_v53, 0.0  ;;  %v1689_v2 = vmul.f32 0.00390625, %v1169_v56  ;;  %v1083_v6 = vmul.f32 %v8806_v34, %v8806_v34  ;;  %v14276_v23 = vld [vmem:[#allocation229_spill] sm:$0xff] }
 0x23e   : > { %13994 = vst [vmem:[#allocation325_spill] sm:$0xff] %v9129_v8  ;;  %v1166_v1 = vpop.xlane.xlu0 %1165  ;;  %v1088_v53 = vmul.f32 %v8820_v63, %v8820_v63  ;;  %v1089_v56 = vmul.f32 %v8825_v16, %v8825_v16  ;;  %1375 = vadd.xlane.f32.xlu0 %v8382_v48  ;;  %v1087_v10 = vmul.f32 %v8835_v35, %v8835_v35  ;;  %13999 = vst [vmem:[#allocation63_spill] sm:$0xff] %v9176_v19 }
 0x23f   : > { %v9143_v18 = vmax.f32 %v1950_v36, 0.0  ;;  %v1688_v42 = vmul.f32 0.00390625, %v1166_v1  ;;  %4958 = vrsqrt.f32 %v9137_v30  ;;  %v1086_v36 = vmul.f32 %v8830_v52, %v8830_v52 }
 0x240   : > { %1378 = vadd.xlane.f32.xlu1 %v8371_v26  ;;  %v1175_v1 = vpop.xlane.xlu1 %1174  ;;  %v1092_v26 = vmul.f32 %v8843_v5, %v8843_v5  ;;  %v1953_v46 = vsub.f32 %v1689_v2, %v13997_v0  ;;  %v1090_v63 = vmul.f32 %v8859_v49, %v8859_v49  ;;  %v1091_v34 = vmul.f32 %v8864_v24, %v8864_v24  ;;  %v14000_v2 = vld [vmem:[#allocation76_spill] sm:$0xff] }
 0x241   : > { %4960 = vrsqrt.f32 %v9143_v18  ;;  %v1952_v3 = vsub.f32 %v1688_v42, %v13998_v45  ;;  %v1691_v16 = vmul.f32 0.00390625, %v1175_v1  ;;  %v1096_v35 = vmul.f32 %v8877_v22, %v8877_v22  ;;  %v14002_v24 = vld [vmem:[#allocation184_spill] sm:$0xff] }
 0x242   : > { %v1172_v52 = vpop.xlane.xlu0 %1171  ;;  %v1097_v5 = vmul.f32 %v8882_v32, %v8882_v32  ;;  %v9178_v0 = vmax.f32 %v1953_v46, 0.0  ;;  %1381 = vadd.xlane.f32.xlu0 %v14002_v24  ;;  %v9186_v22 = vadd.f32 %v1085_v13, %v1084_v7  ;;  %v1094_v32 = vmul.f32 %v8887_v27, %v8887_v27 }
 0x243   : > { %v1690_v48 = vmul.f32 0.00390625, %v1172_v52  ;;  %v9180_v45 = vmax.f32 %v1952_v3, 0.0  ;;  %v1955_v42 = vsub.f32 %v1691_v16, %v14000_v2  ;;  %v14001_v52 = vld [vmem:[#allocation79_spill] sm:$0xff]  ;;  %v9193_v3 = vadd.f32 %v1083_v6, %v1082_v55 }
 0x244   : > { %1384 = vadd.xlane.f32.xlu1 %v8392_v59  ;;  %v1181_v49 = vpop.xlane.xlu1 %1180  ;;  %4962 = vrsqrt.f32 %v9178_v0  ;;  %v9195_v16 = vadd.f32 %v1089_v56, %v1088_v53  ;;  %v9197_v59 = vadd.f32 %v1087_v10, %v1086_v36  ;;  %v9200_v24 = vadd.f32 %v1093_v17, %v1092_v26  ;;  %v14005_v36 = vld [vmem:[#allocation351_spill] sm:$0xff] }
 0x245   : > { %v1954_v1 = vsub.f32 %v1690_v48, %v14001_v52  ;;  %4964 = vrsqrt.f32 %v9180_v45  ;;  %v9202_v7 = vadd.f32 %v1091_v34, %v1090_v63  ;;  %v9204_v13 = vadd.f32 %v1097_v5, %v1096_v35 }
 0x246   : > { %v1178_v46 = vpop.xlane.xlu0 %1177  ;;  %v9206_v48 = vmax.f32 %v1955_v42, 0.0  ;;  %v1693_v52 = vmul.f32 0.00390625, %v1181_v49  ;;  %vm2223_vm0 = vcmp.eq.f32.partialorder %v9137_v30, inf  ;;  %1387 = vadd.xlane.f32.xlu0 %v8479_v40  ;;  %v9213_v55 = vadd.f32 %v1095_v11, %v1094_v32  ;;  %v14003_v49 = vld [vmem:[#allocation84_spill] sm:$0xff]  ;;  %v14004_v32 = vld [vmem:[#allocation85_spill] sm:$0xff] }
 0x247   : > { %v9208_v2 = vmax.f32 %v1954_v1, 0.0  ;;  %v1692_v47 = vmul.f32 0.00390625, %v1178_v46  ;;  %v1100_v34 = vmul.f32 %v8946_v39, %v8946_v39  ;;  %v1101_v17 = vmul.f32 %v8951_v51, %v8951_v51  ;;  %v14006_v1 = vld [vmem:[#allocation352_spill] sm:$0xff] }
 0x248   : > { %1390 = vadd.xlane.f32.xlu1 %v8477_v4  ;;  %v1187_v10 = vpop.xlane.xlu1 %1186  ;;  %vm2225_vm1 = vcmp.eq.f32.partialorder %v9137_v30, 0.0  ;;  %v2226_v5 = vand.u32 2147483648, %v9137_v30  ;;  %vm2216_vm2 = vcmp.eq.f32.partialorder %v9143_v18, inf  ;;  %4966 = vrsqrt.f32 %v9206_v48 }
 0x249   : > { %vm2218_vm3 = vcmp.eq.f32.partialorder %v9143_v18, 0.0  ;;  %v2219_v40 = vand.u32 2147483648, %v9143_v18  ;;  %4968 = vrsqrt.f32 %v9208_v2  ;;  %v1098_v63 = vmul.f32 %v8956_v28, %v8956_v28 }
 0x24a   : > { %v1184_v4 = vpop.xlane.xlu0 %1183  ;;  %v1957_v35 = vsub.f32 %v1693_v52, %v14003_v49  ;;  %v1956_v6 = vsub.f32 %v1692_v47, %v14004_v32  ;;  %v1695_v53 = vmul.f32 0.00390625, %v1187_v10  ;;  %vm2237_vm4 = vcmp.eq.f32.partialorder %v9178_v0, inf  ;;  %1393 = vadd.xlane.f32.xlu0 %v14006_v1 }
 0x24b   : > { %v1694_v56 = vmul.f32 0.00390625, %v1184_v4  ;;  %v2240_v42 = vand.u32 2147483648, %v9178_v0  ;;  %v9234_v46 = vadd.f32 %v1101_v17, %v1100_v34  ;;  %v1099_v28 = vmul.f32 %v8966_v20, %v8966_v20  ;;  %v14007_v34 = vld [vmem:[#allocation92_spill] sm:$0xff] }
 0x24c   : > { %1396 = vadd.xlane.f32.xlu1 %v14005_v36  ;;  %v4959_v26 = vpop.eup %4958  ;;  %v1193_v11 = vpop.xlane.xlu1 %1192  ;;  %vm2239_vm5 = vcmp.eq.f32.partialorder %v9178_v0, 0.0  ;;  %vm2230_vm6 = vcmp.eq.f32.partialorder %v9180_v45, inf  ;;  %v9241_v10 = vmax.f32 %v1957_v35, 0.0  ;;  %v9243_v4 = vmax.f32 %v1956_v6, 0.0  ;;  %v14008_v36 = vld [vmem:[#allocation95_spill] sm:$0xff] }
 0x24d   : > { %v2222_v47 = vmul.f32 %v4959_v26, %v9137_v30  ;;  %vm2232_vm7 = vcmp.eq.f32.partialorder %v9180_v45, 0.0  ;;  %v1959_v17 = vsub.f32 %v1695_v53, %v14007_v34  ;;  %v1958_v1 = vsub.f32 %v1694_v56, %v14008_v36  ;;  %v14009_v6 = vld [vmem:[#allocation367_spill] sm:$0xff] }
 0x24e   : > { %v4961_v52 = vpop.eup %4960  ;;  %v1190_v49 = vpop.xlane.xlu0 %1189  ;;  %v2233_v20 = vand.u32 2147483648, %v9180_v45  ;;  %4970 = vrsqrt.f32 %v9241_v10  ;;  %v1697_v35 = vmul.f32 0.00390625, %v1193_v11  ;;  %v14010_v34 = vld [vmem:[#allocation371_spill] sm:$0xff]  ;;  %vm2251_vm8 = vcmp.eq.f32.partialorder %v9206_v48, inf }
 0x24f   : > { %v2215_v32 = vmul.f32 %v4961_v52, %v9143_v18  ;;  %v2224_v26 = vsel %vm2223_vm0, %v9137_v30, %v2222_v47  ;;  %4972 = vrsqrt.f32 %v9243_v4  ;;  %v1696_v56 = vmul.f32 0.00390625, %v1190_v49  ;;  %1399 = vadd.xlane.f32.xlu0 %v14010_v34  ;;  %v14014_v34 = vld [vmem:[#allocation287_spill] sm:$0xff] }
 0x250   : > { %1402 = vadd.xlane.f32.xlu1 %v14009_v6  ;;  %v2227_v52 = vsel %vm2225_vm1, %v2226_v5, %v2224_v26  ;;  %v9265_v11 = vadd.f32 %v1099_v28, %v1098_v63  ;;  %vm2253_vm9 = vcmp.eq.f32.partialorder %v9206_v48, 0.0  ;;  %v9268_v5 = vmax.f32 %v1959_v17, 0.0 }
 0x251   : > { %v2217_v53 = vsel %vm2216_vm2, %v9143_v18, %v2215_v32  ;;  %v3139_v47 = vadd.f32 1e-10, %v2227_v52  ;;  %v4963_v6 = vpop.eup %4962  ;;  %v9270_v32 = vmax.f32 %v1958_v1, 0.0  ;;  %v2254_v52 = vand.u32 2147483648, %v9206_v48  ;;  %v14011_v18 = vld [vmem:[#allocation404_spill] sm:$0xff] }
 0x252   : > { %v2220_v36 = vsel %vm2218_vm3, %v2219_v40, %v2217_v53  ;;  %v4965_v26 = vpop.eup %4964  ;;  %v2236_v49 = vmul.f32 %v4963_v6, %v9178_v0  ;;  %vm2244_vm10 = vcmp.eq.f32.partialorder %v9208_v2, inf  ;;  %v14012_v40 = vld [vmem:[#allocation100_spill] sm:$0xff]  ;;  %v14013_v53 = vld [vmem:[#allocation101_spill] sm:$0xff]  ;;  %vm2246_vm11 = vcmp.eq.f32.partialorder %v9208_v2, 0.0 }
 0x253   : > { %v3138_v30 = vadd.f32 1e-10, %v2220_v36  ;;  %4974 = vrcp.f32 %v3139_v47  ;;  %v2229_v28 = vmul.f32 %v4965_v26, %v9180_v45  ;;  %v1961_v63 = vsub.f32 %v1697_v35, %v14012_v40  ;;  %1405 = vadd.xlane.f32.xlu0 %v14014_v34  ;;  %v1196_v34 = vpop.xlane.xlu0 %1195 }
 0x254   : > { %1408 = vadd.xlane.f32.xlu1 %v14011_v18  ;;  %v1960_v17 = vsub.f32 %v1696_v56, %v14013_v53  ;;  %v2238_v1 = vsel %vm2237_vm4, %v9178_v0, %v2236_v49  ;;  %v2247_v47 = vand.u32 2147483648, %v9208_v2  ;;  %vm2265_vm12 = vcmp.eq.f32.partialorder %v9241_v10, inf }
 0x255   : > { %4976 = vrcp.f32 %v3138_v30  ;;  %v4967_v36 = vpop.eup %4966  ;;  %v2241_v6 = vsel %vm2239_vm5, %v2240_v42, %v2238_v1  ;;  %v2231_v35 = vsel %vm2230_vm6, %v9180_v45, %v2229_v28  ;;  %vm2267_vm13 = vcmp.eq.f32.partialorder %v9241_v10, 0.0  ;;  %v1199_v42 = vpop.xlane.xlu1 %1198  ;;  %v14015_v1 = vld [vmem:[#allocation413_spill] sm:$0xff] }
 0x256   : > { %4978 = vrsqrt.f32 %v9268_v5  ;;  %v4969_v56 = vpop.eup %4968  ;;  %v3141_v30 = vadd.f32 1e-10, %v2241_v6  ;;  %v2234_v26 = vsel %vm2232_vm7, %v2233_v20, %v2231_v35  ;;  %v2250_v49 = vmul.f32 %v4967_v36, %v9206_v48  ;;  %v14016_v35 = vld [vmem:[#allocation429_spill] sm:$0xff] }
 0x257   : > { %4980 = vrsqrt.f32 %v9270_v32  ;;  %v2268_v0 = vand.u32 2147483648, %v9241_v10  ;;  %v3140_v18 = vadd.f32 1e-10, %v2234_v26  ;;  %v2243_v28 = vmul.f32 %v4969_v56, %v9208_v2  ;;  %1411 = vadd.xlane.f32.xlu0 %v14015_v1 }
 0x258   : > { %1414 = vadd.xlane.f32.xlu1 %v8854_v43  ;;  %v9300_v40 = vmax.f32 %v1961_v63, 0.0  ;;  %v9302_v53 = vmax.f32 %v1960_v17, 0.0  ;;  %4982 = vrcp.f32 %v3141_v30  ;;  %v2252_v20 = vsel %vm2251_vm8, %v9206_v48, %v2250_v49 }
 0x259   : > { %vm2258_vm14 = vcmp.eq.f32.partialorder %v9243_v4, inf  ;;  %vm2260_vm15 = vcmp.eq.f32.partialorder %v9243_v4, 0.0  ;;  %4984 = vrcp.f32 %v3140_v18  ;;  %v2255_v43 = vsel %vm2253_vm9, %v2254_v52, %v2252_v20  ;;  %v1205_v26 = vpop.xlane.xlu1 %1204  ;;  %v14017_v18 = vld [vmem:[#allocation106_spill] sm:$0xff]  ;;  %v14018_v20 = vld [vmem:[#allocation109_spill] sm:$0xff] }
 0x25a   : > { %v2245_v45 = vsel %vm2244_vm10, %v9208_v2, %v2243_v28  ;;  %v1699_v63 = vmul.f32 0.00390625, %v1199_v42  ;;  %v3143_v17 = vadd.f32 1e-10, %v2255_v43  ;;  %4986 = vrsqrt.f32 %v9300_v40 }
 0x25b   : > { %v2248_v36 = vsel %vm2246_vm11, %v2247_v47, %v2245_v45  ;;  %v9318_v6 = vmul.f32 0.00390625, %v1196_v34  ;;  %v4971_v56 = vpop.eup %4970  ;;  %v2261_v48 = vand.u32 2147483648, %v9243_v4  ;;  %vm2279_vm0 = vcmp.eq.f32.partialorder %v9268_v5, inf  ;;  %1417 = vadd.xlane.f32.xlu0 %v8982_v50  ;;  %v14027_v34 = vld [vmem:[#allocation45_spill] sm:$0xff] }
 0x25c   : > { %1420 = vadd.xlane.f32.xlu1 %v14016_v35  ;;  %v3142_v30 = vadd.f32 1e-10, %v2248_v36  ;;  %4988 = vrsqrt.f32 %v9302_v53  ;;  %v4973_v52 = vpop.eup %4972  ;;  %v2264_v2 = vmul.f32 %v4971_v56, %v9241_v10  ;;  %vm2281_vm1 = vcmp.eq.f32.partialorder %v9268_v5, 0.0 }
 0x25d   : > { %4990 = vrcp.f32 %v3143_v17  ;;  %v2282_v47 = vand.u32 2147483648, %v9268_v5  ;;  %vm2272_vm2 = vcmp.eq.f32.partialorder %v9270_v32, inf  ;;  %v2257_v49 = vmul.f32 %v4973_v52, %v9243_v4  ;;  %v14020_v52 = vld [vmem:[#allocation59_spill] sm:$0xff] }
 0x25e   : > { %4992 = vrcp.f32 %v3142_v30  ;;  %vm2274_vm3 = vcmp.eq.f32.partialorder %v9270_v32, 0.0  ;;  %v2275_v42 = vand.u32 2147483648, %v9270_v32  ;;  %v1963_v50 = vsub.f32 %v1699_v63, %v14017_v18  ;;  %v14019_v30 = vld [vmem:[#allocation48_spill] sm:$0xff] }
 0x25f   : > { %v2266_v28 = vsel %vm2265_vm12, %v9241_v10, %v2264_v2  ;;  %v1962_v43 = vsub.f32 %v9318_v6, %v14018_v20  ;;  %v2259_v63 = vsel %vm2258_vm14, %v9243_v4, %v2257_v49  ;;  %v9348_v35 = vmul.f32 0.00390625, %v1205_v26  ;;  %1423 = vadd.xlane.f32.xlu0 %v9015_v38  ;;  %v14025_v20 = vld [vmem:[#allocation53_spill] sm:$0xff] }
 0x260   : > { %1426 = vadd.xlane.f32.xlu1 %v8997_v21  ;;  %v4975_v45 = vpop.eup %4974  ;;  %v2269_v17 = vsel %vm2267_vm13, %v2268_v0, %v2266_v28  ;;  %v9346_v36 = vmax.f32 %v1963_v50, 0.0  ;;  %v14021_v6 = vsub.f32 %v14019_v30, %v14020_v52  ;;  %v14022_v21 = vld [vmem:[#allocation49_spill] sm:$0xff]  ;;  %v2262_v28 = vsel %vm2260_vm15, %v2261_v48, %v2259_v63  ;;  %v14024_v50 = vld [vmem:[#allocation44_spill] sm:$0xff]  ;;  %v1202_v30 = vpop.xlane.xlu0 %1201 }
 0x261   : > { %v14023_v18 = vsub.f32 %v14022_v21, %v14020_v52  ;;  %v3145_v0 = vadd.f32 1e-10, %v2269_v17  ;;  %v14026_v26 = vsub.f32 %v14024_v50, %v14025_v20  ;;  %v14028_v38 = vsub.f32 %v14027_v34, %v14025_v20  ;;  %v14029_v52 = vld [vmem:[#allocation327_spill] sm:$0xff]  ;;  %v14030_v17 = vld [vmem:[#allocation328_spill] sm:$0xff]  ;;  %v14033_v50 = vld [vmem:[#allocation50_spill] sm:$0xff] }
 0x262   : > { %v4977_v56 = vpop.eup %4976  ;;  %v3670_v2 = vmul.f32 %v4975_v45, %v14021_v6  ;;  %v3144_v39 = vadd.f32 1e-10, %v2262_v28  ;;  %4994 = vrsqrt.f32 %v9346_v36  ;;  %vm2293_vm4 = vcmp.eq.f32.partialorder %v9300_v40, inf  ;;  %v14034_v20 = vld [vmem:[#allocation54_spill] sm:$0xff] }
 0x263   : > { %v3671_v10 = vmul.f32 %v4975_v45, %v14023_v18  ;;  %v4979_v49 = vpop.eup %4978  ;;  %v3668_v1 = vmul.f32 %v4977_v56, %v14026_v26  ;;  %v3669_v51 = vmul.f32 %v4977_v56, %v14028_v38  ;;  %4996 = vrcp.f32 %v3145_v0  ;;  %1429 = vadd.xlane.f32.xlu0 %v9097_v14  ;;  %v14031_v56 = vld [vmem:[#allocation330_spill] sm:$0xff]  ;;  %v14032_v18 = vld [vmem:[#allocation335_spill] sm:$0xff] }
 0x264   : > { %v4981_v6 = vpop.eup %4980  ;;  %v3945_v45 = vmul.f32 %v14029_v52, %v3670_v2  ;;  %v2278_v4 = vmul.f32 %v4979_v49, %v9268_v5  ;;  %1432 = vadd.xlane.f32.xlu1 %v9081_v31  ;;  %4998 = vrcp.f32 %v3144_v39  ;;  %vm2286_vm5 = vcmp.eq.f32.partialorder %v9302_v53, inf }
 0x265   : > { %v3946_v21 = vmul.f32 %v14030_v17, %v3671_v10  ;;  %v3943_v48 = vmul.f32 %v14029_v52, %v3668_v1  ;;  %v3944_v63 = vmul.f32 %v14030_v17, %v3669_v51  ;;  %v2271_v34 = vmul.f32 %v4981_v6, %v9270_v32  ;;  %v4983_v51 = vpop.eup %4982 }
 0x266   : > { %v4220_v2 = vadd.f32 %v14031_v56, %v3945_v45  ;;  %v2280_v31 = vsel %vm2279_vm0, %v9268_v5, %v2278_v4  ;;  %vm2295_vm6 = vcmp.eq.f32.partialorder %v9300_v40, 0.0  ;;  %vm2288_vm7 = vcmp.eq.f32.partialorder %v9302_v53, 0.0  ;;  %v4985_v49 = vpop.eup %4984  ;;  %v14036_v5 = vld [vmem:[#allocation51_spill] sm:$0xff]  ;;  %v14038_v4 = vld [vmem:[#allocation42_spill] sm:$0xff] }
 0x267   : > { %v4221_v10 = vadd.f32 %v14032_v18, %v3946_v21  ;;  %v9383_v39 = vmul.f32 0.00390625, %v1202_v30  ;;  %v4218_v1 = vadd.f32 %v14031_v56, %v3943_v48  ;;  %v4219_v0 = vadd.f32 %v14032_v18, %v3944_v63  ;;  %v4987_v21 = vpop.eup %4986  ;;  %v14039_v48 = vld [vmem:[#allocation52_spill] sm:$0xff]  ;;  %1435 = vadd.xlane.f32.xlu0 %v9121_v9 }
 0x268   : > { %v2283_v14 = vsel %vm2281_vm1, %v2282_v47, %v2280_v31  ;;  %v2273_v28 = vsel %vm2272_vm2, %v9270_v32, %v2271_v34  ;;  %4484 = vst [vmem:[%s9394_s23 + $0x10] sm:$0xff] %v4220_v2  ;;  %v14035_v26 = vsub.f32 %v14033_v50, %v14034_v20  ;;  %v14037_v47 = vsub.f32 %v14036_v5, %v14034_v20  ;;  %v14041_v2 = vld [vmem:[#allocation43_spill] sm:$0xff] }
 0x269   : > { %4485 = vst [vmem:[%s9394_s23 + $0x18] sm:$0xff] %v4221_v10  ;;  %v3147_v6 = vadd.f32 1e-10, %v2283_v14  ;;  %v2276_v45 = vsel %vm2274_vm3, %v2275_v42, %v2273_v28  ;;  %1438 = vadd.xlane.f32.xlu1 %v9109_v25  ;;  %4482 = vst [vmem:[%s9394_s23] sm:$0xff] %v4218_v1  ;;  %v14040_v63 = vsub.f32 %v14038_v4, %v14039_v48  ;;  %v9415_v20 = vmax.f32 %v1962_v43, 0.0  ;;  %v4989_v32 = vpop.eup %4988 }
 0x26a   : > { %v3674_v38 = vmul.f32 %v4983_v51, %v14035_v26  ;;  %v3675_v30 = vmul.f32 %v4983_v51, %v14037_v47  ;;  %4483 = vst [vmem:[%s9394_s23 + $0x8] sm:$0xff] %v4219_v0  ;;  %v14042_v10 = vsub.f32 %v14041_v2, %v14039_v48  ;;  %v3146_v50 = vadd.f32 1e-10, %v2276_v45  ;;  %v4991_v1 = vpop.eup %4990  ;;  %v14043_v26 = vld [vmem:[#allocation55_spill] sm:$0xff]  ;;  %v14048_v48 = vld [vmem:[#allocation57_spill] sm:$0xff] }
 0x26b   : > { %v3672_v34 = vmul.f32 %v4985_v49, %v14040_v63  ;;  %5000 = vrcp.f32 %v3147_v6  ;;  %v2292_v51 = vmul.f32 %v4987_v21, %v9300_v40  ;;  %vm2307_vm8 = vcmp.eq.f32.partialorder %v9346_v36, inf  ;;  %v4993_v14 = vpop.eup %4992  ;;  %v14049_v63 = vld [vmem:[#allocation65_spill] sm:$0xff]  ;;  %1441 = vadd.xlane.f32.xlu0 %v9193_v3 }
 0x26c   : > { %v3673_v31 = vmul.f32 %v4985_v49, %v14042_v10  ;;  %v3949_v42 = vmul.f32 %v14029_v52, %v3674_v38  ;;  %v3950_v25 = vmul.f32 %v14030_v17, %v3675_v30  ;;  %5002 = vrcp.f32 %v3146_v50  ;;  %v14044_v38 = vld [vmem:[#allocation64_spill] sm:$0xff]  ;;  %v14051_v10 = vld [vmem:[#allocation58_spill] sm:$0xff] }
 0x26d   : > { %v3947_v0 = vmul.f32 %v14029_v52, %v3672_v34  ;;  %v2285_v9 = vmul.f32 %v4989_v32, %v9302_v53  ;;  %v14045_v5 = vsub.f32 %v14043_v26, %v14044_v38  ;;  %v14046_v30 = vld [vmem:[#allocation56_spill] sm:$0xff]  ;;  %1444 = vadd.xlane.f32.xlu1 %v9186_v22  ;;  %v14050_v34 = vsub.f32 %v14048_v48, %v14049_v63 }
 0x26e   : > { %v3948_v43 = vmul.f32 %v14030_v17, %v3673_v31  ;;  %v4224_v28 = vadd.f32 %v14031_v56, %v3949_v42  ;;  %v4225_v49 = vadd.f32 %v14032_v18, %v3950_v25  ;;  %v14047_v6 = vsub.f32 %v14046_v30, %v14044_v38 }
 0x26f   : > { %v3678_v47 = vmul.f32 %v4991_v1, %v14045_v5  ;;  %v4222_v21 = vadd.f32 %v14031_v56, %v3947_v0  ;;  %v3676_v2 = vmul.f32 %v4993_v14, %v14050_v34  ;;  %v14052_v31 = vsub.f32 %v14051_v10, %v14049_v63  ;;  %1447 = vadd.xlane.f32.xlu0 %v9197_v59  ;;  %v1208_v10 = vpop.xlane.xlu0 %1207  ;;  %v14061_v59 = vld [vmem:[#allocation75_spill] sm:$0xff] }
 0x270   : > { %v3679_v45 = vmul.f32 %v4991_v1, %v14047_v6  ;;  %v4223_v4 = vadd.f32 %v14032_v18, %v3948_v43  ;;  %4488 = vst [vmem:[%s9394_s23 + $0x30] sm:$0xff] %v4224_v28  ;;  %4489 = vst [vmem:[%s9394_s23 + $0x38] sm:$0xff] %v4225_v49  ;;  %v2294_v42 = vsel %vm2293_vm4, %v9300_v40, %v2292_v51  ;;  %v14053_v0 = vand.u32 2147483648, %v9300_v40  ;;  %v4995_v28 = vpop.eup %4994  ;;  %v14055_v6 = vld [vmem:[#allocation61_spill] sm:$0xff] }
 0x271   : > { %v3677_v50 = vmul.f32 %v4993_v14, %v14052_v31  ;;  %v3953_v32 = vmul.f32 %v14029_v52, %v3678_v47  ;;  %v2287_v25 = vsel %vm2286_vm5, %v9302_v53, %v2285_v9  ;;  %4486 = vst [vmem:[%s9394_s23 + $0x20] sm:$0xff] %v4222_v21  ;;  %v3951_v1 = vmul.f32 %v14029_v52, %v3676_v2  ;;  %v4997_v5 = vpop.eup %4996  ;;  %v1211_v2 = vpop.xlane.xlu1 %1210  ;;  %v14060_v31 = vld [vmem:[#allocation66_spill] sm:$0xff] }
 0x272   : > { %v3954_v22 = vmul.f32 %v14030_v17, %v3679_v45  ;;  %4487 = vst [vmem:[%s9394_s23 + $0x28] sm:$0xff] %v4223_v4  ;;  %v2297_v43 = vsel %vm2295_vm6, %v14053_v0, %v2294_v42  ;;  %v14054_v14 = vand.u32 2147483648, %v9302_v53  ;;  %1450 = vadd.xlane.f32.xlu1 %v9195_v16  ;;  %v2306_v53 = vmul.f32 %v4995_v28, %v9346_v36  ;;  %v4999_v30 = vpop.eup %4998  ;;  %v14056_v45 = vld [vmem:[#allocation70_spill] sm:$0xff] }
 0x273   : > { %v3952_v3 = vmul.f32 %v14030_v17, %v3677_v50  ;;  %v4228_v9 = vadd.f32 %v14031_v56, %v3953_v32  ;;  %v3149_v26 = vadd.f32 1e-10, %v2297_v43  ;;  %v4226_v40 = vadd.f32 %v14031_v56, %v3951_v1  ;;  %v14058_v4 = vld [vmem:[#allocation62_spill] sm:$0xff]  ;;  %1453 = vadd.xlane.f32.xlu0 %v9202_v7 }
 0x274   : > { %v2290_v51 = vsel %vm2288_vm7, %v14054_v14, %v2287_v25  ;;  %v4229_v49 = vadd.f32 %v14032_v18, %v3954_v22  ;;  %vm2309_vm9 = vcmp.eq.f32.partialorder %v9346_v36, 0.0  ;;  %v14057_v21 = vsub.f32 %v14055_v6, %v14056_v45  ;;  %v14063_v22 = vld [vmem:[#allocation67_spill] sm:$0xff] }
 0x275   : > { %v3148_v38 = vadd.f32 1e-10, %v2290_v51  ;;  %v4227_v47 = vadd.f32 %v14032_v18, %v3952_v3  ;;  %4492 = vst [vmem:[%s9394_s23 + $0x50] sm:$0xff] %v4228_v9  ;;  %v14059_v48 = vsub.f32 %v14058_v4, %v14056_v45  ;;  %5004 = vrcp.f32 %v3149_v26  ;;  %4490 = vst [vmem:[%s9394_s23 + $0x40] sm:$0xff] %v4226_v40  ;;  %v14068_v45 = vld [vmem:[#allocation71_spill] sm:$0xff]  ;;  %v14071_v4 = vld [vmem:[#allocation72_spill] sm:$0xff] }
 0x276   : > { %4493 = vst [vmem:[%s9394_s23 + $0x58] sm:$0xff] %v4229_v49  ;;  %v3682_v16 = vmul.f32 %v4997_v5, %v14057_v21  ;;  %v2310_v34 = vand.u32 2147483648, %v9346_v36  ;;  %v14062_v50 = vsub.f32 %v14060_v31, %v14061_v59  ;;  %v14064_v42 = vsub.f32 %v14063_v22, %v14061_v59  ;;  %1456 = vadd.xlane.f32.xlu1 %v9200_v24  ;;  %v14069_v21 = vld [vmem:[#allocation80_spill] sm:$0xff]  ;;  %v1214_v31 = vpop.xlane.xlu0 %1213  ;;  %v14073_v59 = vld [vmem:[#allocation73_spill] sm:$0xff] }
 0x277   : > { %v3683_v63 = vmul.f32 %v4997_v5, %v14059_v48  ;;  %4491 = vst [vmem:[%s9394_s23 + $0x48] sm:$0xff] %v4227_v47  ;;  %5006 = vrcp.f32 %v3148_v38  ;;  %v2308_v1 = vsel %vm2307_vm8, %v9346_v36, %v2306_v53  ;;  %v1703_v9 = vmul.f32 0.00390625, %v1211_v2  ;;  %v14065_v36 = vld [vmem:[#allocation113_spill] sm:$0xff]  ;;  %v14066_v5 = vld [vmem:[#allocation431_spill] sm:$0xff]  ;;  %v1217_v2 = vpop.xlane.xlu1 %1216  ;;  %1459 = vadd.xlane.f32.xlu0 %v9213_v55 }
 0x278   : > { %v3680_v32 = vmul.f32 %v4999_v30, %v14062_v50  ;;  %v3681_v25 = vmul.f32 %v4999_v30, %v14064_v42  ;;  %v3957_v3 = vmul.f32 %v14029_v52, %v3682_v16  ;;  %v2311_v43 = vsel %vm2309_vm9, %v2310_v34, %v2308_v1  ;;  %v5001_v40 = vpop.eup %5000  ;;  %v14067_v30 = vld [vmem:[#allocation114_spill] sm:$0xff]  ;;  %v14074_v50 = vld [vmem:[#allocation81_spill] sm:$0xff] }
 0x279   : > { %v3958_v0 = vmul.f32 %v14030_v17, %v3683_v63  ;;  %5008 = vrsqrt.f32 %v9415_v20  ;;  %v3151_v28 = vadd.f32 1e-10, %v2311_v43  ;;  %v1965_v38 = vsub.f32 %v9348_v35, %v14065_v36  ;;  %v5003_v6 = vpop.eup %5002  ;;  %v14076_v42 = vld [vmem:[#allocation74_spill] sm:$0xff] }
 0x27a   : > { %v3955_v14 = vmul.f32 %v14029_v52, %v3680_v32  ;;  %v3956_v51 = vmul.f32 %v14030_v17, %v3681_v25  ;;  %v4232_v49 = vadd.f32 %v14031_v56, %v3957_v3  ;;  %v1104_v24 = vmul.f32 %v14066_v5, %v14066_v5  ;;  %1462 = vadd.xlane.f32.xlu1 %v9204_v13 }
 0x27b   : > { %v4233_v26 = vadd.f32 %v14032_v18, %v3958_v0  ;;  %5010 = vrcp.f32 %v3151_v28  ;;  %v1964_v7 = vsub.f32 %v9383_v39, %v14067_v30  ;;  %v14070_v35 = vsub.f32 %v14068_v45, %v14069_v21  ;;  %v14078_v0 = vld [vmem:[#allocation120_spill] sm:$0xff]  ;;  %1465 = vadd.xlane.f32.xlu0 %v9265_v11 }
 0x27c   : > { %v4230_v47 = vadd.f32 %v14031_v56, %v3955_v14  ;;  %v4231_v53 = vadd.f32 %v14032_v18, %v3956_v51  ;;  %4496 = vst [vmem:[%s9394_s23 + $0x70] sm:$0xff] %v4232_v49  ;;  %v14072_v48 = vsub.f32 %v14071_v4, %v14069_v21  ;;  %v9520_v34 = vmax.f32 %v1965_v38, 0.0  ;;  %v9541_v28 = vld [vmem:[%s6118_s11 + $0x700] sm:$0xff]  ;;  %v9569_v21 = vld [vmem:[%s6118_s11 + $0x738] sm:$0xff] }
 0x27d   : > { %4497 = vst [vmem:[%s9394_s23 + $0x78] sm:$0xff] %v4233_v26  ;;  %v3686_v16 = vmul.f32 %v5001_v40, %v14070_v35  ;;  %v1105_v39 = vmul.f32 %v8976_v54, %v8976_v54  ;;  %v14075_v32 = vsub.f32 %v14073_v59, %v14074_v50  ;;  %v14077_v25 = vsub.f32 %v14076_v42, %v14074_v50  ;;  %v9546_v26 = vld [vmem:[%s6118_s11 + $0x708] sm:$0xff]  ;;  %v14087_v42 = vld [vmem:[#allocation86_spill] sm:$0xff]  ;;  %v14270_v54 = vld [vmem:[#allocation35_spill] sm:$0xff] }
 0x27e   : > { %v3687_v63 = vmul.f32 %v5001_v40, %v14072_v48  ;;  %4494 = vst [vmem:[%s9394_s23 + $0x60] sm:$0xff] %v4230_v47  ;;  %4495 = vst [vmem:[%s9394_s23 + $0x68] sm:$0xff] %v4231_v53  ;;  %v9533_v3 = vmax.f32 %v1964_v7, 0.0  ;;  %v1967_v43 = vsub.f32 %v1703_v9, %v14078_v0  ;;  %5012 = vrsqrt.f32 %v9520_v34  ;;  %1468 = vadd.xlane.f32.xlu1 %v9234_v46  ;;  %v9557_v47 = vld [vmem:[%s6118_s11 + $0x730] sm:$0xff]  ;;  %v14085_v4 = vld [vmem:[#allocation124_spill] sm:$0xff]  ;;  %v1223_v48 = vpop.xlane.xlu1 %1222 }
 0x27f   : > { %v3684_v22 = vmul.f32 %v5003_v6, %v14075_v32  ;;  %v3685_v1 = vmul.f32 %v5003_v6, %v14077_v25  ;;  %v3961_v13 = vmul.f32 %v14029_v52, %v3686_v16  ;;  %v1702_v51 = vmul.f32 0.00390625, %v1208_v10  ;;  %14079 = vst [vmem:[#allocation329_spill] sm:$0xff] %v9541_v28  ;;  %14080 = vst [vmem:[#allocation69_spill] sm:$0xff] %v9546_v26  ;;  %v14082_v6 = vld [vmem:[#allocation174_spill] sm:$0xff]  ;;  %v14116_v35 = vld [vmem:[#allocation12_spill] sm:$0xff] }
 0x280   : > { %v3962_v14 = vmul.f32 %v14030_v17, %v3687_v63  ;;  %5014 = vrsqrt.f32 %v9533_v3  ;;  %v1473_v40 = vadd.f32 %v1105_v39, %v1104_v24  ;;  %14081 = vst [vmem:[#allocation60_spill] sm:$0xff] %v9557_v47  ;;  %v9566_v45 = vmul.f32 %v14082_v6, %v14082_v6  ;;  %14083 = vst [vmem:[#allocation76_spill] sm:$0xff] %v9569_v21  ;;  %v9574_v24 = vld [vmem:[%s6118_s11 + $0x720] sm:$0xff]  ;;  %v1220_v63 = vpop.xlane.xlu0 %1219  ;;  %v14089_v0 = vld [vmem:[#allocation78_spill] sm:$0xff] }
 0x281   : > { %v3959_v55 = vmul.f32 %v14029_v52, %v3684_v22  ;;  %v3960_v36 = vmul.f32 %v14030_v17, %v3685_v1  ;;  %v4236_v38 = vadd.f32 %v14031_v56, %v3961_v13  ;;  %14084 = vst [vmem:[#allocation79_spill] sm:$0xff] %v9574_v24  ;;  %v9580_v16 = vmax.f32 %v1967_v43, 0.0  ;;  %v14086_v22 = vld [vmem:[#allocation77_spill] sm:$0xff]  ;;  %v14118_v53 = vld [vmem:[#allocation94_spill] sm:$0xff]  ;;  %v14171_v24 = vld [vmem:[#allocation123_spill] sm:$0xff] }
 0x282   : > { %v4237_v10 = vadd.f32 %v14032_v18, %v3962_v14  ;;  %v1966_v11 = vsub.f32 %v1702_v51, %v14085_v4  ;;  %v5005_v39 = vpop.eup %5004  ;;  %vm2300_vm10 = vcmp.eq.f32.partialorder %v9415_v20, inf  ;;  %vm2302_vm11 = vcmp.eq.f32.partialorder %v9415_v20, 0.0  ;;  %1474 = vadd.xlane.f32.xlu1 %v1473_v40  ;;  %v14200_v47 = vld [vmem:[#allocation137_spill] sm:$0xff] }
 0x283   : > { %v4234_v30 = vadd.f32 %v14031_v56, %v3959_v55  ;;  %v4235_v7 = vadd.f32 %v14032_v18, %v3960_v36  ;;  %4500 = vst [vmem:[%s9394_s23 + $0x90] sm:$0xff] %v4236_v38  ;;  %v1705_v59 = vmul.f32 0.00390625, %v1217_v2  ;;  %v1704_v50 = vmul.f32 0.00390625, %v1214_v31  ;;  %v14091_v55 = vld [vmem:[#allocation82_spill] sm:$0xff]  ;;  %v14092_v36 = vld [vmem:[#allocation91_spill] sm:$0xff] }
 0x284   : > { %4501 = vst [vmem:[%s9394_s23 + $0x98] sm:$0xff] %v4237_v10  ;;  %v5007_v32 = vpop.eup %5006  ;;  %v14088_v25 = vsub.f32 %v14086_v22, %v14087_v42  ;;  %v14090_v43 = vsub.f32 %v14089_v0, %v14087_v42  ;;  %v2303_v14 = vand.u32 2147483648, %v9415_v20  ;;  %5016 = vrsqrt.f32 %v9580_v16  ;;  %v14094_v31 = vld [vmem:[#allocation83_spill] sm:$0xff] }
 0x285   : > { %4498 = vst [vmem:[%s9394_s23 + $0x80] sm:$0xff] %v4234_v30  ;;  %4499 = vst [vmem:[%s9394_s23 + $0x88] sm:$0xff] %v4235_v7  ;;  %v14093_v38 = vsub.f32 %v14091_v55, %v14092_v36  ;;  %v14095_v10 = vsub.f32 %v14094_v31, %v14092_v36  ;;  %v1707_v7 = vmul.f32 0.00390625, %v1223_v48  ;;  %v1706_v4 = vmul.f32 0.00390625, %v1220_v63  ;;  %v14097_v36 = vld [vmem:[#allocation129_spill] sm:$0xff]  ;;  %v14101_v31 = vld [vmem:[#allocation88_spill] sm:$0xff] }
 0x286   : > { %v3690_v1 = vmul.f32 %v5005_v39, %v14088_v25  ;;  %v3691_v13 = vmul.f32 %v5005_v39, %v14090_v43  ;;  %v5009_v51 = vpop.eup %5008  ;;  %v9604_v25 = vmax.f32 %v1966_v11, 0.0  ;;  %v14096_v43 = vld [vmem:[#allocation128_spill] sm:$0xff]  ;;  %vm2321_vm12 = vcmp.eq.f32.partialorder %v9520_v34, inf }
 0x287   : > { %v3688_v2 = vmul.f32 %v5007_v32, %v14093_v38  ;;  %v3689_v30 = vmul.f32 %v5007_v32, %v14095_v10  ;;  %v2299_v42 = vmul.f32 %v5009_v51, %v9415_v20  ;;  %v1969_v55 = vsub.f32 %v1705_v59, %v14096_v43  ;;  %v14098_v59 = vld [vmem:[#allocation87_spill] sm:$0xff]  ;;  %v14099_v38 = vld [vmem:[#allocation96_spill] sm:$0xff] }
 0x288   : > { %v3965_v22 = vmul.f32 %v14029_v52, %v3690_v1  ;;  %v3966_v39 = vmul.f32 %v14030_v17, %v3691_v13  ;;  %v1968_v32 = vsub.f32 %v1704_v50, %v14097_v36  ;;  %v5011_v48 = vpop.eup %5010  ;;  %5018 = vrsqrt.f32 %v9604_v25 }
 0x289   : > { %v3963_v40 = vmul.f32 %v14029_v52, %v3688_v2  ;;  %v3964_v0 = vmul.f32 %v14030_v17, %v3689_v30  ;;  %v2301_v11 = vsel %vm2300_vm10, %v9415_v20, %v2299_v42  ;;  %v14100_v50 = vsub.f32 %v14098_v59, %v14099_v38  ;;  %v1226_v20 = vpop.xlane.xlu0 %1225 }
 0x28a   : > { %v4240_v63 = vadd.f32 %v14031_v56, %v3965_v22  ;;  %v4241_v1 = vadd.f32 %v14032_v18, %v3966_v39  ;;  %v14102_v10 = vsub.f32 %v14101_v31, %v14099_v38  ;;  %v1229_v22 = vpop.xlane.xlu1 %1228  ;;  %v2304_v39 = vsel %vm2302_vm11, %v2303_v14, %v2301_v11 }
 0x28b   : > { %v4238_v13 = vadd.f32 %v14031_v56, %v3963_v40  ;;  %v4239_v51 = vadd.f32 %v14032_v18, %v3964_v0  ;;  %v3694_v2 = vmul.f32 %v5011_v48, %v14100_v50  ;;  %vm2323_vm13 = vcmp.eq.f32.partialorder %v9520_v34, 0.0  ;;  %v5013_v40 = vpop.eup %5012  ;;  %v14104_v50 = vld [vmem:[#allocation139_spill] sm:$0xff] }
 0x28c   : > { %v3695_v30 = vmul.f32 %v5011_v48, %v14102_v10  ;;  %4504 = vst [vmem:[%s9394_s23 + $0xb0] sm:$0xff] %v4240_v63  ;;  %4505 = vst [vmem:[%s9394_s23 + $0xb8] sm:$0xff] %v4241_v1  ;;  %v2324_v42 = vand.u32 2147483648, %v9520_v34  ;;  %v3150_v36 = vadd.f32 1e-10, %v2304_v39  ;;  %v9635_v48 = vmax.f32 %v1969_v55, 0.0 }
 0x28d   : > { %4502 = vst [vmem:[%s9394_s23 + $0xa0] sm:$0xff] %v4238_v13  ;;  %4503 = vst [vmem:[%s9394_s23 + $0xa8] sm:$0xff] %v4239_v51  ;;  %v3969_v0 = vmul.f32 %v14029_v52, %v3694_v2  ;;  %v2320_v14 = vmul.f32 %v5013_v40, %v9520_v34  ;;  %v9638_v63 = vmax.f32 %v1968_v32, 0.0  ;;  %v14103_v1 = vld [vmem:[#allocation135_spill] sm:$0xff]  ;;  %v1709_v59 = vmul.f32 0.00390625, %v1229_v22  ;;  %v5015_v38 = vpop.eup %5014 }
 0x28e   : > { %v3970_v43 = vmul.f32 %v14030_v17, %v3695_v30  ;;  %v1971_v11 = vsub.f32 %v1707_v7, %v14103_v1  ;;  %5020 = vrcp.f32 %v3150_v36  ;;  %v1970_v2 = vsub.f32 %v1706_v4, %v14104_v50  ;;  %v1235_v4 = vpop.xlane.xlu1 %1234  ;;  %v14105_v30 = vld [vmem:[#allocation363_spill] sm:$0xff] }
 0x28f   : > { %v4244_v13 = vadd.f32 %v14031_v56, %v3969_v0  ;;  %v2322_v55 = vsel %vm2321_vm12, %v9520_v34, %v2320_v14  ;;  %v2313_v31 = vmul.f32 %v5015_v38, %v9533_v3  ;;  %5022 = vrsqrt.f32 %v9635_v48  ;;  %v14108_v38 = vld [vmem:[#allocation144_spill] sm:$0xff] }
 0x290   : > { %v4245_v51 = vadd.f32 %v14032_v18, %v3970_v43  ;;  %v1708_v32 = vmul.f32 0.00390625, %v1226_v20  ;;  %v2325_v7 = vsel %vm2323_vm13, %v2324_v42, %v2322_v55  ;;  %vm2314_vm14 = vcmp.eq.f32.partialorder %v9533_v3, inf  ;;  %v14107_v42 = vld [vmem:[#allocation143_spill] sm:$0xff]  ;;  %v1232_v55 = vpop.xlane.xlu0 %1231 }
 0x291   : > { %4508 = vst [vmem:[%s9394_s23 + $0xd0] sm:$0xff] %v4244_v13  ;;  %v2317_v10 = vand.u32 2147483648, %v9533_v3  ;;  %5024 = vrsqrt.f32 %v9638_v63  ;;  %v9657_v22 = vmul.f32 0.00390625, %v14105_v30  ;;  %v3153_v39 = vadd.f32 1e-10, %v2325_v7  ;;  %v5017_v0 = vpop.eup %5016 }
 0x292   : > { %4509 = vst [vmem:[%s9394_s23 + $0xd8] sm:$0xff] %v4245_v51  ;;  %v2315_v40 = vsel %vm2314_vm14, %v9533_v3, %v2313_v31  ;;  %vm2316_vm15 = vcmp.eq.f32.partialorder %v9533_v3, 0.0  ;;  %v9661_v36 = vmax.f32 %v1971_v11, 0.0  ;;  %v9663_v34 = vmax.f32 %v1970_v2, 0.0  ;;  %v1241_v31 = vpop.xlane.xlu1 %1240 }
 0x293   : > { %14106 = vst [vmem:[#allocation184_spill] sm:$0xff] %v9657_v22  ;;  %v2318_v43 = vsel %vm2316_vm15, %v2317_v10, %v2315_v40  ;;  %v1973_v20 = vsub.f32 %v1709_v59, %v14107_v42  ;;  %5026 = vrcp.f32 %v3153_v39  ;;  %v2334_v1 = vmul.f32 %v5017_v0, %v9580_v16  ;;  %v14109_v0 = vld [vmem:[#allocation151_spill] sm:$0xff] }
 0x294   : > { %v3152_v14 = vadd.f32 1e-10, %v2318_v43  ;;  %v1972_v13 = vsub.f32 %v1708_v32, %v14108_v38  ;;  %vm2335_vm0 = vcmp.eq.f32.partialorder %v9580_v16, inf  ;;  %vm2337_vm1 = vcmp.eq.f32.partialorder %v9580_v16, 0.0 }
 0x295   : > { %v2338_v3 = vand.u32 2147483648, %v9580_v16  ;;  %5028 = vrsqrt.f32 %v9661_v36  ;;  %v2336_v11 = vsel %vm2335_vm0, %v9580_v16, %v2334_v1  ;;  %vm2328_vm2 = vcmp.eq.f32.partialorder %v9604_v25, inf  ;;  %v5019_v59 = vpop.eup %5018 }
 0x296   : > { %5030 = vrcp.f32 %v3152_v14  ;;  %vm2330_vm3 = vcmp.eq.f32.partialorder %v9604_v25, 0.0  ;;  %v2331_v50 = vand.u32 2147483648, %v9604_v25  ;;  %v9677_v2 = vmax.f32 %v1973_v20, 0.0 }
 0x297   : > { %v2339_v51 = vsel %vm2337_vm1, %v2338_v3, %v2336_v11  ;;  %5032 = vrsqrt.f32 %v9663_v34  ;;  %v2327_v7 = vmul.f32 %v5019_v59, %v9604_v25  ;;  %v9680_v10 = vmax.f32 %v1972_v13, 0.0  ;;  %v14110_v13 = vld [vmem:[#allocation89_spill] sm:$0xff]  ;;  %v14113_v59 = vld [vmem:[#allocation90_spill] sm:$0xff] }
 0x298   : > { %v3155_v32 = vadd.f32 1e-10, %v2339_v51  ;;  %v1711_v16 = vmul.f32 0.00390625, %v1235_v4  ;;  %vm2349_vm4 = vcmp.eq.f32.partialorder %v9635_v48, inf  ;;  %vm2351_vm5 = vcmp.eq.f32.partialorder %v9635_v48, 0.0  ;;  %v14111_v3 = vld [vmem:[#allocation97_spill] sm:$0xff] }
 0x299   : > { %v2352_v30 = vand.u32 2147483648, %v9635_v48  ;;  %5034 = vrsqrt.f32 %v9677_v2  ;;  %v2329_v39 = vsel %vm2328_vm2, %v9604_v25, %v2327_v7  ;;  %vm2342_vm6 = vcmp.eq.f32.partialorder %v9638_v63, inf }
 0x29a   : > { %5036 = vrcp.f32 %v3155_v32  ;;  %vm2344_vm7 = vcmp.eq.f32.partialorder %v9638_v63, 0.0  ;;  %v2332_v4 = vsel %vm2330_vm3, %v2331_v50, %v2329_v39  ;;  %v2345_v40 = vand.u32 2147483648, %v9638_v63  ;;  %v1247_v39 = vpop.xlane.xlu1 %1246 }
 0x29b   : > { %5038 = vrsqrt.f32 %v9680_v10  ;;  %v1975_v43 = vsub.f32 %v1711_v16, %v14109_v0  ;;  %v5021_v42 = vpop.eup %5020  ;;  %v3154_v20 = vadd.f32 1e-10, %v2332_v4  ;;  %vm2363_vm8 = vcmp.eq.f32.partialorder %v9661_v36, inf  ;;  %v1238_v16 = vpop.xlane.xlu0 %1237 }
 0x29c   : > { %v2366_v14 = vand.u32 2147483648, %v9661_v36  ;;  %v2359_v1 = vand.u32 2147483648, %v9663_v34  ;;  %v5023_v38 = vpop.eup %5022  ;;  %v14112_v11 = vsub.f32 %v14110_v13, %v14111_v3  ;;  %v14114_v51 = vsub.f32 %v14113_v59, %v14111_v3 }
 0x29d   : > { %v2380_v32 = vand.u32 2147483648, %v9677_v2  ;;  %v9706_v7 = vmax.f32 %v1975_v43, 0.0  ;;  %5040 = vrcp.f32 %v3154_v20  ;;  %v2348_v0 = vmul.f32 %v5023_v38, %v9635_v48 }
 0x29e   : > { %v3692_v25 = vmul.f32 %v5021_v42, %v14112_v11  ;;  %v3693_v50 = vmul.f32 %v5021_v42, %v14114_v51  ;;  %v5025_v4 = vpop.eup %5024  ;;  %vm2365_vm9 = vcmp.eq.f32.partialorder %v9661_v36, 0.0  ;;  %vm2356_vm10 = vcmp.eq.f32.partialorder %v9663_v34, inf }
 0x29f   : > { %v9711_v13 = vmul.f32 0.00390625, %v1232_v55  ;;  %v9713_v11 = vmul.f32 0.00390625, %v1241_v31  ;;  %v2341_v43 = vmul.f32 %v5025_v4, %v9638_v63  ;;  %5042 = vrsqrt.f32 %v9706_v7 }
 0x2a0   : > { %v3967_v42 = vmul.f32 %v14029_v52, %v3692_v25  ;;  %v3968_v3 = vmul.f32 %v14030_v17, %v3693_v50  ;;  %v2350_v20 = vsel %vm2349_vm4, %v9635_v48, %v2348_v0  ;;  %vm2358_vm11 = vcmp.eq.f32.partialorder %v9663_v34, 0.0  ;;  %v5027_v25 = vpop.eup %5026 }
 0x2a1   : > { %vm2377_vm12 = vcmp.eq.f32.partialorder %v9677_v2, inf  ;;  %v9725_v31 = vmul.f32 0.00390625, %v1238_v16  ;;  %v9727_v38 = vmul.f32 0.00390625, %v1247_v39  ;;  %v2353_v50 = vsel %vm2351_vm5, %v2352_v30, %v2350_v20  ;;  %v14115_v16 = vld [vmem:[#allocation93_spill] sm:$0xff]  ;;  %v14120_v20 = vld [vmem:[#allocation154_spill] sm:$0xff] }
 0x2a2   : > { %v4242_v59 = vadd.f32 %v14031_v56, %v3967_v42  ;;  %v4243_v51 = vadd.f32 %v14032_v18, %v3968_v3  ;;  %v2343_v4 = vsel %vm2342_vm6, %v9638_v63, %v2341_v43  ;;  %vm2379_vm13 = vcmp.eq.f32.partialorder %v9677_v2, 0.0  ;;  %v5029_v0 = vpop.eup %5028  ;;  %v14122_v63 = vld [vmem:[#allocation98_spill] sm:$0xff] }
 0x2a3   : > { %v14117_v46 = vsub.f32 %v14115_v16, %v14116_v35  ;;  %v14119_v9 = vsub.f32 %v14118_v53, %v14116_v35  ;;  %v3157_v49 = vadd.f32 1e-10, %v2353_v50  ;;  %v2346_v48 = vsel %vm2344_vm7, %v2345_v40, %v2343_v4  ;;  %v5031_v30 = vpop.eup %5030  ;;  %v14123_v40 = vld [vmem:[#allocation13_spill] sm:$0xff] }
 0x2a4   : > { %vm2370_vm14 = vcmp.eq.f32.partialorder %v9680_v10, inf  ;;  %4506 = vst [vmem:[%s9394_s23 + $0xc0] sm:$0xff] %v4242_v59  ;;  %4507 = vst [vmem:[%s9394_s23 + $0xc8] sm:$0xff] %v4243_v51  ;;  %v3156_v3 = vadd.f32 1e-10, %v2346_v48  ;;  %v2362_v43 = vmul.f32 %v5029_v0, %v9661_v36  ;;  %v1974_v16 = vsub.f32 %v9711_v13, %v14120_v20  ;;  %v5033_v53 = vpop.eup %5032  ;;  %v14125_v59 = vld [vmem:[#allocation99_spill] sm:$0xff] }
 0x2a5   : > { %v3698_v39 = vmul.f32 %v5027_v25, %v14117_v46  ;;  %v3699_v42 = vmul.f32 %v5027_v25, %v14119_v9  ;;  %v14121_v46 = vld [vmem:[#allocation159_spill] sm:$0xff]  ;;  %v14124_v25 = vsub.f32 %v14122_v63, %v14123_v40  ;;  %v14126_v51 = vsub.f32 %v14125_v59, %v14123_v40  ;;  %v14128_v40 = vld [vmem:[#allocation14_spill] sm:$0xff] }
 0x2a6   : > { %v1977_v55 = vsub.f32 %v9713_v11, %v14121_v46  ;;  %vm2372_vm15 = vcmp.eq.f32.partialorder %v9680_v10, 0.0  ;;  %5044 = vrcp.f32 %v3157_v49  ;;  %v2364_v13 = vsel %vm2363_vm8, %v9661_v36, %v2362_v43  ;;  %v14130_v36 = vld [vmem:[#allocation103_spill] sm:$0xff] }
 0x2a7   : > { %v3973_v9 = vmul.f32 %v14029_v52, %v3698_v39  ;;  %v3974_v35 = vmul.f32 %v14030_v17, %v3699_v42  ;;  %v3696_v50 = vmul.f32 %v5031_v30, %v14124_v25  ;;  %v3697_v4 = vmul.f32 %v5031_v30, %v14126_v51  ;;  %v5035_v39 = vpop.eup %5034 }
 0x2a8   : > { %v2355_v11 = vmul.f32 %v5033_v53, %v9663_v34  ;;  %v2394_v0 = vand.u32 2147483648, %v9706_v7  ;;  %vm2391_vm0 = vcmp.eq.f32.partialorder %v9706_v7, inf  ;;  %v5037_v49 = vpop.eup %5036  ;;  %5046 = vrcp.f32 %v3156_v3  ;;  %v14127_v3 = vld [vmem:[#allocation102_spill] sm:$0xff] }
 0x2a9   : > { %v4248_v42 = vadd.f32 %v14031_v56, %v3973_v9  ;;  %v4249_v48 = vadd.f32 %v14032_v18, %v3974_v35  ;;  %v3971_v30 = vmul.f32 %v14029_v52, %v3696_v50  ;;  %v3972_v20 = vmul.f32 %v14030_v17, %v3697_v4  ;;  %v5039_v9 = vpop.eup %5038 }
 0x2aa   : > { %v2367_v43 = vsel %vm2365_vm9, %v2366_v14, %v2364_v13  ;;  %v2357_v46 = vsel %vm2356_vm10, %v9663_v34, %v2355_v11  ;;  %v2376_v53 = vmul.f32 %v5035_v39, %v9677_v2  ;;  %v14129_v25 = vsub.f32 %v14127_v3, %v14128_v40  ;;  %v5041_v34 = vpop.eup %5040  ;;  %v14135_v3 = vld [vmem:[#allocation105_spill] sm:$0xff] }
 0x2ab   : > { %4512 = vst [vmem:[%s9394_s23 + $0xf0] sm:$0xff] %v4248_v42  ;;  %4513 = vst [vmem:[%s9394_s23 + $0xf8] sm:$0xff] %v4249_v48  ;;  %v4246_v35 = vadd.f32 %v14031_v56, %v3971_v30  ;;  %v4247_v63 = vadd.f32 %v14032_v18, %v3972_v20  ;;  %v14131_v14 = vsub.f32 %v14130_v36, %v14128_v40  ;;  %v3159_v51 = vadd.f32 1e-10, %v2367_v43  ;;  %v1244_v43 = vpop.xlane.xlu0 %1243 }
 0x2ac   : > { %v3702_v50 = vmul.f32 %v5037_v49, %v14129_v25  ;;  %v2360_v4 = vsel %vm2358_vm11, %v2359_v1, %v2357_v46  ;;  %v2378_v13 = vsel %vm2377_vm12, %v9677_v2, %v2376_v53  ;;  %v2369_v11 = vmul.f32 %v5039_v9, %v9680_v10  ;;  %v5043_v46 = vpop.eup %5042  ;;  %v14132_v2 = vld [vmem:[#allocation104_spill] sm:$0xff] }
 0x2ad   : > { %v3703_v59 = vmul.f32 %v5037_v49, %v14131_v14  ;;  %4510 = vst [vmem:[%s9394_s23 + $0xe0] sm:$0xff] %v4246_v35  ;;  %4511 = vst [vmem:[%s9394_s23 + $0xe8] sm:$0xff] %v4247_v63  ;;  %v3158_v48 = vadd.f32 1e-10, %v2360_v4  ;;  %v2381_v30 = vsel %vm2379_vm13, %v2380_v32, %v2378_v13  ;;  %5048 = vrcp.f32 %v3159_v51  ;;  %v14133_v32 = vld [vmem:[#allocation15_spill] sm:$0xff]  ;;  %v9831_v13 = vld [vmem:[%s6118_s11 + $0x728] sm:$0xff] }
 0x2ae   : > { %v3977_v39 = vmul.f32 %v14029_v52, %v3702_v50  ;;  %v3161_v1 = vadd.f32 1e-10, %v2381_v30  ;;  %v2371_v20 = vsel %vm2370_vm14, %v9680_v10, %v2369_v11  ;;  %v9809_v49 = vmax.f32 %v1974_v16, 0.0  ;;  %14138 = vst [vmem:[#allocation84_spill] sm:$0xff] %v9831_v13  ;;  %v14139_v30 = vld [vmem:[#allocation366_spill] sm:$0xff]  ;;  %v14169_v11 = vld [vmem:[#allocation20_spill] sm:$0xff] }
 0x2af   : > { %v3978_v42 = vmul.f32 %v14030_v17, %v3703_v59  ;;  %v14134_v35 = vsub.f32 %v14132_v2, %v14133_v32  ;;  %v14136_v40 = vsub.f32 %v14135_v3, %v14133_v32  ;;  %5050 = vrcp.f32 %v3158_v48  ;;  %v14144_v3 = vld [vmem:[#allocation107_spill] sm:$0xff] }
 0x2b0   : > { %v4252_v53 = vadd.f32 %v14031_v56, %v3977_v39  ;;  %v14137_v50 = vand.u32 2147483648, %v9680_v10  ;;  %v2390_v36 = vmul.f32 %v5043_v46, %v9706_v7  ;;  %v9824_v14 = vmax.f32 %v1977_v55, 0.0  ;;  %v1253_v55 = vpop.xlane.xlu1 %1252  ;;  %v1250_v46 = vpop.xlane.xlu0 %1249 }
 0x2b1   : > { %v4253_v9 = vadd.f32 %v14032_v18, %v3978_v42  ;;  %v3700_v63 = vmul.f32 %v5041_v34, %v14134_v35  ;;  %v3701_v25 = vmul.f32 %v5041_v34, %v14136_v40  ;;  %5052 = vrcp.f32 %v3161_v1  ;;  %v14145_v40 = vld [vmem:[#allocation16_spill] sm:$0xff] }
 0x2b2   : > { %v2374_v16 = vsel %vm2372_vm15, %v14137_v50, %v2371_v20  ;;  %4516 = vst [vmem:[%s9394_s23 + $0x110] sm:$0xff] %v4252_v53  ;;  %v2392_v10 = vsel %vm2391_vm0, %v9706_v7, %v2390_v36  ;;  %vm2393_vm1 = vcmp.eq.f32.partialorder %v9706_v7, 0.0  ;;  %5054 = vrsqrt.f32 %v9809_v49  ;;  %v14141_v20 = vld [vmem:[#allocation160_spill] sm:$0xff] }
 0x2b3   : > { %4517 = vst [vmem:[%s9394_s23 + $0x118] sm:$0xff] %v4253_v9  ;;  %v3975_v59 = vmul.f32 %v14029_v52, %v3700_v63  ;;  %v3976_v51 = vmul.f32 %v14030_v17, %v3701_v25  ;;  %v3160_v4 = vadd.f32 1e-10, %v2374_v16  ;;  %v2395_v48 = vsel %vm2393_vm1, %v2394_v0, %v2392_v10  ;;  %v5045_v53 = vpop.eup %5044  ;;  %v9849_v9 = vld [vmem:[%s6118_s11 + $0x750] sm:$0xff]  ;;  %v14143_v0 = vld [vmem:[#allocation167_spill] sm:$0xff] }
 0x2b4   : > { %v9843_v34 = vmul.f32 0.00390625, %v14139_v30  ;;  %v3163_v1 = vadd.f32 1e-10, %v2395_v48  ;;  %v1976_v7 = vsub.f32 %v9725_v31, %v14141_v20  ;;  %14142 = vst [vmem:[#allocation351_spill] sm:$0xff] %v9849_v9  ;;  %v1979_v32 = vsub.f32 %v9727_v38, %v14143_v0  ;;  %v14147_v31 = vld [vmem:[#allocation108_spill] sm:$0xff]  ;;  %v14150_v30 = vld [vmem:[#allocation110_spill] sm:$0xff] }
 0x2b5   : > { %v4250_v39 = vadd.f32 %v14031_v56, %v3975_v59  ;;  %v4251_v42 = vadd.f32 %v14032_v18, %v3976_v51  ;;  %5056 = vrcp.f32 %v3160_v4  ;;  %v1714_v35 = vmul.f32 0.00390625, %v1244_v43  ;;  %v5047_v51 = vpop.eup %5046  ;;  %v9866_v4 = vld [vmem:[%s6118_s11 + $0x758] sm:$0xff] }
 0x2b6   : > { %14140 = vst [vmem:[#allocation85_spill] sm:$0xff] %v9843_v34  ;;  %5058 = vrsqrt.f32 %v9824_v14  ;;  %v1717_v63 = vmul.f32 0.00390625, %v1253_v55  ;;  %v14146_v25 = vsub.f32 %v14144_v3, %v14145_v40  ;;  %v14148_v16 = vsub.f32 %v14147_v31, %v14145_v40  ;;  %14149 = vst [vmem:[#allocation352_spill] sm:$0xff] %v9866_v4  ;;  %v5720_v55 = vld [vmem:[%s6118_s11 + $0x680] sm:$0xff]  ;;  %v5721_v31 = vld [vmem:[%s6118_s11 + $0x688] sm:$0xff] }
 0x2b7   : > { %4514 = vst [vmem:[%s9394_s23 + $0x100] sm:$0xff] %v4250_v39  ;;  %4515 = vst [vmem:[%s9394_s23 + $0x108] sm:$0xff] %v4251_v42  ;;  %5060 = vrcp.f32 %v3163_v1  ;;  %v9863_v59 = vmax.f32 %v1976_v7, 0.0  ;;  %v9870_v43 = vmax.f32 %v1979_v32, 0.0  ;;  %v1716_v10 = vmul.f32 0.00390625, %v1250_v46  ;;  %v14151_v1 = vld [vmem:[#allocation17_spill] sm:$0xff] }
 0x2b8   : > { %v3706_v50 = vmul.f32 %v5045_v53, %v14146_v25  ;;  %v3707_v36 = vmul.f32 %v5045_v53, %v14148_v16  ;;  %v9873_v39 = vmul.f32 %v5720_v55, %v5720_v55  ;;  %v14152_v20 = vsub.f32 %v14150_v30, %v14151_v1  ;;  %v14153_v53 = vld [vmem:[#allocation111_spill] sm:$0xff]  ;;  %v14155_v32 = vld [vmem:[#allocation170_spill] sm:$0xff] }
 0x2b9   : > { %v14154_v0 = vsub.f32 %v14153_v53, %v14151_v1  ;;  %5062 = vrsqrt.f32 %v9863_v59  ;;  %v1978_v46 = vsub.f32 %v1714_v35, %v14155_v32  ;;  %v14156_v40 = vld [vmem:[#allocation175_spill] sm:$0xff]  ;;  %vm2384_vm2 = vcmp.eq.f32.partialorder %v9809_v49, inf  ;;  %v14157_v35 = vld [vmem:[#allocation176_spill] sm:$0xff] }
 0x2ba   : > { %v3981_v42 = vmul.f32 %v14029_v52, %v3706_v50  ;;  %v3982_v48 = vmul.f32 %v14030_v17, %v3707_v36  ;;  %v3704_v7 = vmul.f32 %v5047_v51, %v14152_v20  ;;  %v1981_v25 = vsub.f32 %v1717_v63, %v14156_v40  ;;  %v14158_v20 = vld [vmem:[#allocation115_spill] sm:$0xff] }
 0x2bb   : > { %v3705_v3 = vmul.f32 %v5047_v51, %v14154_v0  ;;  %v9887_v50 = vmul.f32 %v5721_v31, %v5721_v31  ;;  %v5049_v51 = vpop.eup %5048  ;;  %vm2405_vm3 = vcmp.eq.f32.partialorder %v9824_v14, inf  ;;  %5064 = vrsqrt.f32 %v9870_v43 }
 0x2bc   : > { %v4256_v16 = vadd.f32 %v14031_v56, %v3981_v42  ;;  %v4257_v36 = vadd.f32 %v14032_v18, %v3982_v48  ;;  %v3979_v55 = vmul.f32 %v14029_v52, %v3704_v7  ;;  %v1980_v63 = vsub.f32 %v1716_v10, %v14157_v35  ;;  %v14159_v7 = vld [vmem:[#allocation18_spill] sm:$0xff]  ;;  %v5051_v31 = vpop.eup %5050 }
 0x2bd   : > { %v3980_v30 = vmul.f32 %v14030_v17, %v3705_v3  ;;  %v14160_v53 = vsub.f32 %v14158_v20, %v14159_v7  ;;  %v14161_v3 = vld [vmem:[#allocation116_spill] sm:$0xff]  ;;  %vm2386_vm4 = vcmp.eq.f32.partialorder %v9809_v49, 0.0  ;;  %vm2407_vm5 = vcmp.eq.f32.partialorder %v9824_v14, 0.0  ;;  %v14163_v20 = vld [vmem:[#allocation117_spill] sm:$0xff] }
 0x2be   : > { %4520 = vst [vmem:[%s9394_s23 + $0x130] sm:$0xff] %v4256_v16  ;;  %4521 = vst [vmem:[%s9394_s23 + $0x138] sm:$0xff] %v4257_v36  ;;  %v4254_v42 = vadd.f32 %v14031_v56, %v3979_v55  ;;  %v14162_v32 = vsub.f32 %v14161_v3, %v14159_v7  ;;  %v2408_v10 = vand.u32 2147483648, %v9824_v14  ;;  %v9911_v16 = vmax.f32 %v1978_v46, 0.0  ;;  %v5053_v55 = vpop.eup %5052  ;;  %v14166_v3 = vld [vmem:[#allocation118_spill] sm:$0xff] }
 0x2bf   : > { %v4255_v48 = vadd.f32 %v14032_v18, %v3980_v30  ;;  %v3710_v0 = vmul.f32 %v5049_v51, %v14160_v53  ;;  %v9913_v36 = vmax.f32 %v1981_v25, 0.0  ;;  %v5055_v2 = vpop.eup %5054  ;;  %v14168_v46 = vld [vmem:[#allocation122_spill] sm:$0xff]  ;;  %vm2398_vm6 = vcmp.eq.f32.partialorder %v9863_v59, inf }
 0x2c0   : > { %v3711_v40 = vmul.f32 %v5049_v51, %v14162_v32  ;;  %4518 = vst [vmem:[%s9394_s23 + $0x120] sm:$0xff] %v4254_v42  ;;  %v14164_v51 = vld [vmem:[#allocation19_spill] sm:$0xff]  ;;  %v14170_v25 = vsub.f32 %v14168_v46, %v14169_v11  ;;  %v14172_v42 = vsub.f32 %v14171_v24, %v14169_v11  ;;  %5066 = vrsqrt.f32 %v9911_v16 }
 0x2c1   : > { %4519 = vst [vmem:[%s9394_s23 + $0x128] sm:$0xff] %v4255_v48  ;;  %v3985_v30 = vmul.f32 %v14029_v52, %v3710_v0  ;;  %v14165_v7 = vsub.f32 %v14163_v20, %v14164_v51  ;;  %v14167_v32 = vsub.f32 %v14166_v3, %v14164_v51  ;;  %v9932_v0 = vmax.f32 %v1980_v63, 0.0  ;;  %v1259_v3 = vpop.xlane.xlu1 %1258  ;;  %v14173_v63 = vld [vmem:[#allocation125_spill] sm:$0xff] }
 0x2c2   : > { %v3986_v35 = vmul.f32 %v14030_v17, %v3711_v40  ;;  %v3714_v1 = vmul.f32 %v5053_v55, %v14170_v25  ;;  %v3715_v48 = vmul.f32 %v5053_v55, %v14172_v42  ;;  %v5057_v40 = vpop.eup %5056  ;;  %v14176_v25 = vld [vmem:[#allocation126_spill] sm:$0xff]  ;;  %vm2400_vm7 = vcmp.eq.f32.partialorder %v9863_v59, 0.0 }
 0x2c3   : > { %v3708_v53 = vmul.f32 %v5051_v31, %v14165_v7  ;;  %v3709_v38 = vmul.f32 %v5051_v31, %v14167_v32  ;;  %v4260_v20 = vadd.f32 %v14031_v56, %v3985_v30  ;;  %v5059_v24 = vpop.eup %5058  ;;  %v14174_v32 = vld [vmem:[#allocation21_spill] sm:$0xff]  ;;  %v2383_v42 = vmul.f32 %v5055_v2, %v9809_v49 }
 0x2c4   : > { %v4261_v31 = vadd.f32 %v14032_v18, %v3986_v35  ;;  %v3989_v11 = vmul.f32 %v14029_v52, %v3714_v1  ;;  %v3990_v55 = vmul.f32 %v14030_v17, %v3715_v48  ;;  %v14175_v46 = vsub.f32 %v14173_v63, %v14174_v32  ;;  %v5061_v63 = vpop.eup %5060 }
 0x2c5   : > { %v3983_v51 = vmul.f32 %v14029_v52, %v3708_v53  ;;  %v3984_v7 = vmul.f32 %v14030_v17, %v3709_v38  ;;  %v14177_v35 = vsub.f32 %v14176_v25, %v14174_v32  ;;  %4524 = vst [vmem:[%s9394_s23 + $0x150] sm:$0xff] %v4260_v20  ;;  %v2404_v48 = vmul.f32 %v5059_v24, %v9824_v14 }
 0x2c6   : > { %v3712_v30 = vmul.f32 %v5057_v40, %v14175_v46  ;;  %4525 = vst [vmem:[%s9394_s23 + $0x158] sm:$0xff] %v4261_v31  ;;  %v4264_v46 = vadd.f32 %v14031_v56, %v3989_v11  ;;  %v4265_v32 = vadd.f32 %v14032_v18, %v3990_v55  ;;  %v14178_v31 = vld [vmem:[#allocation131_spill] sm:$0xff]  ;;  %v2385_v24 = vsel %vm2384_vm2, %v9809_v49, %v2383_v42  ;;  %v1256_v55 = vpop.xlane.xlu0 %1255 }
 0x2c7   : > { %v3713_v53 = vmul.f32 %v5057_v40, %v14177_v35  ;;  %v4258_v38 = vadd.f32 %v14031_v56, %v3983_v51  ;;  %v4259_v1 = vadd.f32 %v14032_v18, %v3984_v7  ;;  %v14179_v51 = vld [vmem:[#allocation22_spill] sm:$0xff]  ;;  %v14181_v35 = vld [vmem:[#allocation132_spill] sm:$0xff]  ;;  %v2406_v11 = vsel %vm2405_vm3, %v9824_v14, %v2404_v48 }
 0x2c8   : > { %v3987_v40 = vmul.f32 %v14029_v52, %v3712_v30  ;;  %v14180_v25 = vsub.f32 %v14178_v31, %v14179_v51  ;;  %v14182_v2 = vsub.f32 %v14181_v35, %v14179_v51  ;;  %4528 = vst [vmem:[%s9394_s23 + $0x170] sm:$0xff] %v4264_v46  ;;  %4529 = vst [vmem:[%s9394_s23 + $0x178] sm:$0xff] %v4265_v32  ;;  %v1265_v32 = vpop.xlane.xlu1 %1264  ;;  %vm2419_vm8 = vcmp.eq.f32.partialorder %v9870_v43, inf }
 0x2c9   : > { %v3988_v20 = vmul.f32 %v14030_v17, %v3713_v53  ;;  %4522 = vst [vmem:[%s9394_s23 + $0x140] sm:$0xff] %v4258_v38  ;;  %4523 = vst [vmem:[%s9394_s23 + $0x148] sm:$0xff] %v4259_v1  ;;  %v14183_v38 = vand.u32 2147483648, %v9809_v49  ;;  %v2409_v42 = vsel %vm2407_vm5, %v2408_v10, %v2406_v11  ;;  %v2401_v49 = vand.u32 2147483648, %v9863_v59 }
 0x2ca   : > { %v3718_v7 = vmul.f32 %v5061_v63, %v14180_v25  ;;  %v3719_v21 = vmul.f32 %v5061_v63, %v14182_v2  ;;  %v4262_v30 = vadd.f32 %v14031_v56, %v3987_v40  ;;  %v5063_v63 = vpop.eup %5062  ;;  %v3165_v46 = vadd.f32 1e-10, %v2409_v42 }
 0x2cb   : > { %v4263_v53 = vadd.f32 %v14032_v18, %v3988_v20  ;;  %v2388_v1 = vsel %vm2386_vm4, %v14183_v38, %v2385_v24  ;;  %v2397_v40 = vmul.f32 %v5063_v63, %v9863_v59  ;;  %5068 = vrsqrt.f32 %v9913_v36  ;;  %v5065_v14 = vpop.eup %5064 }
 0x2cc   : > { %v3993_v31 = vmul.f32 %v14029_v52, %v3718_v7  ;;  %v3994_v48 = vmul.f32 %v14030_v17, %v3719_v21  ;;  %v3162_v51 = vadd.f32 1e-10, %v2388_v1  ;;  %4526 = vst [vmem:[%s9394_s23 + $0x160] sm:$0xff] %v4262_v30  ;;  %v1719_v20 = vmul.f32 0.00390625, %v1259_v3  ;;  %v1262_v3 = vpop.xlane.xlu0 %1261 }
 0x2cd   : > { %4527 = vst [vmem:[%s9394_s23 + $0x168] sm:$0xff] %v4263_v53  ;;  %v2399_v25 = vsel %vm2398_vm6, %v9863_v59, %v2397_v40  ;;  %v2418_v7 = vmul.f32 %v5065_v14, %v9870_v43  ;;  %vm2421_vm9 = vcmp.eq.f32.partialorder %v9870_v43, 0.0  ;;  %v2422_v2 = vand.u32 2147483648, %v9870_v43  ;;  %v5067_v53 = vpop.eup %5066  ;;  %v14184_v59 = vld [vmem:[#allocation183_spill] sm:$0xff] }
 0x2ce   : > { %v4268_v10 = vadd.f32 %v14031_v56, %v3993_v31  ;;  %v4269_v21 = vadd.f32 %v14032_v18, %v3994_v48  ;;  %5070 = vrcp.f32 %v3162_v51  ;;  %v2402_v35 = vsel %vm2400_vm7, %v2401_v49, %v2399_v25  ;;  %v1271_v31 = vpop.xlane.xlu1 %1270  ;;  %v14186_v14 = vld [vmem:[#allocation191_spill] sm:$0xff] }
 0x2cf   : > { %5072 = vrcp.f32 %v3165_v46  ;;  %vm2412_vm10 = vcmp.eq.f32.partialorder %v9911_v16, inf  ;;  %v3164_v24 = vadd.f32 1e-10, %v2402_v35  ;;  %v2420_v11 = vsel %vm2419_vm8, %v9870_v43, %v2418_v7  ;;  %v14185_v43 = vld [vmem:[#allocation187_spill] sm:$0xff] }
 0x2d0   : > { %4532 = vst [vmem:[%s9394_s23 + $0x190] sm:$0xff] %v4268_v10  ;;  %4533 = vst [vmem:[%s9394_s23 + $0x198] sm:$0xff] %v4269_v21  ;;  %5074 = vrsqrt.f32 %v9932_v0  ;;  %vm2414_vm11 = vcmp.eq.f32.partialorder %v9911_v16, 0.0  ;;  %v2415_v30 = vand.u32 2147483648, %v9911_v16  ;;  %v2423_v38 = vsel %vm2421_vm9, %v2422_v2, %v2420_v11  ;;  %v10022_v7 = vld [vmem:[%s6118_s11 + $0x740] sm:$0xff]  ;;  %v10027_v2 = vld [vmem:[%s6118_s11 + $0x748] sm:$0xff] }
 0x2d1   : > { %v1983_v1 = vsub.f32 %v1719_v20, %v14184_v59  ;;  %v1718_v42 = vmul.f32 0.00390625, %v1256_v55  ;;  %v1721_v63 = vmul.f32 0.00390625, %v1265_v32  ;;  %5076 = vrcp.f32 %v3164_v24  ;;  %v14187_v32 = vld [vmem:[#allocation192_spill] sm:$0xff]  ;;  %14188 = vst [vmem:[#allocation92_spill] sm:$0xff] %v10022_v7  ;;  %14189 = vst [vmem:[#allocation95_spill] sm:$0xff] %v10027_v2  ;;  %v14191_v59 = vld [vmem:[#allocation377_spill] sm:$0xff] }
 0x2d2   : > { %v3167_v48 = vadd.f32 1e-10, %v2423_v38  ;;  %v2411_v51 = vmul.f32 %v5067_v53, %v9911_v16  ;;  %v1720_v46 = vmul.f32 0.00390625, %v1262_v3  ;;  %v1470_v21 = vadd.f32 %v9887_v50, %v9873_v39  ;;  %v14190_v53 = vld [vmem:[#allocation190_spill] sm:$0xff] }
 0x2d3   : > { %v10011_v40 = vmax.f32 %v1983_v1, 0.0  ;;  %v1982_v49 = vsub.f32 %v1718_v42, %v14185_v43  ;;  %v1985_v10 = vsub.f32 %v1721_v63, %v14186_v14  ;;  %v1723_v25 = vmul.f32 0.00390625, %v1271_v31  ;;  %v5724_v3 = vld [vmem:[%s6118_s11 + $0x6b0] sm:$0xff] }
 0x2d4   : > { %5078 = vrcp.f32 %v3167_v48  ;;  %v2413_v55 = vsel %vm2412_vm10, %v9911_v16, %v2411_v51  ;;  %v1984_v20 = vsub.f32 %v1720_v46, %v14187_v32  ;;  %1471 = vadd.xlane.f32.xlu0 %v1470_v21  ;;  %v10040_v38 = vmul.f32 %v14190_v53, %v14190_v53  ;;  %v1268_v16 = vpop.xlane.xlu0 %1267  ;;  %v14194_v48 = vld [vmem:[#allocation199_spill] sm:$0xff]  ;;  %v14195_v32 = vld [vmem:[#allocation133_spill] sm:$0xff] }
 0x2d5   : > { %v2416_v39 = vsel %vm2414_vm11, %v2415_v30, %v2413_v55  ;;  %5080 = vrsqrt.f32 %v10011_v40  ;;  %v10034_v24 = vmax.f32 %v1982_v49, 0.0  ;;  %v10036_v11 = vmax.f32 %v1985_v10, 0.0  ;;  %v14193_v30 = vld [vmem:[#allocation193_spill] sm:$0xff]  ;;  %v14201_v10 = vld [vmem:[#allocation24_spill] sm:$0xff] }
 0x2d6   : > { %v3166_v50 = vadd.f32 1e-10, %v2416_v39  ;;  %v10043_v1 = vmul.f32 0.00390625, %v14191_v59  ;;  %vm2433_vm12 = vcmp.eq.f32.partialorder %v9913_v36, inf  ;;  %v10046_v42 = vmax.f32 %v1984_v20, 0.0  ;;  %v14196_v20 = vld [vmem:[#allocation23_spill] sm:$0xff] }
 0x2d7   : > { %v10050_v63 = vmul.f32 %v14193_v30, %v14193_v30  ;;  %vm2435_vm13 = vcmp.eq.f32.partialorder %v9913_v36, 0.0  ;;  %v2436_v31 = vand.u32 2147483648, %v9913_v36  ;;  %v1987_v51 = vsub.f32 %v1723_v25, %v14194_v48 }
 0x2d8   : > { %14192 = vst [vmem:[#allocation367_spill] sm:$0xff] %v10043_v1  ;;  %5082 = vrcp.f32 %v3166_v50  ;;  %v5069_v46 = vpop.eup %5068  ;;  %vm2426_vm14 = vcmp.eq.f32.partialorder %v9932_v0, inf  ;;  %vm2428_vm15 = vcmp.eq.f32.partialorder %v9932_v0, 0.0  ;;  %v2429_v43 = vand.u32 2147483648, %v9932_v0  ;;  %v14198_v50 = vld [vmem:[#allocation134_spill] sm:$0xff] }
 0x2d9   : > { %5084 = vrsqrt.f32 %v10034_v24  ;;  %v2432_v14 = vmul.f32 %v5069_v46, %v9913_v36  ;;  %v10062_v21 = vmul.f32 0.00390625, %v1268_v16  ;;  %v14197_v25 = vsub.f32 %v14195_v32, %v14196_v20  ;;  %v14203_v16 = vld [vmem:[#allocation138_spill] sm:$0xff] }
 0x2da   : > { %5086 = vrsqrt.f32 %v10036_v11  ;;  %v14199_v59 = vsub.f32 %v14198_v50, %v14196_v20  ;;  %v1108_v35 = vmul.f32 %v5724_v3, %v5724_v3  ;;  %v14202_v26 = vsub.f32 %v14200_v47, %v14201_v10  ;;  %v14206_v50 = vld [vmem:[#allocation25_spill] sm:$0xff]  ;;  %v5739_v1 = vld [vmem:[%s6118_s11 + $0x718] sm:$0xff] }
 0x2db   : > { %v5071_v49 = vpop.eup %5070  ;;  %5088 = vrsqrt.f32 %v10046_v42  ;;  %v14204_v34 = vsub.f32 %v14203_v16, %v14201_v10  ;;  %v2434_v32 = vsel %vm2433_vm12, %v9913_v36, %v2432_v14  ;;  %vm2447_vm0 = vcmp.eq.f32.partialorder %v10011_v40, inf }
 0x2dc   : > { %v5073_v55 = vpop.eup %5072  ;;  %v3716_v39 = vmul.f32 %v5071_v49, %v14197_v25  ;;  %v3717_v48 = vmul.f32 %v5071_v49, %v14199_v59  ;;  %v10082_v49 = vmax.f32 %v1987_v51, 0.0  ;;  %v2437_v47 = vsel %vm2435_vm13, %v2436_v31, %v2434_v32 }
 0x2dd   : > { %v5075_v46 = vpop.eup %5074  ;;  %v3722_v28 = vmul.f32 %v5073_v55, %v14202_v26  ;;  %v3723_v22 = vmul.f32 %v5073_v55, %v14204_v34  ;;  %v3169_v14 = vadd.f32 1e-10, %v2437_v47  ;;  %vm2449_vm1 = vcmp.eq.f32.partialorder %v10011_v40, 0.0 }
 0x2de   : > { %v3991_v20 = vmul.f32 %v14029_v52, %v3716_v39  ;;  %v3992_v3 = vmul.f32 %v14030_v17, %v3717_v48  ;;  %v2425_v26 = vmul.f32 %v5075_v46, %v9932_v0  ;;  %5090 = vrsqrt.f32 %v10082_v49  ;;  %v5077_v51 = vpop.eup %5076  ;;  %v14205_v39 = vld [vmem:[#allocation141_spill] sm:$0xff]  ;;  %v14208_v46 = vld [vmem:[#allocation142_spill] sm:$0xff] }
 0x2df   : > { %v3997_v10 = vmul.f32 %v14029_v52, %v3722_v28  ;;  %v3998_v34 = vmul.f32 %v14030_v17, %v3723_v22  ;;  %v2443_v28 = vand.u32 2147483648, %v10034_v24  ;;  %v14207_v59 = vsub.f32 %v14205_v39, %v14206_v50 }
 0x2e0   : > { %v4266_v55 = vadd.f32 %v14031_v56, %v3991_v20  ;;  %v4267_v25 = vadd.f32 %v14032_v18, %v3992_v3  ;;  %v2427_v36 = vsel %vm2426_vm14, %v9932_v0, %v2425_v26  ;;  %v14209_v16 = vsub.f32 %v14208_v46, %v14206_v50  ;;  %v14213_v0 = vld [vmem:[#allocation147_spill] sm:$0xff] }
 0x2e1   : > { %v4272_v22 = vadd.f32 %v14031_v56, %v3997_v10  ;;  %v4273_v31 = vadd.f32 %v14032_v18, %v3998_v34  ;;  %v3720_v48 = vmul.f32 %v5077_v51, %v14207_v59  ;;  %vm2440_vm2 = vcmp.eq.f32.partialorder %v10034_v24, inf  ;;  %v5079_v20 = vpop.eup %5078 }
 0x2e2   : > { %v3721_v32 = vmul.f32 %v5077_v51, %v14209_v16  ;;  %4530 = vst [vmem:[%s9394_s23 + $0x180] sm:$0xff] %v4266_v55  ;;  %4531 = vst [vmem:[%s9394_s23 + $0x188] sm:$0xff] %v4267_v25  ;;  %5092 = vrcp.f32 %v3169_v14  ;;  %v2430_v3 = vsel %vm2428_vm15, %v2429_v43, %v2427_v36  ;;  %vm2442_vm3 = vcmp.eq.f32.partialorder %v10034_v24, 0.0  ;;  %v5081_v10 = vpop.eup %5080  ;;  %v14210_v55 = vld [vmem:[#allocation146_spill] sm:$0xff] }
 0x2e3   : > { %v2464_v47 = vand.u32 2147483648, %v10036_v11  ;;  %v2457_v26 = vand.u32 2147483648, %v10046_v42  ;;  %4536 = vst [vmem:[%s9394_s23 + $0x1b0] sm:$0xff] %v4272_v22  ;;  %4537 = vst [vmem:[%s9394_s23 + $0x1b8] sm:$0xff] %v4273_v31  ;;  %v3995_v34 = vmul.f32 %v14029_v52, %v3720_v48  ;;  %v14211_v25 = vld [vmem:[#allocation26_spill] sm:$0xff]  ;;  %vm2461_vm4 = vcmp.eq.f32.partialorder %v10036_v11, inf }
 0x2e4   : > { %v3996_v51 = vmul.f32 %v14030_v17, %v3721_v32  ;;  %v14212_v14 = vsub.f32 %v14210_v55, %v14211_v25  ;;  %v14214_v43 = vsub.f32 %v14213_v0, %v14211_v25  ;;  %vm2454_vm5 = vcmp.eq.f32.partialorder %v10046_v42, inf  ;;  %v14215_v31 = vld [vmem:[#allocation203_spill] sm:$0xff] }
 0x2e5   : > { %v3168_v50 = vadd.f32 1e-10, %v2430_v3  ;;  %v2446_v22 = vmul.f32 %v5081_v10, %v10011_v40  ;;  %vm2463_vm6 = vcmp.eq.f32.partialorder %v10036_v11, 0.0  ;;  %vm2456_vm7 = vcmp.eq.f32.partialorder %v10046_v42, 0.0  ;;  %v5725_v48 = vld [vmem:[%s6118_s11 + $0x6b8] sm:$0xff]  ;;  %v5083_v10 = vpop.eup %5082 }
 0x2e6   : > { %v3726_v39 = vmul.f32 %v5079_v20, %v14212_v14  ;;  %v3727_v36 = vmul.f32 %v5079_v20, %v14214_v43  ;;  %v1986_v59 = vsub.f32 %v10062_v21, %v14215_v31  ;;  %v1109_v46 = vmul.f32 %v5725_v48, %v5725_v48  ;;  %v5085_v14 = vpop.eup %5084  ;;  %v14217_v0 = vld [vmem:[#allocation27_spill] sm:$0xff] }
 0x2e7   : > { %v4270_v16 = vadd.f32 %v14031_v56, %v3995_v34  ;;  %v4271_v32 = vadd.f32 %v14032_v18, %v3996_v51  ;;  %5094 = vrcp.f32 %v3168_v50  ;;  %v2448_v55 = vsel %vm2447_vm0, %v10011_v40, %v2446_v22  ;;  %v14219_v50 = vld [vmem:[#allocation150_spill] sm:$0xff] }
 0x2e8   : > { %v4001_v20 = vmul.f32 %v14029_v52, %v3726_v39  ;;  %v4002_v3 = vmul.f32 %v14030_v17, %v3727_v36  ;;  %v10140_v25 = vmax.f32 %v1986_v59, 0.0  ;;  %v1479_v21 = vadd.f32 %v1109_v46, %v1108_v35  ;;  %v14216_v39 = vld [vmem:[#allocation149_spill] sm:$0xff]  ;;  %v5087_v59 = vpop.eup %5086 }
 0x2e9   : > { %4534 = vst [vmem:[%s9394_s23 + $0x1a0] sm:$0xff] %v4270_v16  ;;  %4535 = vst [vmem:[%s9394_s23 + $0x1a8] sm:$0xff] %v4271_v32  ;;  %v14218_v43 = vsub.f32 %v14216_v39, %v14217_v0  ;;  %v14220_v31 = vsub.f32 %v14219_v50, %v14217_v0  ;;  %v14221_v48 = vand.u32 2147483648, %v10011_v40  ;;  %v2439_v46 = vmul.f32 %v5085_v14, %v10034_v24  ;;  %v5089_v16 = vpop.eup %5088  ;;  %v1277_v39 = vpop.xlane.xlu1 %1276 }
 0x2ea   : > { %v4276_v34 = vadd.f32 %v14031_v56, %v4001_v20  ;;  %v4277_v51 = vadd.f32 %v14032_v18, %v4002_v3  ;;  %vm2475_vm8 = vcmp.eq.f32.partialorder %v10082_v49, inf  ;;  %5096 = vrsqrt.f32 %v10140_v25  ;;  %1480 = vadd.xlane.f32.xlu1 %v1479_v21 }
 0x2eb   : > { %v3724_v36 = vmul.f32 %v5083_v10, %v14218_v43  ;;  %v3725_v22 = vmul.f32 %v5083_v10, %v14220_v31  ;;  %v2451_v35 = vsel %vm2449_vm1, %v14221_v48, %v2448_v55  ;;  %v2460_v10 = vmul.f32 %v5087_v59, %v10036_v11  ;;  %v5091_v0 = vpop.eup %5090  ;;  %v5726_v31 = vld [vmem:[%s6118_s11 + $0x6a0] sm:$0xff]  ;;  %v1274_v59 = vpop.xlane.xlu0 %1273 }
 0x2ec   : > { %4540 = vst [vmem:[%s9394_s23 + $0x1d0] sm:$0xff] %v4276_v34  ;;  %4541 = vst [vmem:[%s9394_s23 + $0x1d8] sm:$0xff] %v4277_v51  ;;  %v3171_v3 = vadd.f32 1e-10, %v2451_v35  ;;  %v2441_v40 = vsel %vm2440_vm2, %v10034_v24, %v2439_v46  ;;  %v2453_v55 = vmul.f32 %v5089_v16, %v10046_v42  ;;  %vm2477_vm9 = vcmp.eq.f32.partialorder %v10082_v49, 0.0  ;;  %v5727_v35 = vld [vmem:[%s6118_s11 + $0x6a8] sm:$0xff] }
 0x2ed   : > { %v3999_v32 = vmul.f32 %v14029_v52, %v3724_v36  ;;  %v4000_v20 = vmul.f32 %v14030_v17, %v3725_v22  ;;  %v2478_v21 = vand.u32 2147483648, %v10082_v49  ;;  %v2444_v51 = vsel %vm2442_vm3, %v2443_v28, %v2441_v40  ;;  %v5728_v40 = vld [vmem:[%s6118_s11 + $0x6d0] sm:$0xff] }
 0x2ee   : > { %5098 = vrcp.f32 %v3171_v3  ;;  %v3170_v43 = vadd.f32 1e-10, %v2444_v51  ;;  %v2462_v36 = vsel %vm2461_vm4, %v10036_v11, %v2460_v10  ;;  %v2455_v50 = vsel %vm2454_vm5, %v10046_v42, %v2453_v55  ;;  %v14223_v55 = vld [vmem:[#allocation28_spill] sm:$0xff]  ;;  %v14225_v51 = vld [vmem:[#allocation153_spill] sm:$0xff] }
 0x2ef   : > { %v4274_v14 = vadd.f32 %v14031_v56, %v3999_v32  ;;  %v4275_v34 = vadd.f32 %v14032_v18, %v4000_v20  ;;  %v1106_v22 = vmul.f32 %v5726_v31, %v5726_v31  ;;  %v2465_v24 = vsel %vm2463_vm6, %v2464_v47, %v2462_v36  ;;  %v5093_v3 = vpop.eup %5092 }
 0x2f0   : > { %v2458_v28 = vsel %vm2456_vm7, %v2457_v26, %v2455_v50  ;;  %v2474_v48 = vmul.f32 %v5091_v0, %v10082_v49  ;;  %v1107_v46 = vmul.f32 %v5727_v35, %v5727_v35  ;;  %5100 = vrcp.f32 %v3170_v43  ;;  %v14222_v26 = vld [vmem:[#allocation152_spill] sm:$0xff]  ;;  %v14227_v50 = vld [vmem:[#allocation207_spill] sm:$0xff] }
 0x2f1   : > { %4538 = vst [vmem:[%s9394_s23 + $0x1c0] sm:$0xff] %v4274_v14  ;;  %4539 = vst [vmem:[%s9394_s23 + $0x1c8] sm:$0xff] %v4275_v34  ;;  %v3173_v16 = vadd.f32 1e-10, %v2465_v24  ;;  %v3172_v32 = vadd.f32 1e-10, %v2458_v28  ;;  %v1112_v42 = vmul.f32 %v5728_v40, %v5728_v40  ;;  %v14224_v14 = vsub.f32 %v14222_v26, %v14223_v55 }
 0x2f2   : > { %v1725_v20 = vmul.f32 0.00390625, %v1277_v39  ;;  %v2476_v10 = vsel %vm2475_vm8, %v10082_v49, %v2474_v48  ;;  %v1476_v11 = vadd.f32 %v1107_v46, %v1106_v22  ;;  %v1724_v47 = vmul.f32 0.00390625, %v1274_v59  ;;  %v14228_v22 = vld [vmem:[#allocation208_spill] sm:$0xff]  ;;  %v5729_v48 = vld [vmem:[%s6118_s11 + $0x6d8] sm:$0xff]  ;;  %v14230_v40 = vld [vmem:[#allocation29_spill] sm:$0xff] }
 0x2f3   : > { %v3730_v34 = vmul.f32 %v5093_v3, %v14224_v14  ;;  %v14226_v0 = vsub.f32 %v14225_v51, %v14223_v55  ;;  %5102 = vrcp.f32 %v3173_v16  ;;  %v2479_v39 = vsel %vm2477_vm9, %v2478_v21, %v2476_v10  ;;  %v5730_v46 = vld [vmem:[%s6118_s11 + $0x6c0] sm:$0xff]  ;;  %v14232_v14 = vld [vmem:[#allocation158_spill] sm:$0xff] }
 0x2f4   : > { %5104 = vrcp.f32 %v3172_v32  ;;  %v3175_v36 = vadd.f32 1e-10, %v2479_v39  ;;  %1477 = vadd.xlane.f32.xlu0 %v1476_v11  ;;  %v1989_v31 = vsub.f32 %v1725_v20, %v14227_v50  ;;  %v1988_v59 = vsub.f32 %v1724_v47, %v14228_v22  ;;  %v5095_v49 = vpop.eup %5094  ;;  %v5731_v20 = vld [vmem:[%s6118_s11 + $0x6c8] sm:$0xff]  ;;  %v14242_v39 = vld [vmem:[#allocation270_spill] sm:$0xff] }
 0x2f5   : > { %v3731_v43 = vmul.f32 %v5093_v3, %v14226_v0  ;;  %v4005_v24 = vmul.f32 %v14029_v52, %v3730_v34  ;;  %v1113_v35 = vmul.f32 %v5729_v48, %v5729_v48  ;;  %v1110_v16 = vmul.f32 %v5730_v46, %v5730_v46  ;;  %v14229_v47 = vld [vmem:[#allocation157_spill] sm:$0xff]  ;;  %v1283_v48 = vpop.xlane.xlu1 %1282 }
 0x2f6   : > { %5106 = vrcp.f32 %v3175_v36  ;;  %v10213_v21 = vmax.f32 %v1989_v31, 0.0  ;;  %v10215_v32 = vmax.f32 %v1988_v59, 0.0  ;;  %v1111_v3 = vmul.f32 %v5731_v20, %v5731_v20  ;;  %v10232_v36 = vld [vmem:[%s6118_s11 + $0x778] sm:$0xff]  ;;  %v14236_v31 = vld [vmem:[#allocation381_spill] sm:$0xff] }
 0x2f7   : > { %v4006_v28 = vmul.f32 %v14030_v17, %v3731_v43  ;;  %v4280_v10 = vadd.f32 %v14031_v56, %v4005_v24  ;;  %v14231_v26 = vsub.f32 %v14229_v47, %v14230_v40  ;;  %v14233_v34 = vsub.f32 %v14232_v14, %v14230_v40  ;;  %v5097_v0 = vpop.eup %5096  ;;  %v10227_v43 = vld [vmem:[%s6118_s11 + $0x770] sm:$0xff]  ;;  %14235 = vst [vmem:[#allocation404_spill] sm:$0xff] %v10232_v36 }
 0x2f8   : > { %14234 = vst [vmem:[#allocation371_spill] sm:$0xff] %v10227_v43  ;;  %v10237_v22 = vmul.f32 0.00390625, %v14236_v31  ;;  %5108 = vrsqrt.f32 %v10213_v21  ;;  %vm2468_vm10 = vcmp.eq.f32.partialorder %v10140_v25, inf  ;;  %vm2470_vm11 = vcmp.eq.f32.partialorder %v10140_v25, 0.0  ;;  %v14238_v14 = vld [vmem:[#allocation30_spill] sm:$0xff] }
 0x2f9   : > { %v4281_v11 = vadd.f32 %v14032_v18, %v4006_v28  ;;  %v3728_v55 = vmul.f32 %v5095_v49, %v14231_v26  ;;  %v3729_v51 = vmul.f32 %v5095_v49, %v14233_v34  ;;  %4544 = vst [vmem:[%s9394_s23 + $0x1f0] sm:$0xff] %v4280_v10  ;;  %v2467_v28 = vmul.f32 %v5097_v0, %v10140_v25  ;;  %v1280_v26 = vpop.xlane.xlu0 %1279  ;;  %v14240_v0 = vld [vmem:[#allocation162_spill] sm:$0xff] }
 0x2fa   : > { %5110 = vrsqrt.f32 %v10215_v32  ;;  %v2471_v46 = vand.u32 2147483648, %v10140_v25  ;;  %v1485_v49 = vadd.f32 %v1113_v35, %v1112_v42  ;;  %v1482_v40 = vadd.f32 %v1111_v3, %v1110_v16  ;;  %v5735_v3 = vld [vmem:[%s6118_s11 + $0x6f8] sm:$0xff] }
 0x2fb   : > { %4545 = vst [vmem:[%s9394_s23 + $0x1f8] sm:$0xff] %v4281_v11  ;;  %v4003_v59 = vmul.f32 %v14029_v52, %v3728_v55  ;;  %v4004_v24 = vmul.f32 %v14030_v17, %v3729_v51  ;;  %v5099_v20 = vpop.eup %5098  ;;  %v2469_v47 = vsel %vm2468_vm10, %v10140_v25, %v2467_v28  ;;  %v14237_v55 = vld [vmem:[#allocation161_spill] sm:$0xff]  ;;  %v14241_v31 = vsub.f32 %v14240_v0, %v14238_v14 }
 0x2fc   : > { %v14239_v34 = vsub.f32 %v14237_v55, %v14238_v14  ;;  %v2472_v42 = vsel %vm2470_vm11, %v2471_v46, %v2469_v47  ;;  %1486 = vadd.xlane.f32.xlu1 %v1485_v49  ;;  %v1727_v35 = vmul.f32 0.00390625, %v1283_v48  ;;  %1483 = vadd.xlane.f32.xlu0 %v1482_v40  ;;  %v5734_v25 = vld [vmem:[%s6118_s11 + $0x6f0] sm:$0xff]  ;;  %v1117_v28 = vmul.f32 %v5735_v3, %v5735_v3  ;;  %v14244_v48 = vld [vmem:[#allocation164_spill] sm:$0xff]  ;;  %v14245_v47 = vld [vmem:[#allocation31_spill] sm:$0xff] }
 0x2fd   : > { %v4278_v10 = vadd.f32 %v14031_v56, %v4003_v59  ;;  %v4279_v11 = vadd.f32 %v14032_v18, %v4004_v24  ;;  %v3735_v50 = vmul.f32 %v5099_v20, %v14241_v31  ;;  %v10259_v59 = vmul.f32 0.00390625, %v14242_v39  ;;  %v5101_v55 = vpop.eup %5100 }
 0x2fe   : > { %v3734_v51 = vmul.f32 %v5099_v20, %v14239_v34  ;;  %v3174_v24 = vadd.f32 1e-10, %v2472_v42  ;;  %v1116_v16 = vmul.f32 %v5734_v25, %v5734_v25  ;;  %v14243_v20 = vld [vmem:[#allocation215_spill] sm:$0xff]  ;;  %v1726_v49 = vmul.f32 0.00390625, %v1280_v26 }
 0x2ff   : > { %4542 = vst [vmem:[%s9394_s23 + $0x1e0] sm:$0xff] %v4278_v10  ;;  %4543 = vst [vmem:[%s9394_s23 + $0x1e8] sm:$0xff] %v4279_v11  ;;  %v4010_v14 = vmul.f32 %v14030_v17, %v3735_v50  ;;  %v1991_v46 = vsub.f32 %v1727_v35, %v14243_v20  ;;  %v14246_v39 = vsub.f32 %v14244_v48, %v14245_v47  ;;  %v14247_v10 = vld [vmem:[#allocation165_spill] sm:$0xff]  ;;  %v2492_v31 = vand.u32 2147483648, %v10213_v21  ;;  %v14250_v20 = vld [vmem:[#allocation32_spill] sm:$0xff] }
 0x300   : > { %v4009_v34 = vmul.f32 %v14029_v52, %v3734_v51  ;;  %v14248_v11 = vsub.f32 %v14247_v10, %v14245_v47  ;;  %5112 = vrcp.f32 %v3174_v24  ;;  %v5103_v42 = vpop.eup %5102  ;;  %vm2489_vm12 = vcmp.eq.f32.partialorder %v10213_v21, inf  ;;  %v14255_v10 = vld [vmem:[#allocation33_spill] sm:$0xff] }
 0x301   : > { %v3732_v0 = vmul.f32 %v5101_v55, %v14246_v39  ;;  %v4285_v50 = vadd.f32 %v14032_v18, %v4010_v14  ;;  %vm2482_vm13 = vcmp.eq.f32.partialorder %v10215_v32, inf  ;;  %v10279_v26 = vmax.f32 %v1991_v46, 0.0  ;;  %v5105_v25 = vpop.eup %5104  ;;  %v14252_v39 = vld [vmem:[#allocation169_spill] sm:$0xff]  ;;  %v14254_v46 = vld [vmem:[#allocation172_spill] sm:$0xff] }
 0x302   : > { %v3733_v40 = vmul.f32 %v5101_v55, %v14248_v11  ;;  %v4284_v51 = vadd.f32 %v14031_v56, %v4009_v34  ;;  %v1491_v35 = vadd.f32 %v1117_v28, %v1116_v16  ;;  %v14249_v55 = vld [vmem:[#allocation168_spill] sm:$0xff]  ;;  %v14253_v34 = vsub.f32 %v14252_v39, %v14250_v20 }
 0x303   : > { %v4007_v3 = vmul.f32 %v14029_v52, %v3732_v0  ;;  %v14251_v48 = vsub.f32 %v14249_v55, %v14250_v20  ;;  %vm2491_vm14 = vcmp.eq.f32.partialorder %v10213_v21, 0.0  ;;  %4549 = vst [vmem:[%s9394_s23 + $0x218] sm:$0xff] %v4285_v50  ;;  %v14256_v16 = vsub.f32 %v14254_v46, %v14255_v10  ;;  %v14257_v0 = vld [vmem:[#allocation173_spill] sm:$0xff]  ;;  %v14259_v55 = vld [vmem:[#allocation218_spill] sm:$0xff] }
 0x304   : > { %v4008_v24 = vmul.f32 %v14030_v17, %v3733_v40  ;;  %v3739_v14 = vmul.f32 %v5103_v42, %v14253_v34  ;;  %4548 = vst [vmem:[%s9394_s23 + $0x210] sm:$0xff] %v4284_v51  ;;  %v14258_v11 = vsub.f32 %v14257_v0, %v14255_v10  ;;  %5114 = vrsqrt.f32 %v10279_v26  ;;  %1492 = vadd.xlane.f32.xlu1 %v1491_v35  ;;  %v14261_v10 = vld [vmem:[#allocation34_spill] sm:$0xff] }
 0x305   : > { %v3738_v47 = vmul.f32 %v5103_v42, %v14251_v48  ;;  %v3736_v28 = vmul.f32 %v5105_v25, %v14256_v16  ;;  %v1990_v48 = vsub.f32 %v1726_v49, %v14259_v55  ;;  %v5107_v42 = vpop.eup %5106  ;;  %v4282_v51 = vadd.f32 %v14031_v56, %v4007_v3  ;;  %v14263_v49 = vld [vmem:[#allocation178_spill] sm:$0xff]  ;;  %v1289_v55 = vpop.xlane.xlu1 %1288 }
 0x306   : > { %v3737_v40 = vmul.f32 %v5105_v25, %v14258_v11  ;;  %v4283_v50 = vadd.f32 %v14032_v18, %v4008_v24  ;;  %v4014_v39 = vmul.f32 %v14030_v17, %v3739_v14  ;;  %v14260_v25 = vld [vmem:[#allocation177_spill] sm:$0xff]  ;;  %v14264_v35 = vsub.f32 %v14263_v49, %v14261_v10  ;;  %v5109_v3 = vpop.eup %5108 }
 0x307   : > { %v4013_v20 = vmul.f32 %v14029_v52, %v3738_v47  ;;  %v4011_v34 = vmul.f32 %v14029_v52, %v3736_v28  ;;  %v14262_v16 = vsub.f32 %v14260_v25, %v14261_v10  ;;  %4546 = vst [vmem:[%s9394_s23 + $0x200] sm:$0xff] %v4282_v51  ;;  %v2485_v14 = vand.u32 2147483648, %v10215_v32  ;;  %v5736_v28 = vld [vmem:[%s6118_s11 + $0x6e0] sm:$0xff]  ;;  %v1286_v25 = vpop.xlane.xlu0 %1285  ;;  %v5111_v10 = vpop.eup %5110 }
 0x308   : > { %v4012_v46 = vmul.f32 %v14030_v17, %v3737_v40  ;;  %v3743_v11 = vmul.f32 %v5107_v42, %v14264_v35  ;;  %4547 = vst [vmem:[%s9394_s23 + $0x208] sm:$0xff] %v4283_v50  ;;  %v4289_v47 = vadd.f32 %v14032_v18, %v4014_v39  ;;  %v1114_v40 = vmul.f32 %v5736_v28, %v5736_v28  ;;  %v5737_v35 = vld [vmem:[%s6118_s11 + $0x6e8] sm:$0xff] }
 0x309   : > { %v3742_v0 = vmul.f32 %v5107_v42, %v14262_v16  ;;  %v4288_v24 = vadd.f32 %v14031_v56, %v4013_v20  ;;  %v4286_v42 = vadd.f32 %v14031_v56, %v4011_v34  ;;  %v2488_v20 = vmul.f32 %v5109_v3, %v10213_v21 }
 0x30a   : > { %v4287_v16 = vadd.f32 %v14032_v18, %v4012_v46  ;;  %v4018_v50 = vmul.f32 %v14030_v17, %v3743_v11  ;;  %4553 = vst [vmem:[%s9394_s23 + $0x238] sm:$0xff] %v4289_v47  ;;  %v2481_v39 = vmul.f32 %v5111_v10, %v10215_v32  ;;  %v10326_v49 = vmax.f32 %v1990_v48, 0.0  ;;  %v14266_v10 = vld [vmem:[#allocation200_spill] sm:$0xff] }
 0x30b   : > { %v4017_v51 = vmul.f32 %v14029_v52, %v3742_v0  ;;  %4552 = vst [vmem:[%s9394_s23 + $0x230] sm:$0xff] %v4288_v24  ;;  %v1115_v28 = vmul.f32 %v5737_v35, %v5737_v35  ;;  %4550 = vst [vmem:[%s9394_s23 + $0x220] sm:$0xff] %v4286_v42  ;;  %v1729_v0 = vmul.f32 0.00390625, %v1289_v55  ;;  %v1728_v11 = vmul.f32 0.00390625, %v1286_v25  ;;  %v14265_v24 = vld [vmem:[#allocation397_spill] sm:$0xff]  ;;  %v14268_v35 = vld [vmem:[#allocation222_spill] sm:$0xff] }
 0x30c   : > { %4551 = vst [vmem:[%s9394_s23 + $0x228] sm:$0xff] %v4287_v16  ;;  %v4293_v46 = vadd.f32 %v14032_v18, %v4018_v50  ;;  %v2490_v3 = vsel %vm2489_vm12, %v10213_v21, %v2488_v20  ;;  %v2483_v48 = vsel %vm2482_vm13, %v10215_v32, %v2481_v39  ;;  %vm2484_vm15 = vcmp.eq.f32.partialorder %v10215_v32, 0.0  ;;  %v14267_v50 = vld [vmem:[#allocation221_spill] sm:$0xff]  ;;  %v5740_v21 = vld [vmem:[%s6118_s11 + $0x700] sm:$0xff] }
 0x30d   : > { %v4292_v34 = vadd.f32 %v14031_v56, %v4017_v51  ;;  %5116 = vrsqrt.f32 %v10326_v49  ;;  %v10342_v47 = vmul.f32 0.00390625, %v14265_v24  ;;  %v2493_v55 = vsel %vm2491_vm14, %v2492_v31, %v2490_v3  ;;  %v5113_v39 = vpop.eup %5112  ;;  %v1292_v3 = vpop.xlane.xlu0 %1291 }
 0x30e   : > { %4557 = vst [vmem:[%s9394_s23 + $0x258] sm:$0xff] %v4293_v46  ;;  %v2486_v25 = vsel %vm2484_vm15, %v2485_v14, %v2483_v48  ;;  %v10352_v42 = vmul.f32 %v14266_v10, %v14266_v10  ;;  %v3177_v32 = vadd.f32 1e-10, %v2493_v55  ;;  %v1488_v51 = vadd.f32 %v1115_v28, %v1114_v40  ;;  %v1295_v14 = vpop.xlane.xlu1 %1294  ;;  %v14269_v48 = vld [vmem:[#allocation179_spill] sm:$0xff] }
 0x30f   : > { %4556 = vst [vmem:[%s9394_s23 + $0x250] sm:$0xff] %v4292_v34  ;;  %v3176_v16 = vadd.f32 1e-10, %v2486_v25  ;;  %v1993_v20 = vsub.f32 %v1729_v0, %v14267_v50  ;;  %v1992_v24 = vsub.f32 %v1728_v11, %v14268_v35  ;;  %v5738_v34 = vld [vmem:[%s6118_s11 + $0x710] sm:$0xff]  ;;  %v1121_v19 = vmul.f32 %v5739_v1, %v5739_v1  ;;  %v14272_v25 = vld [vmem:[#allocation180_spill] sm:$0xff] }
 0x310   : > { %v1120_v46 = vmul.f32 %v5738_v34, %v5738_v34  ;;  %v1118_v31 = vmul.f32 %v5740_v21, %v5740_v21  ;;  %v14271_v5 = vsub.f32 %v14269_v48, %v14270_v54  ;;  %v14273_v40 = vsub.f32 %v14272_v25, %v14270_v54  ;;  %1489 = vadd.xlane.f32.xlu0 %v1488_v51  ;;  %v5741_v50 = vld [vmem:[%s6118_s11 + $0x708] sm:$0xff] }
 0x311   : > { %5118 = vrcp.f32 %v3177_v32  ;;  %v10365_v0 = vmax.f32 %v1993_v20, 0.0  ;;  %v10367_v11 = vmax.f32 %v1992_v24, 0.0  ;;  %v1119_v35 = vmul.f32 %v5741_v50, %v5741_v50  ;;  %v5115_v34 = vpop.eup %5114  ;;  %v5742_v50 = vld [vmem:[%s6118_s11 + $0x730] sm:$0xff] }
 0x312   : > { %v3740_v55 = vmul.f32 %v5113_v39, %v14271_v5  ;;  %v3741_v28 = vmul.f32 %v5113_v39, %v14273_v40  ;;  %5120 = vrcp.f32 %v3176_v16  ;;  %v1497_v1 = vadd.f32 %v1121_v19, %v1120_v46  ;;  %v14274_v5 = vld [vmem:[#allocation204_spill] sm:$0xff]  ;;  %v14275_v19 = vld [vmem:[#allocation209_spill] sm:$0xff]  ;;  %v1301_v25 = vpop.xlane.xlu1 %1300  ;;  %v1298_v40 = vpop.xlane.xlu0 %1297 }
 0x313   : > { %5122 = vrsqrt.f32 %v10365_v0  ;;  %v10375_v54 = vmul.f32 %v14274_v5, %v14274_v5  ;;  %v2502_v32 = vmul.f32 %v5115_v34, %v10279_v26  ;;  %vm2503_vm0 = vcmp.eq.f32.partialorder %v10279_v26, inf }
 0x314   : > { %v4015_v21 = vmul.f32 %v14029_v52, %v3740_v55  ;;  %v4016_v48 = vmul.f32 %v14030_v17, %v3741_v28  ;;  %5124 = vrsqrt.f32 %v10367_v11  ;;  %1498 = vadd.xlane.f32.xlu1 %v1497_v1  ;;  %v10382_v16 = vmul.f32 %v14275_v19, %v14275_v19 }
 0x315   : > { %vm2505_vm1 = vcmp.eq.f32.partialorder %v10279_v26, 0.0  ;;  %v2506_v39 = vand.u32 2147483648, %v10279_v26  ;;  %v2504_v24 = vsel %vm2503_vm0, %v10279_v26, %v2502_v32  ;;  %vm2496_vm2 = vcmp.eq.f32.partialorder %v10326_v49, inf  ;;  %v5744_v26 = vld [vmem:[%s6118_s11 + $0x720] sm:$0xff] }
 0x316   : > { %v4290_v51 = vadd.f32 %v14031_v56, %v4015_v21  ;;  %v4291_v20 = vadd.f32 %v14032_v18, %v4016_v48  ;;  %v1494_v46 = vadd.f32 %v1119_v35, %v1118_v31  ;;  %v1731_v55 = vmul.f32 0.00390625, %v1295_v14  ;;  %v5743_v21 = vld [vmem:[%s6118_s11 + $0x738] sm:$0xff]  ;;  %v14277_v14 = vld [vmem:[#allocation233_spill] sm:$0xff] }
 0x317   : > { %v2507_v28 = vsel %vm2505_vm1, %v2506_v39, %v2504_v24  ;;  %v1730_v1 = vmul.f32 0.00390625, %v1292_v3  ;;  %v1124_v34 = vmul.f32 %v5742_v50, %v5742_v50  ;;  %v1125_v48 = vmul.f32 %v5743_v21, %v5743_v21 }
 0x318   : > { %4554 = vst [vmem:[%s9394_s23 + $0x240] sm:$0xff] %v4290_v51  ;;  %4555 = vst [vmem:[%s9394_s23 + $0x248] sm:$0xff] %v4291_v20  ;;  %v3179_v8 = vadd.f32 1e-10, %v2507_v28  ;;  %1495 = vadd.xlane.f32.xlu0 %v1494_v46  ;;  %v1995_v27 = vsub.f32 %v1731_v55, %v14276_v23  ;;  %v1122_v32 = vmul.f32 %v5744_v26, %v5744_v26  ;;  %v1733_v51 = vmul.f32 0.00390625, %v1301_v25  ;;  %v14278_v28 = vld [vmem:[#allocation238_spill] sm:$0xff] }
 0x319   : > { %v1123_v31 = vmul.f32 %v9831_v13, %v9831_v13  ;;  %v1994_v35 = vsub.f32 %v1730_v1, %v14277_v14  ;;  %v1503_v61 = vadd.f32 %v1125_v48, %v1124_v34  ;;  %v1732_v20 = vmul.f32 0.00390625, %v1298_v40  ;;  %v14280_v26 = vld [vmem:[#allocation185_spill] sm:$0xff] }
 0x31a   : > { %v5117_v39 = vpop.eup %5116  ;;  %5126 = vrcp.f32 %v3179_v8  ;;  %vm2498_vm3 = vcmp.eq.f32.partialorder %v10326_v49, 0.0  ;;  %v10400_v3 = vmax.f32 %v1995_v27, 0.0  ;;  %v2499_v23 = vand.u32 2147483648, %v10326_v49  ;;  %v14279_v8 = vld [vmem:[#allocation239_spill] sm:$0xff] }
 0x31b   : > { %v1500_v24 = vadd.f32 %v1123_v31, %v1122_v32  ;;  %v2495_v46 = vmul.f32 %v5117_v39, %v10326_v49  ;;  %v10404_v55 = vmax.f32 %v1994_v35, 0.0  ;;  %1504 = vadd.xlane.f32.xlu1 %v1503_v61  ;;  %v1997_v50 = vsub.f32 %v1733_v51, %v14278_v28  ;;  %v14281_v32 = vld [vmem:[#allocation36_spill] sm:$0xff]  ;;  %v14283_v35 = vld [vmem:[#allocation186_spill] sm:$0xff] }
 0x31c   : > { %vm2517_vm4 = vcmp.eq.f32.partialorder %v10365_v0, inf  ;;  %vm2519_vm5 = vcmp.eq.f32.partialorder %v10365_v0, 0.0  ;;  %5128 = vrsqrt.f32 %v10400_v3  ;;  %v1996_v27 = vsub.f32 %v1732_v20, %v14279_v8 }
 0x31d   : > { %1501 = vadd.xlane.f32.xlu0 %v1500_v24  ;;  %v2497_v25 = vsel %vm2496_vm2, %v10326_v49, %v2495_v46  ;;  %v2520_v40 = vand.u32 2147483648, %v10365_v0  ;;  %vm2510_vm6 = vcmp.eq.f32.partialorder %v10367_v11, inf  ;;  %5130 = vrsqrt.f32 %v10404_v55  ;;  %v14285_v46 = vld [vmem:[#allocation188_spill] sm:$0xff] }
 0x31e   : > { %v5119_v61 = vpop.eup %5118  ;;  %v2500_v1 = vsel %vm2498_vm3, %v2499_v23, %v2497_v25  ;;  %vm2512_vm7 = vcmp.eq.f32.partialorder %v10367_v11, 0.0  ;;  %v2513_v34 = vand.u32 2147483648, %v10367_v11  ;;  %v10421_v21 = vmax.f32 %v1997_v50, 0.0  ;;  %v14286_v23 = vld [vmem:[#allocation37_spill] sm:$0xff] }
 0x31f   : > { %v5121_v48 = vpop.eup %5120  ;;  %v14282_v31 = vsub.f32 %v14280_v26, %v14281_v32  ;;  %v14284_v51 = vsub.f32 %v14283_v35, %v14281_v32  ;;  %v3178_v39 = vadd.f32 1e-10, %v2500_v1  ;;  %v1128_v49 = vmul.f32 %v9849_v9, %v9849_v9  ;;  %v14288_v50 = vld [vmem:[#allocation189_spill] sm:$0xff] }
 0x320   : > { %v5123_v24 = vpop.eup %5122  ;;  %v14287_v28 = vsub.f32 %v14285_v46, %v14286_v23  ;;  %v14289_v25 = vsub.f32 %v14288_v50, %v14286_v23  ;;  %5132 = vrsqrt.f32 %v10421_v21  ;;  %v10438_v26 = vmax.f32 %v1996_v27, 0.0 }
 0x321   : > { %v3746_v14 = vmul.f32 %v5119_v61, %v14282_v31  ;;  %v3747_v20 = vmul.f32 %v5119_v61, %v14284_v51  ;;  %v5125_v31 = vpop.eup %5124  ;;  %5134 = vrcp.f32 %v3178_v39  ;;  %v2516_v32 = vmul.f32 %v5123_v24, %v10365_v0 }
 0x322   : > { %v3744_v8 = vmul.f32 %v5121_v48, %v14287_v28  ;;  %v3745_v13 = vmul.f32 %v5121_v48, %v14289_v25  ;;  %v2509_v48 = vmul.f32 %v5125_v31, %v10367_v11  ;;  %v1129_v27 = vmul.f32 %v9866_v4, %v9866_v4  ;;  %v1304_v31 = vpop.xlane.xlu0 %1303 }
 0x323   : > { %v4021_v61 = vmul.f32 %v14029_v52, %v3746_v14  ;;  %v4022_v1 = vmul.f32 %v14030_v17, %v3747_v20  ;;  %v2518_v20 = vsel %vm2517_vm4, %v10365_v0, %v2516_v32  ;;  %vm2531_vm8 = vcmp.eq.f32.partialorder %v10400_v3, inf }
 0x324   : > { %v4019_v35 = vmul.f32 %v14029_v52, %v3744_v8  ;;  %v4020_v51 = vmul.f32 %v14030_v17, %v3745_v13  ;;  %v2534_v39 = vand.u32 2147483648, %v10400_v3  ;;  %v2521_v23 = vsel %vm2519_vm5, %v2520_v40, %v2518_v20  ;;  %v1307_v8 = vpop.xlane.xlu1 %1306 }
 0x325   : > { %v4296_v46 = vadd.f32 %v14031_v56, %v4021_v61  ;;  %v4297_v14 = vadd.f32 %v14032_v18, %v4022_v1  ;;  %v2511_v28 = vsel %vm2510_vm6, %v10367_v11, %v2509_v48  ;;  %vm2533_vm9 = vcmp.eq.f32.partialorder %v10400_v3, 0.0 }
 0x326   : > { %v4294_v13 = vadd.f32 %v14031_v56, %v4019_v35  ;;  %v4295_v24 = vadd.f32 %v14032_v18, %v4020_v51  ;;  %v3181_v50 = vadd.f32 1e-10, %v2521_v23  ;;  %v2514_v25 = vsel %vm2512_vm7, %v2513_v34, %v2511_v28  ;;  %v14290_v35 = vld [vmem:[#allocation194_spill] sm:$0xff]  ;;  %v14295_v23 = vld [vmem:[#allocation247_spill] sm:$0xff] }
 0x327   : > { %4560 = vst [vmem:[%s9394_s23 + $0x270] sm:$0xff] %v4296_v46  ;;  %4561 = vst [vmem:[%s9394_s23 + $0x278] sm:$0xff] %v4297_v14  ;;  %vm2524_vm10 = vcmp.eq.f32.partialorder %v10404_v55, inf  ;;  %5136 = vrsqrt.f32 %v10438_v26  ;;  %v3180_v0 = vadd.f32 1e-10, %v2514_v25  ;;  %vm2526_vm11 = vcmp.eq.f32.partialorder %v10404_v55, 0.0  ;;  %v5127_v1 = vpop.eup %5126 }
 0x328   : > { %4558 = vst [vmem:[%s9394_s23 + $0x260] sm:$0xff] %v4294_v13  ;;  %4559 = vst [vmem:[%s9394_s23 + $0x268] sm:$0xff] %v4295_v24  ;;  %v2527_v40 = vand.u32 2147483648, %v10404_v55  ;;  %v1509_v61 = vadd.f32 %v1129_v27, %v1128_v49  ;;  %5138 = vrcp.f32 %v3181_v50  ;;  %v1126_v32 = vmul.f32 %v10022_v7, %v10022_v7  ;;  %v14291_v51 = vld [vmem:[#allocation38_spill] sm:$0xff]  ;;  %v14293_v14 = vld [vmem:[#allocation195_spill] sm:$0xff] }
 0x329   : > { %v1127_v11 = vmul.f32 %v10027_v2, %v10027_v2  ;;  %v1735_v34 = vmul.f32 0.00390625, %v1307_v8  ;;  %v14292_v48 = vsub.f32 %v14290_v35, %v14291_v51  ;;  %v14294_v20 = vsub.f32 %v14293_v14, %v14291_v51  ;;  %v5129_v27 = vpop.eup %5128 }
 0x32a   : > { %5140 = vrcp.f32 %v3180_v0  ;;  %1510 = vadd.xlane.f32.xlu1 %v1509_v61  ;;  %v1734_v49 = vmul.f32 0.00390625, %v1304_v31  ;;  %v1132_v50 = vmul.f32 %v10227_v43, %v10227_v43  ;;  %v1133_v8 = vmul.f32 %v10232_v36, %v10232_v36  ;;  %v5131_v25 = vpop.eup %5130  ;;  %v14296_v0 = vld [vmem:[#allocation251_spill] sm:$0xff]  ;;  %v14320_v36 = vld [vmem:[#allocation213_spill] sm:$0xff]  ;;  %v14323_v43 = vld [vmem:[#allocation214_spill] sm:$0xff] }
 0x32b   : > { %v3750_v46 = vmul.f32 %v5127_v1, %v14292_v48  ;;  %v3751_v13 = vmul.f32 %v5127_v1, %v14294_v20  ;;  %v1506_v24 = vadd.f32 %v1127_v11, %v1126_v32  ;;  %v1999_v28 = vsub.f32 %v1735_v34, %v14295_v23 }
 0x32c   : > { %v2530_v1 = vmul.f32 %v5129_v27, %v10400_v3  ;;  %v1998_v61 = vsub.f32 %v1734_v49, %v14296_v0  ;;  %v2523_v31 = vmul.f32 %v5131_v25, %v10404_v55  ;;  %vm2545_vm12 = vcmp.eq.f32.partialorder %v10421_v21, inf }
 0x32d   : > { %v4025_v35 = vmul.f32 %v14029_v52, %v3750_v46  ;;  %v4026_v48 = vmul.f32 %v14030_v17, %v3751_v13  ;;  %1507 = vadd.xlane.f32.xlu0 %v1506_v24  ;;  %v10494_v32 = vmax.f32 %v1999_v28, 0.0  ;;  %v1515_v11 = vadd.f32 %v1133_v8, %v1132_v50  ;;  %v5133_v14 = vpop.eup %5132  ;;  %v14297_v28 = vld [vmem:[#allocation196_spill] sm:$0xff]  ;;  %v14298_v50 = vld [vmem:[#allocation39_spill] sm:$0xff] }
 0x32e   : > { %v2532_v46 = vsel %vm2531_vm8, %v10400_v3, %v2530_v1  ;;  %vm2547_vm13 = vcmp.eq.f32.partialorder %v10421_v21, 0.0  ;;  %v2525_v13 = vsel %vm2524_vm10, %v10404_v55, %v2523_v31  ;;  %v2548_v49 = vand.u32 2147483648, %v10421_v21  ;;  %v5135_v27 = vpop.eup %5134  ;;  %v1313_v31 = vpop.xlane.xlu1 %1312 }
 0x32f   : > { %v4300_v34 = vadd.f32 %v14031_v56, %v4025_v35  ;;  %v4301_v51 = vadd.f32 %v14032_v18, %v4026_v48  ;;  %v2535_v20 = vsel %vm2533_vm9, %v2534_v39, %v2532_v46  ;;  %5142 = vrsqrt.f32 %v10494_v32  ;;  %1516 = vadd.xlane.f32.xlu1 %v1515_v11  ;;  %v14300_v35 = vld [vmem:[#allocation197_spill] sm:$0xff]  ;;  %v1310_v46 = vpop.xlane.xlu0 %1309 }
 0x330   : > { %v3183_v24 = vadd.f32 1e-10, %v2535_v20  ;;  %v2528_v23 = vsel %vm2526_vm11, %v2527_v40, %v2525_v13  ;;  %v2544_v3 = vmul.f32 %v5133_v14, %v10421_v21  ;;  %v10514_v39 = vmax.f32 %v1998_v61, 0.0  ;;  %v5745_v40 = vld [vmem:[%s6118_s11 + $0x760] sm:$0xff] }
 0x331   : > { %4564 = vst [vmem:[%s9394_s23 + $0x290] sm:$0xff] %v4300_v34  ;;  %4565 = vst [vmem:[%s9394_s23 + $0x298] sm:$0xff] %v4301_v51  ;;  %v14299_v8 = vsub.f32 %v14297_v28, %v14298_v50  ;;  %v14301_v48 = vsub.f32 %v14300_v35, %v14298_v50  ;;  %v3182_v0 = vadd.f32 1e-10, %v2528_v23  ;;  %vm2538_vm14 = vcmp.eq.f32.partialorder %v10438_v26, inf }
 0x332   : > { %5144 = vrcp.f32 %v3183_v24  ;;  %v2546_v55 = vsel %vm2545_vm12, %v10421_v21, %v2544_v3  ;;  %vm2540_vm15 = vcmp.eq.f32.partialorder %v10438_v26, 0.0  ;;  %v1130_v61 = vmul.f32 %v5745_v40, %v5745_v40 }
 0x333   : > { %v3748_v25 = vmul.f32 %v5135_v27, %v14299_v8  ;;  %v3749_v1 = vmul.f32 %v5135_v27, %v14301_v48  ;;  %5146 = vrcp.f32 %v3182_v0  ;;  %v2549_v51 = vsel %vm2547_vm13, %v2548_v49, %v2546_v55  ;;  %v5746_v27 = vld [vmem:[%s6118_s11 + $0x768] sm:$0xff] }
 0x334   : > { %v5137_v14 = vpop.eup %5136  ;;  %v3185_v20 = vadd.f32 1e-10, %v2549_v51  ;;  %v2541_v13 = vand.u32 2147483648, %v10438_v26  ;;  %5148 = vrsqrt.f32 %v10514_v39  ;;  %v1131_v24 = vmul.f32 %v5746_v27, %v5746_v27  ;;  %v14303_v0 = vld [vmem:[#allocation40_spill] sm:$0xff]  ;;  %v14305_v51 = vld [vmem:[#allocation202_spill] sm:$0xff] }
 0x335   : > { %v4023_v11 = vmul.f32 %v14029_v52, %v3748_v25  ;;  %v4024_v34 = vmul.f32 %v14030_v17, %v3749_v1  ;;  %v2537_v28 = vmul.f32 %v5137_v14, %v10438_v26  ;;  %v1737_v21 = vmul.f32 0.00390625, %v1313_v31  ;;  %v5139_v49 = vpop.eup %5138  ;;  %v5747_v25 = vld [vmem:[%s6118_s11 + $0x790] sm:$0xff] }
 0x336   : > { %5150 = vrcp.f32 %v3185_v20  ;;  %v1512_v50 = vadd.f32 %v1131_v24, %v1130_v61  ;;  %v1736_v8 = vmul.f32 0.00390625, %v1310_v46  ;;  %v1136_v35 = vmul.f32 %v5747_v25, %v5747_v25  ;;  %v14302_v1 = vld [vmem:[#allocation201_spill] sm:$0xff]  ;;  %v14307_v61 = vld [vmem:[#allocation263_spill] sm:$0xff] }
 0x337   : > { %v4298_v23 = vadd.f32 %v14031_v56, %v4023_v11  ;;  %v4299_v3 = vadd.f32 %v14032_v18, %v4024_v34  ;;  %v5141_v48 = vpop.eup %5140  ;;  %v14304_v55 = vsub.f32 %v14302_v1, %v14303_v0  ;;  %v14306_v11 = vsub.f32 %v14305_v51, %v14303_v0  ;;  %v14308_v14 = vld [vmem:[#allocation205_spill] sm:$0xff]  ;;  %v14313_v0 = vld [vmem:[#allocation268_spill] sm:$0xff] }
 0x338   : > { %v2539_v31 = vsel %vm2538_vm14, %v10438_v26, %v2537_v28  ;;  %v2001_v46 = vsub.f32 %v1737_v21, %v14307_v61  ;;  %v14309_v20 = vld [vmem:[#allocation41_spill] sm:$0xff]  ;;  %1513 = vadd.xlane.f32.xlu0 %v1512_v50  ;;  %v5748_v26 = vld [vmem:[%s6118_s11 + $0x798] sm:$0xff]  ;;  %vm2559_vm0 = vcmp.eq.f32.partialorder %v10494_v32, inf  ;;  %vm2561_vm1 = vcmp.eq.f32.partialorder %v10494_v32, 0.0 }
 0x339   : > { %4562 = vst [vmem:[%s9394_s23 + $0x280] sm:$0xff] %v4298_v23  ;;  %4563 = vst [vmem:[%s9394_s23 + $0x288] sm:$0xff] %v4299_v3  ;;  %v3754_v40 = vmul.f32 %v5139_v49, %v14304_v55  ;;  %v3755_v34 = vmul.f32 %v5139_v49, %v14306_v11  ;;  %v14310_v27 = vsub.f32 %v14308_v14, %v14309_v20  ;;  %v14311_v23 = vld [vmem:[#allocation206_spill] sm:$0xff]  ;;  %vm2552_vm2 = vcmp.eq.f32.partialorder %v10514_v39, inf }
 0x33a   : > { %v14312_v3 = vsub.f32 %v14311_v23, %v14309_v20  ;;  %v2542_v1 = vsel %vm2540_vm15, %v2541_v13, %v2539_v31  ;;  %v2000_v49 = vsub.f32 %v1736_v8, %v14313_v0  ;;  %v10562_v21 = vmax.f32 %v2001_v46, 0.0  ;;  %v1319_v20 = vpop.xlane.xlu1 %1318 }
 0x33b   : > { %v3752_v24 = vmul.f32 %v5141_v48, %v14310_v27  ;;  %v4029_v55 = vmul.f32 %v14029_v52, %v3754_v40  ;;  %v4030_v28 = vmul.f32 %v14030_v17, %v3755_v34  ;;  %v3184_v51 = vadd.f32 1e-10, %v2542_v1  ;;  %v14314_v40 = vld [vmem:[#allocation212_spill] sm:$0xff]  ;;  %v1316_v27 = vpop.xlane.xlu0 %1315 }
 0x33c   : > { %v3753_v25 = vmul.f32 %v5141_v48, %v14312_v3  ;;  %v10566_v48 = vmax.f32 %v2000_v49, 0.0  ;;  %v1137_v13 = vmul.f32 %v5748_v26, %v5748_v26  ;;  %v10573_v34 = vmul.f32 %v14314_v40, %v14314_v40  ;;  %v5143_v31 = vpop.eup %5142  ;;  %v14315_v26 = vld [vmem:[#allocation210_spill] sm:$0xff] }
 0x33d   : > { %v4027_v11 = vmul.f32 %v14029_v52, %v3752_v24  ;;  %v4304_v50 = vadd.f32 %v14031_v56, %v4029_v55  ;;  %v4305_v8 = vadd.f32 %v14032_v18, %v4030_v28  ;;  %5152 = vrcp.f32 %v3184_v51  ;;  %v5750_v55 = vld [vmem:[%s6118_s11 + $0x788] sm:$0xff] }
 0x33e   : > { %v4028_v61 = vmul.f32 %v14030_v17, %v3753_v25  ;;  %5154 = vrsqrt.f32 %v10562_v21  ;;  %v2558_v24 = vmul.f32 %v5143_v31, %v10494_v32  ;;  %v2562_v23 = vand.u32 2147483648, %v10494_v32  ;;  %v5749_v25 = vld [vmem:[%s6118_s11 + $0x780] sm:$0xff] }
 0x33f   : > { %v4302_v46 = vadd.f32 %v14031_v56, %v4027_v11  ;;  %4568 = vst [vmem:[%s9394_s23 + $0x2b0] sm:$0xff] %v4304_v50  ;;  %4569 = vst [vmem:[%s9394_s23 + $0x2b8] sm:$0xff] %v4305_v8  ;;  %5156 = vrsqrt.f32 %v10566_v48  ;;  %vm2554_vm3 = vcmp.eq.f32.partialorder %v10514_v39, 0.0  ;;  %v1521_v3 = vadd.f32 %v1137_v13, %v1136_v35  ;;  %v5145_v0 = vpop.eup %5144  ;;  %v14316_v50 = vld [vmem:[#allocation46_spill] sm:$0xff] }
 0x340   : > { %v4303_v14 = vadd.f32 %v14032_v18, %v4028_v61  ;;  %v1134_v1 = vmul.f32 %v5749_v25, %v5749_v25  ;;  %v2560_v49 = vsel %vm2559_vm0, %v10494_v32, %v2558_v24  ;;  %v1135_v28 = vmul.f32 %v5750_v55, %v5750_v55  ;;  %v5147_v61 = vpop.eup %5146  ;;  %v14321_v55 = vld [vmem:[#allocation47_spill] sm:$0xff] }
 0x341   : > { %4566 = vst [vmem:[%s9394_s23 + $0x2a0] sm:$0xff] %v4302_v46  ;;  %v1739_v51 = vmul.f32 0.00390625, %v1319_v20  ;;  %v1738_v11 = vmul.f32 0.00390625, %v1316_v27  ;;  %v14317_v8 = vsub.f32 %v14315_v26, %v14316_v50  ;;  %v14318_v46 = vld [vmem:[#allocation211_spill] sm:$0xff]  ;;  %v2563_v13 = vsel %vm2561_vm1, %v2562_v23, %v2560_v49  ;;  %1522 = vadd.xlane.f32.xlu1 %v1521_v3  ;;  %v5149_v24 = vpop.eup %5148  ;;  %v14325_v23 = vld [vmem:[#allocation290_spill] sm:$0xff] }
 0x342   : > { %4567 = vst [vmem:[%s9394_s23 + $0x2a8] sm:$0xff] %v4303_v14  ;;  %v14319_v14 = vsub.f32 %v14318_v46, %v14316_v50  ;;  %v2555_v25 = vand.u32 2147483648, %v10514_v39  ;;  %v14322_v20 = vsub.f32 %v14320_v36, %v14321_v55  ;;  %v14324_v2 = vsub.f32 %v14323_v43, %v14321_v55 }
 0x343   : > { %v3758_v31 = vmul.f32 %v5145_v0, %v14317_v8  ;;  %v3187_v8 = vadd.f32 1e-10, %v2563_v13  ;;  %v1518_v7 = vadd.f32 %v1135_v28, %v1134_v1  ;;  %v2551_v32 = vmul.f32 %v5149_v24, %v10514_v39  ;;  %v5151_v3 = vpop.eup %5150 }
 0x344   : > { %v3759_v35 = vmul.f32 %v5145_v0, %v14319_v14  ;;  %v3756_v27 = vmul.f32 %v5147_v61, %v14322_v20  ;;  %v3757_v26 = vmul.f32 %v5147_v61, %v14324_v2  ;;  %v2003_v49 = vsub.f32 %v1739_v51, %v14325_v23  ;;  %v14326_v2 = vld [vmem:[#allocation291_spill] sm:$0xff]  ;;  %v14327_v51 = vld [vmem:[#allocation216_spill] sm:$0xff] }
 0x345   : > { %v4033_v50 = vmul.f32 %v14029_v52, %v3758_v31  ;;  %5158 = vrcp.f32 %v3187_v8  ;;  %vm2573_vm4 = vcmp.eq.f32.partialorder %v10562_v21, inf  ;;  %1519 = vadd.xlane.f32.xlu0 %v1518_v7  ;;  %v2002_v43 = vsub.f32 %v1738_v11, %v14326_v2  ;;  %v14328_v61 = vld [vmem:[#allocation223_spill] sm:$0xff]  ;;  %v14333_v2 = vld [vmem:[#allocation228_spill] sm:$0xff] }
 0x346   : > { %v4034_v0 = vmul.f32 %v14030_v17, %v3759_v35  ;;  %v4031_v36 = vmul.f32 %v14029_v52, %v3756_v27  ;;  %v4032_v46 = vmul.f32 %v14030_v17, %v3757_v26  ;;  %v14329_v31 = vsub.f32 %v14327_v51, %v14328_v61  ;;  %v14330_v35 = vld [vmem:[#allocation217_spill] sm:$0xff] }
 0x347   : > { %v4308_v1 = vadd.f32 %v14031_v56, %v4033_v50  ;;  %v14331_v13 = vsub.f32 %v14330_v35, %v14328_v61  ;;  %v2553_v11 = vsel %vm2552_vm2, %v10514_v39, %v2551_v32  ;;  %v10630_v20 = vmax.f32 %v2003_v49, 0.0  ;;  %v5751_v39 = vld [vmem:[%s6118_s11 + $0x7b0] sm:$0xff] }
 0x348   : > { %v4309_v28 = vadd.f32 %v14032_v18, %v4034_v0  ;;  %v3762_v14 = vmul.f32 %v5151_v3, %v14329_v31  ;;  %v4306_v55 = vadd.f32 %v14031_v56, %v4031_v36  ;;  %v4307_v7 = vadd.f32 %v14032_v18, %v4032_v46  ;;  %v14332_v46 = vld [vmem:[#allocation219_spill] sm:$0xff]  ;;  %v1325_v31 = vpop.xlane.xlu1 %1324 }
 0x349   : > { %v3763_v24 = vmul.f32 %v5151_v3, %v14331_v13  ;;  %4572 = vst [vmem:[%s9394_s23 + $0x2d0] sm:$0xff] %v4308_v1  ;;  %v2556_v8 = vsel %vm2554_vm3, %v2555_v25, %v2553_v11  ;;  %v10638_v50 = vmax.f32 %v2002_v43, 0.0  ;;  %vm2575_vm5 = vcmp.eq.f32.partialorder %v10562_v21, 0.0 }
 0x34a   : > { %4573 = vst [vmem:[%s9394_s23 + $0x2d8] sm:$0xff] %v4309_v28  ;;  %v4037_v27 = vmul.f32 %v14029_v52, %v3762_v14  ;;  %4570 = vst [vmem:[%s9394_s23 + $0x2c0] sm:$0xff] %v4306_v55  ;;  %v3186_v0 = vadd.f32 1e-10, %v2556_v8  ;;  %v2576_v32 = vand.u32 2147483648, %v10562_v21  ;;  %5160 = vrsqrt.f32 %v10630_v20  ;;  %v5153_v23 = vpop.eup %5152  ;;  %v14335_v28 = vld [vmem:[#allocation220_spill] sm:$0xff] }
 0x34b   : > { %v4038_v26 = vmul.f32 %v14030_v17, %v3763_v24  ;;  %4571 = vst [vmem:[%s9394_s23 + $0x2c8] sm:$0xff] %v4307_v7  ;;  %5162 = vrsqrt.f32 %v10638_v50  ;;  %v1140_v25 = vmul.f32 %v5751_v39, %v5751_v39  ;;  %v5155_v36 = vpop.eup %5154  ;;  %v14334_v43 = vsub.f32 %v14332_v46, %v14333_v2  ;;  %v5752_v24 = vld [vmem:[%s6118_s11 + $0x7b8] sm:$0xff] }
 0x34c   : > { %v4312_v49 = vadd.f32 %v14031_v56, %v4037_v27  ;;  %v14336_v51 = vsub.f32 %v14335_v28, %v14333_v2  ;;  %5164 = vrcp.f32 %v3186_v0  ;;  %vm2566_vm6 = vcmp.eq.f32.partialorder %v10566_v48, inf  ;;  %v5157_v14 = vpop.eup %5156  ;;  %v1322_v0 = vpop.xlane.xlu0 %1321 }
 0x34d   : > { %v4313_v3 = vadd.f32 %v14032_v18, %v4038_v26  ;;  %v3760_v1 = vmul.f32 %v5153_v23, %v14334_v43  ;;  %v2572_v35 = vmul.f32 %v5155_v36, %v10562_v21  ;;  %vm2568_vm7 = vcmp.eq.f32.partialorder %v10566_v48, 0.0  ;;  %v5753_v26 = vld [vmem:[%s6118_s11 + $0x7a0] sm:$0xff] }
 0x34e   : > { %v3761_v61 = vmul.f32 %v5153_v23, %v14336_v51  ;;  %4576 = vst [vmem:[%s9394_s23 + $0x2f0] sm:$0xff] %v4312_v49  ;;  %v2569_v13 = vand.u32 2147483648, %v10566_v48  ;;  %v1141_v55 = vmul.f32 %v5752_v24, %v5752_v24  ;;  %v2565_v27 = vmul.f32 %v5157_v14, %v10566_v48  ;;  %v5756_v24 = vld [vmem:[%s6118_s11 + $0x7d8] sm:$0xff] }
 0x34f   : > { %4577 = vst [vmem:[%s9394_s23 + $0x2f8] sm:$0xff] %v4313_v3  ;;  %v4035_v7 = vmul.f32 %v14029_v52, %v3760_v1  ;;  %v1138_v8 = vmul.f32 %v5753_v26, %v5753_v26  ;;  %v2574_v23 = vsel %vm2573_vm4, %v10562_v21, %v2572_v35  ;;  %v5754_v3 = vld [vmem:[%s6118_s11 + $0x7a8] sm:$0xff]  ;;  %v1741_v36 = vmul.f32 0.00390625, %v1325_v31  ;;  %v5755_v21 = vld [vmem:[%s6118_s11 + $0x7d0] sm:$0xff] }
 0x350   : > { %v4036_v11 = vmul.f32 %v14030_v17, %v3761_v61  ;;  %v1527_v49 = vadd.f32 %v1141_v55, %v1140_v25  ;;  %v1139_v39 = vmul.f32 %v5754_v3, %v5754_v3  ;;  %v2577_v43 = vsel %vm2575_vm5, %v2576_v32, %v2574_v23  ;;  %v14337_v61 = vld [vmem:[#allocation312_spill] sm:$0xff]  ;;  %v14339_v23 = vld [vmem:[#allocation230_spill] sm:$0xff] }
 0x351   : > { %v4310_v46 = vadd.f32 %v14031_v56, %v4035_v7  ;;  %v2567_v1 = vsel %vm2566_vm6, %v10566_v48, %v2565_v27  ;;  %v3189_v28 = vadd.f32 1e-10, %v2577_v43  ;;  %v2005_v31 = vsub.f32 %v1741_v36, %v14337_v61  ;;  %v5757_v48 = vld [vmem:[%s6118_s11 + $0x7c0] sm:$0xff]  ;;  %v5758_v27 = vld [vmem:[%s6118_s11 + $0x7c8] sm:$0xff]  ;;  %v1331_v43 = vpop.xlane.xlu1 %1330 }
 0x352   : > { %v4311_v2 = vadd.f32 %v14032_v18, %v4036_v11  ;;  %v2570_v25 = vsel %vm2568_vm7, %v2569_v13, %v2567_v1  ;;  %1528 = vadd.xlane.f32.xlu1 %v1527_v49  ;;  %v1524_v51 = vadd.f32 %v1139_v39, %v1138_v8  ;;  %v1740_v35 = vmul.f32 0.00390625, %v1322_v0  ;;  %v5159_v7 = vpop.eup %5158  ;;  %v14338_v8 = vld [vmem:[#allocation224_spill] sm:$0xff]  ;;  %v14341_v39 = vld [vmem:[#allocation225_spill] sm:$0xff]  ;;  %v1328_v1 = vpop.xlane.xlu0 %1327 }
 0x353   : > { %4574 = vst [vmem:[%s9394_s23 + $0x2e0] sm:$0xff] %v4310_v46  ;;  %v3188_v14 = vadd.f32 1e-10, %v2570_v25  ;;  %v1144_v32 = vmul.f32 %v5755_v21, %v5755_v21  ;;  %v1145_v55 = vmul.f32 %v5756_v24, %v5756_v24  ;;  %5166 = vrcp.f32 %v3189_v28  ;;  %v14343_v46 = vld [vmem:[#allocation316_spill] sm:$0xff] }
 0x354   : > { %4575 = vst [vmem:[%s9394_s23 + $0x2e8] sm:$0xff] %v4311_v2  ;;  %1525 = vadd.xlane.f32.xlu0 %v1524_v51  ;;  %v10684_v11 = vmax.f32 %v2005_v31, 0.0  ;;  %v1142_v13 = vmul.f32 %v5757_v48, %v5757_v48  ;;  %v1143_v26 = vmul.f32 %v5758_v27, %v5758_v27  ;;  %v14340_v49 = vsub.f32 %v14338_v8, %v14339_v23 }
 0x355   : > { %v14342_v0 = vsub.f32 %v14341_v39, %v14339_v23  ;;  %5168 = vrcp.f32 %v3188_v14  ;;  %v2004_v2 = vsub.f32 %v1740_v35, %v14343_v46  ;;  %vm2587_vm8 = vcmp.eq.f32.partialorder %v10630_v20, inf }
 0x356   : > { %v3766_v3 = vmul.f32 %v5159_v7, %v14340_v49  ;;  %vm2589_vm9 = vcmp.eq.f32.partialorder %v10630_v20, 0.0  ;;  %v2590_v28 = vand.u32 2147483648, %v10630_v20  ;;  %5170 = vrsqrt.f32 %v10684_v11  ;;  %v14344_v49 = vld [vmem:[#allocation226_spill] sm:$0xff] }
 0x357   : > { %v3767_v36 = vmul.f32 %v5159_v7, %v14342_v0  ;;  %v10701_v61 = vmax.f32 %v2004_v2, 0.0  ;;  %v1533_v31 = vadd.f32 %v1145_v55, %v1144_v32  ;;  %v5161_v14 = vpop.eup %5160  ;;  %vm2580_vm10 = vcmp.eq.f32.partialorder %v10638_v50, inf }
 0x358   : > { %v4041_v25 = vmul.f32 %v14029_v52, %v3766_v3  ;;  %v1530_v35 = vadd.f32 %v1143_v26, %v1142_v13  ;;  %v1743_v21 = vmul.f32 0.00390625, %v1331_v43  ;;  %v1742_v24 = vmul.f32 0.00390625, %v1328_v1  ;;  %v5163_v7 = vpop.eup %5162  ;;  %v5759_v26 = vld [vmem:[%s6118_s11 + $0x7f0] sm:$0xff]  ;;  %v14349_v1 = vld [vmem:[#allocation324_spill] sm:$0xff] }
 0x359   : > { %v4042_v51 = vmul.f32 %v14030_v17, %v3767_v36  ;;  %v2586_v8 = vmul.f32 %v5161_v14, %v10630_v20  ;;  %5172 = vrsqrt.f32 %v10701_v61  ;;  %1534 = vadd.xlane.f32.xlu1 %v1533_v31  ;;  %v5165_v32 = vpop.eup %5164  ;;  %v2579_v55 = vmul.f32 %v5163_v7, %v10638_v50  ;;  %v14345_v3 = vld [vmem:[#allocation234_spill] sm:$0xff]  ;;  %v14347_v36 = vld [vmem:[#allocation227_spill] sm:$0xff] }
 0x35a   : > { %v4316_v48 = vadd.f32 %v14031_v56, %v4041_v25  ;;  %vm2582_vm11 = vcmp.eq.f32.partialorder %v10638_v50, 0.0  ;;  %v2583_v13 = vand.u32 2147483648, %v10638_v50  ;;  %1531 = vadd.xlane.f32.xlu0 %v1530_v35  ;;  %v1148_v23 = vmul.f32 %v5759_v26, %v5759_v26  ;;  %v14350_v14 = vld [vmem:[#allocation326_spill] sm:$0xff] }
 0x35b   : > { %v4317_v27 = vadd.f32 %v14032_v18, %v4042_v51  ;;  %v14346_v39 = vsub.f32 %v14344_v49, %v14345_v3  ;;  %v14348_v46 = vsub.f32 %v14347_v36, %v14345_v3  ;;  %v2588_v43 = vsel %vm2587_vm8, %v10630_v20, %v2586_v8  ;;  %v5760_v7 = vld [vmem:[%s6118_s11 + $0x7f8] sm:$0xff] }
 0x35c   : > { %4580 = vst [vmem:[%s9394_s23 + $0x310] sm:$0xff] %v4316_v48  ;;  %v2007_v25 = vsub.f32 %v1743_v21, %v14349_v1  ;;  %v2591_v51 = vsel %vm2589_vm9, %v2590_v28, %v2588_v43  ;;  %v2581_v31 = vsel %vm2580_vm10, %v10638_v50, %v2579_v55  ;;  %v2006_v35 = vsub.f32 %v1742_v24, %v14350_v14  ;;  %v14351_v3 = vld [vmem:[#allocation355_spill] sm:$0xff]  ;;  %v14355_v14 = vld [vmem:[#allocation232_spill] sm:$0xff] }
 0x35d   : > { %4581 = vst [vmem:[%s9394_s23 + $0x318] sm:$0xff] %v4317_v27  ;;  %v3764_v0 = vmul.f32 %v5165_v32, %v14346_v39  ;;  %v3765_v2 = vmul.f32 %v5165_v32, %v14348_v46  ;;  %v1149_v48 = vmul.f32 %v5760_v7, %v5760_v7  ;;  %v3191_v26 = vadd.f32 1e-10, %v2591_v51  ;;  %v5761_v50 = vld [vmem:[%s6118_s11 + $0x7e0] sm:$0xff] }
 0x35e   : > { %v2584_v21 = vsel %vm2582_vm11, %v2583_v13, %v2581_v31  ;;  %v10735_v20 = vmax.f32 %v2007_v25, 0.0  ;;  %v10737_v28 = vmax.f32 %v2006_v35, 0.0  ;;  %v10743_v39 = vmul.f32 %v14351_v3, %v14351_v3  ;;  %v14352_v1 = vld [vmem:[#allocation231_spill] sm:$0xff]  ;;  %v14353_v25 = vld [vmem:[#allocation242_spill] sm:$0xff] }
 0x35f   : > { %v4039_v27 = vmul.f32 %v14029_v52, %v3764_v0  ;;  %v4040_v32 = vmul.f32 %v14030_v17, %v3765_v2  ;;  %v3190_v8 = vadd.f32 1e-10, %v2584_v21  ;;  %v1539_v55 = vadd.f32 %v1149_v48, %v1148_v23  ;;  %v1337_v0 = vpop.xlane.xlu1 %1336  ;;  %v1334_v23 = vpop.xlane.xlu0 %1333  ;;  %v5762_v48 = vld [vmem:[%s6118_s11 + $0x7e8] sm:$0xff]  ;;  %v14358_v21 = vld [vmem:[#allocation243_spill] sm:$0xff] }
 0x360   : > { %5174 = vrcp.f32 %v3191_v26  ;;  %vm2601_vm12 = vcmp.eq.f32.partialorder %v10684_v11, inf  ;;  %vm2603_vm13 = vcmp.eq.f32.partialorder %v10684_v11, 0.0  ;;  %v1146_v13 = vmul.f32 %v5761_v50, %v5761_v50  ;;  %v5167_v36 = vpop.eup %5166  ;;  %v14357_v26 = vld [vmem:[#allocation235_spill] sm:$0xff] }
 0x361   : > { %v4314_v24 = vadd.f32 %v14031_v56, %v4039_v27  ;;  %v4315_v49 = vadd.f32 %v14032_v18, %v4040_v32  ;;  %5176 = vrcp.f32 %v3190_v8  ;;  %1540 = vadd.xlane.f32.xlu1 %v1539_v55  ;;  %v2604_v46 = vand.u32 2147483648, %v10684_v11 }
 0x362   : > { %vm2594_vm14 = vcmp.eq.f32.partialorder %v10701_v61, inf  ;;  %v2597_v2 = vand.u32 2147483648, %v10701_v61  ;;  %5178 = vrsqrt.f32 %v10735_v20  ;;  %v5169_v43 = vpop.eup %5168  ;;  %v14354_v51 = vsub.f32 %v14352_v1, %v14353_v25 }
 0x363   : > { %4578 = vst [vmem:[%s9394_s23 + $0x300] sm:$0xff] %v4314_v24  ;;  %4579 = vst [vmem:[%s9394_s23 + $0x308] sm:$0xff] %v4315_v49  ;;  %v14356_v35 = vsub.f32 %v14355_v14, %v14353_v25  ;;  %5180 = vrsqrt.f32 %v10737_v28  ;;  %v1147_v27 = vmul.f32 %v5762_v48, %v5762_v48  ;;  %v5171_v32 = vpop.eup %5170  ;;  %v14359_v8 = vsub.f32 %v14357_v26, %v14358_v21  ;;  %v14360_v24 = vld [vmem:[#allocation236_spill] sm:$0xff]  ;;  %v14362_v26 = vld [vmem:[#allocation181_spill] sm:$0xff] }
 0x364   : > { %v3770_v31 = vmul.f32 %v5167_v36, %v14354_v51  ;;  %v14361_v49 = vsub.f32 %v14360_v24, %v14358_v21  ;;  %v1745_v1 = vmul.f32 0.00390625, %v1337_v0  ;;  %v1744_v51 = vmul.f32 0.00390625, %v1334_v23  ;;  %v14363_v21 = vld [vmem:[#allocation340_spill] sm:$0xff] }
 0x365   : > { %v3771_v7 = vmul.f32 %v5167_v36, %v14356_v35  ;;  %v3768_v55 = vmul.f32 %v5169_v43, %v14359_v8  ;;  %v2600_v25 = vmul.f32 %v5171_v32, %v10684_v11  ;;  %v1536_v14 = vadd.f32 %v1147_v27, %v1146_v13 }
 0x366   : > { %v3769_v50 = vmul.f32 %v5169_v43, %v14361_v49  ;;  %v4045_v4 = vmul.f32 %v14029_v52, %v3770_v31  ;;  %v2009_v8 = vsub.f32 %v1745_v1, %v14362_v26  ;;  %v2008_v43 = vsub.f32 %v1744_v51, %v14363_v21  ;;  %v5173_v24 = vpop.eup %5172  ;;  %v5763_v31 = vld [vmem:[%s6118_s11 + $0x810] sm:$0xff]  ;;  %v1343_v49 = vpop.xlane.xlu1 %1342 }
 0x367   : > { %v4046_v36 = vmul.f32 %v14030_v17, %v3771_v7  ;;  %v4043_v35 = vmul.f32 %v14029_v52, %v3768_v55  ;;  %v2602_v13 = vsel %vm2601_vm12, %v10684_v11, %v2600_v25  ;;  %1537 = vadd.xlane.f32.xlu0 %v1536_v14  ;;  %v1152_v7 = vmul.f32 %v5763_v31, %v5763_v31  ;;  %v1340_v21 = vpop.xlane.xlu0 %1339 }
 0x368   : > { %v4044_v48 = vmul.f32 %v14030_v17, %v3769_v50  ;;  %v4320_v0 = vadd.f32 %v14031_v56, %v4045_v4  ;;  %v2605_v4 = vsel %vm2603_vm13, %v2604_v46, %v2602_v13  ;;  %v2593_v55 = vmul.f32 %v5173_v24, %v10701_v61  ;;  %v5765_v46 = vld [vmem:[%s6118_s11 + $0x800] sm:$0xff] }
 0x369   : > { %v4321_v23 = vadd.f32 %v14032_v18, %v4046_v36  ;;  %v4318_v27 = vadd.f32 %v14031_v56, %v4043_v35  ;;  %v3193_v50 = vadd.f32 1e-10, %v2605_v4  ;;  %v10788_v1 = vmax.f32 %v2009_v8, 0.0  ;;  %v5764_v36 = vld [vmem:[%s6118_s11 + $0x818] sm:$0xff]  ;;  %v5766_v35 = vld [vmem:[%s6118_s11 + $0x808] sm:$0xff] }
 0x36a   : > { %v4319_v32 = vadd.f32 %v14032_v18, %v4044_v48  ;;  %4584 = vst [vmem:[%s9394_s23 + $0x330] sm:$0xff] %v4320_v0  ;;  %v10790_v51 = vmax.f32 %v2008_v43, 0.0  ;;  %v1153_v25 = vmul.f32 %v5764_v36, %v5764_v36  ;;  %v2595_v11 = vsel %vm2594_vm14, %v10701_v61, %v2593_v55  ;;  %v14365_v13 = vld [vmem:[#allocation252_spill] sm:$0xff] }
 0x36b   : > { %4585 = vst [vmem:[%s9394_s23 + $0x338] sm:$0xff] %v4321_v23  ;;  %4582 = vst [vmem:[%s9394_s23 + $0x320] sm:$0xff] %v4318_v27  ;;  %vm2596_vm15 = vcmp.eq.f32.partialorder %v10701_v61, 0.0  ;;  %v1150_v14 = vmul.f32 %v5765_v46, %v5765_v46  ;;  %v1151_v48 = vmul.f32 %v5766_v35, %v5766_v35  ;;  %5182 = vrcp.f32 %v3193_v50  ;;  %v14364_v23 = vld [vmem:[#allocation240_spill] sm:$0xff] }
 0x36c   : > { %4583 = vst [vmem:[%s9394_s23 + $0x328] sm:$0xff] %v4319_v32  ;;  %v2598_v26 = vsel %vm2596_vm15, %v2597_v2, %v2595_v11  ;;  %vm2615_vm0 = vcmp.eq.f32.partialorder %v10735_v20, inf  ;;  %v1747_v8 = vmul.f32 0.00390625, %v1343_v49  ;;  %vm2617_vm1 = vcmp.eq.f32.partialorder %v10735_v20, 0.0  ;;  %v14367_v32 = vld [vmem:[#allocation241_spill] sm:$0xff]  ;;  %v14369_v36 = vld [vmem:[#allocation244_spill] sm:$0xff] }
 0x36d   : > { %v3192_v43 = vadd.f32 1e-10, %v2598_v26  ;;  %v2618_v24 = vand.u32 2147483648, %v10735_v20  ;;  %5184 = vrsqrt.f32 %v10788_v1  ;;  %v5175_v0 = vpop.eup %5174  ;;  %vm2608_vm2 = vcmp.eq.f32.partialorder %v10737_v28, inf  ;;  %v14370_v11 = vld [vmem:[#allocation255_spill] sm:$0xff]  ;;  %v14372_v26 = vld [vmem:[#allocation245_spill] sm:$0xff] }
 0x36e   : > { %vm2610_vm3 = vcmp.eq.f32.partialorder %v10737_v28, 0.0  ;;  %5186 = vrsqrt.f32 %v10790_v51  ;;  %v1545_v61 = vadd.f32 %v1153_v25, %v1152_v7  ;;  %v5177_v2 = vpop.eup %5176  ;;  %v14366_v31 = vsub.f32 %v14364_v23, %v14365_v13  ;;  %v14374_v25 = vld [vmem:[#allocation349_spill] sm:$0xff] }
 0x36f   : > { %v14368_v4 = vsub.f32 %v14367_v32, %v14365_v13  ;;  %5188 = vrcp.f32 %v3192_v43  ;;  %v1542_v49 = vadd.f32 %v1151_v48, %v1150_v14  ;;  %v5179_v50 = vpop.eup %5178  ;;  %v14371_v46 = vsub.f32 %v14369_v36, %v14370_v11  ;;  %v1349_v43 = vpop.xlane.xlu1 %1348 }
 0x370   : > { %v3774_v27 = vmul.f32 %v5175_v0, %v14366_v31  ;;  %v14373_v9 = vsub.f32 %v14372_v26, %v14370_v11  ;;  %1546 = vadd.xlane.f32.xlu1 %v1545_v61  ;;  %v2011_v57 = vsub.f32 %v1747_v8, %v14374_v25  ;;  %v1746_v23 = vmul.f32 0.00390625, %v1340_v21  ;;  %v5181_v31 = vpop.eup %5180  ;;  %v1346_v61 = vpop.xlane.xlu0 %1345  ;;  %v5768_v26 = vld [vmem:[%s6118_s11 + $0x838] sm:$0xff]  ;;  %v5769_v25 = vld [vmem:[%s6118_s11 + $0x820] sm:$0xff] }
 0x371   : > { %v3775_v55 = vmul.f32 %v5175_v0, %v14368_v4  ;;  %v3772_v35 = vmul.f32 %v5177_v2, %v14371_v46  ;;  %v2614_v14 = vmul.f32 %v5179_v50, %v10735_v20  ;;  %v2611_v48 = vand.u32 2147483648, %v10737_v28  ;;  %1543 = vadd.xlane.f32.xlu0 %v1542_v49  ;;  %v14375_v4 = vld [vmem:[#allocation350_spill] sm:$0xff] }
 0x372   : > { %v3773_v7 = vmul.f32 %v5177_v2, %v14373_v9  ;;  %v4049_v60 = vmul.f32 %v14029_v52, %v3774_v27  ;;  %v2607_v8 = vmul.f32 %v5181_v31, %v10737_v28  ;;  %v10828_v21 = vmax.f32 %v2011_v57, 0.0  ;;  %v5767_v46 = vld [vmem:[%s6118_s11 + $0x830] sm:$0xff] }
 0x373   : > { %v4050_v0 = vmul.f32 %v14030_v17, %v3775_v55  ;;  %v4047_v13 = vmul.f32 %v14029_v52, %v3772_v35  ;;  %v2616_v32 = vsel %vm2615_vm0, %v10735_v20, %v2614_v14  ;;  %v2010_v55 = vsub.f32 %v1746_v23, %v14375_v4  ;;  %v5770_v23 = vld [vmem:[%s6118_s11 + $0x828] sm:$0xff]  ;;  %v14377_v4 = vld [vmem:[#allocation259_spill] sm:$0xff] }
 0x374   : > { %v4048_v9 = vmul.f32 %v14030_v17, %v3773_v7  ;;  %v4324_v2 = vadd.f32 %v14031_v56, %v4049_v60  ;;  %v2619_v57 = vsel %vm2617_vm1, %v2618_v24, %v2616_v32  ;;  %v2609_v60 = vsel %vm2608_vm2, %v10737_v28, %v2607_v8  ;;  %v14376_v32 = vld [vmem:[#allocation249_spill] sm:$0xff] }
 0x375   : > { %v4325_v27 = vadd.f32 %v14032_v18, %v4050_v0  ;;  %v4322_v49 = vadd.f32 %v14031_v56, %v4047_v13  ;;  %v3195_v36 = vadd.f32 1e-10, %v2619_v57  ;;  %v2612_v11 = vsel %vm2610_vm3, %v2611_v48, %v2609_v60  ;;  %v1355_v0 = vpop.xlane.xlu1 %1354  ;;  %v1352_v48 = vpop.xlane.xlu0 %1351 }
 0x376   : > { %v4323_v50 = vadd.f32 %v14032_v18, %v4048_v9  ;;  %4588 = vst [vmem:[%s9394_s23 + $0x350] sm:$0xff] %v4324_v2  ;;  %5190 = vrsqrt.f32 %v10828_v21  ;;  %v1156_v35 = vmul.f32 %v5767_v46, %v5767_v46  ;;  %v3194_v20 = vadd.f32 1e-10, %v2612_v11 }
 0x377   : > { %4589 = vst [vmem:[%s9394_s23 + $0x358] sm:$0xff] %v4325_v27  ;;  %4586 = vst [vmem:[%s9394_s23 + $0x340] sm:$0xff] %v4322_v49  ;;  %vm2629_vm4 = vcmp.eq.f32.partialorder %v10788_v1, inf  ;;  %vm2631_vm5 = vcmp.eq.f32.partialorder %v10788_v1, 0.0  ;;  %v10853_v24 = vmax.f32 %v2010_v55, 0.0  ;;  %5192 = vrcp.f32 %v3195_v36 }
 0x378   : > { %4587 = vst [vmem:[%s9394_s23 + $0x348] sm:$0xff] %v4323_v50  ;;  %v1157_v7 = vmul.f32 %v5768_v26, %v5768_v26  ;;  %v1154_v28 = vmul.f32 %v5769_v25, %v5769_v25  ;;  %v1155_v31 = vmul.f32 %v5770_v23, %v5770_v23  ;;  %5194 = vrcp.f32 %v3194_v20  ;;  %v5183_v13 = vpop.eup %5182  ;;  %v14379_v50 = vld [vmem:[#allocation250_spill] sm:$0xff] }
 0x379   : > { %v2632_v14 = vand.u32 2147483648, %v10788_v1  ;;  %vm2622_vm6 = vcmp.eq.f32.partialorder %v10790_v51, inf  ;;  %vm2624_vm7 = vcmp.eq.f32.partialorder %v10790_v51, 0.0  ;;  %5196 = vrsqrt.f32 %v10853_v24 }
 0x37a   : > { %v1551_v9 = vadd.f32 %v1157_v7, %v1156_v35  ;;  %v1548_v8 = vadd.f32 %v1155_v31, %v1154_v28  ;;  %v1749_v2 = vmul.f32 0.00390625, %v1349_v43  ;;  %v5185_v27 = vpop.eup %5184  ;;  %v14378_v55 = vsub.f32 %v14376_v32, %v14377_v4  ;;  %v14381_v35 = vld [vmem:[#allocation368_spill] sm:$0xff]  ;;  %v14383_v32 = vld [vmem:[#allocation253_spill] sm:$0xff] }
 0x37b   : > { %v14380_v57 = vsub.f32 %v14379_v50, %v14377_v4  ;;  %v2625_v36 = vand.u32 2147483648, %v10790_v51  ;;  %v1748_v11 = vmul.f32 0.00390625, %v1346_v61  ;;  %v5187_v46 = vpop.eup %5186  ;;  %v2628_v20 = vmul.f32 %v5185_v27, %v10788_v1  ;;  %v14384_v4 = vld [vmem:[#allocation264_spill] sm:$0xff] }
 0x37c   : > { %v3778_v49 = vmul.f32 %v5183_v13, %v14378_v55  ;;  %1552 = vadd.xlane.f32.xlu1 %v1551_v9  ;;  %1549 = vadd.xlane.f32.xlu0 %v1548_v8  ;;  %v2013_v26 = vsub.f32 %v1749_v2, %v14381_v35  ;;  %v1751_v43 = vmul.f32 0.00390625, %v1355_v0  ;;  %v1750_v7 = vmul.f32 0.00390625, %v1352_v48  ;;  %v5189_v25 = vpop.eup %5188  ;;  %v14386_v8 = vld [vmem:[#allocation254_spill] sm:$0xff] }
 0x37d   : > { %v3779_v60 = vmul.f32 %v5183_v13, %v14380_v57  ;;  %v2621_v31 = vmul.f32 %v5187_v46, %v10790_v51  ;;  %v14382_v13 = vld [vmem:[#allocation372_spill] sm:$0xff]  ;;  %v14385_v27 = vsub.f32 %v14383_v32, %v14384_v4  ;;  %v14387_v2 = vsub.f32 %v14386_v8, %v14384_v4  ;;  %v14389_v32 = vld [vmem:[#allocation385_spill] sm:$0xff] }
 0x37e   : > { %v4053_v28 = vmul.f32 %v14029_v52, %v3778_v49  ;;  %v2012_v61 = vsub.f32 %v1748_v11, %v14382_v13  ;;  %v2630_v48 = vsel %vm2629_vm4, %v10788_v1, %v2628_v20  ;;  %v10884_v55 = vmax.f32 %v2013_v26, 0.0  ;;  %v1361_v49 = vpop.xlane.xlu1 %1360 }
 0x37f   : > { %v4054_v23 = vmul.f32 %v14030_v17, %v3779_v60  ;;  %v3776_v9 = vmul.f32 %v5189_v25, %v14385_v27  ;;  %v3777_v0 = vmul.f32 %v5189_v25, %v14387_v2  ;;  %v2633_v60 = vsel %vm2631_vm5, %v2632_v14, %v2630_v48 }
 0x380   : > { %v4328_v50 = vadd.f32 %v14031_v56, %v4053_v28  ;;  %v2623_v11 = vsel %vm2622_vm6, %v10790_v51, %v2621_v31  ;;  %v3197_v25 = vadd.f32 1e-10, %v2633_v60  ;;  %vm2643_vm8 = vcmp.eq.f32.partialorder %v10828_v21, inf  ;;  %v14388_v31 = vld [vmem:[#allocation378_spill] sm:$0xff] }
 0x381   : > { %v4329_v57 = vadd.f32 %v14032_v18, %v4054_v23  ;;  %v4051_v46 = vmul.f32 %v14029_v52, %v3776_v9  ;;  %v4052_v35 = vmul.f32 %v14030_v17, %v3777_v0  ;;  %v2626_v20 = vsel %vm2624_vm7, %v2625_v36, %v2623_v11  ;;  %v1358_v23 = vpop.xlane.xlu0 %1357  ;;  %v14394_v60 = vld [vmem:[#allocation258_spill] sm:$0xff] }
 0x382   : > { %4592 = vst [vmem:[%s9394_s23 + $0x370] sm:$0xff] %v4328_v50  ;;  %v3196_v26 = vadd.f32 1e-10, %v2626_v20  ;;  %5198 = vrsqrt.f32 %v10884_v55  ;;  %v1753_v1 = vmul.f32 0.00390625, %v1361_v49  ;;  %vm2645_vm9 = vcmp.eq.f32.partialorder %v10828_v21, 0.0  ;;  %v14392_v49 = vld [vmem:[#allocation265_spill] sm:$0xff]  ;;  %v1367_v20 = vpop.xlane.xlu1 %1366 }
 0x383   : > { %4593 = vst [vmem:[%s9394_s23 + $0x378] sm:$0xff] %v4329_v57  ;;  %v4326_v14 = vadd.f32 %v14031_v56, %v4051_v46  ;;  %v4327_v28 = vadd.f32 %v14032_v18, %v4052_v35  ;;  %5200 = vrcp.f32 %v3197_v25  ;;  %v5191_v51 = vpop.eup %5190  ;;  %v10904_v36 = vmax.f32 %v2012_v61, 0.0  ;;  %v14390_v61 = vld [vmem:[#allocation388_spill] sm:$0xff] }
 0x384   : > { %5202 = vrcp.f32 %v3196_v26  ;;  %v2015_v13 = vsub.f32 %v1751_v43, %v14388_v31  ;;  %v2014_v4 = vsub.f32 %v1750_v7, %v14389_v32  ;;  %v2642_v27 = vmul.f32 %v5191_v51, %v10828_v21  ;;  %v5193_v8 = vpop.eup %5192  ;;  %v14391_v7 = vld [vmem:[#allocation257_spill] sm:$0xff]  ;;  %v14399_v51 = vld [vmem:[#allocation262_spill] sm:$0xff] }
 0x385   : > { %4590 = vst [vmem:[%s9394_s23 + $0x360] sm:$0xff] %v4326_v14  ;;  %4591 = vst [vmem:[%s9394_s23 + $0x368] sm:$0xff] %v4327_v28  ;;  %v2646_v9 = vand.u32 2147483648, %v10828_v21  ;;  %vm2636_vm10 = vcmp.eq.f32.partialorder %v10853_v24, inf  ;;  %vm2638_vm11 = vcmp.eq.f32.partialorder %v10853_v24, 0.0  ;;  %v2639_v2 = vand.u32 2147483648, %v10853_v24  ;;  %v5195_v48 = vpop.eup %5194 }
 0x386   : > { %5204 = vrsqrt.f32 %v10904_v36  ;;  %v2017_v0 = vsub.f32 %v1753_v1, %v14390_v61  ;;  %v1752_v43 = vmul.f32 0.00390625, %v1358_v23  ;;  %v14393_v50 = vsub.f32 %v14391_v7, %v14392_v49  ;;  %v5197_v26 = vpop.eup %5196  ;;  %v14396_v14 = vld [vmem:[#allocation261_spill] sm:$0xff]  ;;  %v14397_v1 = vld [vmem:[#allocation272_spill] sm:$0xff] }
 0x387   : > { %v14395_v11 = vsub.f32 %v14394_v60, %v14392_v49  ;;  %v2644_v35 = vsel %vm2643_vm8, %v10828_v21, %v2642_v27  ;;  %v10926_v25 = vmax.f32 %v2015_v13, 0.0  ;;  %v14398_v28 = vsub.f32 %v14396_v14, %v14397_v1  ;;  %v14402_v14 = vld [vmem:[#allocation362_spill] sm:$0xff] }
 0x388   : > { %v3782_v57 = vmul.f32 %v5193_v8, %v14393_v50  ;;  %v14400_v31 = vsub.f32 %v14399_v51, %v14397_v1  ;;  %v2647_v61 = vsel %vm2645_vm9, %v2646_v9, %v2644_v35  ;;  %v2635_v49 = vmul.f32 %v5197_v26, %v10853_v24  ;;  %v14401_v35 = vld [vmem:[#allocation358_spill] sm:$0xff] }
 0x389   : > { %v3783_v46 = vmul.f32 %v5193_v8, %v14395_v11  ;;  %v3780_v23 = vmul.f32 %v5195_v48, %v14398_v28  ;;  %v10936_v8 = vmax.f32 %v2014_v4, 0.0  ;;  %v3199_v27 = vadd.f32 1e-10, %v2647_v61  ;;  %v14403_v28 = vld [vmem:[#allocation365_spill] sm:$0xff]  ;;  %v14405_v61 = vld [vmem:[#allocation276_spill] sm:$0xff] }
 0x38a   : > { %v3781_v32 = vmul.f32 %v5195_v48, %v14400_v31  ;;  %v4057_v7 = vmul.f32 %v14029_v52, %v3782_v57  ;;  %5206 = vrsqrt.f32 %v10926_v25  ;;  %v1755_v21 = vmul.f32 0.00390625, %v1367_v20 }
 0x38b   : > { %v4058_v13 = vmul.f32 %v14030_v17, %v3783_v46  ;;  %v4055_v50 = vmul.f32 %v14029_v52, %v3780_v23  ;;  %5208 = vrcp.f32 %v3199_v27  ;;  %v2637_v48 = vsel %vm2636_vm10, %v10853_v24, %v2635_v49 }
 0x38c   : > { %v4056_v60 = vmul.f32 %v14030_v17, %v3781_v32  ;;  %v4332_v4 = vadd.f32 %v14031_v56, %v4057_v7  ;;  %v2640_v46 = vsel %vm2638_vm11, %v2639_v2, %v2637_v48  ;;  %v10955_v20 = vmul.f32 %v14401_v35, %v14401_v35  ;;  %v14404_v2 = vld [vmem:[#allocation389_spill] sm:$0xff] }
 0x38d   : > { %v4333_v9 = vadd.f32 %v14032_v18, %v4058_v13  ;;  %v4330_v57 = vadd.f32 %v14031_v56, %v4055_v50  ;;  %v3198_v26 = vadd.f32 1e-10, %v2640_v46  ;;  %5210 = vrsqrt.f32 %v10936_v8  ;;  %v14406_v50 = vld [vmem:[#allocation266_spill] sm:$0xff]  ;;  %v1364_v46 = vpop.xlane.xlu0 %1363 }
 0x38e   : > { %v4331_v11 = vadd.f32 %v14032_v18, %v4056_v60  ;;  %4596 = vst [vmem:[%s9394_s23 + $0x390] sm:$0xff] %v4332_v4  ;;  %v10962_v1 = vmul.f32 %v14402_v14, %v14402_v14  ;;  %v10966_v23 = vmul.f32 %v14403_v28, %v14403_v28  ;;  %vm2657_vm12 = vcmp.eq.f32.partialorder %v10884_v55, inf }
 0x38f   : > { %4597 = vst [vmem:[%s9394_s23 + $0x398] sm:$0xff] %v4333_v9  ;;  %4594 = vst [vmem:[%s9394_s23 + $0x380] sm:$0xff] %v4330_v57  ;;  %vm2659_vm13 = vcmp.eq.f32.partialorder %v10884_v55, 0.0  ;;  %v10972_v24 = vmax.f32 %v2017_v0, 0.0  ;;  %v2016_v51 = vsub.f32 %v1752_v43, %v14404_v2  ;;  %v5199_v31 = vpop.eup %5198  ;;  %5212 = vrcp.f32 %v3198_v26  ;;  %v14407_v43 = vld [vmem:[#allocation277_spill] sm:$0xff]  ;;  %v14409_v9 = vld [vmem:[#allocation267_spill] sm:$0xff] }
 0x390   : > { %4595 = vst [vmem:[%s9394_s23 + $0x388] sm:$0xff] %v4331_v11  ;;  %v2660_v32 = vand.u32 2147483648, %v10884_v55  ;;  %vm2650_vm14 = vcmp.eq.f32.partialorder %v10904_v36, inf  ;;  %v2019_v7 = vsub.f32 %v1755_v21, %v14405_v61  ;;  %v5201_v13 = vpop.eup %5200  ;;  %v2656_v27 = vmul.f32 %v5199_v31, %v10884_v55  ;;  %v14411_v26 = vld [vmem:[#allocation271_spill] sm:$0xff]  ;;  %v14412_v2 = vld [vmem:[#allocation281_spill] sm:$0xff] }
 0x391   : > { %vm2652_vm15 = vcmp.eq.f32.partialorder %v10904_v36, 0.0  ;;  %v2653_v49 = vand.u32 2147483648, %v10904_v36  ;;  %5214 = vrsqrt.f32 %v10972_v24  ;;  %v5203_v0 = vpop.eup %5202  ;;  %v14408_v60 = vsub.f32 %v14406_v50, %v14407_v43 }
 0x392   : > { %v14410_v48 = vsub.f32 %v14409_v9, %v14407_v43  ;;  %vm2671_vm0 = vcmp.eq.f32.partialorder %v10926_v25, inf  ;;  %v2674_v21 = vand.u32 2147483648, %v10926_v25  ;;  %v10990_v11 = vmax.f32 %v2016_v51, 0.0 }
 0x393   : > { %v3786_v4 = vmul.f32 %v5201_v13, %v14408_v60  ;;  %v14413_v31 = vsub.f32 %v14411_v26, %v14412_v2  ;;  %v14415_v62 = vsub.f32 %v14414_v12, %v14412_v2  ;;  %v2658_v43 = vsel %vm2657_vm12, %v10884_v55, %v2656_v27  ;;  %v1373_v60 = vpop.xlane.xlu1 %1372  ;;  %v5205_v51 = vpop.eup %5204 }
 0x394   : > { %v3787_v57 = vmul.f32 %v5201_v13, %v14410_v48  ;;  %vm2673_vm1 = vcmp.eq.f32.partialorder %v10926_v25, 0.0  ;;  %v11002_v13 = vmax.f32 %v2019_v7, 0.0  ;;  %v2661_v26 = vsel %vm2659_vm13, %v2660_v32, %v2658_v43 }
 0x395   : > { %v3784_v61 = vmul.f32 %v5203_v0, %v14413_v31  ;;  %v3785_v50 = vmul.f32 %v5203_v0, %v14415_v62  ;;  %v4061_v9 = vmul.f32 %v14029_v52, %v3786_v4  ;;  %5216 = vrsqrt.f32 %v10990_v11 }
 0x396   : > { %v4062_v48 = vmul.f32 %v14030_v17, %v3787_v57  ;;  %v3201_v27 = vadd.f32 1e-10, %v2661_v26  ;;  %v2649_v7 = vmul.f32 %v5205_v51, %v10904_v36  ;;  %v1754_v57 = vmul.f32 0.00390625, %v1364_v46  ;;  %v1370_v46 = vpop.xlane.xlu0 %1369 }
 0x397   : > { %v4059_v62 = vmul.f32 %v14029_v52, %v3784_v61  ;;  %v4060_v12 = vmul.f32 %v14030_v17, %v3785_v50  ;;  %v4336_v0 = vadd.f32 %v14031_v56, %v4061_v9  ;;  %v1757_v55 = vmul.f32 0.00390625, %v1373_v60  ;;  %v5207_v61 = vpop.eup %5206 }
 0x398   : > { %v4337_v4 = vadd.f32 %v14032_v18, %v4062_v48  ;;  %5218 = vrcp.f32 %v3201_v27  ;;  %v2651_v31 = vsel %vm2650_vm14, %v10904_v36, %v2649_v7  ;;  %vm2664_vm2 = vcmp.eq.f32.partialorder %v10936_v8, inf  ;;  %v5209_v43 = vpop.eup %5208  ;;  %v14416_v48 = vld [vmem:[#allocation274_spill] sm:$0xff]  ;;  %v14421_v7 = vld [vmem:[#allocation399_spill] sm:$0xff] }
 0x399   : > { %v4334_v32 = vadd.f32 %v14031_v56, %v4059_v62  ;;  %v4335_v2 = vadd.f32 %v14032_v18, %v4060_v12  ;;  %4600 = vst [vmem:[%s9394_s23 + $0x3b0] sm:$0xff] %v4336_v0  ;;  %v2654_v50 = vsel %vm2652_vm15, %v2653_v49, %v2651_v31  ;;  %vm2666_vm3 = vcmp.eq.f32.partialorder %v10936_v8, 0.0  ;;  %v14417_v36 = vld [vmem:[#allocation282_spill] sm:$0xff]  ;;  %v14419_v62 = vld [vmem:[#allocation275_spill] sm:$0xff] }
 0x39a   : > { %4601 = vst [vmem:[%s9394_s23 + $0x3b8] sm:$0xff] %v4337_v4  ;;  %5220 = vrsqrt.f32 %v11002_v13  ;;  %v3200_v60 = vadd.f32 1e-10, %v2654_v50  ;;  %v2670_v51 = vmul.f32 %v5207_v61, %v10926_v25  ;;  %v2667_v9 = vand.u32 2147483648, %v10936_v8  ;;  %v14422_v4 = vld [vmem:[#allocation416_spill] sm:$0xff] }
 0x39b   : > { %4598 = vst [vmem:[%s9394_s23 + $0x3a0] sm:$0xff] %v4334_v32  ;;  %4599 = vst [vmem:[%s9394_s23 + $0x3a8] sm:$0xff] %v4335_v2  ;;  %vm2685_vm4 = vcmp.eq.f32.partialorder %v10972_v24, inf  ;;  %v14418_v49 = vsub.f32 %v14416_v48, %v14417_v36  ;;  %v14420_v12 = vsub.f32 %v14419_v62, %v14417_v36  ;;  %v2018_v0 = vsub.f32 %v1754_v57, %v14421_v7  ;;  %v5211_v2 = vpop.eup %5210  ;;  %v14426_v7 = vld [vmem:[#allocation280_spill] sm:$0xff] }
 0x39c   : > { %v2021_v32 = vsub.f32 %v1757_v55, %v14422_v4  ;;  %5222 = vrcp.f32 %v3200_v60  ;;  %v2672_v31 = vsel %vm2671_vm0, %v10926_v25, %v2670_v51  ;;  %vm2687_vm5 = vcmp.eq.f32.partialorder %v10972_v24, 0.0  ;;  %v5213_v55 = vpop.eup %5212  ;;  %v14424_v25 = vld [vmem:[#allocation112_spill] sm:$0xff] }
 0x39d   : > { %v3790_v26 = vmul.f32 %v5209_v43, %v14418_v49  ;;  %v3791_v27 = vmul.f32 %v5209_v43, %v14420_v12  ;;  %v1756_v61 = vmul.f32 0.00390625, %v1370_v46  ;;  %v2675_v43 = vsel %vm2673_vm1, %v2674_v21, %v2672_v31  ;;  %v14423_v12 = vld [vmem:[#allocation279_spill] sm:$0xff]  ;;  %v14428_v31 = vld [vmem:[#allocation417_spill] sm:$0xff] }
 0x39e   : > { %v2663_v57 = vmul.f32 %v5211_v2, %v10936_v8  ;;  %v3203_v60 = vadd.f32 1e-10, %v2675_v43  ;;  %v2688_v36 = vand.u32 2147483648, %v10972_v24  ;;  %v11049_v49 = vmax.f32 %v2018_v0, 0.0  ;;  %v5215_v46 = vpop.eup %5214 }
 0x39f   : > { %v4065_v50 = vmul.f32 %v14029_v52, %v3790_v26  ;;  %v4066_v48 = vmul.f32 %v14030_v17, %v3791_v27  ;;  %v11051_v51 = vmax.f32 %v2021_v32, 0.0  ;;  %v14425_v21 = vsub.f32 %v14423_v12, %v14424_v25 }
 0x3a0   : > { %v14427_v4 = vsub.f32 %v14426_v7, %v14424_v25  ;;  %5224 = vrcp.f32 %v3203_v60  ;;  %v2665_v0 = vsel %vm2664_vm2, %v10936_v8, %v2663_v57  ;;  %v2684_v32 = vmul.f32 %v5215_v46, %v10972_v24 }
 0x3a1   : > { %v4340_v26 = vadd.f32 %v14031_v56, %v4065_v50  ;;  %v4341_v62 = vadd.f32 %v14032_v18, %v4066_v48  ;;  %v3788_v27 = vmul.f32 %v5213_v55, %v14425_v21  ;;  %v2020_v43 = vsub.f32 %v1756_v61, %v14428_v31  ;;  %v1379_v61 = vpop.xlane.xlu1 %1378  ;;  %v1376_v21 = vpop.xlane.xlu0 %1375 }
 0x3a2   : > { %v3789_v2 = vmul.f32 %v5213_v55, %v14427_v4  ;;  %v2668_v12 = vsel %vm2666_vm3, %v2667_v9, %v2665_v0  ;;  %5226 = vrsqrt.f32 %v11049_v49  ;;  %v5217_v55 = vpop.eup %5216  ;;  %v2686_v57 = vsel %vm2685_vm4, %v10972_v24, %v2684_v32  ;;  %v14430_v0 = vld [vmem:[#allocation119_spill] sm:$0xff] }
 0x3a3   : > { %4604 = vst [vmem:[%s9394_s23 + $0x3d0] sm:$0xff] %v4340_v26  ;;  %4605 = vst [vmem:[%s9394_s23 + $0x3d8] sm:$0xff] %v4341_v62  ;;  %v4063_v50 = vmul.f32 %v14029_v52, %v3788_v27  ;;  %v3202_v60 = vadd.f32 1e-10, %v2668_v12  ;;  %vm2678_vm6 = vcmp.eq.f32.partialorder %v10990_v11, inf  ;;  %vm2680_vm7 = vcmp.eq.f32.partialorder %v10990_v11, 0.0 }
 0x3a4   : > { %v4064_v48 = vmul.f32 %v14030_v17, %v3789_v2  ;;  %v2689_v9 = vsel %vm2687_vm5, %v2688_v36, %v2686_v57  ;;  %v2677_v26 = vmul.f32 %v5217_v55, %v10990_v11  ;;  %v2681_v25 = vand.u32 2147483648, %v10990_v11  ;;  %v14429_v2 = vld [vmem:[#allocation284_spill] sm:$0xff] }
 0x3a5   : > { %v4338_v46 = vadd.f32 %v14031_v56, %v4063_v50  ;;  %5228 = vrcp.f32 %v3202_v60  ;;  %v3205_v62 = vadd.f32 1e-10, %v2689_v9  ;;  %vm2699_vm8 = vcmp.eq.f32.partialorder %v11002_v13, inf  ;;  %v5219_v27 = vpop.eup %5218  ;;  %v14432_v50 = vld [vmem:[#allocation285_spill] sm:$0xff] }
 0x3a6   : > { %v4339_v8 = vadd.f32 %v14032_v18, %v4064_v48  ;;  %v2679_v7 = vsel %vm2678_vm6, %v10990_v11, %v2677_v26  ;;  %5230 = vrsqrt.f32 %v11051_v51  ;;  %v11089_v4 = vmax.f32 %v2020_v43, 0.0  ;;  %v14434_v26 = vld [vmem:[#allocation423_spill] sm:$0xff] }
 0x3a7   : > { %4602 = vst [vmem:[%s9394_s23 + $0x3c0] sm:$0xff] %v4338_v46  ;;  %v1759_v24 = vmul.f32 0.00390625, %v1379_v61  ;;  %v5221_v36 = vpop.eup %5220  ;;  %v14431_v32 = vsub.f32 %v14429_v2, %v14430_v0  ;;  %v14433_v48 = vsub.f32 %v14432_v50, %v14430_v0  ;;  %5232 = vrcp.f32 %v3205_v62  ;;  %v14436_v2 = vld [vmem:[#allocation121_spill] sm:$0xff] }
 0x3a8   : > { %4603 = vst [vmem:[%s9394_s23 + $0x3c8] sm:$0xff] %v4339_v8  ;;  %v2682_v55 = vsel %vm2680_vm7, %v2681_v25, %v2679_v7  ;;  %v2698_v57 = vmul.f32 %v5221_v36, %v11002_v13  ;;  %vm2701_vm9 = vcmp.eq.f32.partialorder %v11002_v13, 0.0  ;;  %5234 = vrsqrt.f32 %v11089_v4  ;;  %v1385_v8 = vpop.xlane.xlu1 %1384  ;;  %v14435_v36 = vld [vmem:[#allocation288_spill] sm:$0xff] }
 0x3a9   : > { %v3794_v31 = vmul.f32 %v5219_v27, %v14431_v32  ;;  %v3795_v12 = vmul.f32 %v5219_v27, %v14433_v48  ;;  %v3204_v60 = vadd.f32 1e-10, %v2682_v55  ;;  %v2702_v46 = vand.u32 2147483648, %v11002_v13  ;;  %v5223_v9 = vpop.eup %5222 }
 0x3aa   : > { %vm2692_vm10 = vcmp.eq.f32.partialorder %v11049_v49, inf  ;;  %v2700_v11 = vsel %vm2699_vm8, %v11002_v13, %v2698_v57  ;;  %v2023_v62 = vsub.f32 %v1759_v24, %v14434_v26  ;;  %v1758_v25 = vmul.f32 0.00390625, %v1376_v21  ;;  %v14440_v21 = vld [vmem:[#allocation424_spill] sm:$0xff] }
 0x3ab   : > { %v4069_v43 = vmul.f32 %v14029_v52, %v3794_v31  ;;  %v4070_v61 = vmul.f32 %v14030_v17, %v3795_v12  ;;  %5236 = vrcp.f32 %v3204_v60  ;;  %v14437_v0 = vsub.f32 %v14435_v36, %v14436_v2  ;;  %v14438_v31 = vld [vmem:[#allocation289_spill] sm:$0xff]  ;;  %v1382_v12 = vpop.xlane.xlu0 %1381 }
 0x3ac   : > { %v14439_v50 = vsub.f32 %v14438_v31, %v14436_v2  ;;  %vm2694_vm11 = vcmp.eq.f32.partialorder %v11049_v49, 0.0  ;;  %v2703_v55 = vsel %vm2701_vm9, %v2702_v46, %v2700_v11  ;;  %v11121_v24 = vmax.f32 %v2023_v62, 0.0 }
 0x3ad   : > { %v4344_v27 = vadd.f32 %v14031_v56, %v4069_v43  ;;  %v4345_v7 = vadd.f32 %v14032_v18, %v4070_v61  ;;  %v3792_v32 = vmul.f32 %v5223_v9, %v14437_v0  ;;  %v2022_v60 = vsub.f32 %v1758_v25, %v14440_v21  ;;  %v5225_v36 = vpop.eup %5224  ;;  %v14441_v25 = vld [vmem:[#allocation295_spill] sm:$0xff]  ;;  %v14444_v0 = vld [vmem:[#allocation296_spill] sm:$0xff] }
 0x3ae   : > { %v3793_v48 = vmul.f32 %v5223_v9, %v14439_v50  ;;  %v1761_v57 = vmul.f32 0.00390625, %v1385_v8  ;;  %v3207_v26 = vadd.f32 1e-10, %v2703_v55  ;;  %v2695_v9 = vand.u32 2147483648, %v11049_v49 }
 0x3af   : > { %4608 = vst [vmem:[%s9394_s23 + $0x3f0] sm:$0xff] %v4344_v27  ;;  %4609 = vst [vmem:[%s9394_s23 + $0x3f8] sm:$0xff] %v4345_v7  ;;  %v4067_v43 = vmul.f32 %v14029_v52, %v3792_v32  ;;  %vm2713_vm12 = vcmp.eq.f32.partialorder %v11051_v51, inf  ;;  %v2716_v13 = vand.u32 2147483648, %v11051_v51  ;;  %5238 = vrsqrt.f32 %v11121_v24  ;;  %v5227_v8 = vpop.eup %5226  ;;  %v14442_v27 = vld [vmem:[#allocation127_spill] sm:$0xff] }
 0x3b0   : > { %v4068_v61 = vmul.f32 %v14030_v17, %v3793_v48  ;;  %v11132_v46 = vmul.f32 0.00390625, %v1382_v12  ;;  %v14443_v7 = vsub.f32 %v14441_v25, %v14442_v27  ;;  %v14445_v32 = vsub.f32 %v14444_v0, %v14442_v27 }
 0x3b1   : > { %v4342_v11 = vadd.f32 %v14031_v56, %v4067_v43  ;;  %vm2715_vm13 = vcmp.eq.f32.partialorder %v11051_v51, 0.0  ;;  %5240 = vrcp.f32 %v3207_v26  ;;  %v2691_v50 = vmul.f32 %v5227_v8, %v11049_v49  ;;  %v1391_v43 = vpop.xlane.xlu1 %1390 }
 0x3b2   : > { %v4343_v62 = vadd.f32 %v14032_v18, %v4068_v61  ;;  %v3798_v2 = vmul.f32 %v5225_v36, %v14443_v7  ;;  %v3799_v31 = vmul.f32 %v5225_v36, %v14445_v32  ;;  %v11144_v48 = vmax.f32 %v2022_v60, 0.0  ;;  %v5229_v61 = vpop.eup %5228  ;;  %v14449_v7 = vld [vmem:[#allocation299_spill] sm:$0xff] }
 0x3b3   : > { %v2025_v12 = vsub.f32 %v1761_v57, %v9043_v29  ;;  %4606 = vst [vmem:[%s9394_s23 + $0x3e0] sm:$0xff] %v4342_v11  ;;  %vm2706_vm14 = vcmp.eq.f32.partialorder %v11089_v4, inf  ;;  %vm2708_vm15 = vcmp.eq.f32.partialorder %v11089_v4, 0.0  ;;  %v2693_v60 = vsel %vm2692_vm10, %v11049_v49, %v2691_v50  ;;  %v5231_v26 = vpop.eup %5230  ;;  %v14446_v11 = vld [vmem:[#allocation298_spill] sm:$0xff] }
 0x3b4   : > { %4607 = vst [vmem:[%s9394_s23 + $0x3e8] sm:$0xff] %v4343_v62  ;;  %v4073_v55 = vmul.f32 %v14029_v52, %v3798_v2  ;;  %v4074_v21 = vmul.f32 %v14030_v17, %v3799_v31  ;;  %v2709_v29 = vand.u32 2147483648, %v11089_v4  ;;  %5242 = vrsqrt.f32 %v11144_v48  ;;  %v14447_v62 = vld [vmem:[#allocation130_spill] sm:$0xff]  ;;  %v5233_v32 = vpop.eup %5232 }
 0x3b5   : > { %v2024_v57 = vsub.f32 %v11132_v46, %v9085_v58  ;;  %v14448_v25 = vsub.f32 %v14446_v11, %v14447_v62  ;;  %v14450_v2 = vsub.f32 %v14449_v7, %v14447_v62  ;;  %v2696_v31 = vsel %vm2694_vm11, %v2695_v9, %v2693_v60  ;;  %v14452_v62 = vld [vmem:[#allocation136_spill] sm:$0xff]  ;;  %v14454_v49 = vld [vmem:[#allocation302_spill] sm:$0xff] }
 0x3b6   : > { %v4348_v36 = vadd.f32 %v14031_v56, %v4073_v55  ;;  %v4349_v8 = vadd.f32 %v14032_v18, %v4074_v21  ;;  %v2712_v50 = vmul.f32 %v5231_v26, %v11051_v51  ;;  %v11171_v58 = vmax.f32 %v2025_v12, 0.0  ;;  %v5235_v55 = vpop.eup %5234 }
 0x3b7   : > { %v3796_v27 = vmul.f32 %v5229_v61, %v14448_v25  ;;  %v3797_v0 = vmul.f32 %v5229_v61, %v14450_v2  ;;  %v11173_v46 = vmul.f32 0.00390625, %v1391_v43  ;;  %v14451_v25 = vld [vmem:[#allocation301_spill] sm:$0xff]  ;;  %v14455_v9 = vsub.f32 %v14454_v49, %v14452_v62 }
 0x3b8   : > { %4612 = vst [vmem:[%s9394_s23 + $0x410] sm:$0xff] %v4348_v36  ;;  %4613 = vst [vmem:[%s9394_s23 + $0x418] sm:$0xff] %v4349_v8  ;;  %v14453_v61 = vsub.f32 %v14451_v25, %v14452_v62  ;;  %v3206_v60 = vadd.f32 1e-10, %v2696_v31  ;;  %v2714_v43 = vsel %vm2713_vm12, %v11051_v51, %v2712_v50  ;;  %v2705_v26 = vmul.f32 %v5235_v55, %v11089_v4  ;;  %v5237_v36 = vpop.eup %5236  ;;  %v14456_v25 = vld [vmem:[#allocation304_spill] sm:$0xff] }
 0x3b9   : > { %v4071_v21 = vmul.f32 %v14029_v52, %v3796_v27  ;;  %v4072_v11 = vmul.f32 %v14030_v17, %v3797_v0  ;;  %v3803_v12 = vmul.f32 %v5233_v32, %v14455_v9  ;;  %5244 = vrsqrt.f32 %v11171_v58 }
 0x3ba   : > { %v3802_v7 = vmul.f32 %v5233_v32, %v14453_v61  ;;  %v14457_v32 = vld [vmem:[#allocation140_spill] sm:$0xff]  ;;  %v14459_v61 = vld [vmem:[#allocation305_spill] sm:$0xff]  ;;  %5246 = vrcp.f32 %v3206_v60  ;;  %v2717_v55 = vsel %vm2715_vm13, %v2716_v13, %v2714_v43  ;;  %v2707_v9 = vsel %vm2706_vm14, %v11089_v4, %v2705_v26  ;;  %v1388_v13 = vpop.xlane.xlu0 %1387  ;;  %v1397_v60 = vpop.xlane.xlu1 %1396 }
 0x3bb   : > { %v4346_v8 = vadd.f32 %v14031_v56, %v4071_v21  ;;  %v4347_v27 = vadd.f32 %v14032_v18, %v4072_v11  ;;  %v4078_v0 = vmul.f32 %v14030_v17, %v3803_v12  ;;  %v14458_v31 = vsub.f32 %v14456_v25, %v14457_v32 }
 0x3bc   : > { %v4077_v2 = vmul.f32 %v14029_v52, %v3802_v7  ;;  %v14460_v50 = vsub.f32 %v14459_v61, %v14457_v32  ;;  %v3209_v7 = vadd.f32 1e-10, %v2717_v55  ;;  %v2710_v51 = vsel %vm2708_vm15, %v2709_v29, %v2707_v9  ;;  %v5239_v43 = vpop.eup %5238  ;;  %v14462_v61 = vld [vmem:[#allocation145_spill] sm:$0xff] }
 0x3bd   : > { %v3800_v62 = vmul.f32 %v5237_v36, %v14458_v31  ;;  %4610 = vst [vmem:[%s9394_s23 + $0x400] sm:$0xff] %v4346_v8  ;;  %4611 = vst [vmem:[%s9394_s23 + $0x408] sm:$0xff] %v4347_v27  ;;  %v4353_v11 = vadd.f32 %v14032_v18, %v4078_v0  ;;  %vm2727_vm0 = vcmp.eq.f32.partialorder %v11121_v24, inf  ;;  %v3208_v8 = vadd.f32 1e-10, %v2710_v51  ;;  %v14464_v55 = vld [vmem:[#allocation309_spill] sm:$0xff] }
 0x3be   : > { %v3801_v49 = vmul.f32 %v5237_v36, %v14460_v50  ;;  %v4352_v21 = vadd.f32 %v14031_v56, %v4077_v2  ;;  %5248 = vrcp.f32 %v3209_v7  ;;  %vm2729_vm1 = vcmp.eq.f32.partialorder %v11121_v24, 0.0  ;;  %v5241_v0 = vpop.eup %5240 }
 0x3bf   : > { %v4075_v12 = vmul.f32 %v14029_v52, %v3800_v62  ;;  %4617 = vst [vmem:[%s9394_s23 + $0x438] sm:$0xff] %v4353_v11  ;;  %v2730_v26 = vand.u32 2147483648, %v11121_v24  ;;  %v2726_v29 = vmul.f32 %v5239_v43, %v11121_v24  ;;  %v11221_v2 = vmax.f32 %v2024_v57, 0.0  ;;  %v14461_v62 = vld [vmem:[#allocation308_spill] sm:$0xff] }
 0x3c0   : > { %v4076_v36 = vmul.f32 %v14030_v17, %v3801_v49  ;;  %4616 = vst [vmem:[%s9394_s23 + $0x430] sm:$0xff] %v4352_v21  ;;  %5250 = vrcp.f32 %v3208_v8  ;;  %v2027_v25 = vsub.f32 %v11173_v46, %v9135_v41  ;;  %v1762_v32 = vmul.f32 0.00390625, %v1388_v13  ;;  %v14466_v46 = vld [vmem:[#allocation370_spill] sm:$0xff] }
 0x3c1   : > { %v4350_v27 = vadd.f32 %v14031_v56, %v4075_v12  ;;  %v1765_v31 = vmul.f32 0.00390625, %v1397_v60  ;;  %v14463_v50 = vsub.f32 %v14461_v62, %v14462_v61  ;;  %v14465_v21 = vsub.f32 %v14464_v55, %v14462_v61  ;;  %v5243_v7 = vpop.eup %5242  ;;  %v1394_v60 = vpop.xlane.xlu0 %1393 }
 0x3c2   : > { %v4351_v4 = vadd.f32 %v14032_v18, %v4076_v36  ;;  %v2728_v57 = vsel %vm2727_vm0, %v11121_v24, %v2726_v29  ;;  %5252 = vrsqrt.f32 %v11221_v2  ;;  %vm2720_vm2 = vcmp.eq.f32.partialorder %v11144_v48, inf  ;;  %v1403_v55 = vpop.xlane.xlu1 %1402 }
 0x3c3   : > { %4614 = vst [vmem:[%s9394_s23 + $0x420] sm:$0xff] %v4350_v27  ;;  %v3806_v49 = vmul.f32 %v5241_v0, %v14463_v50  ;;  %v3807_v11 = vmul.f32 %v5241_v0, %v14465_v21  ;;  %v2731_v41 = vsel %vm2729_vm1, %v2730_v26, %v2728_v57  ;;  %vm2722_vm3 = vcmp.eq.f32.partialorder %v11144_v48, 0.0  ;;  %v14468_v21 = vld [vmem:[#allocation313_spill] sm:$0xff] }
 0x3c4   : > { %4615 = vst [vmem:[%s9394_s23 + $0x428] sm:$0xff] %v4351_v4  ;;  %v11243_v9 = vmul.f32 %v14466_v46, %v14466_v46  ;;  %v3211_v51 = vadd.f32 1e-10, %v2731_v41  ;;  %v2719_v13 = vmul.f32 %v5243_v7, %v11144_v48  ;;  %v2723_v24 = vand.u32 2147483648, %v11144_v48  ;;  %v14471_v41 = vld [vmem:[#allocation314_spill] sm:$0xff] }
 0x3c5   : > { %v4081_v12 = vmul.f32 %v14029_v52, %v3806_v49  ;;  %v4082_v36 = vmul.f32 %v14030_v17, %v3807_v11  ;;  %v11249_v43 = vmax.f32 %v2027_v25, 0.0  ;;  %v2026_v8 = vsub.f32 %v1762_v32, %v9566_v45  ;;  %v14467_v25 = vld [vmem:[#allocation237_spill] sm:$0xff]  ;;  %v14469_v11 = vld [vmem:[#allocation148_spill] sm:$0xff] }
 0x3c6   : > { %v2029_v26 = vsub.f32 %v1765_v31, %v10040_v38  ;;  %5254 = vrcp.f32 %v3211_v51  ;;  %v2721_v29 = vsel %vm2720_vm2, %v11144_v48, %v2719_v13  ;;  %v5245_v0 = vpop.eup %5244  ;;  %v1764_v61 = vmul.f32 0.00390625, %v1394_v60 }
 0x3c7   : > { %v4356_v27 = vadd.f32 %v14031_v56, %v4081_v12  ;;  %v4357_v4 = vadd.f32 %v14032_v18, %v4082_v36  ;;  %v2724_v62 = vsel %vm2722_vm3, %v2723_v24, %v2721_v29  ;;  %5256 = vrsqrt.f32 %v11249_v43  ;;  %v5247_v31 = vpop.eup %5246  ;;  %v14473_v29 = vld [vmem:[#allocation318_spill] sm:$0xff] }
 0x3c8   : > { %v11261_v50 = vmul.f32 %v14467_v25, %v14467_v25  ;;  %v3210_v45 = vadd.f32 1e-10, %v2724_v62  ;;  %v2740_v38 = vmul.f32 %v5245_v0, %v11171_v58  ;;  %vm2741_vm4 = vcmp.eq.f32.partialorder %v11171_v58, inf  ;;  %v14474_v0 = vld [vmem:[#allocation155_spill] sm:$0xff] }
 0x3c9   : > { %4620 = vst [vmem:[%s9394_s23 + $0x450] sm:$0xff] %v4356_v27  ;;  %4621 = vst [vmem:[%s9394_s23 + $0x458] sm:$0xff] %v4357_v4  ;;  %v11267_v32 = vmax.f32 %v2026_v8, 0.0  ;;  %vm2743_vm5 = vcmp.eq.f32.partialorder %v11171_v58, 0.0  ;;  %v2744_v48 = vand.u32 2147483648, %v11171_v58  ;;  %vm2734_vm6 = vcmp.eq.f32.partialorder %v11221_v2, inf }
 0x3ca   : > { %v11272_v49 = vmax.f32 %v2029_v26, 0.0  ;;  %v14470_v57 = vsub.f32 %v14468_v21, %v14469_v11  ;;  %v14472_v12 = vsub.f32 %v14471_v41, %v14469_v11  ;;  %5258 = vrcp.f32 %v3210_v45  ;;  %v14478_v41 = vld [vmem:[#allocation321_spill] sm:$0xff] }
 0x3cb   : > { %v2742_v51 = vsel %vm2741_vm4, %v11171_v58, %v2740_v38  ;;  %vm2736_vm7 = vcmp.eq.f32.partialorder %v11221_v2, 0.0  ;;  %5260 = vrsqrt.f32 %v11267_v32  ;;  %v2028_v60 = vsub.f32 %v1764_v61, %v10050_v63  ;;  %v5249_v24 = vpop.eup %5248  ;;  %v14476_v58 = vld [vmem:[#allocation319_spill] sm:$0xff]  ;;  %v1400_v63 = vpop.xlane.xlu0 %1399 }
 0x3cc   : > { %v3804_v7 = vmul.f32 %v5247_v31, %v14470_v57  ;;  %v3805_v36 = vmul.f32 %v5247_v31, %v14472_v12  ;;  %v2745_v13 = vsel %vm2743_vm5, %v2744_v48, %v2742_v51  ;;  %v1767_v4 = vmul.f32 0.00390625, %v1403_v55  ;;  %v14479_v12 = vld [vmem:[#allocation156_spill] sm:$0xff] }
 0x3cd   : > { %v3213_v27 = vadd.f32 1e-10, %v2745_v13  ;;  %v14475_v62 = vsub.f32 %v14473_v29, %v14474_v0  ;;  %v14477_v38 = vsub.f32 %v14476_v58, %v14474_v0  ;;  %v2737_v48 = vand.u32 2147483648, %v11221_v2  ;;  %v5251_v61 = vpop.eup %5250  ;;  %v14481_v13 = vld [vmem:[#allocation322_spill] sm:$0xff] }
 0x3ce   : > { %v4079_v8 = vmul.f32 %v14029_v52, %v3804_v7  ;;  %v4080_v26 = vmul.f32 %v14030_v17, %v3805_v36  ;;  %5262 = vrsqrt.f32 %v11272_v49  ;;  %vm2755_vm8 = vcmp.eq.f32.partialorder %v11249_v43, inf }
 0x3cf   : > { %v3810_v45 = vmul.f32 %v5249_v24, %v14475_v62  ;;  %v3811_v31 = vmul.f32 %v5249_v24, %v14477_v38  ;;  %5264 = vrcp.f32 %v3213_v27  ;;  %v5253_v11 = vpop.eup %5252  ;;  %v14480_v36 = vsub.f32 %v14478_v41, %v14479_v12 }
 0x3d0   : > { %v4354_v21 = vadd.f32 %v14031_v56, %v4079_v8  ;;  %v4355_v55 = vadd.f32 %v14032_v18, %v4080_v26  ;;  %v14482_v24 = vsub.f32 %v14481_v13, %v14479_v12  ;;  %v2733_v8 = vmul.f32 %v5253_v11, %v11221_v2  ;;  %v14483_v11 = vld [vmem:[#allocation331_spill] sm:$0xff]  ;;  %v14486_v12 = vld [vmem:[#allocation332_spill] sm:$0xff] }
 0x3d1   : > { %v4085_v57 = vmul.f32 %v14029_v52, %v3810_v45  ;;  %v4086_v7 = vmul.f32 %v14030_v17, %v3811_v31  ;;  %v3808_v51 = vmul.f32 %v5251_v61, %v14480_v36  ;;  %v11308_v26 = vmax.f32 %v2028_v60, 0.0 }
 0x3d2   : > { %v3809_v29 = vmul.f32 %v5251_v61, %v14482_v24  ;;  %4618 = vst [vmem:[%s9394_s23 + $0x440] sm:$0xff] %v4354_v21  ;;  %4619 = vst [vmem:[%s9394_s23 + $0x448] sm:$0xff] %v4355_v55  ;;  %v2031_v27 = vsub.f32 %v1767_v4, %v10352_v42  ;;  %v1766_v0 = vmul.f32 0.00390625, %v1400_v63  ;;  %v2735_v31 = vsel %vm2734_vm6, %v11221_v2, %v2733_v8  ;;  %v1409_v21 = vpop.xlane.xlu1 %1408 }
 0x3d3   : > { %v4360_v62 = vadd.f32 %v14031_v56, %v4085_v57  ;;  %v4361_v45 = vadd.f32 %v14032_v18, %v4086_v7  ;;  %v4083_v58 = vmul.f32 %v14029_v52, %v3808_v51  ;;  %vm2757_vm9 = vcmp.eq.f32.partialorder %v11249_v43, 0.0  ;;  %v5255_v42 = vpop.eup %5254  ;;  %v14484_v57 = vld [vmem:[#allocation163_spill] sm:$0xff] }
 0x3d4   : > { %v4084_v38 = vmul.f32 %v14030_v17, %v3809_v29  ;;  %v2758_v60 = vand.u32 2147483648, %v11249_v43  ;;  %5266 = vrsqrt.f32 %v11308_v26  ;;  %v2738_v61 = vsel %vm2736_vm7, %v2737_v48, %v2735_v31  ;;  %v5257_v55 = vpop.eup %5256  ;;  %v1406_v29 = vpop.xlane.xlu0 %1405 }
 0x3d5   : > { %4624 = vst [vmem:[%s9394_s23 + $0x470] sm:$0xff] %v4360_v62  ;;  %4625 = vst [vmem:[%s9394_s23 + $0x478] sm:$0xff] %v4361_v45  ;;  %v4358_v4 = vadd.f32 %v14031_v56, %v4083_v58  ;;  %vm2748_vm10 = vcmp.eq.f32.partialorder %v11267_v32, inf  ;;  %v14485_v7 = vsub.f32 %v14483_v11, %v14484_v57  ;;  %v14487_v36 = vsub.f32 %v14486_v12, %v14484_v57 }
 0x3d6   : > { %v4359_v63 = vadd.f32 %v14032_v18, %v4084_v38  ;;  %v3212_v13 = vadd.f32 1e-10, %v2738_v61  ;;  %v11334_v24 = vmax.f32 %v2031_v27, 0.0  ;;  %v2754_v2 = vmul.f32 %v5257_v55, %v11249_v43  ;;  %v14491_v55 = vld [vmem:[#allocation334_spill] sm:$0xff] }
 0x3d7   : > { %v3814_v41 = vmul.f32 %v5255_v42, %v14485_v7  ;;  %v3815_v51 = vmul.f32 %v5255_v42, %v14487_v36  ;;  %4622 = vst [vmem:[%s9394_s23 + $0x460] sm:$0xff] %v4358_v4  ;;  %vm2750_vm11 = vcmp.eq.f32.partialorder %v11267_v32, 0.0  ;;  %v2751_v48 = vand.u32 2147483648, %v11267_v32  ;;  %v5259_v27 = vpop.eup %5258  ;;  %v14488_v4 = vld [vmem:[#allocation333_spill] sm:$0xff] }
 0x3d8   : > { %4623 = vst [vmem:[%s9394_s23 + $0x468] sm:$0xff] %v4359_v63  ;;  %v2030_v8 = vsub.f32 %v1766_v0, %v10375_v54  ;;  %5268 = vrcp.f32 %v3212_v13  ;;  %v1769_v58 = vmul.f32 0.00390625, %v1409_v21  ;;  %v2756_v38 = vsel %vm2755_vm8, %v11249_v43, %v2754_v2  ;;  %v5261_v42 = vpop.eup %5260  ;;  %v14489_v63 = vld [vmem:[#allocation166_spill] sm:$0xff] }
 0x3d9   : > { %v4089_v62 = vmul.f32 %v14029_v52, %v3814_v41  ;;  %v4090_v45 = vmul.f32 %v14030_v17, %v3815_v51  ;;  %vm2769_vm12 = vcmp.eq.f32.partialorder %v11272_v49, inf  ;;  %5270 = vrsqrt.f32 %v11334_v24 }
 0x3da   : > { %v1768_v31 = vmul.f32 0.00390625, %v1406_v29  ;;  %v14490_v61 = vsub.f32 %v14488_v4, %v14489_v63  ;;  %v14492_v11 = vsub.f32 %v14491_v55, %v14489_v63  ;;  %v2759_v7 = vsel %vm2757_vm9, %v2758_v60, %v2756_v38  ;;  %v1415_v63 = vpop.xlane.xlu1 %1414 }
 0x3db   : > { %v4364_v54 = vadd.f32 %v14031_v56, %v4089_v62  ;;  %v4365_v0 = vadd.f32 %v14032_v18, %v4090_v45  ;;  %v2747_v41 = vmul.f32 %v5261_v42, %v11267_v32  ;;  %v2772_v12 = vand.u32 2147483648, %v11272_v49  ;;  %v5263_v51 = vpop.eup %5262  ;;  %v14493_v42 = vld [vmem:[#allocation336_spill] sm:$0xff] }
 0x3dc   : > { %v3812_v21 = vmul.f32 %v5259_v27, %v14490_v61  ;;  %v3813_v57 = vmul.f32 %v5259_v27, %v14492_v11  ;;  %v11361_v36 = vmax.f32 %v2030_v8, 0.0  ;;  %v3215_v2 = vadd.f32 1e-10, %v2759_v7  ;;  %v5265_v43 = vpop.eup %5264 }
 0x3dd   : > { %4628 = vst [vmem:[%s9394_s23 + $0x490] sm:$0xff] %v4364_v54  ;;  %4629 = vst [vmem:[%s9394_s23 + $0x498] sm:$0xff] %v4365_v0  ;;  %v2033_v62 = vsub.f32 %v1769_v58, %v10382_v16  ;;  %v2749_v60 = vsel %vm2748_vm10, %v11267_v32, %v2747_v41  ;;  %v2768_v8 = vmul.f32 %v5263_v51, %v11272_v49  ;;  %v14495_v58 = vld [vmem:[#allocation337_spill] sm:$0xff]  ;;  %vm2771_vm13 = vcmp.eq.f32.partialorder %v11272_v49, 0.0  ;;  %v1412_v51 = vpop.xlane.xlu0 %1411 }
 0x3de   : > { %v4087_v13 = vmul.f32 %v14029_v52, %v3812_v21  ;;  %v4088_v29 = vmul.f32 %v14030_v17, %v3813_v57  ;;  %5272 = vrsqrt.f32 %v11361_v36  ;;  %v2032_v45 = vsub.f32 %v1768_v31, %v10573_v34 }
 0x3df   : > { %v14494_v54 = vsub.f32 %v14493_v42, %v8351_v33  ;;  %v14496_v0 = vsub.f32 %v14495_v58, %v8351_v33  ;;  %5274 = vrcp.f32 %v3215_v2  ;;  %v2752_v61 = vsel %vm2750_vm11, %v2751_v48, %v2749_v60  ;;  %v1421_v2 = vpop.xlane.xlu1 %1420 }
 0x3e0   : > { %v4362_v27 = vadd.f32 %v14031_v56, %v4087_v13  ;;  %v4363_v38 = vadd.f32 %v14032_v18, %v4088_v29  ;;  %v2770_v34 = vsel %vm2769_vm12, %v11272_v49, %v2768_v8  ;;  %v3214_v55 = vadd.f32 1e-10, %v2752_v61 }
 0x3e1   : > { %v3818_v16 = vmul.f32 %v5265_v43, %v14494_v54  ;;  %v3819_v4 = vmul.f32 %v5265_v43, %v14496_v0  ;;  %v2773_v33 = vsel %vm2771_vm13, %v2772_v12, %v2770_v34  ;;  %v5267_v11 = vpop.eup %5266  ;;  %vm2762_vm14 = vcmp.eq.f32.partialorder %v11308_v26, inf }
 0x3e2   : > { %4626 = vst [vmem:[%s9394_s23 + $0x480] sm:$0xff] %v4362_v27  ;;  %4627 = vst [vmem:[%s9394_s23 + $0x488] sm:$0xff] %v4363_v38  ;;  %v3217_v57 = vadd.f32 1e-10, %v2773_v33  ;;  %v11393_v32 = vmax.f32 %v2033_v62, 0.0  ;;  %v11395_v48 = vmax.f32 %v2032_v45, 0.0  ;;  %5276 = vrcp.f32 %v3214_v55 }
 0x3e3   : > { %v4093_v31 = vmul.f32 %v14029_v52, %v3818_v16  ;;  %v4094_v21 = vmul.f32 %v14030_v17, %v3819_v4  ;;  %v2761_v41 = vmul.f32 %v5267_v11, %v11308_v26  ;;  %vm2764_vm15 = vcmp.eq.f32.partialorder %v11308_v26, 0.0  ;;  %v14497_v45 = vld [vmem:[#allocation338_spill] sm:$0xff] }
 0x3e4   : > { %5278 = vrcp.f32 %v3217_v57  ;;  %v2765_v12 = vand.u32 2147483648, %v11308_v26  ;;  %vm2783_vm0 = vcmp.eq.f32.partialorder %v11334_v24, inf  ;;  %vm2785_vm1 = vcmp.eq.f32.partialorder %v11334_v24, 0.0 }
 0x3e5   : > { %v4368_v49 = vadd.f32 %v14031_v56, %v4093_v31  ;;  %v4369_v7 = vadd.f32 %v14032_v18, %v4094_v21  ;;  %v2763_v13 = vsel %vm2762_vm14, %v11308_v26, %v2761_v41  ;;  %v2786_v29 = vand.u32 2147483648, %v11334_v24  ;;  %v5269_v62 = vpop.eup %5268  ;;  %v14499_v26 = vld [vmem:[#allocation339_spill] sm:$0xff]  ;;  %v1418_v21 = vpop.xlane.xlu0 %1417 }
 0x3e6   : > { %5280 = vrsqrt.f32 %v11393_v32  ;;  %v2766_v43 = vsel %vm2764_vm15, %v2765_v12, %v2763_v13  ;;  %vm2776_vm2 = vcmp.eq.f32.partialorder %v11361_v36, inf  ;;  %v1771_v60 = vmul.f32 0.00390625, %v1415_v63  ;;  %v5271_v8 = vpop.eup %5270 }
 0x3e7   : > { %4632 = vst [vmem:[%s9394_s23 + $0x4b0] sm:$0xff] %v4368_v49  ;;  %4633 = vst [vmem:[%s9394_s23 + $0x4b8] sm:$0xff] %v4369_v7  ;;  %5282 = vrsqrt.f32 %v11395_v48  ;;  %v14498_v27 = vsub.f32 %v14497_v45, %v8376_v15  ;;  %v14500_v42 = vsub.f32 %v14499_v26, %v8376_v15  ;;  %v3216_v16 = vadd.f32 1e-10, %v2766_v43 }
 0x3e8   : > { %v1770_v58 = vmul.f32 0.00390625, %v1412_v51  ;;  %v2782_v0 = vmul.f32 %v5271_v8, %v11334_v24  ;;  %vm2778_vm3 = vcmp.eq.f32.partialorder %v11361_v36, 0.0  ;;  %v2035_v4 = vsub.f32 %v1771_v60, %v10743_v39 }
 0x3e9   : > { %v3816_v38 = vmul.f32 %v5269_v62, %v14498_v27  ;;  %v3817_v54 = vmul.f32 %v5269_v62, %v14500_v42  ;;  %v1773_v61 = vmul.f32 0.00390625, %v1421_v2  ;;  %5284 = vrcp.f32 %v3216_v16  ;;  %v14503_v62 = vld [vmem:[#allocation342_spill] sm:$0xff] }
 0x3ea   : > { %v2034_v31 = vsub.f32 %v1770_v58, %v10955_v20  ;;  %v2784_v15 = vsel %vm2783_vm0, %v11334_v24, %v2782_v0  ;;  %v2779_v55 = vand.u32 2147483648, %v11361_v36  ;;  %v11427_v33 = vmax.f32 %v2035_v4, 0.0  ;;  %v14501_v24 = vld [vmem:[#allocation341_spill] sm:$0xff]  ;;  %v14505_v0 = vld [vmem:[#allocation343_spill] sm:$0xff] }
 0x3eb   : > { %v4091_v63 = vmul.f32 %v14029_v52, %v3816_v38  ;;  %v4092_v34 = vmul.f32 %v14030_v17, %v3817_v54  ;;  %v2037_v39 = vsub.f32 %v1773_v61, %v10962_v1  ;;  %v5273_v11 = vpop.eup %5272  ;;  %v2787_v20 = vsel %vm2785_vm1, %v2786_v29, %v2784_v15  ;;  %v14507_v61 = vld [vmem:[#allocation344_spill] sm:$0xff] }
 0x3ec   : > { %v11434_v7 = vmax.f32 %v2034_v31, 0.0  ;;  %v3219_v41 = vadd.f32 1e-10, %v2787_v20  ;;  %v2775_v51 = vmul.f32 %v5273_v11, %v11361_v36  ;;  %vm2797_vm4 = vcmp.eq.f32.partialorder %v11393_v32, inf  ;;  %v5275_v13 = vpop.eup %5274 }
 0x3ed   : > { %v4366_v57 = vadd.f32 %v14031_v56, %v4091_v63  ;;  %v4367_v49 = vadd.f32 %v14032_v18, %v4092_v34  ;;  %5286 = vrsqrt.f32 %v11427_v33  ;;  %v1772_v12 = vmul.f32 0.00390625, %v1418_v21 }
 0x3ee   : > { %vm2799_vm5 = vcmp.eq.f32.partialorder %v11393_v32, 0.0  ;;  %v2800_v1 = vand.u32 2147483648, %v11393_v32  ;;  %vm2790_vm6 = vcmp.eq.f32.partialorder %v11395_v48, inf  ;;  %5288 = vrsqrt.f32 %v11434_v7 }
 0x3ef   : > { %4630 = vst [vmem:[%s9394_s23 + $0x4a0] sm:$0xff] %v4366_v57  ;;  %4631 = vst [vmem:[%s9394_s23 + $0x4a8] sm:$0xff] %v4367_v49  ;;  %v14502_v29 = vsub.f32 %v14501_v24, %v8379_v37  ;;  %v14504_v43 = vsub.f32 %v14503_v62, %v8379_v37  ;;  %5290 = vrcp.f32 %v3219_v41  ;;  %v2777_v8 = vsel %vm2776_vm2, %v11361_v36, %v2775_v51  ;;  %v5277_v26 = vpop.eup %5276  ;;  %v14511_v57 = vld [vmem:[#allocation346_spill] sm:$0xff] }
 0x3f0   : > { %v2780_v45 = vsel %vm2778_vm3, %v2779_v55, %v2777_v8  ;;  %vm2792_vm7 = vcmp.eq.f32.partialorder %v11395_v48, 0.0  ;;  %v2793_v27 = vand.u32 2147483648, %v11395_v48  ;;  %v11458_v38 = vmax.f32 %v2037_v39, 0.0  ;;  %v14509_v55 = vld [vmem:[#allocation345_spill] sm:$0xff] }
 0x3f1   : > { %v3822_v2 = vmul.f32 %v5275_v13, %v14502_v29  ;;  %v3823_v60 = vmul.f32 %v5275_v13, %v14504_v43  ;;  %v3218_v54 = vadd.f32 1e-10, %v2780_v45  ;;  %v2036_v16 = vsub.f32 %v1772_v12, %v10966_v23  ;;  %v5279_v58 = vpop.eup %5278 }
 0x3f2   : > { %v14506_v4 = vsub.f32 %v14505_v0, %v14082_v6  ;;  %v14508_v63 = vsub.f32 %v14507_v61, %v14082_v6  ;;  %v2814_v31 = vand.u32 2147483648, %v11427_v33  ;;  %5292 = vrsqrt.f32 %v11458_v38  ;;  %v14515_v0 = vld [vmem:[#allocation348_spill] sm:$0xff] }
 0x3f3   : > { %v4097_v42 = vmul.f32 %v14029_v52, %v3822_v2  ;;  %v4098_v37 = vmul.f32 %v14030_v17, %v3823_v60  ;;  %v5281_v21 = vpop.eup %5280  ;;  %v14510_v39 = vsub.f32 %v14509_v55, %v14190_v53  ;;  %v14512_v49 = vsub.f32 %v14511_v57, %v14190_v53  ;;  %v1427_v2 = vpop.xlane.xlu1 %1426 }
 0x3f4   : > { %v3820_v36 = vmul.f32 %v5277_v26, %v14506_v4  ;;  %v3821_v34 = vmul.f32 %v5277_v26, %v14508_v63  ;;  %v5283_v6 = vpop.eup %5282  ;;  %5294 = vrcp.f32 %v3218_v54  ;;  %v2796_v12 = vmul.f32 %v5281_v21, %v11393_v32  ;;  %v14513_v54 = vld [vmem:[#allocation347_spill] sm:$0xff] }
 0x3f5   : > { %v4372_v15 = vadd.f32 %v14031_v56, %v4097_v42  ;;  %v4373_v23 = vadd.f32 %v14032_v18, %v4098_v37  ;;  %v3826_v11 = vmul.f32 %v5279_v58, %v14510_v39  ;;  %v3827_v20 = vmul.f32 %v5279_v58, %v14512_v49 }
 0x3f6   : > { %v4095_v41 = vmul.f32 %v14029_v52, %v3820_v36  ;;  %v4096_v51 = vmul.f32 %v14030_v17, %v3821_v34  ;;  %vm2811_vm8 = vcmp.eq.f32.partialorder %v11427_v33, inf  ;;  %v2789_v53 = vmul.f32 %v5283_v6, %v11395_v48  ;;  %v5285_v8 = vpop.eup %5284 }
 0x3f7   : > { %4636 = vst [vmem:[%s9394_s23 + $0x4d0] sm:$0xff] %v4372_v15  ;;  %4637 = vst [vmem:[%s9394_s23 + $0x4d8] sm:$0xff] %v4373_v23  ;;  %v4101_v13 = vmul.f32 %v14029_v52, %v3826_v11  ;;  %v4102_v24 = vmul.f32 %v14030_v17, %v3827_v20  ;;  %vm2813_vm9 = vcmp.eq.f32.partialorder %v11427_v33, 0.0  ;;  %vm2804_vm10 = vcmp.eq.f32.partialorder %v11434_v7, inf  ;;  %v1433_v11 = vpop.xlane.xlu1 %1432 }
 0x3f8   : > { %v11490_v29 = vmax.f32 %v2036_v16, 0.0  ;;  %v4370_v62 = vadd.f32 %v14031_v56, %v4095_v41  ;;  %v4371_v43 = vadd.f32 %v14032_v18, %v4096_v51  ;;  %v2798_v60 = vsel %vm2797_vm4, %v11393_v32, %v2796_v12  ;;  %v1424_v32 = vpop.xlane.xlu0 %1423  ;;  %v14517_v41 = vld [vmem:[#allocation246_spill] sm:$0xff]  ;;  %v14518_v12 = vld [vmem:[#allocation353_spill] sm:$0xff] }
 0x3f9   : > { %vm2806_vm11 = vcmp.eq.f32.partialorder %v11434_v7, 0.0  ;;  %v4376_v45 = vadd.f32 %v14031_v56, %v4101_v13  ;;  %v4377_v26 = vadd.f32 %v14032_v18, %v4102_v24  ;;  %v2801_v42 = vsel %vm2799_vm5, %v2800_v1, %v2798_v60 }
 0x3fa   : > { %v2791_v37 = vsel %vm2790_vm6, %v11395_v48, %v2789_v53  ;;  %4634 = vst [vmem:[%s9394_s23 + $0x4c0] sm:$0xff] %v4370_v62  ;;  %4635 = vst [vmem:[%s9394_s23 + $0x4c8] sm:$0xff] %v4371_v43  ;;  %v14514_v16 = vsub.f32 %v14513_v54, %v14193_v30  ;;  %v14516_v4 = vsub.f32 %v14515_v0, %v14193_v30  ;;  %v3221_v61 = vadd.f32 1e-10, %v2801_v42  ;;  %v5287_v21 = vpop.eup %5286  ;;  %v14520_v53 = vld [vmem:[#allocation354_spill] sm:$0xff] }
 0x3fb   : > { %v2794_v63 = vsel %vm2792_vm7, %v2793_v27, %v2791_v37  ;;  %4640 = vst [vmem:[%s9394_s23 + $0x4f0] sm:$0xff] %v4376_v45  ;;  %4641 = vst [vmem:[%s9394_s23 + $0x4f8] sm:$0xff] %v4377_v26  ;;  %v2807_v34 = vand.u32 2147483648, %v11434_v7  ;;  %vm2825_vm12 = vcmp.eq.f32.partialorder %v11458_v38, inf  ;;  %5296 = vrsqrt.f32 %v11490_v29  ;;  %v5289_v27 = vpop.eup %5288 }
 0x3fc   : > { %v3824_v58 = vmul.f32 %v5285_v8, %v14514_v16  ;;  %v3825_v36 = vmul.f32 %v5285_v8, %v14516_v4  ;;  %v3220_v1 = vadd.f32 1e-10, %v2794_v63  ;;  %5298 = vrcp.f32 %v3221_v61  ;;  %v5291_v57 = vpop.eup %5290 }
 0x3fd   : > { %vm2827_vm13 = vcmp.eq.f32.partialorder %v11458_v38, 0.0  ;;  %v2828_v48 = vand.u32 2147483648, %v11458_v38  ;;  %v2810_v23 = vmul.f32 %v5287_v21, %v11427_v33  ;;  %v1775_v55 = vmul.f32 0.00390625, %v1427_v2 }
 0x3fe   : > { %v4099_v15 = vmul.f32 %v14029_v52, %v3824_v58  ;;  %v4100_v30 = vmul.f32 %v14030_v17, %v3825_v36  ;;  %5300 = vrcp.f32 %v3220_v1  ;;  %v1774_v39 = vmul.f32 0.00390625, %v1424_v32  ;;  %v14524_v1 = vld [vmem:[#allocation357_spill] sm:$0xff] }
 0x3ff   : > { %v2803_v6 = vmul.f32 %v5289_v27, %v11434_v7  ;;  %v1909_v51 = vmul.f32 %v14517_v41, %v14517_v41  ;;  %v14519_v13 = vsub.f32 %v14518_v12, %v14266_v10  ;;  %v14521_v62 = vsub.f32 %v14520_v53, %v14266_v10  ;;  %v5293_v42 = vpop.eup %5292 }
 0x400   : > { %v4374_v49 = vadd.f32 %v14031_v56, %v4099_v15  ;;  %v4375_v20 = vadd.f32 %v14032_v18, %v4100_v30  ;;  %v2812_v43 = vsel %vm2811_vm8, %v11427_v33, %v2810_v23  ;;  %v2039_v60 = vsub.f32 %v1775_v55, %v11243_v9  ;;  %v11571_v30 = vld [vmem:[%s6118_s11 + $0x760] sm:$0xff]  ;;  %v11576_v23 = vld [vmem:[%s6118_s11 + $0x768] sm:$0xff] }
 0x401   : > { %v3830_v24 = vmul.f32 %v5291_v57, %v14519_v13  ;;  %v3831_v2 = vmul.f32 %v5291_v57, %v14521_v62  ;;  %v2815_v8 = vsel %vm2813_vm9, %v2814_v31, %v2812_v43  ;;  %v2805_v45 = vsel %vm2804_vm10, %v11434_v7, %v2803_v6  ;;  %v5295_v0 = vpop.eup %5294  ;;  %v14522_v7 = vld [vmem:[#allocation356_spill] sm:$0xff]  ;;  %v1430_v6 = vpop.xlane.xlu0 %1429 }
 0x402   : > { %4638 = vst [vmem:[%s9394_s23 + $0x4e0] sm:$0xff] %v4374_v49  ;;  %4639 = vst [vmem:[%s9394_s23 + $0x4e8] sm:$0xff] %v4375_v20  ;;  %v2038_v10 = vsub.f32 %v1774_v39, %v11261_v50  ;;  %v1777_v26 = vmul.f32 0.00390625, %v1433_v11  ;;  %v3223_v9 = vadd.f32 1e-10, %v2815_v8  ;;  %v2808_v16 = vsel %vm2806_vm11, %v2807_v34, %v2805_v45  ;;  %v11586_v39 = vld [vmem:[%s6118_s11 + $0x790] sm:$0xff] }
 0x403   : > { %v4105_v37 = vmul.f32 %v14029_v52, %v3830_v24  ;;  %v4106_v54 = vmul.f32 %v14030_v17, %v3831_v2  ;;  %v3222_v33 = vadd.f32 1e-10, %v2808_v16  ;;  %v2824_v31 = vmul.f32 %v5293_v42, %v11458_v38  ;;  %v11603_v13 = vld [vmem:[%s6118_s11 + $0x788] sm:$0xff]  ;;  %v14526_v42 = vld [vmem:[#allocation359_spill] sm:$0xff] }
 0x404   : > { %v11555_v58 = vmax.f32 %v2039_v60, 0.0  ;;  %v11557_v50 = vmax.f32 %v2038_v10, 0.0  ;;  %5302 = vrcp.f32 %v3223_v9  ;;  %v2041_v61 = vsub.f32 %v1777_v26, %v1909_v51  ;;  %v11593_v51 = vld [vmem:[%s6118_s11 + $0x798] sm:$0xff]  ;;  %v1439_v10 = vpop.xlane.xlu1 %1438  ;;  %v14528_v9 = vld [vmem:[#allocation360_spill] sm:$0xff] }
 0x405   : > { %v4380_v4 = vadd.f32 %v14031_v56, %v4105_v37  ;;  %v4381_v36 = vadd.f32 %v14032_v18, %v4106_v54  ;;  %v14523_v63 = vsub.f32 %v14522_v7, %v14274_v5  ;;  %v14525_v34 = vsub.f32 %v14524_v1, %v14274_v5  ;;  %v14534_v1 = vld [vmem:[#allocation248_spill] sm:$0xff] }
 0x406   : > { %5304 = vrcp.f32 %v3222_v33  ;;  %v2826_v15 = vsel %vm2825_vm12, %v11458_v38, %v2824_v31  ;;  %v3640_v27 = vsub.f32 %v11571_v30, %v10237_v22  ;;  %v3641_v55 = vsub.f32 %v11576_v23, %v10237_v22  ;;  %v11598_v38 = vld [vmem:[%s6118_s11 + $0x780] sm:$0xff] }
 0x407   : > { %v3828_v32 = vmul.f32 %v5295_v0, %v14523_v63  ;;  %v3829_v21 = vmul.f32 %v5295_v0, %v14525_v34  ;;  %4644 = vst [vmem:[%s9394_s23 + $0x510] sm:$0xff] %v4380_v4  ;;  %4645 = vst [vmem:[%s9394_s23 + $0x518] sm:$0xff] %v4381_v36  ;;  %v2829_v5 = vsel %vm2827_vm13, %v2828_v48, %v2826_v15  ;;  %5306 = vrsqrt.f32 %v11555_v58  ;;  %v14530_v0 = vld [vmem:[#allocation361_spill] sm:$0xff]  ;;  %v14633_v48 = vld [vmem:[#allocation427_spill] sm:$0xff] }
 0x408   : > { %v3646_v11 = vsub.f32 %v11586_v39, %v10259_v59  ;;  %v3225_v20 = vadd.f32 1e-10, %v2829_v5  ;;  %5308 = vrsqrt.f32 %v11557_v50  ;;  %v5297_v53 = vpop.eup %5296  ;;  %v11610_v43 = vmax.f32 %v2041_v61, 0.0  ;;  %v14532_v61 = vld [vmem:[#allocation364_spill] sm:$0xff] }
 0x409   : > { %v4103_v57 = vmul.f32 %v14029_v52, %v3828_v32  ;;  %v4104_v49 = vmul.f32 %v14030_v17, %v3829_v21  ;;  %v5299_v60 = vpop.eup %5298  ;;  %v2817_v8 = vmul.f32 %v5297_v53, %v11490_v29  ;;  %vm2818_vm14 = vcmp.eq.f32.partialorder %v11490_v29, inf }
 0x40a   : > { %5310 = vrcp.f32 %v3225_v20  ;;  %vm2820_vm15 = vcmp.eq.f32.partialorder %v11490_v29, 0.0  ;;  %v1776_v45 = vmul.f32 0.00390625, %v1430_v6  ;;  %v14527_v37 = vsub.f32 %v14526_v42, %v14275_v19  ;;  %v1436_v6 = vpop.xlane.xlu0 %1435 }
 0x40b   : > { %v4378_v62 = vadd.f32 %v14031_v56, %v4103_v57  ;;  %v4379_v2 = vadd.f32 %v14032_v18, %v4104_v49  ;;  %v5301_v26 = vpop.eup %5300  ;;  %v14529_v16 = vsub.f32 %v14528_v9, %v14275_v19  ;;  %v2821_v31 = vand.u32 2147483648, %v11490_v29 }
 0x40c   : > { %v3834_v54 = vmul.f32 %v5299_v60, %v14527_v37  ;;  %5312 = vrsqrt.f32 %v11610_v43  ;;  %v14531_v4 = vsub.f32 %v14530_v0, %v14314_v40  ;;  %v14533_v7 = vsub.f32 %v14532_v61, %v14314_v40  ;;  %v14538_v0 = vld [vmem:[#allocation373_spill] sm:$0xff] }
 0x40d   : > { %4642 = vst [vmem:[%s9394_s23 + $0x500] sm:$0xff] %v4378_v62  ;;  %4643 = vst [vmem:[%s9394_s23 + $0x508] sm:$0xff] %v4379_v2  ;;  %v3835_v33 = vmul.f32 %v5299_v60, %v14529_v16  ;;  %v2819_v32 = vsel %vm2818_vm14, %v11490_v29, %v2817_v8  ;;  %v1908_v34 = vmul.f32 %v14534_v1, %v14534_v1  ;;  %vm2839_vm0 = vcmp.eq.f32.partialorder %v11555_v58, inf  ;;  %v14535_v29 = vld [vmem:[#allocation256_spill] sm:$0xff] }
 0x40e   : > { %v3832_v36 = vmul.f32 %v5301_v26, %v14531_v4  ;;  %v3833_v63 = vmul.f32 %v5301_v26, %v14533_v7  ;;  %v4109_v19 = vmul.f32 %v14029_v52, %v3834_v54  ;;  %v2822_v15 = vsel %vm2820_vm15, %v2821_v31, %v2819_v32 }
 0x40f   : > { %v4110_v21 = vmul.f32 %v14030_v17, %v3835_v33  ;;  %v2842_v5 = vand.u32 2147483648, %v11555_v58  ;;  %v3224_v49 = vadd.f32 1e-10, %v2822_v15  ;;  %v2040_v20 = vsub.f32 %v1776_v45, %v1908_v34  ;;  %v1445_v45 = vpop.xlane.xlu1 %1444 }
 0x410   : > { %v4107_v57 = vmul.f32 %v14029_v52, %v3832_v36  ;;  %v4108_v40 = vmul.f32 %v14030_v17, %v3833_v63  ;;  %v4384_v53 = vadd.f32 %v14031_v56, %v4109_v19  ;;  %vm2841_vm1 = vcmp.eq.f32.partialorder %v11555_v58, 0.0  ;;  %v14540_v63 = vld [vmem:[#allocation374_spill] sm:$0xff]  ;;  %v14542_v19 = vld [vmem:[#allocation375_spill] sm:$0xff] }
 0x411   : > { %v4385_v62 = vadd.f32 %v14032_v18, %v4110_v21  ;;  %v1911_v2 = vmul.f32 %v14535_v29, %v14535_v29  ;;  %v1779_v60 = vmul.f32 0.00390625, %v1439_v10  ;;  %5314 = vrcp.f32 %v3224_v49  ;;  %v5303_v37 = vpop.eup %5302  ;;  %v14536_v10 = vld [vmem:[#allocation369_spill] sm:$0xff] }
 0x412   : > { %v4382_v8 = vadd.f32 %v14031_v56, %v4107_v57  ;;  %v4383_v26 = vadd.f32 %v14032_v18, %v4108_v40  ;;  %v11649_v42 = vmax.f32 %v2040_v20, 0.0  ;;  %4648 = vst [vmem:[%s9394_s23 + $0x530] sm:$0xff] %v4384_v53  ;;  %vm2832_vm2 = vcmp.eq.f32.partialorder %v11557_v50, inf  ;;  %v14544_v57 = vld [vmem:[#allocation260_spill] sm:$0xff] }
 0x413   : > { %4649 = vst [vmem:[%s9394_s23 + $0x538] sm:$0xff] %v4385_v62  ;;  %vm2834_vm3 = vcmp.eq.f32.partialorder %v11557_v50, 0.0  ;;  %v2043_v54 = vsub.f32 %v1779_v60, %v1911_v2  ;;  %v1778_v9 = vmul.f32 0.00390625, %v1436_v6  ;;  %v5305_v16 = vpop.eup %5304  ;;  %v14537_v33 = vsub.f32 %v14536_v10, %v14351_v3 }
 0x414   : > { %4646 = vst [vmem:[%s9394_s23 + $0x520] sm:$0xff] %v4382_v8  ;;  %4647 = vst [vmem:[%s9394_s23 + $0x528] sm:$0xff] %v4383_v26  ;;  %v14539_v4 = vsub.f32 %v14538_v0, %v14351_v3  ;;  %v2835_v61 = vand.u32 2147483648, %v11557_v50  ;;  %5316 = vrsqrt.f32 %v11649_v42  ;;  %v5307_v7 = vpop.eup %5306  ;;  %v14541_v32 = vsub.f32 %v14540_v63, %v14401_v35  ;;  %v14545_v8 = vld [vmem:[#allocation392_spill] sm:$0xff] }
 0x415   : > { %v3838_v31 = vmul.f32 %v5303_v37, %v14537_v33  ;;  %v14543_v21 = vsub.f32 %v14542_v19, %v14401_v35  ;;  %v1910_v40 = vmul.f32 %v14544_v57, %v14544_v57  ;;  %v1781_v49 = vmul.f32 0.00390625, %v1445_v45  ;;  %v5309_v62 = vpop.eup %5308 }
 0x416   : > { %v3839_v36 = vmul.f32 %v5303_v37, %v14539_v4  ;;  %v3836_v34 = vmul.f32 %v5305_v16, %v14541_v32  ;;  %v2838_v6 = vmul.f32 %v5307_v7, %v11555_v58  ;;  %v11676_v53 = vmax.f32 %v2043_v54, 0.0 }
 0x417   : > { %v3837_v15 = vmul.f32 %v5305_v16, %v14543_v21  ;;  %v4113_v3 = vmul.f32 %v14029_v52, %v3838_v31  ;;  %v2042_v60 = vsub.f32 %v1778_v9, %v1910_v40  ;;  %v1913_v26 = vmul.f32 %v14545_v8, %v14545_v8  ;;  %v5311_v45 = vpop.eup %5310  ;;  %v14546_v31 = vld [vmem:[#allocation376_spill] sm:$0xff] }
 0x418   : > { %v4114_v20 = vmul.f32 %v14030_v17, %v3839_v36  ;;  %v4111_v2 = vmul.f32 %v14029_v52, %v3836_v34  ;;  %v2840_v54 = vsel %vm2839_vm0, %v11555_v58, %v2838_v6  ;;  %v2831_v10 = vmul.f32 %v5309_v62, %v11557_v50  ;;  %v14548_v36 = vld [vmem:[#allocation379_spill] sm:$0xff] }
 0x419   : > { %v4112_v35 = vmul.f32 %v14030_v17, %v3837_v15  ;;  %v4388_v37 = vadd.f32 %v14031_v56, %v4113_v3  ;;  %v14547_v0 = vsub.f32 %v14546_v31, %v14402_v14  ;;  %v14549_v7 = vsub.f32 %v14548_v36, %v14402_v14  ;;  %v5313_v32 = vpop.eup %5312 }
 0x41a   : > { %v4389_v16 = vadd.f32 %v14032_v18, %v4114_v20  ;;  %v4386_v33 = vadd.f32 %v14031_v56, %v4111_v2  ;;  %v2843_v34 = vsel %vm2841_vm1, %v2842_v5, %v2840_v54  ;;  %v2833_v19 = vsel %vm2832_vm2, %v11557_v50, %v2831_v10  ;;  %v1442_v20 = vpop.xlane.xlu0 %1441 }
 0x41b   : > { %v4387_v9 = vadd.f32 %v14032_v18, %v4112_v35  ;;  %v3842_v4 = vmul.f32 %v5311_v45, %v14547_v0  ;;  %v3843_v63 = vmul.f32 %v5311_v45, %v14549_v7  ;;  %4652 = vst [vmem:[%s9394_s23 + $0x550] sm:$0xff] %v4388_v37  ;;  %5318 = vrsqrt.f32 %v11676_v53  ;;  %v14551_v37 = vld [vmem:[#allocation401_spill] sm:$0xff] }
 0x41c   : > { %4653 = vst [vmem:[%s9394_s23 + $0x558] sm:$0xff] %v4389_v16  ;;  %v2045_v21 = vsub.f32 %v1781_v49, %v1913_v26  ;;  %4650 = vst [vmem:[%s9394_s23 + $0x540] sm:$0xff] %v4386_v33  ;;  %v3227_v40 = vadd.f32 1e-10, %v2843_v34  ;;  %v2836_v3 = vsel %vm2834_vm3, %v2835_v61, %v2833_v19  ;;  %v2852_v5 = vmul.f32 %v5313_v32, %v11610_v43  ;;  %v14550_v26 = vld [vmem:[#allocation286_spill] sm:$0xff] }
 0x41d   : > { %4651 = vst [vmem:[%s9394_s23 + $0x548] sm:$0xff] %v4387_v9  ;;  %v4117_v15 = vmul.f32 %v14029_v52, %v3842_v4  ;;  %v4118_v14 = vmul.f32 %v14030_v17, %v3843_v63  ;;  %v3226_v58 = vadd.f32 1e-10, %v2836_v3  ;;  %vm2853_vm4 = vcmp.eq.f32.partialorder %v11610_v43, inf  ;;  %v14554_v9 = vld [vmem:[#allocation382_spill] sm:$0xff]  ;;  %v1451_v4 = vpop.xlane.xlu1 %1450  ;;  %v14556_v63 = vld [vmem:[#allocation269_spill] sm:$0xff] }
 0x41e   : > { %v2856_v49 = vand.u32 2147483648, %v11610_v43  ;;  %5320 = vrcp.f32 %v3227_v40  ;;  %v11715_v2 = vmax.f32 %v2042_v60, 0.0  ;;  %v2854_v50 = vsel %vm2853_vm4, %v11610_v43, %v2852_v5  ;;  %v5315_v35 = vpop.eup %5314  ;;  %v14552_v60 = vld [vmem:[#allocation380_spill] sm:$0xff]  ;;  %v1448_v34 = vpop.xlane.xlu0 %1447 }
 0x41f   : > { %v4392_v6 = vadd.f32 %v14031_v56, %v4117_v15  ;;  %v4393_v62 = vadd.f32 %v14032_v18, %v4118_v14  ;;  %5322 = vrcp.f32 %v3226_v58  ;;  %vm2855_vm5 = vcmp.eq.f32.partialorder %v11610_v43, 0.0  ;;  %v14557_v14 = vld [vmem:[#allocation278_spill] sm:$0xff]  ;;  %v14558_v58 = vld [vmem:[#allocation283_spill] sm:$0xff] }
 0x420   : > { %v11719_v61 = vmax.f32 %v2045_v21, 0.0  ;;  %v11722_v45 = vmul.f32 0.00390625, %v14550_v26  ;;  %v11725_v16 = vmul.f32 0.00390625, %v14551_v37  ;;  %v2857_v54 = vsel %vm2855_vm5, %v2856_v49, %v2854_v50 }
 0x421   : > { %4656 = vst [vmem:[%s9394_s23 + $0x570] sm:$0xff] %v4392_v6  ;;  %4657 = vst [vmem:[%s9394_s23 + $0x578] sm:$0xff] %v4393_v62  ;;  %5324 = vrsqrt.f32 %v11715_v2  ;;  %v14553_v10 = vsub.f32 %v14552_v60, %v14403_v28  ;;  %v14555_v43 = vsub.f32 %v14554_v9, %v14403_v28  ;;  %v3229_v0 = vadd.f32 1e-10, %v2857_v54  ;;  %v5317_v36 = vpop.eup %5316 }
 0x422   : > { %vm2846_vm6 = vcmp.eq.f32.partialorder %v11649_v42, inf  ;;  %vm2848_vm7 = vcmp.eq.f32.partialorder %v11649_v42, 0.0  ;;  %v2849_v7 = vand.u32 2147483648, %v11649_v42  ;;  %5326 = vrsqrt.f32 %v11719_v61 }
 0x423   : > { %v3840_v33 = vmul.f32 %v5315_v35, %v14553_v10  ;;  %v3841_v31 = vmul.f32 %v5315_v35, %v14555_v43  ;;  %v1912_v32 = vmul.f32 %v14556_v63, %v14556_v63  ;;  %5328 = vrcp.f32 %v3229_v0  ;;  %v1457_v10 = vpop.xlane.xlu1 %1456 }
 0x424   : > { %v2845_v21 = vmul.f32 %v5317_v36, %v11649_v42  ;;  %v1780_v15 = vmul.f32 0.00390625, %v1442_v20  ;;  %v1915_v40 = vmul.f32 %v14557_v14, %v14557_v14  ;;  %v1783_v3 = vmul.f32 0.00390625, %v1451_v4  ;;  %v1454_v4 = vpop.xlane.xlu0 %1453 }
 0x425   : > { %v4115_v19 = vmul.f32 %v14029_v52, %v3840_v33  ;;  %v4116_v28 = vmul.f32 %v14030_v17, %v3841_v31  ;;  %v1914_v5 = vmul.f32 %v14558_v58, %v14558_v58  ;;  %v1782_v50 = vmul.f32 0.00390625, %v1448_v34 }
 0x426   : > { %v2847_v62 = vsel %vm2846_vm6, %v11649_v42, %v2845_v21  ;;  %vm2867_vm8 = vcmp.eq.f32.partialorder %v11676_v53, inf  ;;  %v2044_v20 = vsub.f32 %v1780_v15, %v1912_v32  ;;  %v2047_v26 = vsub.f32 %v1783_v3, %v1915_v40  ;;  %v14560_v21 = vld [vmem:[#allocation293_spill] sm:$0xff]  ;;  %v14561_v3 = vld [vmem:[#allocation383_spill] sm:$0xff] }
 0x427   : > { %v4390_v49 = vadd.f32 %v14031_v56, %v4115_v19  ;;  %v4391_v6 = vadd.f32 %v14032_v18, %v4116_v28  ;;  %v2850_v35 = vsel %vm2848_vm7, %v2849_v7, %v2847_v62  ;;  %vm2869_vm9 = vcmp.eq.f32.partialorder %v11676_v53, 0.0  ;;  %v14559_v19 = vld [vmem:[#allocation182_spill] sm:$0xff] }
 0x428   : > { %v3228_v37 = vadd.f32 1e-10, %v2850_v35  ;;  %v2870_v54 = vand.u32 2147483648, %v11676_v53  ;;  %v2046_v60 = vsub.f32 %v1782_v50, %v1914_v5  ;;  %v5319_v33 = vpop.eup %5318  ;;  %vm2860_vm10 = vcmp.eq.f32.partialorder %v11715_v2, inf }
 0x429   : > { %4654 = vst [vmem:[%s9394_s23 + $0x560] sm:$0xff] %v4390_v49  ;;  %4655 = vst [vmem:[%s9394_s23 + $0x568] sm:$0xff] %v4391_v6  ;;  %v2863_v9 = vand.u32 2147483648, %v11715_v2  ;;  %v11763_v42 = vmax.f32 %v2044_v20, 0.0  ;;  %v11765_v43 = vmax.f32 %v2047_v26, 0.0  ;;  %v2866_v31 = vmul.f32 %v5319_v33, %v11676_v53  ;;  %v14563_v6 = vld [vmem:[#allocation384_spill] sm:$0xff] }
 0x42a   : > { %5330 = vrcp.f32 %v3228_v37  ;;  %vm2862_vm11 = vcmp.eq.f32.partialorder %v11715_v2, 0.0  ;;  %vm2881_vm12 = vcmp.eq.f32.partialorder %v11719_v61, inf  ;;  %v11770_v0 = vmax.f32 %v2046_v60, 0.0  ;;  %v14565_v37 = vld [vmem:[#allocation386_spill] sm:$0xff]  ;;  %v14567_v33 = vld [vmem:[#allocation387_spill] sm:$0xff] }
 0x42b   : > { %vm2883_vm13 = vcmp.eq.f32.partialorder %v11719_v61, 0.0  ;;  %v2884_v36 = vand.u32 2147483648, %v11719_v61  ;;  %5332 = vrsqrt.f32 %v11763_v42  ;;  %v1785_v7 = vmul.f32 0.00390625, %v1457_v10  ;;  %v5321_v32 = vpop.eup %5320 }
 0x42c   : > { %v2868_v34 = vsel %vm2867_vm8, %v11676_v53, %v2866_v31  ;;  %5334 = vrsqrt.f32 %v11765_v43  ;;  %v1917_v28 = vmul.f32 %v14559_v19, %v14559_v19  ;;  %v11783_v15 = vmul.f32 %v14560_v21, %v14560_v21  ;;  %v5323_v40 = vpop.eup %5322 }
 0x42d   : > { %v14562_v5 = vsub.f32 %v14561_v3, %v14466_v46  ;;  %v14564_v62 = vsub.f32 %v14563_v6, %v14466_v46  ;;  %v2871_v35 = vsel %vm2869_vm9, %v2870_v54, %v2868_v34  ;;  %v11793_v20 = vmul.f32 0.00390625, %v1454_v4 }
 0x42e   : > { %v5325_v26 = vpop.eup %5324  ;;  %v14566_v60 = vsub.f32 %v14565_v37, %v14467_v25  ;;  %v14568_v31 = vsub.f32 %v14567_v33, %v14467_v25  ;;  %v3231_v3 = vadd.f32 1e-10, %v2871_v35  ;;  %5336 = vrsqrt.f32 %v11770_v0  ;;  %v14569_v25 = vld [vmem:[#allocation300_spill] sm:$0xff]  ;;  %v14571_v37 = vld [vmem:[#allocation390_spill] sm:$0xff]  ;;  %v1463_v33 = vpop.xlane.xlu1 %1462 }
 0x42f   : > { %v3846_v49 = vmul.f32 %v5321_v32, %v14562_v5  ;;  %v3847_v50 = vmul.f32 %v5321_v32, %v14564_v62  ;;  %v2859_v53 = vmul.f32 %v5325_v26, %v11715_v2  ;;  %v2049_v54 = vsub.f32 %v1785_v7, %v1917_v28  ;;  %v5327_v4 = vpop.eup %5326 }
 0x430   : > { %v3844_v10 = vmul.f32 %v5323_v40, %v14566_v60  ;;  %v3845_v24 = vmul.f32 %v5323_v40, %v14568_v31  ;;  %5338 = vrcp.f32 %v3231_v3  ;;  %v11809_v40 = vmul.f32 %v14569_v25, %v14569_v25  ;;  %v5329_v6 = vpop.eup %5328 }
 0x431   : > { %v4121_v46 = vmul.f32 %v14029_v52, %v3846_v49  ;;  %v4122_v32 = vmul.f32 %v14030_v17, %v3847_v50  ;;  %v2861_v7 = vsel %vm2860_vm10, %v11715_v2, %v2859_v53  ;;  %v2880_v28 = vmul.f32 %v5327_v4, %v11719_v61 }
 0x432   : > { %v4119_v34 = vmul.f32 %v14029_v52, %v3844_v10  ;;  %v4120_v5 = vmul.f32 %v14030_v17, %v3845_v24  ;;  %v14570_v35 = vsub.f32 %v8696_v44, %v14517_v41  ;;  %v14572_v60 = vsub.f32 %v14571_v37, %v14517_v41  ;;  %v1469_v37 = vpop.xlane.xlu1 %1468 }
 0x433   : > { %v4396_v49 = vadd.f32 %v14031_v56, %v4121_v46  ;;  %v4397_v62 = vadd.f32 %v14032_v18, %v4122_v32  ;;  %vm2874_vm14 = vcmp.eq.f32.partialorder %v11763_v42, inf  ;;  %v2864_v31 = vsel %vm2862_vm11, %v2863_v9, %v2861_v7 }
 0x434   : > { %v4394_v24 = vadd.f32 %v14031_v56, %v4119_v34  ;;  %v4395_v50 = vadd.f32 %v14032_v18, %v4120_v5  ;;  %v3850_v26 = vmul.f32 %v5329_v6, %v14570_v35  ;;  %v3851_v10 = vmul.f32 %v5329_v6, %v14572_v60 }
 0x435   : > { %4660 = vst [vmem:[%s9394_s23 + $0x590] sm:$0xff] %v4396_v49  ;;  %4661 = vst [vmem:[%s9394_s23 + $0x598] sm:$0xff] %v4397_v62  ;;  %v2882_v3 = vsel %vm2881_vm12, %v11719_v61, %v2880_v28  ;;  %vm2876_vm15 = vcmp.eq.f32.partialorder %v11763_v42, 0.0  ;;  %v2877_v44 = vand.u32 2147483648, %v11763_v42  ;;  %v11835_v46 = vmax.f32 %v2049_v54, 0.0  ;;  %v1460_v54 = vpop.xlane.xlu0 %1459  ;;  %v14573_v62 = vld [vmem:[#allocation391_spill] sm:$0xff] }
 0x436   : > { %4658 = vst [vmem:[%s9394_s23 + $0x580] sm:$0xff] %v4394_v24  ;;  %4659 = vst [vmem:[%s9394_s23 + $0x588] sm:$0xff] %v4395_v50  ;;  %v4125_v41 = vmul.f32 %v14029_v52, %v3850_v26  ;;  %v4126_v32 = vmul.f32 %v14030_v17, %v3851_v10  ;;  %v3230_v53 = vadd.f32 1e-10, %v2864_v31  ;;  %v2885_v2 = vsel %vm2883_vm13, %v2884_v36, %v2882_v3  ;;  %v14575_v24 = vld [vmem:[#allocation393_spill] sm:$0xff] }
 0x437   : > { %v3233_v9 = vadd.f32 1e-10, %v2885_v2  ;;  %vm2895_vm0 = vcmp.eq.f32.partialorder %v11765_v43, inf  ;;  %vm2897_vm1 = vcmp.eq.f32.partialorder %v11765_v43, 0.0  ;;  %5340 = vrsqrt.f32 %v11835_v46  ;;  %v5331_v6 = vpop.eup %5330 }
 0x438   : > { %v4400_v4 = vadd.f32 %v14031_v56, %v4125_v41  ;;  %v4401_v34 = vadd.f32 %v14032_v18, %v4126_v32  ;;  %5342 = vrcp.f32 %v3230_v53  ;;  %v2898_v5 = vand.u32 2147483648, %v11765_v43  ;;  %v5333_v49 = vpop.eup %5332 }
 0x439   : > { %5344 = vrcp.f32 %v3233_v9  ;;  %vm2888_vm2 = vcmp.eq.f32.partialorder %v11770_v0, inf  ;;  %v2048_v61 = vsub.f32 %v11793_v20, %v11783_v15  ;;  %v1787_v36 = vmul.f32 0.00390625, %v1463_v33  ;;  %v5335_v60 = vpop.eup %5334  ;;  %v14577_v33 = vld [vmem:[#allocation303_spill] sm:$0xff] }
 0x43a   : > { %4664 = vst [vmem:[%s9394_s23 + $0x5b0] sm:$0xff] %v4400_v4  ;;  %4665 = vst [vmem:[%s9394_s23 + $0x5b8] sm:$0xff] %v4401_v34  ;;  %v14574_v7 = vsub.f32 %v14573_v62, %v14534_v1  ;;  %v14576_v50 = vsub.f32 %v14575_v24, %v14534_v1  ;;  %vm2890_vm3 = vcmp.eq.f32.partialorder %v11770_v0, 0.0  ;;  %v1786_v26 = vmul.f32 0.00390625, %v1460_v54 }
 0x43b   : > { %v2873_v10 = vmul.f32 %v5333_v49, %v11763_v42  ;;  %v2891_v15 = vand.u32 2147483648, %v11770_v0  ;;  %v11863_v20 = vmax.f32 %v2048_v61, 0.0  ;;  %v1918_v31 = vmul.f32 %v14577_v33, %v14577_v33  ;;  %v5337_v53 = vpop.eup %5336 }
 0x43c   : > { %v3848_v28 = vmul.f32 %v5331_v6, %v14574_v7  ;;  %v3849_v35 = vmul.f32 %v5331_v6, %v14576_v50  ;;  %v2894_v1 = vmul.f32 %v5335_v60, %v11765_v43  ;;  %v2051_v32 = vsub.f32 %v1787_v36, %v11809_v40  ;;  %v14578_v7 = vld [vmem:[#allocation294_spill] sm:$0xff]  ;;  %v14581_v50 = vld [vmem:[#allocation395_spill] sm:$0xff] }
 0x43d   : > { %v2875_v2 = vsel %vm2874_vm14, %v11763_v42, %v2873_v10  ;;  %5346 = vrsqrt.f32 %v11863_v20  ;;  %v2050_v9 = vsub.f32 %v1786_v26, %v1918_v31  ;;  %v1789_v54 = vmul.f32 0.00390625, %v1469_v37  ;;  %v5339_v61 = vpop.eup %5338  ;;  %v14579_v42 = vld [vmem:[#allocation394_spill] sm:$0xff] }
 0x43e   : > { %v4123_v3 = vmul.f32 %v14029_v52, %v3848_v28  ;;  %v4124_v41 = vmul.f32 %v14030_v17, %v3849_v35  ;;  %v2878_v6 = vsel %vm2876_vm15, %v2877_v44, %v2875_v2  ;;  %v2896_v40 = vsel %vm2895_vm0, %v11765_v43, %v2894_v1 }
 0x43f   : > { %v3232_v36 = vadd.f32 1e-10, %v2878_v6  ;;  %v2899_v49 = vsel %vm2897_vm1, %v2898_v5, %v2896_v40  ;;  %v2887_v62 = vmul.f32 %v5337_v53, %v11770_v0  ;;  %v1921_v28 = vmul.f32 %v14578_v7, %v14578_v7 }
 0x440   : > { %v4398_v4 = vadd.f32 %v14031_v56, %v4123_v3  ;;  %v4399_v34 = vadd.f32 %v14032_v18, %v4124_v41  ;;  %v14580_v44 = vsub.f32 %v14579_v42, %v14535_v29  ;;  %v14582_v35 = vsub.f32 %v14581_v50, %v14535_v29  ;;  %v11907_v41 = vld [vmem:[%s6118_s11 + $0x7b0] sm:$0xff] }
 0x441   : > { %v3235_v37 = vadd.f32 1e-10, %v2899_v49  ;;  %v11895_v43 = vmax.f32 %v2051_v32, 0.0  ;;  %5348 = vrcp.f32 %v3232_v36  ;;  %v2889_v5 = vsel %vm2888_vm2, %v11770_v0, %v2887_v62  ;;  %v11912_v32 = vld [vmem:[%s6118_s11 + $0x7b8] sm:$0xff]  ;;  %v14583_v36 = vld [vmem:[#allocation396_spill] sm:$0xff] }
 0x442   : > { %4662 = vst [vmem:[%s9394_s23 + $0x5a0] sm:$0xff] %v4398_v4  ;;  %4663 = vst [vmem:[%s9394_s23 + $0x5a8] sm:$0xff] %v4399_v34  ;;  %v3854_v24 = vmul.f32 %v5339_v61, %v14580_v44  ;;  %v3855_v26 = vmul.f32 %v5339_v61, %v14582_v35  ;;  %v11900_v60 = vmax.f32 %v2050_v9, 0.0  ;;  %v2053_v10 = vsub.f32 %v1789_v54, %v1921_v28  ;;  %v11918_v54 = vld [vmem:[%s6118_s11 + $0x7a0] sm:$0xff]  ;;  %v1466_v34 = vpop.xlane.xlu0 %1465  ;;  %v14585_v28 = vld [vmem:[#allocation398_spill] sm:$0xff] }
 0x443   : > { %5350 = vrcp.f32 %v3235_v37  ;;  %v2892_v29 = vsel %vm2890_vm3, %v2891_v15, %v2889_v5  ;;  %vm2909_vm4 = vcmp.eq.f32.partialorder %v11835_v46, inf  ;;  %vm2911_vm5 = vcmp.eq.f32.partialorder %v11835_v46, 0.0  ;;  %v14587_v35 = vld [vmem:[#allocation400_spill] sm:$0xff]  ;;  %v14589_v5 = vld [vmem:[#allocation402_spill] sm:$0xff] }
 0x444   : > { %v4129_v31 = vmul.f32 %v14029_v52, %v3854_v24  ;;  %v4130_v3 = vmul.f32 %v14030_v17, %v3855_v26  ;;  %v3234_v2 = vadd.f32 1e-10, %v2892_v29  ;;  %5352 = vrsqrt.f32 %v11895_v43  ;;  %v5341_v9 = vpop.eup %5340 }
 0x445   : > { %5354 = vrsqrt.f32 %v11900_v60  ;;  %v5343_v6 = vpop.eup %5342  ;;  %v2908_v40 = vmul.f32 %v5341_v9, %v11835_v46  ;;  %v14584_v49 = vsub.f32 %v14583_v36, %v14544_v57  ;;  %v14586_v42 = vsub.f32 %v14585_v28, %v14544_v57 }
 0x446   : > { %v4404_v15 = vadd.f32 %v14031_v56, %v4129_v31  ;;  %v4405_v4 = vadd.f32 %v14032_v18, %v4130_v3  ;;  %5356 = vrcp.f32 %v3234_v2  ;;  %v5345_v61 = vpop.eup %5344  ;;  %v2912_v24 = vand.u32 2147483648, %v11835_v46 }
 0x447   : > { %v3852_v62 = vmul.f32 %v5343_v6, %v14584_v49  ;;  %v3853_v44 = vmul.f32 %v5343_v6, %v14586_v42  ;;  %v11937_v50 = vmax.f32 %v2053_v10, 0.0  ;;  %v14588_v26 = vsub.f32 %v14587_v35, %v14545_v8  ;;  %v1472_v49 = vpop.xlane.xlu0 %1471 }
 0x448   : > { %4668 = vst [vmem:[%s9394_s23 + $0x5d0] sm:$0xff] %v4404_v15  ;;  %4669 = vst [vmem:[%s9394_s23 + $0x5d8] sm:$0xff] %v4405_v4  ;;  %v14590_v31 = vsub.f32 %v14589_v5, %v14545_v8  ;;  %v2910_v29 = vsel %vm2909_vm4, %v11835_v46, %v2908_v40  ;;  %vm2902_vm6 = vcmp.eq.f32.partialorder %v11863_v20, inf  ;;  %vm2904_vm7 = vcmp.eq.f32.partialorder %v11863_v20, 0.0  ;;  %v1475_v8 = vpop.xlane.xlu1 %1474  ;;  %v14592_v5 = vld [vmem:[#allocation317_spill] sm:$0xff] }
 0x449   : > { %v3858_v37 = vmul.f32 %v5345_v61, %v14588_v26  ;;  %v4127_v2 = vmul.f32 %v14029_v52, %v3852_v62  ;;  %v4128_v57 = vmul.f32 %v14030_v17, %v3853_v44  ;;  %v2913_v9 = vsel %vm2911_vm5, %v2912_v24, %v2910_v29  ;;  %v14591_v44 = vld [vmem:[#allocation310_spill] sm:$0xff] }
 0x44a   : > { %v3859_v3 = vmul.f32 %v5345_v61, %v14590_v31  ;;  %5358 = vrsqrt.f32 %v11937_v50  ;;  %v3237_v4 = vadd.f32 1e-10, %v2913_v9  ;;  %v5347_v46 = vpop.eup %5346  ;;  %v2905_v61 = vand.u32 2147483648, %v11863_v20  ;;  %v14593_v9 = vld [vmem:[#allocation320_spill] sm:$0xff] }
 0x44b   : > { %v4133_v10 = vmul.f32 %v14029_v52, %v3858_v37  ;;  %v4402_v6 = vadd.f32 %v14031_v56, %v4127_v2  ;;  %v4403_v40 = vadd.f32 %v14032_v18, %v4128_v57  ;;  %v2926_v36 = vand.u32 2147483648, %v11895_v43 }
 0x44c   : > { %v4134_v15 = vmul.f32 %v14030_v17, %v3859_v3  ;;  %5360 = vrcp.f32 %v3237_v4  ;;  %v2901_v42 = vmul.f32 %v5347_v46, %v11863_v20  ;;  %vm2923_vm8 = vcmp.eq.f32.partialorder %v11895_v43, inf  ;;  %v14594_v4 = vld [vmem:[#allocation403_spill] sm:$0xff] }
 0x44d   : > { %v4408_v62 = vadd.f32 %v14031_v56, %v4133_v10  ;;  %4666 = vst [vmem:[%s9394_s23 + $0x5c0] sm:$0xff] %v4402_v6  ;;  %4667 = vst [vmem:[%s9394_s23 + $0x5c8] sm:$0xff] %v4403_v40  ;;  %vm2925_vm9 = vcmp.eq.f32.partialorder %v11895_v43, 0.0  ;;  %vm2916_vm10 = vcmp.eq.f32.partialorder %v11900_v60, inf  ;;  %v1920_v24 = vmul.f32 %v14591_v44, %v14591_v44  ;;  %v14596_v6 = vld [vmem:[#allocation405_spill] sm:$0xff] }
 0x44e   : > { %v4409_v28 = vadd.f32 %v14032_v18, %v4134_v15  ;;  %v1788_v35 = vmul.f32 0.00390625, %v1466_v34  ;;  %v1791_v26 = vmul.f32 0.00390625, %v1475_v8  ;;  %v2903_v37 = vsel %vm2902_vm6, %v11863_v20, %v2901_v42  ;;  %v5349_v29 = vpop.eup %5348 }
 0x44f   : > { %4672 = vst [vmem:[%s9394_s23 + $0x5f0] sm:$0xff] %v4408_v62  ;;  %vm2918_vm11 = vcmp.eq.f32.partialorder %v11900_v60, 0.0  ;;  %v1923_v31 = vmul.f32 %v14592_v5, %v14592_v5  ;;  %v11975_v3 = vmul.f32 0.00390625, %v1472_v49  ;;  %v2906_v2 = vsel %vm2904_vm7, %v2905_v61, %v2903_v37 }
 0x450   : > { %4673 = vst [vmem:[%s9394_s23 + $0x5f8] sm:$0xff] %v4409_v28  ;;  %v2919_v34 = vand.u32 2147483648, %v11900_v60  ;;  %v2052_v57 = vsub.f32 %v1788_v35, %v1920_v24  ;;  %v11982_v10 = vmul.f32 %v14593_v9, %v14593_v9  ;;  %v5351_v15 = vpop.eup %5350  ;;  %v14595_v8 = vsub.f32 %v14594_v4, %v14556_v63  ;;  %v14598_v28 = vld [vmem:[#allocation406_spill] sm:$0xff]  ;;  %v14600_v35 = vld [vmem:[#allocation407_spill] sm:$0xff] }
 0x451   : > { %v14597_v40 = vsub.f32 %v14596_v6, %v14556_v63  ;;  %v3236_v62 = vadd.f32 1e-10, %v2906_v2  ;;  %vm2937_vm12 = vcmp.eq.f32.partialorder %v11937_v50, inf  ;;  %v2055_v20 = vsub.f32 %v1791_v26, %v1923_v31  ;;  %v5353_v61 = vpop.eup %5352 }
 0x452   : > { %v3856_v46 = vmul.f32 %v5349_v29, %v14595_v8  ;;  %v14599_v42 = vsub.f32 %v14598_v28, %v14557_v14  ;;  %v14601_v37 = vsub.f32 %v14600_v35, %v14557_v14  ;;  %v11997_v53 = vmax.f32 %v2052_v57, 0.0  ;;  %v5355_v63 = vpop.eup %5354 }
 0x453   : > { %v3857_v49 = vmul.f32 %v5349_v29, %v14597_v40  ;;  %v2054_v4 = vsub.f32 %v11975_v3, %v11982_v10  ;;  %5362 = vrcp.f32 %v3236_v62  ;;  %v2922_v26 = vmul.f32 %v5353_v61, %v11895_v43  ;;  %v5357_v31 = vpop.eup %5356  ;;  %v14604_v40 = vld [vmem:[#allocation409_spill] sm:$0xff] }
 0x454   : > { %v3862_v24 = vmul.f32 %v5351_v15, %v14599_v42  ;;  %v3863_v0 = vmul.f32 %v5351_v15, %v14601_v37  ;;  %v4131_v29 = vmul.f32 %v14029_v52, %v3856_v46  ;;  %v2915_v57 = vmul.f32 %v5355_v63, %v11900_v60  ;;  %v14602_v15 = vld [vmem:[#allocation408_spill] sm:$0xff] }
 0x455   : > { %v4132_v2 = vmul.f32 %v14030_v17, %v3857_v49  ;;  %5364 = vrsqrt.f32 %v11997_v53  ;;  %v14603_v46 = vsub.f32 %v14602_v15, %v14558_v58  ;;  %v14605_v49 = vsub.f32 %v14604_v40, %v14558_v58  ;;  %v14607_v15 = vld [vmem:[#allocation410_spill] sm:$0xff]  ;;  %v14609_v40 = vld [vmem:[#allocation411_spill] sm:$0xff] }
 0x456   : > { %v4137_v8 = vmul.f32 %v14029_v52, %v3862_v24  ;;  %v4138_v14 = vmul.f32 %v14030_v17, %v3863_v0  ;;  %v4406_v3 = vadd.f32 %v14031_v56, %v4131_v29  ;;  %v2924_v28 = vsel %vm2923_vm8, %v11895_v43, %v2922_v26  ;;  %v1481_v24 = vpop.xlane.xlu1 %1480 }
 0x457   : > { %v4407_v10 = vadd.f32 %v14032_v18, %v4132_v2  ;;  %v3860_v6 = vmul.f32 %v5357_v31, %v14603_v46  ;;  %v3861_v62 = vmul.f32 %v5357_v31, %v14605_v49  ;;  %v2917_v42 = vsel %vm2916_vm10, %v11900_v60, %v2915_v57  ;;  %v5359_v35 = vpop.eup %5358 }
 0x458   : > { %v4412_v0 = vadd.f32 %v14031_v56, %v4137_v8  ;;  %v4413_v61 = vadd.f32 %v14032_v18, %v4138_v14  ;;  %4670 = vst [vmem:[%s9394_s23 + $0x5e0] sm:$0xff] %v4406_v3  ;;  %v2927_v63 = vsel %vm2925_vm9, %v2926_v36, %v2924_v28  ;;  %v2920_v29 = vsel %vm2918_vm11, %v2919_v34, %v2917_v42  ;;  %v14606_v3 = vld [vmem:[#allocation425_spill] sm:$0xff] }
 0x459   : > { %4671 = vst [vmem:[%s9394_s23 + $0x5e8] sm:$0xff] %v4407_v10  ;;  %v4135_v37 = vmul.f32 %v14029_v52, %v3860_v6  ;;  %v4136_v58 = vmul.f32 %v14030_v17, %v3861_v62  ;;  %v3239_v2 = vadd.f32 1e-10, %v2927_v63  ;;  %v3238_v26 = vadd.f32 1e-10, %v2920_v29  ;;  %v5361_v60 = vpop.eup %5360  ;;  %v1478_v10 = vpop.xlane.xlu0 %1477  ;;  %v14611_v63 = vld [vmem:[#allocation292_spill] sm:$0xff] }
 0x45a   : > { %4676 = vst [vmem:[%s9394_s23 + $0x610] sm:$0xff] %v4412_v0  ;;  %4677 = vst [vmem:[%s9394_s23 + $0x618] sm:$0xff] %v4413_v61  ;;  %v2936_v31 = vmul.f32 %v5359_v35, %v11937_v50  ;;  %v12035_v8 = vmax.f32 %v2055_v20, 0.0  ;;  %v2940_v43 = vand.u32 2147483648, %v11937_v50  ;;  %v1793_v36 = vmul.f32 0.00390625, %v1481_v24  ;;  %v12055_v61 = vld [vmem:[%s6118_s11 + $0x7a8] sm:$0xff] }
 0x45b   : > { %v4410_v14 = vadd.f32 %v14031_v56, %v4135_v37  ;;  %v4411_v57 = vadd.f32 %v14032_v18, %v4136_v58  ;;  %5366 = vrcp.f32 %v3239_v2  ;;  %vm2939_vm13 = vcmp.eq.f32.partialorder %v11937_v50, 0.0  ;;  %v14612_v2 = vld [vmem:[#allocation412_spill] sm:$0xff] }
 0x45c   : > { %v2938_v34 = vsel %vm2937_vm12, %v11937_v50, %v2936_v31  ;;  %v1925_v20 = vmul.f32 %v14606_v3, %v14606_v3  ;;  %v14608_v46 = vsub.f32 %v14607_v15, %v14559_v19  ;;  %v14610_v49 = vsub.f32 %v14609_v40, %v14559_v19  ;;  %v1487_v19 = vpop.xlane.xlu1 %1486  ;;  %v14613_v31 = vld [vmem:[#allocation426_spill] sm:$0xff] }
 0x45d   : > { %4674 = vst [vmem:[%s9394_s23 + $0x600] sm:$0xff] %v4410_v14  ;;  %4675 = vst [vmem:[%s9394_s23 + $0x608] sm:$0xff] %v4411_v57  ;;  %5368 = vrcp.f32 %v3238_v26  ;;  %v2941_v0 = vsel %vm2939_vm13, %v2940_v43, %v2938_v34  ;;  %v12060_v42 = vmax.f32 %v2054_v4, 0.0  ;;  %v1792_v58 = vmul.f32 0.00390625, %v1478_v10 }
 0x45e   : > { %v3866_v6 = vmul.f32 %v5361_v60, %v14608_v46  ;;  %v3867_v62 = vmul.f32 %v5361_v60, %v14610_v49  ;;  %v3241_v28 = vadd.f32 1e-10, %v2941_v0  ;;  %5370 = vrsqrt.f32 %v12035_v8  ;;  %v14614_v60 = vld [vmem:[#allocation297_spill] sm:$0xff]  ;;  %v14616_v49 = vld [vmem:[#allocation414_spill] sm:$0xff] }
 0x45f   : > { %v2057_v37 = vsub.f32 %v1793_v36, %v1925_v20  ;;  %v12065_v29 = vmul.f32 0.00390625, %v14611_v63  ;;  %v12068_v26 = vmul.f32 0.00390625, %v14612_v2  ;;  %v1924_v4 = vmul.f32 %v14613_v31, %v14613_v31  ;;  %v14615_v20 = vld [vmem:[#allocation422_spill] sm:$0xff] }
 0x460   : > { %v4141_v24 = vmul.f32 %v14029_v52, %v3866_v6  ;;  %v4142_v35 = vmul.f32 %v14030_v17, %v3867_v62  ;;  %5372 = vrcp.f32 %v3241_v28  ;;  %v5363_v36 = vpop.eup %5362  ;;  %v12078_v34 = vmul.f32 0.00390625, %v14614_v60  ;;  %v1484_v6 = vpop.xlane.xlu0 %1483  ;;  %v14618_v28 = vld [vmem:[#allocation415_spill] sm:$0xff] }
 0x461   : > { %5374 = vrsqrt.f32 %v12060_v42  ;;  %v12075_v43 = vmax.f32 %v2057_v37, 0.0  ;;  %v12081_v10 = vmul.f32 0.00390625, %v14615_v20  ;;  %v2056_v15 = vsub.f32 %v1792_v58, %v1924_v4  ;;  %v14620_v37 = vld [vmem:[#allocation436_spill] sm:$0xff]  ;;  %v1493_v60 = vpop.xlane.xlu1 %1492 }
 0x462   : > { %v4416_v14 = vadd.f32 %v14031_v56, %v4141_v24  ;;  %v4417_v57 = vadd.f32 %v14032_v18, %v4142_v35  ;;  %v1795_v46 = vmul.f32 0.00390625, %v1487_v19  ;;  %v5365_v40 = vpop.eup %5364  ;;  %v14617_v62 = vsub.f32 %v14616_v49, %v14560_v21 }
 0x463   : > { %v14619_v24 = vsub.f32 %v14618_v28, %v14560_v21  ;;  %5376 = vrsqrt.f32 %v12075_v43  ;;  %v1927_v63 = vmul.f32 %v14620_v37, %v14620_v37  ;;  %v2929_v58 = vmul.f32 %v5365_v40, %v11997_v53 }
 0x464   : > { %4680 = vst [vmem:[%s9394_s23 + $0x630] sm:$0xff] %v4416_v14  ;;  %4681 = vst [vmem:[%s9394_s23 + $0x638] sm:$0xff] %v4417_v57  ;;  %v3864_v0 = vmul.f32 %v5363_v36, %v14617_v62  ;;  %vm2930_vm14 = vcmp.eq.f32.partialorder %v11997_v53, inf  ;;  %v2933_v19 = vand.u32 2147483648, %v11997_v53  ;;  %v12097_v2 = vmax.f32 %v2056_v15, 0.0 }
 0x465   : > { %v3865_v35 = vmul.f32 %v5363_v36, %v14619_v24  ;;  %v2059_v57 = vsub.f32 %v1795_v46, %v1927_v63  ;;  %v1794_v21 = vmul.f32 0.00390625, %v1484_v6  ;;  %v2931_v36 = vsel %vm2930_vm14, %v11997_v53, %v2929_v58  ;;  %v14621_v46 = vld [vmem:[#allocation171_spill] sm:$0xff]  ;;  %v1490_v63 = vpop.xlane.xlu0 %1489 }
 0x466   : > { %v4139_v4 = vmul.f32 %v14029_v52, %v3864_v0  ;;  %vm2932_vm15 = vcmp.eq.f32.partialorder %v11997_v53, 0.0  ;;  %vm2951_vm0 = vcmp.eq.f32.partialorder %v12035_v8, inf  ;;  %5378 = vrsqrt.f32 %v12097_v2 }
 0x467   : > { %v4140_v14 = vmul.f32 %v14030_v17, %v3865_v35  ;;  %v2934_v40 = vsel %vm2932_vm15, %v2933_v19, %v2931_v36  ;;  %vm2953_vm1 = vcmp.eq.f32.partialorder %v12035_v8, 0.0  ;;  %v1926_v6 = vmul.f32 %v14621_v46, %v14621_v46  ;;  %v14622_v19 = vld [vmem:[#allocation418_spill] sm:$0xff]  ;;  %v14624_v36 = vld [vmem:[#allocation419_spill] sm:$0xff] }
 0x468   : > { %v4414_v20 = vadd.f32 %v14031_v56, %v4139_v4  ;;  %v3240_v49 = vadd.f32 1e-10, %v2934_v40  ;;  %v2954_v62 = vand.u32 2147483648, %v12035_v8  ;;  %vm2944_vm2 = vcmp.eq.f32.partialorder %v12060_v42, inf  ;;  %v5367_v0 = vpop.eup %5366 }
 0x469   : > { %v4415_v15 = vadd.f32 %v14032_v18, %v4140_v14  ;;  %v12112_v53 = vmax.f32 %v2059_v57, 0.0  ;;  %vm2946_vm3 = vcmp.eq.f32.partialorder %v12060_v42, 0.0  ;;  %v2947_v28 = vand.u32 2147483648, %v12060_v42 }
 0x46a   : > { %4678 = vst [vmem:[%s9394_s23 + $0x620] sm:$0xff] %v4414_v20  ;;  %v2058_v24 = vsub.f32 %v1794_v21, %v1926_v6  ;;  %v1797_v35 = vmul.f32 0.00390625, %v1493_v60  ;;  %v5369_v58 = vpop.eup %5368  ;;  %v14623_v4 = vsub.f32 %v14622_v19, %v14569_v25  ;;  %v14625_v40 = vsub.f32 %v14624_v36, %v14569_v25  ;;  %v14628_v21 = vld [vmem:[#allocation421_spill] sm:$0xff]  ;;  %v14630_v19 = vld [vmem:[#allocation440_spill] sm:$0xff] }
 0x46b   : > { %4679 = vst [vmem:[%s9394_s23 + $0x628] sm:$0xff] %v4415_v15  ;;  %5380 = vrcp.f32 %v3240_v49  ;;  %vm2965_vm4 = vcmp.eq.f32.partialorder %v12075_v43, inf  ;;  %v5371_v20 = vpop.eup %5370  ;;  %v14626_v15 = vld [vmem:[#allocation420_spill] sm:$0xff]  ;;  %v14629_v60 = vsub.f32 %v14628_v21, %v14577_v33  ;;  %vm2967_vm5 = vcmp.eq.f32.partialorder %v12075_v43, 0.0 }
 0x46c   : > { %v3870_v14 = vmul.f32 %v5367_v0, %v14623_v4  ;;  %v3871_v57 = vmul.f32 %v5367_v0, %v14625_v40  ;;  %v14627_v50 = vsub.f32 %v14626_v15, %v14577_v33  ;;  %5382 = vrsqrt.f32 %v12112_v53 }
 0x46d   : > { %v3869_v6 = vmul.f32 %v5369_v58, %v14629_v60  ;;  %v1929_v25 = vmul.f32 %v14630_v19, %v14630_v19  ;;  %v2950_v4 = vmul.f32 %v5371_v20, %v12035_v8  ;;  %v1796_v36 = vmul.f32 0.00390625, %v1490_v63 }
 0x46e   : > { %v3868_v1 = vmul.f32 %v5369_v58, %v14627_v50  ;;  %v4145_v49 = vmul.f32 %v14029_v52, %v3870_v14  ;;  %v4146_v0 = vmul.f32 %v14030_v17, %v3871_v57  ;;  %v5373_v50 = vpop.eup %5372  ;;  %v12140_v40 = vmax.f32 %v2058_v24, 0.0  ;;  %v14631_v57 = vld [vmem:[#allocation306_spill] sm:$0xff] }
 0x46f   : > { %v4144_v58 = vmul.f32 %v14030_v17, %v3869_v6  ;;  %v2061_v15 = vsub.f32 %v1797_v35, %v1929_v25  ;;  %v5375_v21 = vpop.eup %5374  ;;  %v14632_v63 = vsub.f32 %v14631_v57, %v14578_v7  ;;  %v14634_v12 = vsub.f32 %v14633_v48, %v14578_v7 }
 0x470   : > { %v4143_v33 = vmul.f32 %v14029_v52, %v3868_v1  ;;  %v4420_v60 = vadd.f32 %v14031_v56, %v4145_v49  ;;  %v4421_v14 = vadd.f32 %v14032_v18, %v4146_v0  ;;  %v2952_v35 = vsel %vm2951_vm0, %v12035_v8, %v2950_v4  ;;  %v5377_v49 = vpop.eup %5376 }
 0x471   : > { %v3874_v20 = vmul.f32 %v5373_v50, %v14632_v63  ;;  %v3875_v1 = vmul.f32 %v5373_v50, %v14634_v12  ;;  %v4419_v24 = vadd.f32 %v14032_v18, %v4144_v58  ;;  %v2943_v25 = vmul.f32 %v5375_v21, %v12060_v42  ;;  %v14635_v58 = vld [vmem:[#allocation443_spill] sm:$0xff] }
 0x472   : > { %v4418_v6 = vadd.f32 %v14031_v56, %v4143_v33  ;;  %4684 = vst [vmem:[%s9394_s23 + $0x650] sm:$0xff] %v4420_v60  ;;  %4685 = vst [vmem:[%s9394_s23 + $0x658] sm:$0xff] %v4421_v14  ;;  %v2955_v12 = vsel %vm2953_vm1, %v2954_v62, %v2952_v35  ;;  %5384 = vrsqrt.f32 %v12140_v40  ;;  %v2964_v4 = vmul.f32 %v5377_v49, %v12075_v43  ;;  %v1499_v60 = vpop.xlane.xlu1 %1498 }
 0x473   : > { %v4149_v0 = vmul.f32 %v14029_v52, %v3874_v20  ;;  %v4150_v57 = vmul.f32 %v14030_v17, %v3875_v1  ;;  %4683 = vst [vmem:[%s9394_s23 + $0x648] sm:$0xff] %v4419_v24  ;;  %v3243_v48 = vadd.f32 1e-10, %v2955_v12  ;;  %v2945_v7 = vsel %vm2944_vm2, %v12060_v42, %v2943_v25  ;;  %v5379_v14 = vpop.eup %5378 }
 0x474   : > { %4682 = vst [vmem:[%s9394_s23 + $0x640] sm:$0xff] %v4418_v6  ;;  %v2968_v50 = vand.u32 2147483648, %v12075_v43  ;;  %v2948_v62 = vsel %vm2946_vm3, %v2947_v28, %v2945_v7  ;;  %v1928_v21 = vmul.f32 %v14635_v58, %v14635_v58  ;;  %v2966_v20 = vsel %vm2965_vm4, %v12075_v43, %v2964_v4  ;;  %v14637_v7 = vld [vmem:[#allocation428_spill] sm:$0xff] }
 0x475   : > { %v4424_v33 = vadd.f32 %v14031_v56, %v4149_v0  ;;  %v4425_v8 = vadd.f32 %v14032_v18, %v4150_v57  ;;  %5386 = vrcp.f32 %v3243_v48  ;;  %v3242_v63 = vadd.f32 1e-10, %v2948_v62  ;;  %v14636_v0 = vld [vmem:[#allocation445_spill] sm:$0xff] }
 0x476   : > { %vm2958_vm6 = vcmp.eq.f32.partialorder %v12097_v2, inf  ;;  %v2969_v1 = vsel %vm2967_vm5, %v2968_v50, %v2966_v20  ;;  %v2957_v42 = vmul.f32 %v5379_v14, %v12097_v2  ;;  %v12185_v28 = vmax.f32 %v2061_v15, 0.0  ;;  %v1496_v15 = vpop.xlane.xlu0 %1495 }
 0x477   : > { %4688 = vst [vmem:[%s9394_s23 + $0x670] sm:$0xff] %v4424_v33  ;;  %4689 = vst [vmem:[%s9394_s23 + $0x678] sm:$0xff] %v4425_v8  ;;  %v2060_v6 = vsub.f32 %v1796_v36, %v1928_v21  ;;  %5388 = vrcp.f32 %v3242_v63  ;;  %v3245_v24 = vadd.f32 1e-10, %v2969_v1  ;;  %v2961_v35 = vand.u32 2147483648, %v12097_v2  ;;  %v14639_v33 = vld [vmem:[#allocation430_spill] sm:$0xff]  ;;  %v1505_v63 = vpop.xlane.xlu1 %1504 }
 0x478   : > { %v1799_v25 = vmul.f32 0.00390625, %v1499_v60  ;;  %v2959_v49 = vsel %vm2958_vm6, %v12097_v2, %v2957_v42  ;;  %vm2960_vm7 = vcmp.eq.f32.partialorder %v12097_v2, 0.0  ;;  %5390 = vrsqrt.f32 %v12185_v28  ;;  %v5381_v57 = vpop.eup %5380  ;;  %v14641_v42 = vld [vmem:[#allocation451_spill] sm:$0xff] }
 0x479   : > { %v1931_v43 = vmul.f32 %v14636_v0, %v14636_v0  ;;  %5392 = vrcp.f32 %v3245_v24  ;;  %v2962_v12 = vsel %vm2960_vm7, %v2961_v35, %v2959_v49  ;;  %vm2979_vm8 = vcmp.eq.f32.partialorder %v12112_v53, inf  ;;  %v5383_v48 = vpop.eup %5382 }
 0x47a   : > { %v12194_v36 = vmax.f32 %v2060_v6, 0.0  ;;  %v14638_v4 = vsub.f32 %v14637_v7, %v14591_v44  ;;  %v14640_v2 = vsub.f32 %v14639_v33, %v14591_v44  ;;  %v3244_v62 = vadd.f32 1e-10, %v2962_v12 }
 0x47b   : > { %v2063_v21 = vsub.f32 %v1799_v25, %v1931_v43  ;;  %v2978_v60 = vmul.f32 %v5383_v48, %v12112_v53  ;;  %vm2981_vm9 = vcmp.eq.f32.partialorder %v12112_v53, 0.0  ;;  %v2982_v14 = vand.u32 2147483648, %v12112_v53  ;;  %v14642_v25 = vld [vmem:[#allocation325_spill] sm:$0xff] }
 0x47c   : > { %v3872_v50 = vmul.f32 %v5381_v57, %v14638_v4  ;;  %v3873_v8 = vmul.f32 %v5381_v57, %v14640_v2  ;;  %5394 = vrsqrt.f32 %v12194_v36  ;;  %v1930_v44 = vmul.f32 %v14641_v42, %v14641_v42 }
 0x47d   : > { %5396 = vrcp.f32 %v3244_v62  ;;  %v2980_v6 = vsel %vm2979_vm8, %v12112_v53, %v2978_v60  ;;  %v12213_v24 = vmax.f32 %v2063_v21, 0.0  ;;  %v1798_v35 = vmul.f32 0.00390625, %v1496_v15  ;;  %v1502_v53 = vpop.xlane.xlu0 %1501 }
 0x47e   : > { %v4147_v20 = vmul.f32 %v14029_v52, %v3872_v50  ;;  %v4148_v1 = vmul.f32 %v14030_v17, %v3873_v8  ;;  %v1933_v49 = vmul.f32 %v14642_v25, %v14642_v25  ;;  %v2983_v12 = vsel %vm2981_vm9, %v2982_v14, %v2980_v6 }
 0x47f   : > { %v1801_v48 = vmul.f32 0.00390625, %v1505_v63  ;;  %v5385_v7 = vpop.eup %5384  ;;  %v3247_v4 = vadd.f32 1e-10, %v2983_v12  ;;  %vm2972_vm10 = vcmp.eq.f32.partialorder %v12140_v40, inf  ;;  %vm2974_vm11 = vcmp.eq.f32.partialorder %v12140_v40, 0.0  ;;  %v14643_v63 = vld [vmem:[#allocation431_spill] sm:$0xff] }
 0x480   : > { %v4422_v43 = vadd.f32 %v14031_v56, %v4147_v20  ;;  %v4423_v57 = vadd.f32 %v14032_v18, %v4148_v1  ;;  %5398 = vrsqrt.f32 %v12213_v24  ;;  %v2971_v15 = vmul.f32 %v5385_v7, %v12140_v40 }
 0x481   : > { %v2975_v50 = vand.u32 2147483648, %v12140_v40  ;;  %v2062_v33 = vsub.f32 %v1798_v35, %v1930_v44  ;;  %v2065_v2 = vsub.f32 %v1801_v48, %v1933_v49  ;;  %5400 = vrcp.f32 %v3247_v4  ;;  %v14645_v44 = vld [vmem:[#allocation432_spill] sm:$0xff]  ;;  %v14647_v4 = vld [vmem:[#allocation63_spill] sm:$0xff] }
 0x482   : > { %4686 = vst [vmem:[%s9394_s23 + $0x660] sm:$0xff] %v4422_v43  ;;  %4687 = vst [vmem:[%s9394_s23 + $0x668] sm:$0xff] %v4423_v57  ;;  %vm2993_vm12 = vcmp.eq.f32.partialorder %v12185_v28, inf  ;;  %vm2995_vm13 = vcmp.eq.f32.partialorder %v12185_v28, 0.0  ;;  %v2996_v8 = vand.u32 2147483648, %v12185_v28  ;;  %v5387_v62 = vpop.eup %5386  ;;  %v2973_v21 = vsel %vm2972_vm10, %v12140_v40, %v2971_v15  ;;  %v1511_v57 = vpop.xlane.xlu1 %1510 }
 0x483   : > { %vm2986_vm14 = vcmp.eq.f32.partialorder %v12194_v36, inf  ;;  %v12231_v60 = vmax.f32 %v2062_v33, 0.0  ;;  %v1800_v14 = vmul.f32 0.00390625, %v1502_v53  ;;  %v14644_v20 = vsub.f32 %v14643_v63, %v14592_v5 }
 0x484   : > { %v14646_v6 = vsub.f32 %v14645_v44, %v14592_v5  ;;  %v2976_v49 = vsel %vm2974_vm11, %v2975_v50, %v2973_v21  ;;  %v2989_v43 = vand.u32 2147483648, %v12194_v36  ;;  %v5389_v12 = vpop.eup %5388  ;;  %vm2988_vm15 = vcmp.eq.f32.partialorder %v12194_v36, 0.0  ;;  %v14648_v50 = vld [vmem:[#allocation434_spill] sm:$0xff]  ;;  %v14650_v21 = vld [vmem:[#allocation435_spill] sm:$0xff] }
 0x485   : > { %v3878_v1 = vmul.f32 %v5387_v62, %v14644_v20  ;;  %v3246_v48 = vadd.f32 1e-10, %v2976_v49  ;;  %5402 = vrsqrt.f32 %v12231_v60  ;;  %v12244_v7 = vmax.f32 %v2065_v2, 0.0  ;;  %v5391_v15 = vpop.eup %5390 }
 0x486   : > { %v3879_v35 = vmul.f32 %v5387_v62, %v14646_v6  ;;  %v1932_v53 = vmul.f32 %v14647_v4, %v14647_v4  ;;  %v14649_v33 = vsub.f32 %v14648_v50, %v14593_v9  ;;  %v14651_v63 = vsub.f32 %v14650_v21, %v14593_v9  ;;  %v5393_v44 = vpop.eup %5392  ;;  %v14654_v21 = vld [vmem:[#allocation438_spill] sm:$0xff] }
 0x487   : > { %v4153_v5 = vmul.f32 %v14029_v52, %v3878_v1  ;;  %5404 = vrcp.f32 %v3246_v48  ;;  %v2992_v2 = vmul.f32 %v5391_v15, %v12185_v28  ;;  %vm3007_vm0 = vcmp.eq.f32.partialorder %v12213_v24, inf  ;;  %v14652_v48 = vld [vmem:[#allocation437_spill] sm:$0xff] }
 0x488   : > { %v4154_v40 = vmul.f32 %v14030_v17, %v3879_v35  ;;  %v3876_v62 = vmul.f32 %v5389_v12, %v14649_v33  ;;  %v3877_v20 = vmul.f32 %v5389_v12, %v14651_v63  ;;  %v2064_v6 = vsub.f32 %v1800_v14, %v1932_v53 }
 0x489   : > { %v12258_v1 = vmul.f32 0.00390625, %v1511_v57  ;;  %v4428_v35 = vadd.f32 %v14031_v56, %v4153_v5  ;;  %vm3009_vm1 = vcmp.eq.f32.partialorder %v12213_v24, 0.0  ;;  %v5395_v12 = vpop.eup %5394  ;;  %v14653_v15 = vsub.f32 %v14652_v48, %v14606_v3  ;;  %v14656_v48 = vld [vmem:[#allocation439_spill] sm:$0xff] }
 0x48a   : > { %v4429_v49 = vadd.f32 %v14032_v18, %v4154_v40  ;;  %v4151_v50 = vmul.f32 %v14029_v52, %v3876_v62  ;;  %v4152_v9 = vmul.f32 %v14030_v17, %v3877_v20  ;;  %v14655_v14 = vsub.f32 %v14654_v21, %v14606_v3  ;;  %v5397_v5 = vpop.eup %5396  ;;  %v14658_v21 = vld [vmem:[#allocation198_spill] sm:$0xff] }
 0x48b   : > { %v3882_v33 = vmul.f32 %v5393_v44, %v14653_v15  ;;  %v2994_v53 = vsel %vm2993_vm12, %v12185_v28, %v2992_v2  ;;  %5406 = vrsqrt.f32 %v12244_v7  ;;  %4692 = vst [vmem:[%s9394_s23 + $0x690] sm:$0xff] %v4428_v35  ;;  %v2985_v3 = vmul.f32 %v5395_v12, %v12194_v36 }
 0x48c   : > { %v3883_v57 = vmul.f32 %v5393_v44, %v14655_v14  ;;  %4693 = vst [vmem:[%s9394_s23 + $0x698] sm:$0xff] %v4429_v49  ;;  %v4426_v40 = vadd.f32 %v14031_v56, %v4151_v50  ;;  %v4427_v62 = vadd.f32 %v14032_v18, %v4152_v9  ;;  %v2997_v63 = vsel %vm2995_vm13, %v2996_v8, %v2994_v53  ;;  %v14660_v9 = vld [vmem:[#allocation184_spill] sm:$0xff] }
 0x48d   : > { %v4157_v20 = vmul.f32 %v14029_v52, %v3882_v33  ;;  %v14657_v2 = vsub.f32 %v14656_v48, %v14613_v31  ;;  %v14659_v35 = vsub.f32 %v14658_v21, %v14613_v31  ;;  %v3249_v28 = vadd.f32 1e-10, %v2997_v63  ;;  %v5399_v33 = vpop.eup %5398  ;;  %v14663_v21 = vld [vmem:[#allocation444_spill] sm:$0xff] }
 0x48e   : > { %v4158_v44 = vmul.f32 %v14030_v17, %v3883_v57  ;;  %4690 = vst [vmem:[%s9394_s23 + $0x680] sm:$0xff] %v4426_v40  ;;  %4691 = vst [vmem:[%s9394_s23 + $0x688] sm:$0xff] %v4427_v62  ;;  %v2987_v8 = vsel %vm2986_vm14, %v12194_v36, %v2985_v3  ;;  %v3010_v50 = vand.u32 2147483648, %v12213_v24  ;;  %v1935_v12 = vmul.f32 %v14660_v9, %v14660_v9  ;;  %v5401_v63 = vpop.eup %5400 }
 0x48f   : > { %v3880_v15 = vmul.f32 %v5397_v5, %v14657_v2  ;;  %v3881_v49 = vmul.f32 %v5397_v5, %v14659_v35  ;;  %v4432_v14 = vadd.f32 %v14031_v56, %v4157_v20  ;;  %5408 = vrcp.f32 %v3249_v28  ;;  %v1508_v2 = vpop.xlane.xlu0 %1507 }
 0x490   : > { %v4433_v31 = vadd.f32 %v14032_v18, %v4158_v44  ;;  %v2990_v5 = vsel %vm2988_vm15, %v2989_v43, %v2987_v8  ;;  %v3006_v40 = vmul.f32 %v5399_v33, %v12213_v24  ;;  %v12305_v62 = vmax.f32 %v2064_v6, 0.0 }
 0x491   : > { %v4155_v57 = vmul.f32 %v14029_v52, %v3880_v15  ;;  %v4156_v53 = vmul.f32 %v14030_v17, %v3881_v49  ;;  %4696 = vst [vmem:[%s9394_s23 + $0x6b0] sm:$0xff] %v4432_v14  ;;  %v3248_v44 = vadd.f32 1e-10, %v2990_v5  ;;  %v2067_v48 = vsub.f32 %v12258_v1, %v1935_v12  ;;  %v14661_v15 = vld [vmem:[#allocation442_spill] sm:$0xff]  ;;  %v14665_v5 = vld [vmem:[#allocation315_spill] sm:$0xff] }
 0x492   : > { %4697 = vst [vmem:[%s9394_s23 + $0x6b8] sm:$0xff] %v4433_v31  ;;  %v14662_v36 = vsub.f32 %v14661_v15, %v14620_v37  ;;  %v14664_v35 = vsub.f32 %v14663_v21, %v14620_v37  ;;  %v3008_v49 = vsel %vm3007_vm0, %v12213_v24, %v3006_v40  ;;  %5410 = vrsqrt.f32 %v12305_v62  ;;  %v5403_v28 = vpop.eup %5402  ;;  %v1517_v15 = vpop.xlane.xlu1 %1516 }
 0x493   : > { %v4430_v3 = vadd.f32 %v14031_v56, %v4155_v57  ;;  %v4431_v20 = vadd.f32 %v14032_v18, %v4156_v53  ;;  %5412 = vrcp.f32 %v3248_v44  ;;  %v3011_v1 = vsel %vm3009_vm1, %v3010_v50, %v3008_v49 }
 0x494   : > { %v3886_v43 = vmul.f32 %v5401_v63, %v14662_v36  ;;  %v3887_v6 = vmul.f32 %v5401_v63, %v14664_v35  ;;  %vm3000_vm2 = vcmp.eq.f32.partialorder %v12231_v60, inf  ;;  %vm3002_vm3 = vcmp.eq.f32.partialorder %v12231_v60, 0.0  ;;  %v5405_v50 = vpop.eup %5404  ;;  %v1514_v36 = vpop.xlane.xlu0 %1513  ;;  %v14669_v35 = vld [vmem:[#allocation85_spill] sm:$0xff] }
 0x495   : > { %4694 = vst [vmem:[%s9394_s23 + $0x6a0] sm:$0xff] %v4430_v3  ;;  %4695 = vst [vmem:[%s9394_s23 + $0x6a8] sm:$0xff] %v4431_v20  ;;  %v3251_v12 = vadd.f32 1e-10, %v3011_v1  ;;  %v3003_v33 = vand.u32 2147483648, %v12231_v60  ;;  %v2999_v14 = vmul.f32 %v5403_v28, %v12231_v60  ;;  %vm3021_vm4 = vcmp.eq.f32.partialorder %v12244_v7, inf }
 0x496   : > { %v4161_v37 = vmul.f32 %v14029_v52, %v3886_v43  ;;  %v4162_v8 = vmul.f32 %v14030_v17, %v3887_v6  ;;  %vm3023_vm5 = vcmp.eq.f32.partialorder %v12244_v7, 0.0  ;;  %v12334_v24 = vmax.f32 %v2067_v48, 0.0  ;;  %v14667_v3 = vld [vmem:[#allocation446_spill] sm:$0xff]  ;;  %v14670_v6 = vld [vmem:[#allocation367_spill] sm:$0xff] }
 0x497   : > { %5414 = vrcp.f32 %v3251_v12  ;;  %v1802_v53 = vmul.f32 0.00390625, %v1508_v2  ;;  %v14666_v40 = vsub.f32 %v14665_v5, %v14621_v46  ;;  %v14668_v20 = vsub.f32 %v14667_v3, %v14621_v46 }
 0x498   : > { %v4436_v31 = vadd.f32 %v14031_v56, %v4161_v37  ;;  %v4437_v57 = vadd.f32 %v14032_v18, %v4162_v8  ;;  %v3001_v48 = vsel %vm3000_vm2, %v12231_v60, %v2999_v14  ;;  %5416 = vrsqrt.f32 %v12334_v24  ;;  %v5407_v43 = vpop.eup %5406 }
 0x499   : > { %v3884_v63 = vmul.f32 %v5405_v50, %v14666_v40  ;;  %v3885_v44 = vmul.f32 %v5405_v50, %v14668_v20  ;;  %v3004_v2 = vsel %vm3002_vm3, %v3003_v33, %v3001_v48  ;;  %v3024_v21 = vand.u32 2147483648, %v12244_v7  ;;  %v14671_v20 = vld [vmem:[#allocation307_spill] sm:$0xff] }
 0x49a   : > { %4700 = vst [vmem:[%s9394_s23 + $0x6d0] sm:$0xff] %v4436_v31  ;;  %4701 = vst [vmem:[%s9394_s23 + $0x6d8] sm:$0xff] %v4437_v57  ;;  %v1934_v46 = vmul.f32 %v14669_v35, %v14669_v35  ;;  %v1937_v49 = vmul.f32 %v14670_v6, %v14670_v6  ;;  %v3250_v37 = vadd.f32 1e-10, %v3004_v2  ;;  %v3020_v8 = vmul.f32 %v5407_v43, %v12244_v7  ;;  %v14674_v43 = vld [vmem:[#allocation447_spill] sm:$0xff] }
 0x49b   : > { %v4159_v1 = vmul.f32 %v14029_v52, %v3884_v63  ;;  %v4160_v28 = vmul.f32 %v14030_v17, %v3885_v44  ;;  %v1805_v60 = vmul.f32 0.00390625, %v1517_v15  ;;  %v1936_v33 = vmul.f32 %v10237_v22, %v10237_v22  ;;  %v14672_v15 = vld [vmem:[#allocation323_spill] sm:$0xff] }
 0x49c   : > { %v2066_v12 = vsub.f32 %v1802_v53, %v1934_v46  ;;  %v1804_v14 = vmul.f32 0.00390625, %v1514_v36  ;;  %5418 = vrcp.f32 %v3250_v37  ;;  %v3022_v57 = vsel %vm3021_vm4, %v12244_v7, %v3020_v8  ;;  %v5409_v3 = vpop.eup %5408 }
 0x49d   : > { %v4434_v50 = vadd.f32 %v14031_v56, %v4159_v1  ;;  %v4435_v31 = vadd.f32 %v14032_v18, %v4160_v28  ;;  %v3025_v5 = vsel %vm3023_vm5, %v3024_v21, %v3022_v57  ;;  %v2069_v53 = vsub.f32 %v1805_v60, %v1937_v49  ;;  %v1523_v60 = vpop.xlane.xlu1 %1522 }
 0x49e   : > { %v12369_v40 = vmax.f32 %v2066_v12, 0.0  ;;  %v2068_v63 = vsub.f32 %v1804_v14, %v1936_v33  ;;  %v12372_v44 = vmul.f32 0.00390625, %v14671_v20  ;;  %v3253_v48 = vadd.f32 1e-10, %v3025_v5  ;;  %v14676_v33 = vld [vmem:[#allocation448_spill] sm:$0xff] }
 0x49f   : > { %4698 = vst [vmem:[%s9394_s23 + $0x6c0] sm:$0xff] %v4434_v50  ;;  %4699 = vst [vmem:[%s9394_s23 + $0x6c8] sm:$0xff] %v4435_v31  ;;  %vm3014_vm6 = vcmp.eq.f32.partialorder %v12305_v62, inf  ;;  %vm3016_vm7 = vcmp.eq.f32.partialorder %v12305_v62, 0.0  ;;  %v14673_v36 = vsub.f32 %v14672_v15, %v14630_v19  ;;  %v14675_v2 = vsub.f32 %v14674_v43, %v14630_v19  ;;  %v5411_v49 = vpop.eup %5410  ;;  %v14678_v31 = vld [vmem:[#allocation449_spill] sm:$0xff] }
 0x4a0   : > { %v3017_v46 = vand.u32 2147483648, %v12305_v62  ;;  %5420 = vrsqrt.f32 %v12369_v40  ;;  %vm3035_vm8 = vcmp.eq.f32.partialorder %v12334_v24, inf  ;;  %vm3037_vm9 = vcmp.eq.f32.partialorder %v12334_v24, 0.0  ;;  %v5413_v28 = vpop.eup %5412 }
 0x4a1   : > { %v3890_v7 = vmul.f32 %v5409_v3, %v14673_v36  ;;  %v3891_v21 = vmul.f32 %v5409_v3, %v14675_v2  ;;  %5422 = vrcp.f32 %v3253_v48  ;;  %v12388_v1 = vmax.f32 %v2069_v53, 0.0  ;;  %v1520_v3 = vpop.xlane.xlu0 %1519 }
 0x4a2   : > { %v3013_v19 = vmul.f32 %v5411_v49, %v12305_v62  ;;  %v12393_v12 = vmax.f32 %v2068_v63, 0.0  ;;  %v14677_v14 = vsub.f32 %v14676_v33, %v14635_v58  ;;  %v14679_v57 = vsub.f32 %v14678_v31, %v14635_v58  ;;  %v14680_v49 = vld [vmem:[#allocation450_spill] sm:$0xff] }
 0x4a3   : > { %v4165_v37 = vmul.f32 %v14029_v52, %v3890_v7  ;;  %v4166_v8 = vmul.f32 %v14030_v17, %v3891_v21  ;;  %v3038_v53 = vand.u32 2147483648, %v12334_v24  ;;  %5424 = vrsqrt.f32 %v12388_v1 }
 0x4a4   : > { %v3888_v50 = vmul.f32 %v5413_v28, %v14677_v14  ;;  %v3889_v5 = vmul.f32 %v5413_v28, %v14679_v57  ;;  %v3015_v48 = vsel %vm3014_vm6, %v12305_v62, %v3013_v19  ;;  %v1939_v15 = vmul.f32 %v10259_v59, %v10259_v59  ;;  %v5415_v36 = vpop.eup %5414 }
 0x4a5   : > { %v4440_v20 = vadd.f32 %v14031_v56, %v4165_v37  ;;  %v4441_v63 = vadd.f32 %v14032_v18, %v4166_v8  ;;  %v3018_v43 = vsel %vm3016_vm7, %v3017_v46, %v3015_v48  ;;  %v1807_v2 = vmul.f32 0.00390625, %v1523_v60  ;;  %v5417_v21 = vpop.eup %5416  ;;  %v14682_v8 = vld [vmem:[#allocation68_spill] sm:$0xff]  ;;  %v1526_v48 = vpop.xlane.xlu0 %1525 }
 0x4a6   : > { %v4163_v58 = vmul.f32 %v14029_v52, %v3888_v50  ;;  %v4164_v7 = vmul.f32 %v14030_v17, %v3889_v5  ;;  %v14681_v28 = vsub.f32 %v14680_v49, %v14636_v0  ;;  %v14683_v19 = vsub.f32 %v14682_v8, %v14636_v0  ;;  %v14684_v49 = vld [vmem:[#allocation329_spill] sm:$0xff] }
 0x4a7   : > { %4704 = vst [vmem:[%s9394_s23 + $0x6f0] sm:$0xff] %v4440_v20  ;;  %4705 = vst [vmem:[%s9394_s23 + $0x6f8] sm:$0xff] %v4441_v63  ;;  %v3252_v14 = vadd.f32 1e-10, %v3018_v43  ;;  %5426 = vrsqrt.f32 %v12393_v12  ;;  %v3034_v60 = vmul.f32 %v5417_v21, %v12334_v24  ;;  %v1938_v50 = vmul.f32 %v10342_v47, %v10342_v47  ;;  %v1529_v63 = vpop.xlane.xlu1 %1528  ;;  %v14686_v8 = vld [vmem:[#allocation69_spill] sm:$0xff] }
 0x4a8   : > { %v3894_v37 = vmul.f32 %v5415_v36, %v14681_v28  ;;  %v3895_v33 = vmul.f32 %v5415_v36, %v14683_v19  ;;  %v4438_v62 = vadd.f32 %v14031_v56, %v4163_v58  ;;  %v4439_v46 = vadd.f32 %v14032_v18, %v4164_v7 }
 0x4a9   : > { %5428 = vrcp.f32 %v3252_v14  ;;  %vm3028_vm10 = vcmp.eq.f32.partialorder %v12369_v40, inf  ;;  %v3036_v0 = vsel %vm3035_vm8, %v12334_v24, %v3034_v60  ;;  %vm3030_vm11 = vcmp.eq.f32.partialorder %v12369_v40, 0.0  ;;  %v5419_v36 = vpop.eup %5418 }
 0x4aa   : > { %v4169_v31 = vmul.f32 %v14029_v52, %v3894_v37  ;;  %v4170_v57 = vmul.f32 %v14030_v17, %v3895_v33  ;;  %4702 = vst [vmem:[%s9394_s23 + $0x6e0] sm:$0xff] %v4438_v62  ;;  %4703 = vst [vmem:[%s9394_s23 + $0x6e8] sm:$0xff] %v4439_v46  ;;  %v2071_v5 = vsub.f32 %v1807_v2, %v1939_v15  ;;  %v1806_v20 = vmul.f32 0.00390625, %v1520_v3 }
 0x4ab   : > { %v3039_v43 = vsel %vm3037_vm9, %v3038_v53, %v3036_v0  ;;  %v3031_v21 = vand.u32 2147483648, %v12369_v40  ;;  %v14685_v28 = vsub.f32 %v14684_v49, %v14641_v42  ;;  %v14687_v15 = vsub.f32 %v14686_v8, %v14641_v42 }
 0x4ac   : > { %v4444_v58 = vadd.f32 %v14031_v56, %v4169_v31  ;;  %v4445_v7 = vadd.f32 %v14032_v18, %v4170_v57  ;;  %v3255_v2 = vadd.f32 1e-10, %v3039_v43  ;;  %v12448_v19 = vmax.f32 %v2071_v5, 0.0  ;;  %v14688_v5 = vld [vmem:[#allocation60_spill] sm:$0xff] }
 0x4ad   : > { %v3892_v37 = vmul.f32 %v5419_v36, %v14685_v28  ;;  %v3893_v3 = vmul.f32 %v5419_v36, %v14687_v15  ;;  %vm3049_vm12 = vcmp.eq.f32.partialorder %v12388_v1, inf  ;;  %v2070_v33 = vsub.f32 %v1806_v20, %v1938_v50  ;;  %v5421_v14 = vpop.eup %5420 }
 0x4ae   : > { %4708 = vst [vmem:[%s9394_s23 + $0x710] sm:$0xff] %v4444_v58  ;;  %4709 = vst [vmem:[%s9394_s23 + $0x718] sm:$0xff] %v4445_v7  ;;  %v1809_v24 = vmul.f32 0.00390625, %v1529_v63  ;;  %v1808_v53 = vmul.f32 0.00390625, %v1526_v48  ;;  %5430 = vrcp.f32 %v3255_v2  ;;  %vm3051_vm13 = vcmp.eq.f32.partialorder %v12388_v1, 0.0  ;;  %v5423_v42 = vpop.eup %5422  ;;  %v14690_v48 = vld [vmem:[#allocation76_spill] sm:$0xff] }
 0x4af   : > { %v4167_v62 = vmul.f32 %v14029_v52, %v3892_v37  ;;  %v4168_v46 = vmul.f32 %v14030_v17, %v3893_v3  ;;  %v3027_v60 = vmul.f32 %v5421_v14, %v12369_v40  ;;  %5432 = vrsqrt.f32 %v12448_v19 }
 0x4b0   : > { %v1941_v50 = vmul.f32 %v11722_v45, %v11722_v45  ;;  %v1940_v31 = vmul.f32 %v11725_v16, %v11725_v16  ;;  %v14689_v20 = vsub.f32 %v14688_v5, %v14642_v25  ;;  %v14691_v36 = vsub.f32 %v14690_v48, %v14642_v25  ;;  %v5425_v7 = vpop.eup %5424  ;;  %v14692_v5 = vld [vmem:[#allocation79_spill] sm:$0xff]  ;;  %v14694_v48 = vld [vmem:[#allocation84_spill] sm:$0xff] }
 0x4b1   : > { %v4442_v57 = vadd.f32 %v14031_v56, %v4167_v62  ;;  %v4443_v0 = vadd.f32 %v14032_v18, %v4168_v46  ;;  %v3029_v43 = vsel %vm3028_vm10, %v12369_v40, %v3027_v60  ;;  %v12473_v49 = vmax.f32 %v2070_v33, 0.0  ;;  %v1535_v33 = vpop.xlane.xlu1 %1534 }
 0x4b2   : > { %v3898_v63 = vmul.f32 %v5423_v42, %v14689_v20  ;;  %v3899_v58 = vmul.f32 %v5423_v42, %v14691_v36  ;;  %v2073_v28 = vsub.f32 %v1809_v24, %v1941_v50  ;;  %v2072_v37 = vsub.f32 %v1808_v53, %v1940_v31 }
 0x4b3   : > { %4706 = vst [vmem:[%s9394_s23 + $0x700] sm:$0xff] %v4442_v57  ;;  %4707 = vst [vmem:[%s9394_s23 + $0x708] sm:$0xff] %v4443_v0  ;;  %v3032_v3 = vsel %vm3030_vm11, %v3031_v21, %v3029_v43  ;;  %v3048_v25 = vmul.f32 %v5425_v7, %v12388_v1  ;;  %v3052_v14 = vand.u32 2147483648, %v12388_v1  ;;  %vm3042_vm14 = vcmp.eq.f32.partialorder %v12393_v12, inf  ;;  %v14696_v7 = vld [vmem:[#allocation433_spill] sm:$0xff] }
 0x4b4   : > { %v4173_v8 = vmul.f32 %v14029_v52, %v3898_v63  ;;  %v4174_v15 = vmul.f32 %v14030_v17, %v3899_v58  ;;  %v3254_v2 = vadd.f32 1e-10, %v3032_v3  ;;  %5434 = vrsqrt.f32 %v12473_v49  ;;  %v5427_v24 = vpop.eup %5426  ;;  %v1532_v3 = vpop.xlane.xlu0 %1531 }
 0x4b5   : > { %v3050_v40 = vsel %vm3049_vm12, %v12388_v1, %v3048_v25  ;;  %vm3044_vm15 = vcmp.eq.f32.partialorder %v12393_v12, 0.0  ;;  %v3041_v46 = vmul.f32 %v5427_v24, %v12393_v12  ;;  %v12494_v42 = vmax.f32 %v2073_v28, 0.0  ;;  %v1541_v24 = vpop.xlane.xlu1 %1540 }
 0x4b6   : > { %v4448_v53 = vadd.f32 %v14031_v56, %v4173_v8  ;;  %v4449_v62 = vadd.f32 %v14032_v18, %v4174_v15  ;;  %5436 = vrcp.f32 %v3254_v2  ;;  %v3053_v21 = vsel %vm3051_vm13, %v3052_v14, %v3050_v40  ;;  %v5429_v60 = vpop.eup %5428 }
 0x4b7   : > { %v3257_v50 = vadd.f32 1e-10, %v3053_v21  ;;  %v3045_v31 = vand.u32 2147483648, %v12393_v12  ;;  %v12499_v57 = vmax.f32 %v2072_v37, 0.0  ;;  %v1811_v0 = vmul.f32 0.00390625, %v1535_v33 }
 0x4b8   : > { %4712 = vst [vmem:[%s9394_s23 + $0x730] sm:$0xff] %v4448_v53  ;;  %4713 = vst [vmem:[%s9394_s23 + $0x738] sm:$0xff] %v4449_v62  ;;  %v14693_v20 = vsub.f32 %v14692_v5, %v14647_v4  ;;  %v14695_v1 = vsub.f32 %v14694_v48, %v14647_v4  ;;  %v3043_v58 = vsel %vm3042_vm14, %v12393_v12, %v3041_v46  ;;  %5438 = vrsqrt.f32 %v12494_v42  ;;  %v14697_v62 = vld [vmem:[#allocation351_spill] sm:$0xff]  ;;  %v14699_v46 = vld [vmem:[#allocation352_spill] sm:$0xff] }
 0x4b9   : > { %v12512_v43 = vmul.f32 0.00390625, %v14696_v7  ;;  %5440 = vrcp.f32 %v3257_v50  ;;  %v3046_v28 = vsel %vm3044_vm15, %v3045_v31, %v3043_v58  ;;  %vm3063_vm0 = vcmp.eq.f32.partialorder %v12448_v19, inf }
 0x4ba   : > { %v3896_v63 = vmul.f32 %v5429_v60, %v14693_v20  ;;  %v3897_v36 = vmul.f32 %v5429_v60, %v14695_v1  ;;  %v3256_v8 = vadd.f32 1e-10, %v3046_v28  ;;  %v1943_v15 = vmul.f32 %v12065_v29, %v12065_v29 }
 0x4bb   : > { %vm3065_vm1 = vcmp.eq.f32.partialorder %v12448_v19, 0.0  ;;  %v3066_v25 = vand.u32 2147483648, %v12448_v19  ;;  %vm3056_vm2 = vcmp.eq.f32.partialorder %v12473_v49, inf  ;;  %5442 = vrsqrt.f32 %v12499_v57  ;;  %v5431_v12 = vpop.eup %5430 }
 0x4bc   : > { %v4171_v37 = vmul.f32 %v14029_v52, %v3896_v63  ;;  %v4172_v4 = vmul.f32 %v14030_v17, %v3897_v36  ;;  %5444 = vrcp.f32 %v3256_v8  ;;  %v2075_v33 = vsub.f32 %v1811_v0, %v1943_v15  ;;  %v5433_v53 = vpop.eup %5432 }
 0x4bd   : > { %v14698_v40 = vsub.f32 %v14697_v62, %v14660_v9  ;;  %v14700_v60 = vsub.f32 %v14699_v46, %v14660_v9  ;;  %v1942_v31 = vmul.f32 %v12068_v26, %v12068_v26  ;;  %v1810_v5 = vmul.f32 0.00390625, %v1532_v3 }
 0x4be   : > { %v4446_v2 = vadd.f32 %v14031_v56, %v4171_v37  ;;  %v4447_v14 = vadd.f32 %v14032_v18, %v4172_v4  ;;  %v3062_v20 = vmul.f32 %v5433_v53, %v12448_v19  ;;  %vm3058_vm3 = vcmp.eq.f32.partialorder %v12473_v49, 0.0 }
 0x4bf   : > { %v3902_v21 = vmul.f32 %v5431_v12, %v14698_v40  ;;  %v3903_v50 = vmul.f32 %v5431_v12, %v14700_v60  ;;  %v3059_v0 = vand.u32 2147483648, %v12473_v49  ;;  %v12540_v63 = vmax.f32 %v2075_v33, 0.0  ;;  %v14703_v40 = vld [vmem:[#allocation95_spill] sm:$0xff] }
 0x4c0   : > { %4710 = vst [vmem:[%s9394_s23 + $0x720] sm:$0xff] %v4446_v2  ;;  %4711 = vst [vmem:[%s9394_s23 + $0x728] sm:$0xff] %v4447_v14  ;;  %v2074_v9 = vsub.f32 %v1810_v5, %v1942_v31  ;;  %v1813_v36 = vmul.f32 0.00390625, %v1541_v24  ;;  %v3064_v58 = vsel %vm3063_vm0, %v12448_v19, %v3062_v20  ;;  %vm3077_vm4 = vcmp.eq.f32.partialorder %v12494_v42, inf  ;;  %v1538_v14 = vpop.xlane.xlu0 %1537  ;;  %v14701_v24 = vld [vmem:[#allocation92_spill] sm:$0xff] }
 0x4c1   : > { %v4177_v48 = vmul.f32 %v14029_v52, %v3902_v21  ;;  %v4178_v1 = vmul.f32 %v14030_v17, %v3903_v50  ;;  %vm3079_vm5 = vcmp.eq.f32.partialorder %v12494_v42, 0.0  ;;  %5446 = vrsqrt.f32 %v12540_v63  ;;  %v5435_v7 = vpop.eup %5434  ;;  %v1547_v50 = vpop.xlane.xlu1 %1546 }
 0x4c2   : > { %v3067_v4 = vsel %vm3065_vm1, %v3066_v25, %v3064_v58  ;;  %v1945_v8 = vmul.f32 %v12078_v34, %v12078_v34  ;;  %v3055_v3 = vmul.f32 %v5435_v7, %v12473_v49  ;;  %v3080_v12 = vand.u32 2147483648, %v12494_v42  ;;  %v14705_v7 = vld [vmem:[#allocation371_spill] sm:$0xff] }
 0x4c3   : > { %v4452_v28 = vadd.f32 %v14031_v56, %v4177_v48  ;;  %v4453_v37 = vadd.f32 %v14032_v18, %v4178_v1  ;;  %v3259_v15 = vadd.f32 1e-10, %v3067_v4  ;;  %v12558_v2 = vmax.f32 %v2074_v9, 0.0  ;;  %v5437_v33 = vpop.eup %5436 }
 0x4c4   : > { %vm3070_vm6 = vcmp.eq.f32.partialorder %v12499_v57, inf  ;;  %vm3072_vm7 = vcmp.eq.f32.partialorder %v12499_v57, 0.0  ;;  %v3073_v19 = vand.u32 2147483648, %v12499_v57  ;;  %v2077_v25 = vsub.f32 %v1813_v36, %v1945_v8 }
 0x4c5   : > { %4716 = vst [vmem:[%s9394_s23 + $0x750] sm:$0xff] %v4452_v28  ;;  %4717 = vst [vmem:[%s9394_s23 + $0x758] sm:$0xff] %v4453_v37  ;;  %v14702_v53 = vsub.f32 %v14701_v24, %v14669_v35  ;;  %v14704_v21 = vsub.f32 %v14703_v40, %v14669_v35  ;;  %5448 = vrcp.f32 %v3259_v15  ;;  %v3057_v60 = vsel %vm3056_vm2, %v12473_v49, %v3055_v3  ;;  %v5439_v31 = vpop.eup %5438 }
 0x4c6   : > { %v3060_v5 = vsel %vm3058_vm3, %v3059_v0, %v3057_v60  ;;  %5450 = vrsqrt.f32 %v12558_v2  ;;  %v1944_v20 = vmul.f32 %v12081_v10, %v12081_v10  ;;  %v1812_v48 = vmul.f32 0.00390625, %v1538_v14  ;;  %v5441_v1 = vpop.eup %5440  ;;  %v14707_v0 = vld [vmem:[#allocation404_spill] sm:$0xff] }
 0x4c7   : > { %v3900_v62 = vmul.f32 %v5437_v33, %v14702_v53  ;;  %v3901_v46 = vmul.f32 %v5437_v33, %v14704_v21  ;;  %v3258_v36 = vadd.f32 1e-10, %v3060_v5  ;;  %v3076_v58 = vmul.f32 %v5439_v31, %v12494_v42  ;;  %v14709_v5 = vld [vmem:[#allocation311_spill] sm:$0xff] }
 0x4c8   : > { %v14706_v28 = vsub.f32 %v14705_v7, %v14670_v6  ;;  %v14708_v37 = vsub.f32 %v14707_v0, %v14670_v6  ;;  %v12588_v8 = vmax.f32 %v2077_v25, 0.0  ;;  %v1815_v15 = vmul.f32 0.00390625, %v1547_v50  ;;  %v5443_v3 = vpop.eup %5442 }
 0x4c9   : > { %v4175_v35 = vmul.f32 %v14029_v52, %v3900_v62  ;;  %v4176_v9 = vmul.f32 %v14030_v17, %v3901_v46  ;;  %5452 = vrcp.f32 %v3258_v36  ;;  %v3078_v24 = vsel %vm3077_vm4, %v12494_v42, %v3076_v58  ;;  %v5445_v53 = vpop.eup %5444 }
 0x4ca   : > { %v3906_v49 = vmul.f32 %v5441_v1, %v14706_v28  ;;  %v3907_v4 = vmul.f32 %v5441_v1, %v14708_v37  ;;  %v3081_v6 = vsel %vm3079_vm5, %v3080_v12, %v3078_v24  ;;  %v3069_v25 = vmul.f32 %v5443_v3, %v12499_v57 }
 0x4cb   : > { %v4450_v14 = vadd.f32 %v14031_v56, %v4175_v35  ;;  %v4451_v33 = vadd.f32 %v14032_v18, %v4176_v9  ;;  %v3904_v21 = vmul.f32 %v5445_v53, %v3640_v27  ;;  %v3905_v46 = vmul.f32 %v5445_v53, %v3641_v55  ;;  %v1544_v55 = vpop.xlane.xlu0 %1543  ;;  %v14710_v35 = vld [vmem:[#allocation441_spill] sm:$0xff] }
 0x4cc   : > { %v4181_v62 = vmul.f32 %v14029_v52, %v3906_v49  ;;  %v4182_v40 = vmul.f32 %v14030_v17, %v3907_v4  ;;  %v3261_v60 = vadd.f32 1e-10, %v3081_v6  ;;  %5454 = vrsqrt.f32 %v12588_v8  ;;  %v1553_v49 = vpop.xlane.xlu1 %1552 }
 0x4cd   : > { %4714 = vst [vmem:[%s9394_s23 + $0x740] sm:$0xff] %v4450_v14  ;;  %4715 = vst [vmem:[%s9394_s23 + $0x748] sm:$0xff] %v4451_v33  ;;  %v3071_v50 = vsel %vm3070_vm6, %v12499_v57, %v3069_v25  ;;  %v1947_v30 = vmul.f32 %v12372_v44, %v12372_v44  ;;  %v4179_v27 = vmul.f32 %v14029_v52, %v3904_v21  ;;  %v12621_v1 = vmul.f32 0.00390625, %v14709_v5 }
 0x4ce   : > { %v4456_v42 = vadd.f32 %v14031_v56, %v4181_v62  ;;  %v4457_v12 = vadd.f32 %v14032_v18, %v4182_v40  ;;  %v4180_v22 = vmul.f32 %v14030_v17, %v3905_v46  ;;  %5456 = vrcp.f32 %v3261_v60  ;;  %v5447_v31 = vpop.eup %5446 }
 0x4cf   : > { %v3074_v23 = vsel %vm3072_vm7, %v3073_v19, %v3071_v50  ;;  %v12624_v9 = vmul.f32 0.00390625, %v14710_v35  ;;  %v2076_v58 = vsub.f32 %v1812_v48, %v1944_v20  ;;  %v4454_v7 = vadd.f32 %v14031_v56, %v4179_v27  ;;  %v1550_v6 = vpop.xlane.xlu0 %1549 }
 0x4d0   : > { %4720 = vst [vmem:[%s9394_s23 + $0x770] sm:$0xff] %v4456_v42  ;;  %4721 = vst [vmem:[%s9394_s23 + $0x778] sm:$0xff] %v4457_v12  ;;  %v3260_v36 = vadd.f32 1e-10, %v3074_v23  ;;  %v4455_v28 = vadd.f32 %v14032_v18, %v4180_v22  ;;  %v3090_v57 = vmul.f32 %v5447_v31, %v12540_v63  ;;  %v2079_v19 = vsub.f32 %v1815_v15, %v1947_v30 }
 0x4d1   : > { %vm3091_vm8 = vcmp.eq.f32.partialorder %v12540_v63, inf  ;;  %v3094_v0 = vand.u32 2147483648, %v12540_v63  ;;  %v12633_v37 = vmax.f32 %v2076_v58, 0.0  ;;  %4718 = vst [vmem:[%s9394_s23 + $0x760] sm:$0xff] %v4454_v7  ;;  %vm3093_vm9 = vcmp.eq.f32.partialorder %v12540_v63, 0.0 }
 0x4d2   : > { %5458 = vrcp.f32 %v3260_v36  ;;  %4719 = vst [vmem:[%s9394_s23 + $0x768] sm:$0xff] %v4455_v28  ;;  %v3092_v4 = vsel %vm3091_vm8, %v12540_v63, %v3090_v57  ;;  %v12639_v20 = vmax.f32 %v2079_v19, 0.0  ;;  %v1946_v48 = vmul.f32 %v12512_v43, %v12512_v43  ;;  %v5449_v15 = vpop.eup %5448 }
 0x4d3   : > { %v3095_v3 = vsel %vm3093_vm9, %v3094_v0, %v3092_v4  ;;  %5460 = vrsqrt.f32 %v12633_v37  ;;  %v1814_v14 = vmul.f32 0.00390625, %v1544_v55  ;;  %v1817_v33 = vmul.f32 0.00390625, %v1553_v49  ;;  %v5451_v24 = vpop.eup %5450 }
 0x4d4   : > { %v3910_v53 = vmul.f32 %v5449_v15, %v3646_v11  ;;  %v14711_v62 = vsub.f32 %v11593_v51, %v10259_v59  ;;  %v3263_v40 = vadd.f32 1e-10, %v3095_v3  ;;  %vm3084_vm10 = vcmp.eq.f32.partialorder %v12558_v2, inf  ;;  %v5781_v3 = vld [vmem:[%s6118_s11 + $0x7d0] sm:$0xff] }
 0x4d5   : > { %v3083_v25 = vmul.f32 %v5451_v24, %v12558_v2  ;;  %vm3086_vm11 = vcmp.eq.f32.partialorder %v12558_v2, 0.0  ;;  %5462 = vrsqrt.f32 %v12639_v20  ;;  %v1949_v21 = vmul.f32 %v12621_v1, %v12621_v1 }
 0x4d6   : > { %v3911_v63 = vmul.f32 %v5449_v15, %v14711_v62  ;;  %v4185_v39 = vmul.f32 %v14029_v52, %v3910_v53  ;;  %5464 = vrcp.f32 %v3263_v40  ;;  %v3087_v59 = vand.u32 2147483648, %v12558_v2  ;;  %v5453_v51 = vpop.eup %5452 }
 0x4d7   : > { %v3085_v46 = vsel %vm3084_vm10, %v12558_v2, %v3083_v25  ;;  %v2078_v60 = vsub.f32 %v1814_v14, %v1946_v48  ;;  %v2081_v42 = vsub.f32 %v1817_v33, %v1949_v21  ;;  %v1816_v12 = vmul.f32 0.00390625, %v1550_v6 }
 0x4d8   : > { %v4186_v11 = vmul.f32 %v14030_v17, %v3911_v63  ;;  %v4460_v50 = vadd.f32 %v14031_v56, %v4185_v39  ;;  %v14712_v27 = vsub.f32 %v11598_v38, %v10342_v47  ;;  %v14713_v23 = vsub.f32 %v11603_v13, %v10342_v47 }
 0x4d9   : > { %v5455_v31 = vpop.eup %5454  ;;  %v3088_v5 = vsel %vm3086_vm11, %v3087_v59, %v3085_v46  ;;  %v12670_v35 = vmax.f32 %v2078_v60, 0.0  ;;  %v12672_v36 = vmax.f32 %v2081_v42, 0.0  ;;  %v1948_v58 = vmul.f32 %v12624_v9, %v12624_v9 }
 0x4da   : > { %v4461_v30 = vadd.f32 %v14032_v18, %v4186_v11  ;;  %v3908_v22 = vmul.f32 %v5453_v51, %v14712_v27  ;;  %v3909_v55 = vmul.f32 %v5453_v51, %v14713_v23  ;;  %4724 = vst [vmem:[%s9394_s23 + $0x790] sm:$0xff] %v4460_v50  ;;  %v3262_v47 = vadd.f32 1e-10, %v3088_v5 }
 0x4db   : > { %v3104_v13 = vmul.f32 %v5455_v31, %v12588_v8  ;;  %v5457_v2 = vpop.eup %5456  ;;  %vm3105_vm12 = vcmp.eq.f32.partialorder %v12588_v8, inf  ;;  %v3108_v28 = vand.u32 2147483648, %v12588_v8  ;;  %5466 = vrsqrt.f32 %v12670_v35 }
 0x4dc   : > { %4725 = vst [vmem:[%s9394_s23 + $0x798] sm:$0xff] %v4461_v30  ;;  %v4183_v38 = vmul.f32 %v14029_v52, %v3908_v22  ;;  %v4184_v7 = vmul.f32 %v14030_v17, %v3909_v55  ;;  %v2080_v57 = vsub.f32 %v1816_v12, %v1948_v58  ;;  %v14714_v0 = vsub.f32 %v11907_v41, %v11722_v45 }
 0x4dd   : > { %v14715_v48 = vsub.f32 %v11912_v32, %v11722_v45  ;;  %v3654_v14 = vsub.f32 %v5781_v3, %v12065_v29  ;;  %5468 = vrcp.f32 %v3262_v47  ;;  %v3106_v33 = vsel %vm3105_vm12, %v12588_v8, %v3104_v13  ;;  %v5782_v45 = vld [vmem:[%s6118_s11 + $0x7d8] sm:$0xff] }
 0x4de   : > { %v4458_v19 = vadd.f32 %v14031_v56, %v4183_v38  ;;  %v4459_v49 = vadd.f32 %v14032_v18, %v4184_v7  ;;  %v3914_v4 = vmul.f32 %v5457_v2, %v14714_v0  ;;  %vm3107_vm13 = vcmp.eq.f32.partialorder %v12588_v8, 0.0 }
 0x4df   : > { %v3915_v15 = vmul.f32 %v5457_v2, %v14715_v48  ;;  %v5459_v24 = vpop.eup %5458  ;;  %v3109_v62 = vsel %vm3107_vm13, %v3108_v28, %v3106_v33  ;;  %5470 = vrsqrt.f32 %v12672_v36  ;;  %v3655_v32 = vsub.f32 %v5782_v45, %v12065_v29  ;;  %v5783_v2 = vld [vmem:[%s6118_s11 + $0x7c0] sm:$0xff]  ;;  %v5786_v33 = vld [vmem:[%s6118_s11 + $0x7f8] sm:$0xff] }
 0x4e0   : > { %4722 = vst [vmem:[%s9394_s23 + $0x780] sm:$0xff] %v4458_v19  ;;  %4723 = vst [vmem:[%s9394_s23 + $0x788] sm:$0xff] %v4459_v49  ;;  %v4189_v53 = vmul.f32 %v14029_v52, %v3914_v4  ;;  %v14716_v63 = vsub.f32 %v11918_v54, %v11725_v16  ;;  %v14717_v8 = vsub.f32 %v12055_v61, %v11725_v16  ;;  %v3265_v25 = vadd.f32 1e-10, %v3109_v62  ;;  %v5461_v21 = vpop.eup %5460 }
 0x4e1   : > { %v4190_v41 = vmul.f32 %v14030_v17, %v3915_v15  ;;  %vm3098_vm14 = vcmp.eq.f32.partialorder %v12633_v37, inf  ;;  %v12712_v59 = vmax.f32 %v2080_v57, 0.0  ;;  %v3097_v54 = vmul.f32 %v5461_v21, %v12633_v37  ;;  %v5784_v57 = vld [vmem:[%s6118_s11 + $0x7c8] sm:$0xff] }
 0x4e2   : > { %v3912_v40 = vmul.f32 %v5459_v24, %v14716_v63  ;;  %v3913_v6 = vmul.f32 %v5459_v24, %v14717_v8  ;;  %v4464_v39 = vadd.f32 %v14031_v56, %v4189_v53  ;;  %5472 = vrcp.f32 %v3265_v25  ;;  %v5463_v46 = vpop.eup %5462 }
 0x4e3   : > { %v4465_v11 = vadd.f32 %v14032_v18, %v4190_v41  ;;  %vm3100_vm15 = vcmp.eq.f32.partialorder %v12633_v37, 0.0  ;;  %v3101_v16 = vand.u32 2147483648, %v12633_v37  ;;  %vm3119_vm0 = vcmp.eq.f32.partialorder %v12639_v20, inf  ;;  %v5465_v61 = vpop.eup %5464 }
 0x4e4   : > { %v4187_v29 = vmul.f32 %v14029_v52, %v3912_v40  ;;  %v4188_v51 = vmul.f32 %v14030_v17, %v3913_v6  ;;  %4728 = vst [vmem:[%s9394_s23 + $0x7b0] sm:$0xff] %v4464_v39  ;;  %5474 = vrsqrt.f32 %v12712_v59  ;;  %v3099_v12 = vsel %vm3098_vm14, %v12633_v37, %v3097_v54 }
 0x4e5   : > { %4729 = vst [vmem:[%s9394_s23 + $0x7b8] sm:$0xff] %v4465_v11  ;;  %v3118_v50 = vmul.f32 %v5463_v46, %v12639_v20  ;;  %v3918_v30 = vmul.f32 %v5465_v61, %v3654_v14  ;;  %v3919_v27 = vmul.f32 %v5465_v61, %v3655_v32  ;;  %v3102_v22 = vsel %vm3100_vm15, %v3101_v16, %v3099_v12  ;;  %v5785_v14 = vld [vmem:[%s6118_s11 + $0x7f0] sm:$0xff]  ;;  %v5787_v46 = vld [vmem:[%s6118_s11 + $0x7e0] sm:$0xff]  ;;  %v5788_v61 = vld [vmem:[%s6118_s11 + $0x7e8] sm:$0xff] }
 0x4e6   : > { %v4462_v60 = vadd.f32 %v14031_v56, %v4187_v29  ;;  %v4463_v42 = vadd.f32 %v14032_v18, %v4188_v51  ;;  %v3122_v23 = vand.u32 2147483648, %v12639_v20  ;;  %v3264_v55 = vadd.f32 1e-10, %v3102_v22 }
 0x4e7   : > { %v3120_v31 = vsel %vm3119_vm0, %v12639_v20, %v3118_v50  ;;  %vm3121_vm1 = vcmp.eq.f32.partialorder %v12639_v20, 0.0  ;;  %v4193_v5 = vmul.f32 %v14029_v52, %v3918_v30  ;;  %v4194_v37 = vmul.f32 %v14030_v17, %v3919_v27 }
 0x4e8   : > { %4726 = vst [vmem:[%s9394_s23 + $0x7a0] sm:$0xff] %v4462_v60  ;;  %4727 = vst [vmem:[%s9394_s23 + $0x7a8] sm:$0xff] %v4463_v42  ;;  %v3123_v58 = vsel %vm3121_vm1, %v3122_v23, %v3120_v31  ;;  %5476 = vrcp.f32 %v3264_v55  ;;  %v5467_v7 = vpop.eup %5466  ;;  %v3652_v28 = vsub.f32 %v5783_v2, %v12068_v26  ;;  %v3653_v20 = vsub.f32 %v5784_v57, %v12068_v26  ;;  %v5789_v23 = vld [vmem:[%s6118_s11 + $0x810] sm:$0xff]  ;;  %v5790_v31 = vld [vmem:[%s6118_s11 + $0x818] sm:$0xff] }
 0x4e9   : > { %v3267_v38 = vadd.f32 1e-10, %v3123_v58  ;;  %v4468_v47 = vadd.f32 %v14031_v56, %v4193_v5  ;;  %v4469_v13 = vadd.f32 %v14032_v18, %v4194_v37  ;;  %v3111_v19 = vmul.f32 %v5467_v7, %v12670_v35 }
 0x4ea   : > { %v5469_v49 = vpop.eup %5468  ;;  %vm3112_vm2 = vcmp.eq.f32.partialorder %v12670_v35, inf  ;;  %v3115_v0 = vand.u32 2147483648, %v12670_v35  ;;  %vm3114_vm3 = vcmp.eq.f32.partialorder %v12670_v35, 0.0  ;;  %v3658_v26 = vsub.f32 %v5785_v14, %v12078_v34  ;;  %v5793_v14 = vld [vmem:[%s6118_s11 + $0x830] sm:$0xff] }
 0x4eb   : > { %5478 = vrcp.f32 %v3267_v38  ;;  %4732 = vst [vmem:[%s9394_s23 + $0x7d0] sm:$0xff] %v4468_v47  ;;  %4733 = vst [vmem:[%s9394_s23 + $0x7d8] sm:$0xff] %v4469_v13  ;;  %v3916_v48 = vmul.f32 %v5469_v49, %v3652_v28  ;;  %v3917_v15 = vmul.f32 %v5469_v49, %v3653_v20  ;;  %v3113_v3 = vsel %vm3112_vm2, %v12670_v35, %v3111_v19  ;;  %v5791_v19 = vld [vmem:[%s6118_s11 + $0x800] sm:$0xff] }
 0x4ec   : > { %v5471_v4 = vpop.eup %5470  ;;  %v3659_v24 = vsub.f32 %v5786_v33, %v12078_v34  ;;  %v3116_v53 = vsel %vm3114_vm3, %v3115_v0, %v3113_v3  ;;  %vm3133_vm4 = vcmp.eq.f32.partialorder %v12672_v36, inf  ;;  %vm3135_vm5 = vcmp.eq.f32.partialorder %v12672_v36, 0.0  ;;  %v5792_v0 = vld [vmem:[%s6118_s11 + $0x808] sm:$0xff]  ;;  %v5794_v33 = vld [vmem:[%s6118_s11 + $0x838] sm:$0xff] }
 0x4ed   : > { %v3132_v41 = vmul.f32 %v5471_v4, %v12672_v36  ;;  %v4191_v62 = vmul.f32 %v14029_v52, %v3916_v48  ;;  %v4192_v45 = vmul.f32 %v14030_v17, %v3917_v15  ;;  %v3266_v32 = vadd.f32 1e-10, %v3116_v53 }
 0x4ee   : > { %v3136_v40 = vand.u32 2147483648, %v12672_v36  ;;  %vm3126_vm6 = vcmp.eq.f32.partialorder %v12712_v59, inf  ;;  %v3129_v54 = vand.u32 2147483648, %v12712_v59  ;;  %v3656_v16 = vsub.f32 %v5787_v46, %v12081_v10 }
 0x4ef   : > { %v5473_v63 = vpop.eup %5472  ;;  %v3134_v35 = vsel %vm3133_vm4, %v12672_v36, %v3132_v41  ;;  %v4466_v8 = vadd.f32 %v14031_v56, %v4191_v62  ;;  %v4467_v6 = vadd.f32 %v14032_v18, %v4192_v45  ;;  %5480 = vrcp.f32 %v3266_v32  ;;  %v5795_v32 = vld [vmem:[%s6118_s11 + $0x820] sm:$0xff] }
 0x4f0   : > { %v3922_v25 = vmul.f32 %v5473_v63, %v3658_v26  ;;  %v3923_v21 = vmul.f32 %v5473_v63, %v3659_v24  ;;  %v3137_v39 = vsel %vm3135_vm5, %v3136_v40, %v3134_v35  ;;  %v3657_v60 = vsub.f32 %v5788_v61, %v12081_v10  ;;  %v5796_v35 = vld [vmem:[%s6118_s11 + $0x828] sm:$0xff] }
 0x4f1   : > { %v5475_v34 = vpop.eup %5474  ;;  %4730 = vst [vmem:[%s9394_s23 + $0x7c0] sm:$0xff] %v4466_v8  ;;  %4731 = vst [vmem:[%s9394_s23 + $0x7c8] sm:$0xff] %v4467_v6  ;;  %v3269_v51 = vadd.f32 1e-10, %v3137_v39  ;;  %vm3128_vm7 = vcmp.eq.f32.partialorder %v12712_v59, 0.0  ;;  %v3662_v55 = vsub.f32 %v5789_v23, %v12372_v44  ;;  %v3663_v5 = vsub.f32 %v5790_v31, %v12372_v44 }
 0x4f2   : > { %v3125_v11 = vmul.f32 %v5475_v34, %v12712_v59  ;;  %v4197_v29 = vmul.f32 %v14029_v52, %v3922_v25  ;;  %v4198_v36 = vmul.f32 %v14030_v17, %v3923_v21  ;;  %v3660_v49 = vsub.f32 %v5791_v19, %v12512_v43 }
 0x4f3   : > { %5482 = vrcp.f32 %v3269_v51  ;;  %v3661_v4 = vsub.f32 %v5792_v0, %v12512_v43  ;;  %v3666_v26 = vsub.f32 %v5793_v14, %v12621_v1  ;;  %v3667_v24 = vsub.f32 %v5794_v33, %v12621_v1 }
 0x4f4   : > { %v3127_v42 = vsel %vm3126_vm6, %v12712_v59, %v3125_v11  ;;  %v4472_v12 = vadd.f32 %v14031_v56, %v4197_v29  ;;  %v4473_v50 = vadd.f32 %v14032_v18, %v4198_v36  ;;  %v3664_v63 = vsub.f32 %v5795_v32, %v12624_v9 }
 0x4f5   : > { %v3130_v30 = vsel %vm3128_vm7, %v3129_v54, %v3127_v42  ;;  %v5477_v27 = vpop.eup %5476  ;;  %v3665_v40 = vsub.f32 %v5796_v35, %v12624_v9 }
 0x4f6   : > { %v3268_v22 = vadd.f32 1e-10, %v3130_v30  ;;  %4736 = vst [vmem:[%s9394_s23 + $0x7f0] sm:$0xff] %v4472_v12  ;;  %4737 = vst [vmem:[%s9394_s23 + $0x7f8] sm:$0xff] %v4473_v50  ;;  %v3920_v10 = vmul.f32 %v5477_v27, %v3656_v16  ;;  %v3921_v59 = vmul.f32 %v5477_v27, %v3657_v60 }
 0x4f8   : > { %v5479_v37 = vpop.eup %5478  ;;  %5484 = vrcp.f32 %v3268_v22  ;;  %v4195_v58 = vmul.f32 %v14029_v52, %v3920_v10  ;;  %v4196_v38 = vmul.f32 %v14030_v17, %v3921_v59 }
 0x4f9   : > { %v3926_v7 = vmul.f32 %v5479_v37, %v3662_v55  ;;  %v3927_v47 = vmul.f32 %v5479_v37, %v3663_v5 }
 0x4fa   : > { %v4470_v13 = vadd.f32 %v14031_v56, %v4195_v58  ;;  %v4471_v44 = vadd.f32 %v14032_v18, %v4196_v38 }
 0x4fb   : > { %v4201_v2 = vmul.f32 %v14029_v52, %v3926_v7  ;;  %v4202_v28 = vmul.f32 %v14030_v17, %v3927_v47 }
 0x4fc   : > { %4734 = vst [vmem:[%s9394_s23 + $0x7e0] sm:$0xff] %v4470_v13  ;;  %4735 = vst [vmem:[%s9394_s23 + $0x7e8] sm:$0xff] %v4471_v44  ;;  %v5481_v48 = vpop.eup %5480 }
 0x4fd   : > { %v4476_v57 = vadd.f32 %v14031_v56, %v4201_v2  ;;  %v4477_v20 = vadd.f32 %v14032_v18, %v4202_v28  ;;  %v3924_v15 = vmul.f32 %v5481_v48, %v3660_v49  ;;  %v3925_v3 = vmul.f32 %v5481_v48, %v3661_v4 }
 0x4ff   : > { %4740 = vst [vmem:[%s9394_s23 + $0x810] sm:$0xff] %v4476_v57  ;;  %4741 = vst [vmem:[%s9394_s23 + $0x818] sm:$0xff] %v4477_v20  ;;  %v4199_v41 = vmul.f32 %v14029_v52, %v3924_v15  ;;  %v4200_v62 = vmul.f32 %v14030_v17, %v3925_v3 }
 0x500   : > { %v5483_v53 = vpop.eup %5482 }
 0x501   : > { %v3930_v43 = vmul.f32 %v5483_v53, %v3666_v26  ;;  %v3931_v45 = vmul.f32 %v5483_v53, %v3667_v24  ;;  %v4474_v34 = vadd.f32 %v14031_v56, %v4199_v41  ;;  %v4475_v1 = vadd.f32 %v14032_v18, %v4200_v62 }
 0x503   : > { %v4205_v6 = vmul.f32 %v14029_v52, %v3930_v43  ;;  %v4206_v25 = vmul.f32 %v14030_v17, %v3931_v45  ;;  %4738 = vst [vmem:[%s9394_s23 + $0x800] sm:$0xff] %v4474_v34  ;;  %4739 = vst [vmem:[%s9394_s23 + $0x808] sm:$0xff] %v4475_v1 }
 0x505   : > { %v5485_v8 = vpop.eup %5484  ;;  %v4480_v11 = vadd.f32 %v14031_v56, %v4205_v6  ;;  %v4481_v9 = vadd.f32 %v14032_v18, %v4206_v25 }
 0x506   : > { %v3928_v21 = vmul.f32 %v5485_v8, %v3664_v63  ;;  %v3929_v39 = vmul.f32 %v5485_v8, %v3665_v40 }
 0x507   : > { %4744 = vst [vmem:[%s9394_s23 + $0x830] sm:$0xff] %v4480_v11  ;;  %4745 = vst [vmem:[%s9394_s23 + $0x838] sm:$0xff] %v4481_v9 }
 0x508   : > { %v4203_v29 = vmul.f32 %v14029_v52, %v3928_v21  ;;  %v4204_v36 = vmul.f32 %v14030_v17, %v3929_v39  ;;  %4753 = sbr.rel (!%p14718_p9) target bundleno = 1320 (0x528), region = 48 }
 0x50a   : > { %v4478_v51 = vadd.f32 %v14031_v56, %v4203_v29  ;;  %v4479_v54 = vadd.f32 %v14032_v18, %v4204_v36 }
 0x50c   : > { %4742 = vst [vmem:[%s9394_s23 + $0x820] sm:$0xff] %v4478_v51  ;;  %4743 = vst [vmem:[%s9394_s23 + $0x828] sm:$0xff] %v4479_v54 }
 0x50d   : > { %s14727_s29 = smov (!%p4756_p10, %s4755_s29), 132 }
 0x50e   : > { %s12829_s4 = sshll.u32 %s14727_s29, 8 }
 0x50f   : > { %s4761_s7 = ssub.s32 33792, %s12829_s4 }
 0x510   : > { %4762 = vsyncadd %s4747_s26, %s4761_s7  ;;  %p4877_p1 = scmp.ne.s32.totalorder %s12829_s4, 0  ;;  %s4891_s24 = smul.u32 33792, %s5994_s16 }
 0x511   : > { %s4768_s17 = sshll.u32 %s9394_s23, 4  ;;  %s5950_s22 = smov [#allocation8]   ;;  %s12842_s17 = int_to_ptr.vmem [resolvable:$true] %s4768_s17 }
 0x512   : > { %s12840_s28 = scalar_lea.hbm %s12890_s3, %s4891_s24  ;;  %s5875_s30 = scalar_lea.vmem %s12842_s17, %s12829_s4 }
 0x513   : > { %p5876_p3 = scmp.ne.s32.totalorder %s12842_s17, %s5875_s30  ;;  %s5879_s5 = sshll.u32 %s5950_s22, 4  ;;  %s5880_s5 = int_to_ptr.vmem [resolvable:$false] %s5879_s5 }
 0x514   : > { %s5881_s16 = scalar_lea.vmem %s5880_s5, 67584  ;;  %p5882_p4 = scmp.lt.s32.totalorder %s12842_s17, %s5880_s5 }
 0x515   : > { %p5877_p7 = pnand %p5876_p3, %p4877_p1  ;;  %p5883_p6 = scmp.lt.s32.totalorder %s5881_s16, %s5875_s30 }
 0x517   : > { %p5878_p12 = pneg %p5877_p7  ;;  %p5884_p13 = por %p5883_p6, %p5882_p4 }
 0x519   : > { %p5885_p0 = pnand %p5884_p13, %p5878_p12 }
 0x51b   : > { %5888 = shalt.err (!%p5885_p0)
}
 0x51c   : > { %s5889_s6 = scalar_lea.hbm %s12840_s28, %s12829_s4  ;;  %s5893_s11 = scalar_lea.hbm %s12890_s3, 67328 }
 0x51d   : > { %p5890_p2 = scmp.ne.s32.totalorder %s12840_s28, %s5889_s6  ;;  %p5894_p9 = scmp.lt.s32.totalorder %s12840_s28, %s12890_s3 }
 0x51e   : > { %p5895_p10 = scmp.lt.s32.totalorder %s5893_s11, %s5889_s6 }
 0x51f   : > { %p5891_p5 = pnand %p5890_p2, %p4877_p1 }
 0x520   : > { %p5896_p3 = por %p5895_p10, %p5894_p9 }
 0x521   : > { %p5892_p8 = pneg %p5891_p5 }
 0x523   : > { %p5897_p7 = pnand %p5896_p3, %p5892_p8 }
 0x525   : > { %5900 = shalt.err (!%p5897_p7)
}
 0x526   : > { %s5951_s29 = smov 256   ;;  %s5952_s7 = smov 16  }
 0x527   : > { %4774 = dma.vmem_to_hbm [thread:$0]  (%p4877_p1), %s12842_s17, %s12829_s4, %s12840_s28, %s4747_s26, %s5951_s29, %s5951_s29, %s5952_s7  }
 0x528 PF: > { %s4783_s24 = sand.u32 1, %s5931_s12   ;;  %p14719_p12 = scmp.ne.s32.totalorder %s13371_s25, 0 }
 0x529   : > { %s4784_s19 = scalar_lea.sflag [#allocation4], %s4783_s24 }
 0x52a   : > { %p4912_p4 = pnand %p4864_p11, %p14719_p12 }
 0x52c   : > { %p4913_p6 = pneg %p4912_p4 }
 0x52e   : > { %5926 = dma.done.wait (%p4913_p6), %s4784_s19, 33792  }
 0x52f   : > { %5928 = vsyncadd (%p4913_p6), %s4784_s19, 4294933504  ;;  %p17_p13 = scmp.ge.s32.totalorder %s5998_s18, 4   ;;  %s14720_s12 = smov %s5935_s13 }
 0x530   : > { %s14721_s13 = smov %s5939_s14  ;;  %s14722_s14 = smov %s6010_s21 }
 0x531   : > { %s14723_s15 = smov %s5998_s18  ;;  %19 = sbr.rel (!%p17_p13) target bundleno = 6 (0x6), region = 85 }
 0x536   :  { %4789 = vsyncpa [#allocation3], 1 }
 0x537   :  { %4791 = vsyncpa [#allocation3 + $0x1], 1 }
 0x538   :  { %4792 = vsyncpa [#allocation6], 1 }
 0x539   :  { %4793 = vsyncpa [#allocation4], 1 }
 0x53a   :  { %4795 = vsyncpa [#allocation4 + $0x1], 1 }

</bundles_post_ra>
